<compile_context>
chip_gen: v5e
topology: v5e:2x2
jax: 0.10.0
libtpu: 0.0.40
codegen_flags: <defaults>
</compile_context>

<pallas_src>
import functools
import math

import numpy as np
import jax
import jax.numpy as jnp
from jax import lax
from jax.experimental import pallas as pl
from jax.experimental.pallas import tpu as pltpu


_VMEM = pltpu.MemorySpace.VMEM
_SMEM = pltpu.MemorySpace.SMEM
_LN_EPS = 1e-5
_NEG_INF = -1e30


# ------------------------------ in-kernel helpers ------------------------------

def _layernorm(h, g, b, eps=_LN_EPS):
    mu = jnp.mean(h, axis=-1, keepdims=True)
    var = jnp.mean((h - mu) ** 2, axis=-1, keepdims=True)
    return (h - mu) * lax.rsqrt(var + eps) * g + b


def _attend_heads(q_of, k_of, v_of, store, nhead, scale, key_mask):
    """Per-head scaled-dot-product attention for one batch element (stays in vregs)."""
    for h in range(nhead):
        q = q_of(h) * scale                                            # (Lq, hd)
        k = k_of(h)                                                     # (Lk, hd)
        v = v_of(h)                                                     # (Lk, hd)
        s = lax.dot_general(q, k, (((1,), (1,)), ((), ())),
                            preferred_element_type=jnp.float32)         # (Lq, Lk)
        if key_mask is not None:
            s = jnp.where(key_mask, s, _NEG_INF)
        s = s - jnp.max(s, axis=-1, keepdims=True)
        p = jnp.exp(s)
        p = p * pl.reciprocal(jnp.sum(p, axis=-1, keepdims=True), approx=True)
        store(h, jnp.dot(p, v, preferred_element_type=jnp.float32))     # (Lq, hd)


# --------------------------------- kernels ------------------------------------

def _encoder_kernel(x_ref, sa_w, sa_b, so_w, so_b, n1_g, n1_b,
                    f1_w, f1_b, f2_w, f2_b, n2_g, n2_b,
                    o_ref, qkv_s, ctx_s, *, nhead):
    """One TransformerEncoderLayer per grid step; activation resident in o_ref."""
    l = pl.program_id(0)
    B, L, E = o_ref.shape
    hd = E // nhead
    scale = 1.0 / math.sqrt(hd)

    @pl.when(l == 0)
    def _():
        o_ref[...] = x_ref[...]

    Wsa, bsa = sa_w[0], sa_b[0]
    Wso, bso = so_w[0], so_b[0]
    g1, be1 = n1_g[0], n1_b[0]
    W1, bf1 = f1_w[0], f1_b[0]
    W2, bf2 = f2_w[0], f2_b[0]
    g2, be2 = n2_g[0], n2_b[0]

    for b in range(B):
        xb = o_ref[b]                                                   # (L, E)
        qkv_s[b] = jnp.dot(xb, Wsa, preferred_element_type=jnp.float32) + bsa

        def q_of(h, b=b): return qkv_s[b, :, h * hd:(h + 1) * hd]
        def k_of(h, b=b): return qkv_s[b, :, E + h * hd:E + (h + 1) * hd]
        def v_of(h, b=b): return qkv_s[b, :, 2 * E + h * hd:2 * E + (h + 1) * hd]
        def store(h, c, b=b):
            ctx_s[b, :, h * hd:(h + 1) * hd] = c

        _attend_heads(q_of, k_of, v_of, store, nhead, scale, None)
        a = jnp.dot(ctx_s[b], Wso, preferred_element_type=jnp.float32) + bso
        x1 = _layernorm(xb + a, g1, be1)
        f = jnp.maximum(jnp.dot(x1, W1, preferred_element_type=jnp.float32) + bf1, 0.0)
        f = jnp.dot(f, W2, preferred_element_type=jnp.float32) + bf2
        o_ref[b] = _layernorm(x1 + f, g2, be2)


def _cross_kv_kernel(mem_ref, kvw_ref, kvb_ref, o_ref):
    """K/V of the encoder memory for every decoder layer: o[l, b] = mem[b] @ Wkv[l] + bkv[l]."""
    nL = kvw_ref.shape[0]
    B = mem_ref.shape[0]
    for li in range(nL):
        w = kvw_ref[li]
        bias = kvb_ref[li]
        for b in range(B):
            o_ref[li, b] = jnp.dot(mem_ref[b], w,
                                   preferred_element_type=jnp.float32) + bias


def _decoder_step_kernel(
        pred_ref, pe_ref, vl_ref, noise_ref, kv_ref,
        sa_w, sa_b, so_w, so_b, n1_g, n1_b,
        cq_w, cq_b, co_w, co_b, n2_g, n2_b,
        f1_w, f1_b, f2_w, f2_b, n3_g, n3_b,
        mean_w, mean_b, var_w, var_b,
        o_ref, samp_ref,
        qkv_s, cq_s, ctx_s,
        *, nhead):
    """One TransformerDecoderLayer per grid step + fused PE add and mean/var sampling."""
    l = pl.program_id(0)
    B, L, E = o_ref.shape
    hd = E // nhead
    scale = 1.0 / math.sqrt(hd)
    vl = vl_ref[0, 0]                       # current valid length of the predictions buffer

    @pl.when(l == 0)
    def _():
        for b in range(B):
            o_ref[b] = pred_ref[b] + pe_ref[...]

    Wsa, bsa = sa_w[0], sa_b[0]
    Wso, bso = so_w[0], so_b[0]
    g1, be1 = n1_g[0], n1_b[0]
    Wcq, bcq = cq_w[0], cq_b[0]
    Wco, bco = co_w[0], co_b[0]
    g2, be2 = n2_g[0], n2_b[0]
    W1, bf1 = f1_w[0], f1_b[0]
    W2, bf2 = f2_w[0], f2_b[0]
    g3, be3 = n3_g[0], n3_b[0]

    # Self-attention keys at positions >= vl are padding (not yet generated).
    key_valid = lax.broadcasted_iota(jnp.int32, (1, L), 1) < vl          # (1, L)

    for b in range(B):
        xb = o_ref[b]                                                    # (L, E)

        # ---- masked self-attention ----
        qkv_s[b] = jnp.dot(xb, Wsa, preferred_element_type=jnp.float32) + bsa

        def q_of(h, b=b): return qkv_s[b, :, h * hd:(h + 1) * hd]
        def k_of(h, b=b): return qkv_s[b, :, E + h * hd:E + (h + 1) * hd]
        def v_of(h, b=b): return qkv_s[b, :, 2 * E + h * hd:2 * E + (h + 1) * hd]
        def store(h, c, b=b):
            ctx_s[b, :, h * hd:(h + 1) * hd] = c

        _attend_heads(q_of, k_of, v_of, store, nhead, scale, key_valid)
        a = jnp.dot(ctx_s[b], Wso, preferred_element_type=jnp.float32) + bso
        x1 = _layernorm(xb + a, g1, be1)

        # ---- cross-attention over the precomputed encoder K/V cache ----
        cq_s[b] = jnp.dot(x1, Wcq, preferred_element_type=jnp.float32) + bcq

        def cq_of(h, b=b): return cq_s[b, :, h * hd:(h + 1) * hd]
        def ck_of(h, b=b): return kv_ref[0, b, :, h * hd:(h + 1) * hd]
        def cv_of(h, b=b): return kv_ref[0, b, :, E + h * hd:E + (h + 1) * hd]
        def cstore(h, c, b=b):
            ctx_s[b, :, h * hd:(h + 1) * hd] = c

        _attend_heads(cq_of, ck_of, cv_of, cstore, nhead, scale, None)
        a2 = jnp.dot(ctx_s[b], Wco, preferred_element_type=jnp.float32) + bco
        x2 = _layernorm(x1 + a2, g2, be2)

        # ---- feed-forward ----
        f = jnp.maximum(jnp.dot(x2, W1, preferred_element_type=jnp.float32) + bf1, 0.0)
        f = jnp.dot(f, W2, preferred_element_type=jnp.float32) + bf2
        o_ref[b] = _layernorm(x2 + f, g3, be3)

    # After the last layer: reparameterized sample from the last *valid* row.
    @pl.when(l == pl.num_programs(0) - 1)
    def _():
        noise = noise_ref[0, 0]
        row_sel = (lax.broadcasted_iota(jnp.int32, (1, L), 1) == vl - 1
                   ).astype(jnp.float32)                                 # (1, L) one-hot
        for b in range(B):
            last = jnp.dot(row_sel, o_ref[b], preferred_element_type=jnp.float32)  # (1, E)
            mean = jnp.dot(last, mean_w[...],
                           preferred_element_type=jnp.float32) + mean_b[...]
            var = jnp.dot(last, var_w[...],
                          preferred_element_type=jnp.float32) + var_b[...]
            samp_ref[b] = mean + var * noise


# ------------------------------ pallas_call wrappers ---------------------------

def _stacked_spec(a):
    """Per-layer slab of a (num_layers, ...) stacked array, selected by the grid index."""
    n = a.ndim - 1
    return pl.BlockSpec((1,) + a.shape[1:], lambda l: (l,) + (0,) * n)


def _full_spec(a):
    """Whole array, constant across the layer grid (loaded once, stays resident)."""
    n = a.ndim
    return pl.BlockSpec(a.shape, lambda l: (0,) * n)


def run_encoder(x, enc, nhead):
    nL = enc["qkv_w"].shape[0]
    B, L, E = x.shape
    ops = [enc["qkv_w"], enc["qkv_b"], enc["out_w"], enc["out_b"],
           enc["ln1_g"], enc["ln1_b"],
           enc["lin1_w"], enc["lin1_b"], enc["lin2_w"], enc["lin2_b"],
           enc["ln2_g"], enc["ln2_b"]]
    return pl.pallas_call(
        functools.partial(_encoder_kernel, nhead=nhead),
        grid=(nL,),
        in_specs=[_full_spec(x)] + [_stacked_spec(w) for w in ops],
        out_specs=pl.BlockSpec((B, L, E), lambda l: (0, 0, 0)),
        out_shape=jax.ShapeDtypeStruct((B, L, E), jnp.float32),
        scratch_shapes=[pltpu.VMEM((B, L, 3 * E), jnp.float32),
                        pltpu.VMEM((B, L, E), jnp.float32)],
        compiler_params=pltpu.CompilerParams(dimension_semantics=("arbitrary",)),
    )(x, *ops)


def run_cross_kv(mem, kv_w, kv_b):
    nL = kv_w.shape[0]
    B, Lk, E = mem.shape
    return pl.pallas_call(
        _cross_kv_kernel,
        out_shape=jax.ShapeDtypeStruct((nL, B, Lk, 2 * E), jnp.float32),
        in_specs=[pl.BlockSpec(memory_space=_VMEM)] * 3,
        out_specs=pl.BlockSpec(memory_space=_VMEM),
    )(mem, kv_w, kv_b)


def run_decoder_step(preds, pe_slab, vl_arr, noise_arr, kv_cache, params, nhead):
    dec = params["dec"]
    nL = dec["sa_w"].shape[0]
    B, L, E = preds.shape
    weights = [dec["sa_w"], dec["sa_b"], dec["so_w"], dec["so_b"],
               dec["ln1_g"], dec["ln1_b"],
               dec["cq_w"], dec["cq_b"], dec["co_w"], dec["co_b"],
               dec["ln2_g"], dec["ln2_b"],
               dec["lin1_w"], dec["lin1_b"], dec["lin2_w"], dec["lin2_b"],
               dec["ln3_g"], dec["ln3_b"]]
    head = [params["mean_w"], params["mean_b"], params["var_w"], params["var_b"]]
    smem = pl.BlockSpec(memory_space=_SMEM)
    in_specs = ([_full_spec(preds), _full_spec(pe_slab), smem, smem,
                 _stacked_spec(kv_cache)]
                + [_stacked_spec(w) for w in weights]
                + [_full_spec(h) for h in head])
    return pl.pallas_call(
        functools.partial(_decoder_step_kernel, nhead=nhead),
        grid=(nL,),
        in_specs=in_specs,
        out_specs=(pl.BlockSpec((B, L, E), lambda l: (0, 0, 0)),
                   pl.BlockSpec((B, 1, E), lambda l: (0, 0, 0))),
        out_shape=(jax.ShapeDtypeStruct((B, L, E), jnp.float32),
                   jax.ShapeDtypeStruct((B, 1, E), jnp.float32)),
        scratch_shapes=[pltpu.VMEM((B, L, 3 * E), jnp.float32),
                        pltpu.VMEM((B, L, E), jnp.float32),
                        pltpu.VMEM((B, L, E), jnp.float32)],
        compiler_params=pltpu.CompilerParams(dimension_semantics=("arbitrary",)),
    )(preds, pe_slab, vl_arr, noise_arr, kv_cache, *weights, *head)


# --------------------------- parameters / buffers ------------------------------

def make_positional_encoding(max_len, d_model):
    position = np.arange(max_len, dtype=np.float32)[:, None]
    div_term = np.exp(np.arange(0, d_model, 2, dtype=np.float32)
                      * (-math.log(10000.0) / d_model))
    pe = np.zeros((max_len, d_model), np.float32)
    pe[:, 0::2] = np.sin(position * div_term)
    pe[:, 1::2] = np.cos(position * div_term)
    return jnp.asarray(pe)                                  # (max_len, d_model)


def init_params(key, cfg, scale=0.05):
    E, F, nL = cfg["d_model"], cfg["dim_feedforward"], cfg["num_layers"]
    keys = iter(jax.random.split(key, 32))

    def rnd(shape):
        return jax.random.normal(next(keys), shape, jnp.float32) * scale

    def ones(shape):
        return jnp.ones(shape, jnp.float32)

    def zeros(shape):
        return jnp.zeros(shape, jnp.float32)

    enc = dict(
        qkv_w=rnd((nL, E, 3 * E)), qkv_b=rnd((nL, 1, 3 * E)),
        out_w=rnd((nL, E, E)), out_b=rnd((nL, 1, E)),
        ln1_g=ones((nL, 1, E)), ln1_b=zeros((nL, 1, E)),
        lin1_w=rnd((nL, E, F)), lin1_b=rnd((nL, 1, F)),
        lin2_w=rnd((nL, F, E)), lin2_b=rnd((nL, 1, E)),
        ln2_g=ones((nL, 1, E)), ln2_b=zeros((nL, 1, E)),
    )
    dec = dict(
        sa_w=rnd((nL, E, 3 * E)), sa_b=rnd((nL, 1, 3 * E)),
        so_w=rnd((nL, E, E)), so_b=rnd((nL, 1, E)),
        ln1_g=ones((nL, 1, E)), ln1_b=zeros((nL, 1, E)),
        cq_w=rnd((nL, E, E)), cq_b=rnd((nL, 1, E)),
        ckv_w=rnd((nL, E, 2 * E)), ckv_b=rnd((nL, 1, 2 * E)),
        co_w=rnd((nL, E, E)), co_b=rnd((nL, 1, E)),
        ln2_g=ones((nL, 1, E)), ln2_b=zeros((nL, 1, E)),
        lin1_w=rnd((nL, E, F)), lin1_b=rnd((nL, 1, F)),
        lin2_w=rnd((nL, F, E)), lin2_b=rnd((nL, 1, E)),
        ln3_g=ones((nL, 1, E)), ln3_b=zeros((nL, 1, E)),
    )
    # TODO(synk): np.random.normal() per-step noise made deterministic (seed 0).
    noises = jnp.asarray(np.random.RandomState(0).normal(
        size=(cfg["output_len"] - 1,)).astype(np.float32))
    return dict(enc=enc, dec=dec,
                mean_w=rnd((E, E)), mean_b=rnd((1, E)),
                var_w=rnd((E, E)), var_b=rnd((1, E)),
                pe=make_positional_encoding(300, E), noises=noises)


# ------------------------------ module forward ---------------------------------

def comment_encoded_to_skills_forward(x, params, cfg):
    """Mirrors CommentEncodedtoSkills.forward (eval mode; deterministic noise)."""
    nhead, output_len = cfg["nhead"], cfg["output_len"]
    B, _, E = x.shape
    l_max = 2 * output_len - 2        # final decoder length == returned sequence length

    # The transformer runs batch-major internally (mathematically identical to the
    # original (seq, batch, d) ordering), so both transposes of the original vanish.
    mem = run_encoder(x, params["enc"], nhead)                           # (B, Lk, E)

    # Cross-attention K/V of the encoder memory for every decoder layer, computed once.
    kv_cache = run_cross_kv(mem, params["dec"]["ckv_w"], params["dec"]["ckv_b"])

    pe_slab = params["pe"][:l_max]                                       # (l_max, E)
    noises = params["noises"]                                            # (output_len-1,)

    preds0 = jnp.zeros((B, l_max, E), jnp.float32)   # fixed-shape predictions buffer
    dec0 = jnp.zeros((B, l_max, E), jnp.float32)

    def step(t, carry):
        preds, _ = carry
        vl = output_len + t                         # current valid length of `preds`
        vl_arr = jnp.full((1, 1), vl, dtype=jnp.int32)
        noise_arr = jnp.reshape(lax.dynamic_slice(noises, (t,), (1,)), (1, 1))
        dec_out, sampled = run_decoder_step(preds, pe_slab, vl_arr, noise_arr,
                                            kv_cache, params, nhead)
        # On the final step this (clamped) write lands on a row that is never read
        # again, matching the original whose final `torch.cat` result is also unused.
        preds = lax.dynamic_update_slice(preds, sampled, (0, vl, 0))
        return preds, dec_out

    _, dec_out = lax.fori_loop(0, output_len - 1, step, (preds0, dec0))
    return dec_out                                   # (B, 2*output_len-2, d_model)


# ----------------------------------- main ---------------------------------------

if __name__ == "__main__":
    cfg = dict(
        d_model=32,          # d_model (small, divisible by nhead)
        nhead=8,             # nn.TransformerEncoderLayer(nhead=8)
        dim_feedforward=64,  # small stand-in for PyTorch default 2048
        num_layers=8,        # TransformerEncoder/Decoder num_layers=8
        input_len=8,         # source sequence length
        output_len=4,        # self.output_len
        vocab_size=100,      # unused in forward (as in the PyTorch module)
    )

    key = jax.random.PRNGKey(0)
    k_params, k_x = jax.random.split(key)
    params = init_params(k_params, cfg)

    bs = 2
    x = jax.random.normal(k_x, (bs, cfg["input_len"], cfg["d_model"]), jnp.float32)

    fwd = jax.jit(functools.partial(comment_encoded_to_skills_forward, cfg=cfg))
    out = jax.block_until_ready(fwd(x, params))

    expected_len = 2 * cfg["output_len"] - 2
    assert out.shape == (bs, expected_len, cfg["d_model"]), out.shape
    assert bool(jnp.all(jnp.isfinite(out)))
    print("KERNEL_OK")
</pallas_src>

<mosaic_0001>
module attributes {stable_mosaic.version = 11 : i64} {
  func.func @_cross_kv_kernel(%arg0: memref<2x8x32xf32, #tpu.memory_space<vmem>>, %arg1: memref<8x32x64xf32, #tpu.memory_space<vmem>>, %arg2: memref<8x1x64xf32, #tpu.memory_space<vmem>>, %arg3: memref<8x2x8x64xf32, #tpu.memory_space<vmem>>) attributes {dimension_semantics = [], scalar_prefetch = 0 : i64, scratch_operands = 0 : i64, tpu.core_type = #tpu.core_type<tc>} {
    %c0 = arith.constant 0 : index
    %c0_0 = arith.constant 0 : index
    %c0_1 = arith.constant 0 : index
    %0 = vector.load %arg1[%c0, %c0_0, %c0_1] : memref<8x32x64xf32, #tpu.memory_space<vmem>>, vector<1x32x64xf32>
    %1 = vector.shape_cast %0 : vector<1x32x64xf32> to vector<32x64xf32>
    %c0_2 = arith.constant 0 : index
    %c0_3 = arith.constant 0 : index
    %c0_4 = arith.constant 0 : index
    %2 = vector.load %arg2[%c0_2, %c0_3, %c0_4] : memref<8x1x64xf32, #tpu.memory_space<vmem>>, vector<1x1x64xf32>
    %3 = vector.shape_cast %2 : vector<1x1x64xf32> to vector<1x64xf32>
    %c0_5 = arith.constant 0 : index
    %c0_6 = arith.constant 0 : index
    %c0_7 = arith.constant 0 : index
    %4 = vector.load %arg0[%c0_5, %c0_6, %c0_7] : memref<2x8x32xf32, #tpu.memory_space<vmem>>, vector<1x8x32xf32>
    %5 = vector.shape_cast %4 : vector<1x8x32xf32> to vector<8x32xf32>
    %cst = arith.constant dense<0.000000e+00> : vector<8x64xf32>
    %6 = tpu.matmul %5, %1, %cst {dimension_numbers = #tpu.dot_dimension_numbers<[1], [0], [0], [1], [0, 0, 1, 1], [], []>} : vector<8x32xf32>, vector<32x64xf32>, vector<8x64xf32> -> vector<8x64xf32>
    %7 = vector.broadcast %3 : vector<1x64xf32> to vector<8x64xf32>
    %8 = arith.addf %6, %7 : vector<8x64xf32>
    %c0_8 = arith.constant 0 : index
    %c0_9 = arith.constant 0 : index
    %c0_10 = arith.constant 0 : index
    %c0_11 = arith.constant 0 : index
    %9 = vector.load %arg3[%c0_8, %c0_9, %c0_10, %c0_11] : memref<8x2x8x64xf32, #tpu.memory_space<vmem>>, vector<1x1x8x64xf32>
    %10 = vector.shape_cast %9 : vector<1x1x8x64xf32> to vector<8x64xf32>
    %11 = vector.shape_cast %8 : vector<8x64xf32> to vector<1x1x8x64xf32>
    tpu.vector_store %arg3[%c0_8, %c0_9, %c0_10, %c0_11], %11 {strides = array<i32>} : memref<8x2x8x64xf32, #tpu.memory_space<vmem>>, vector<1x1x8x64xf32>,
    %c1 = arith.constant 1 : index
    %c0_12 = arith.constant 0 : index
    %c0_13 = arith.constant 0 : index
    %12 = vector.load %arg0[%c1, %c0_12, %c0_13] : memref<2x8x32xf32, #tpu.memory_space<vmem>>, vector<1x8x32xf32>
    %13 = vector.shape_cast %12 : vector<1x8x32xf32> to vector<8x32xf32>
    %cst_14 = arith.constant dense<0.000000e+00> : vector<8x64xf32>
    %14 = tpu.matmul %13, %1, %cst_14 {dimension_numbers = #tpu.dot_dimension_numbers<[1], [0], [0], [1], [0, 0, 1, 1], [], []>} : vector<8x32xf32>, vector<32x64xf32>, vector<8x64xf32> -> vector<8x64xf32>
    %15 = vector.broadcast %3 : vector<1x64xf32> to vector<8x64xf32>
    %16 = arith.addf %14, %15 : vector<8x64xf32>
    %c0_15 = arith.constant 0 : index
    %c1_16 = arith.constant 1 : index
    %c0_17 = arith.constant 0 : index
    %c0_18 = arith.constant 0 : index
    %17 = vector.load %arg3[%c0_15, %c1_16, %c0_17, %c0_18] : memref<8x2x8x64xf32, #tpu.memory_space<vmem>>, vector<1x1x8x64xf32>
    %18 = vector.shape_cast %17 : vector<1x1x8x64xf32> to vector<8x64xf32>
    %19 = vector.shape_cast %16 : vector<8x64xf32> to vector<1x1x8x64xf32>
    tpu.vector_store %arg3[%c0_15, %c1_16, %c0_17, %c0_18], %19 {strides = array<i32>} : memref<8x2x8x64xf32, #tpu.memory_space<vmem>>, vector<1x1x8x64xf32>,
    %c1_19 = arith.constant 1 : index
    %c0_20 = arith.constant 0 : index
    %c0_21 = arith.constant 0 : index
    %20 = vector.load %arg1[%c1_19, %c0_20, %c0_21] : memref<8x32x64xf32, #tpu.memory_space<vmem>>, vector<1x32x64xf32>
    %21 = vector.shape_cast %20 : vector<1x32x64xf32> to vector<32x64xf32>
    %c1_22 = arith.constant 1 : index
    %c0_23 = arith.constant 0 : index
    %c0_24 = arith.constant 0 : index
    %22 = vector.load %arg2[%c1_22, %c0_23, %c0_24] : memref<8x1x64xf32, #tpu.memory_space<vmem>>, vector<1x1x64xf32>
    %23 = vector.shape_cast %22 : vector<1x1x64xf32> to vector<1x64xf32>
    %c0_25 = arith.constant 0 : index
    %c0_26 = arith.constant 0 : index
    %c0_27 = arith.constant 0 : index
    %24 = vector.load %arg0[%c0_25, %c0_26, %c0_27] : memref<2x8x32xf32, #tpu.memory_space<vmem>>, vector<1x8x32xf32>
    %25 = vector.shape_cast %24 : vector<1x8x32xf32> to vector<8x32xf32>
    %cst_28 = arith.constant dense<0.000000e+00> : vector<8x64xf32>
    %26 = tpu.matmul %25, %21, %cst_28 {dimension_numbers = #tpu.dot_dimension_numbers<[1], [0], [0], [1], [0, 0, 1, 1], [], []>} : vector<8x32xf32>, vector<32x64xf32>, vector<8x64xf32> -> vector<8x64xf32>
    %27 = vector.broadcast %23 : vector<1x64xf32> to vector<8x64xf32>
    %28 = arith.addf %26, %27 : vector<8x64xf32>
    %c1_29 = arith.constant 1 : index
    %c0_30 = arith.constant 0 : index
    %c0_31 = arith.constant 0 : index
    %c0_32 = arith.constant 0 : index
    %29 = vector.load %arg3[%c1_29, %c0_30, %c0_31, %c0_32] : memref<8x2x8x64xf32, #tpu.memory_space<vmem>>, vector<1x1x8x64xf32>
    %30 = vector.shape_cast %29 : vector<1x1x8x64xf32> to vector<8x64xf32>
    %31 = vector.shape_cast %28 : vector<8x64xf32> to vector<1x1x8x64xf32>
    tpu.vector_store %arg3[%c1_29, %c0_30, %c0_31, %c0_32], %31 {strides = array<i32>} : memref<8x2x8x64xf32, #tpu.memory_space<vmem>>, vector<1x1x8x64xf32>,
    %c1_33 = arith.constant 1 : index
    %c0_34 = arith.constant 0 : index
    %c0_35 = arith.constant 0 : index
    %32 = vector.load %arg0[%c1_33, %c0_34, %c0_35] : memref<2x8x32xf32, #tpu.memory_space<vmem>>, vector<1x8x32xf32>
    %33 = vector.shape_cast %32 : vector<1x8x32xf32> to vector<8x32xf32>
    %cst_36 = arith.constant dense<0.000000e+00> : vector<8x64xf32>
    %34 = tpu.matmul %33, %21, %cst_36 {dimension_numbers = #tpu.dot_dimension_numbers<[1], [0], [0], [1], [0, 0, 1, 1], [], []>} : vector<8x32xf32>, vector<32x64xf32>, vector<8x64xf32> -> vector<8x64xf32>
    %35 = vector.broadcast %23 : vector<1x64xf32> to vector<8x64xf32>
    %36 = arith.addf %34, %35 : vector<8x64xf32>
    %c1_37 = arith.constant 1 : index
    %c1_38 = arith.constant 1 : index
    %c0_39 = arith.constant 0 : index
    %c0_40 = arith.constant 0 : index
    %37 = vector.load %arg3[%c1_37, %c1_38, %c0_39, %c0_40] : memref<8x2x8x64xf32, #tpu.memory_space<vmem>>, vector<1x1x8x64xf32>
    %38 = vector.shape_cast %37 : vector<1x1x8x64xf32> to vector<8x64xf32>
    %39 = vector.shape_cast %36 : vector<8x64xf32> to vector<1x1x8x64xf32>
    tpu.vector_store %arg3[%c1_37, %c1_38, %c0_39, %c0_40], %39 {strides = array<i32>} : memref<8x2x8x64xf32, #tpu.memory_space<vmem>>, vector<1x1x8x64xf32>,
    %c2 = arith.constant 2 : index
    %c0_41 = arith.constant 0 : index
    %c0_42 = arith.constant 0 : index
    %40 = vector.load %arg1[%c2, %c0_41, %c0_42] : memref<8x32x64xf32, #tpu.memory_space<vmem>>, vector<1x32x64xf32>
    %41 = vector.shape_cast %40 : vector<1x32x64xf32> to vector<32x64xf32>
    %c2_43 = arith.constant 2 : index
    %c0_44 = arith.constant 0 : index
    %c0_45 = arith.constant 0 : index
    %42 = vector.load %arg2[%c2_43, %c0_44, %c0_45] : memref<8x1x64xf32, #tpu.memory_space<vmem>>, vector<1x1x64xf32>
    %43 = vector.shape_cast %42 : vector<1x1x64xf32> to vector<1x64xf32>
    %c0_46 = arith.constant 0 : index
    %c0_47 = arith.constant 0 : index
    %c0_48 = arith.constant 0 : index
    %44 = vector.load %arg0[%c0_46, %c0_47, %c0_48] : memref<2x8x32xf32, #tpu.memory_space<vmem>>, vector<1x8x32xf32>
    %45 = vector.shape_cast %44 : vector<1x8x32xf32> to vector<8x32xf32>
    %cst_49 = arith.constant dense<0.000000e+00> : vector<8x64xf32>
    %46 = tpu.matmul %45, %41, %cst_49 {dimension_numbers = #tpu.dot_dimension_numbers<[1], [0], [0], [1], [0, 0, 1, 1], [], []>} : vector<8x32xf32>, vector<32x64xf32>, vector<8x64xf32> -> vector<8x64xf32>
    %47 = vector.broadcast %43 : vector<1x64xf32> to vector<8x64xf32>
    %48 = arith.addf %46, %47 : vector<8x64xf32>
    %c2_50 = arith.constant 2 : index
    %c0_51 = arith.constant 0 : index
    %c0_52 = arith.constant 0 : index
    %c0_53 = arith.constant 0 : index
    %49 = vector.load %arg3[%c2_50, %c0_51, %c0_52, %c0_53] : memref<8x2x8x64xf32, #tpu.memory_space<vmem>>, vector<1x1x8x64xf32>
    %50 = vector.shape_cast %49 : vector<1x1x8x64xf32> to vector<8x64xf32>
    %51 = vector.shape_cast %48 : vector<8x64xf32> to vector<1x1x8x64xf32>
    tpu.vector_store %arg3[%c2_50, %c0_51, %c0_52, %c0_53], %51 {strides = array<i32>} : memref<8x2x8x64xf32, #tpu.memory_space<vmem>>, vector<1x1x8x64xf32>,
    %c1_54 = arith.constant 1 : index
    %c0_55 = arith.constant 0 : index
    %c0_56 = arith.constant 0 : index
    %52 = vector.load %arg0[%c1_54, %c0_55, %c0_56] : memref<2x8x32xf32, #tpu.memory_space<vmem>>, vector<1x8x32xf32>
    %53 = vector.shape_cast %52 : vector<1x8x32xf32> to vector<8x32xf32>
    %cst_57 = arith.constant dense<0.000000e+00> : vector<8x64xf32>
    %54 = tpu.matmul %53, %41, %cst_57 {dimension_numbers = #tpu.dot_dimension_numbers<[1], [0], [0], [1], [0, 0, 1, 1], [], []>} : vector<8x32xf32>, vector<32x64xf32>, vector<8x64xf32> -> vector<8x64xf32>
    %55 = vector.broadcast %43 : vector<1x64xf32> to vector<8x64xf32>
    %56 = arith.addf %54, %55 : vector<8x64xf32>
    %c2_58 = arith.constant 2 : index
    %c1_59 = arith.constant 1 : index
    %c0_60 = arith.constant 0 : index
    %c0_61 = arith.constant 0 : index
    %57 = vector.load %arg3[%c2_58, %c1_59, %c0_60, %c0_61] : memref<8x2x8x64xf32, #tpu.memory_space<vmem>>, vector<1x1x8x64xf32>
    %58 = vector.shape_cast %57 : vector<1x1x8x64xf32> to vector<8x64xf32>
    %59 = vector.shape_cast %56 : vector<8x64xf32> to vector<1x1x8x64xf32>
    tpu.vector_store %arg3[%c2_58, %c1_59, %c0_60, %c0_61], %59 {strides = array<i32>} : memref<8x2x8x64xf32, #tpu.memory_space<vmem>>, vector<1x1x8x64xf32>,
    %c3 = arith.constant 3 : index
    %c0_62 = arith.constant 0 : index
    %c0_63 = arith.constant 0 : index
    %60 = vector.load %arg1[%c3, %c0_62, %c0_63] : memref<8x32x64xf32, #tpu.memory_space<vmem>>, vector<1x32x64xf32>
    %61 = vector.shape_cast %60 : vector<1x32x64xf32> to vector<32x64xf32>
    %c3_64 = arith.constant 3 : index
    %c0_65 = arith.constant 0 : index
    %c0_66 = arith.constant 0 : index
    %62 = vector.load %arg2[%c3_64, %c0_65, %c0_66] : memref<8x1x64xf32, #tpu.memory_space<vmem>>, vector<1x1x64xf32>
    %63 = vector.shape_cast %62 : vector<1x1x64xf32> to vector<1x64xf32>
    %c0_67 = arith.constant 0 : index
    %c0_68 = arith.constant 0 : index
    %c0_69 = arith.constant 0 : index
    %64 = vector.load %arg0[%c0_67, %c0_68, %c0_69] : memref<2x8x32xf32, #tpu.memory_space<vmem>>, vector<1x8x32xf32>
    %65 = vector.shape_cast %64 : vector<1x8x32xf32> to vector<8x32xf32>
    %cst_70 = arith.constant dense<0.000000e+00> : vector<8x64xf32>
    %66 = tpu.matmul %65, %61, %cst_70 {dimension_numbers = #tpu.dot_dimension_numbers<[1], [0], [0], [1], [0, 0, 1, 1], [], []>} : vector<8x32xf32>, vector<32x64xf32>, vector<8x64xf32> -> vector<8x64xf32>
    %67 = vector.broadcast %63 : vector<1x64xf32> to vector<8x64xf32>
    %68 = arith.addf %66, %67 : vector<8x64xf32>
    %c3_71 = arith.constant 3 : index
    %c0_72 = arith.constant 0 : index
    %c0_73 = arith.constant 0 : index
    %c0_74 = arith.constant 0 : index
    %69 = vector.load %arg3[%c3_71, %c0_72, %c0_73, %c0_74] : memref<8x2x8x64xf32, #tpu.memory_space<vmem>>, vector<1x1x8x64xf32>
    %70 = vector.shape_cast %69 : vector<1x1x8x64xf32> to vector<8x64xf32>
    %71 = vector.shape_cast %68 : vector<8x64xf32> to vector<1x1x8x64xf32>
    tpu.vector_store %arg3[%c3_71, %c0_72, %c0_73, %c0_74], %71 {strides = array<i32>} : memref<8x2x8x64xf32, #tpu.memory_space<vmem>>, vector<1x1x8x64xf32>,
    %c1_75 = arith.constant 1 : index
    %c0_76 = arith.constant 0 : index
    %c0_77 = arith.constant 0 : index
    %72 = vector.load %arg0[%c1_75, %c0_76, %c0_77] : memref<2x8x32xf32, #tpu.memory_space<vmem>>, vector<1x8x32xf32>
    %73 = vector.shape_cast %72 : vector<1x8x32xf32> to vector<8x32xf32>
    %cst_78 = arith.constant dense<0.000000e+00> : vector<8x64xf32>
    %74 = tpu.matmul %73, %61, %cst_78 {dimension_numbers = #tpu.dot_dimension_numbers<[1], [0], [0], [1], [0, 0, 1, 1], [], []>} : vector<8x32xf32>, vector<32x64xf32>, vector<8x64xf32> -> vector<8x64xf32>
    %75 = vector.broadcast %63 : vector<1x64xf32> to vector<8x64xf32>
    %76 = arith.addf %74, %75 : vector<8x64xf32>
    %c3_79 = arith.constant 3 : index
    %c1_80 = arith.constant 1 : index
    %c0_81 = arith.constant 0 : index
    %c0_82 = arith.constant 0 : index
    %77 = vector.load %arg3[%c3_79, %c1_80, %c0_81, %c0_82] : memref<8x2x8x64xf32, #tpu.memory_space<vmem>>, vector<1x1x8x64xf32>
    %78 = vector.shape_cast %77 : vector<1x1x8x64xf32> to vector<8x64xf32>
    %79 = vector.shape_cast %76 : vector<8x64xf32> to vector<1x1x8x64xf32>
    tpu.vector_store %arg3[%c3_79, %c1_80, %c0_81, %c0_82], %79 {strides = array<i32>} : memref<8x2x8x64xf32, #tpu.memory_space<vmem>>, vector<1x1x8x64xf32>,
    %c4 = arith.constant 4 : index
    %c0_83 = arith.constant 0 : index
    %c0_84 = arith.constant 0 : index
    %80 = vector.load %arg1[%c4, %c0_83, %c0_84] : memref<8x32x64xf32, #tpu.memory_space<vmem>>, vector<1x32x64xf32>
    %81 = vector.shape_cast %80 : vector<1x32x64xf32> to vector<32x64xf32>
    %c4_85 = arith.constant 4 : index
    %c0_86 = arith.constant 0 : index
    %c0_87 = arith.constant 0 : index
    %82 = vector.load %arg2[%c4_85, %c0_86, %c0_87] : memref<8x1x64xf32, #tpu.memory_space<vmem>>, vector<1x1x64xf32>
    %83 = vector.shape_cast %82 : vector<1x1x64xf32> to vector<1x64xf32>
    %c0_88 = arith.constant 0 : index
    %c0_89 = arith.constant 0 : index
    %c0_90 = arith.constant 0 : index
    %84 = vector.load %arg0[%c0_88, %c0_89, %c0_90] : memref<2x8x32xf32, #tpu.memory_space<vmem>>, vector<1x8x32xf32>
    %85 = vector.shape_cast %84 : vector<1x8x32xf32> to vector<8x32xf32>
    %cst_91 = arith.constant dense<0.000000e+00> : vector<8x64xf32>
    %86 = tpu.matmul %85, %81, %cst_91 {dimension_numbers = #tpu.dot_dimension_numbers<[1], [0], [0], [1], [0, 0, 1, 1], [], []>} : vector<8x32xf32>, vector<32x64xf32>, vector<8x64xf32> -> vector<8x64xf32>
    %87 = vector.broadcast %83 : vector<1x64xf32> to vector<8x64xf32>
    %88 = arith.addf %86, %87 : vector<8x64xf32>
    %c4_92 = arith.constant 4 : index
    %c0_93 = arith.constant 0 : index
    %c0_94 = arith.constant 0 : index
    %c0_95 = arith.constant 0 : index
    %89 = vector.load %arg3[%c4_92, %c0_93, %c0_94, %c0_95] : memref<8x2x8x64xf32, #tpu.memory_space<vmem>>, vector<1x1x8x64xf32>
    %90 = vector.shape_cast %89 : vector<1x1x8x64xf32> to vector<8x64xf32>
    %91 = vector.shape_cast %88 : vector<8x64xf32> to vector<1x1x8x64xf32>
    tpu.vector_store %arg3[%c4_92, %c0_93, %c0_94, %c0_95], %91 {strides = array<i32>} : memref<8x2x8x64xf32, #tpu.memory_space<vmem>>, vector<1x1x8x64xf32>,
    %c1_96 = arith.constant 1 : index
    %c0_97 = arith.constant 0 : index
    %c0_98 = arith.constant 0 : index
    %92 = vector.load %arg0[%c1_96, %c0_97, %c0_98] : memref<2x8x32xf32, #tpu.memory_space<vmem>>, vector<1x8x32xf32>
    %93 = vector.shape_cast %92 : vector<1x8x32xf32> to vector<8x32xf32>
    %cst_99 = arith.constant dense<0.000000e+00> : vector<8x64xf32>
    %94 = tpu.matmul %93, %81, %cst_99 {dimension_numbers = #tpu.dot_dimension_numbers<[1], [0], [0], [1], [0, 0, 1, 1], [], []>} : vector<8x32xf32>, vector<32x64xf32>, vector<8x64xf32> -> vector<8x64xf32>
    %95 = vector.broadcast %83 : vector<1x64xf32> to vector<8x64xf32>
    %96 = arith.addf %94, %95 : vector<8x64xf32>
    %c4_100 = arith.constant 4 : index
    %c1_101 = arith.constant 1 : index
    %c0_102 = arith.constant 0 : index
    %c0_103 = arith.constant 0 : index
    %97 = vector.load %arg3[%c4_100, %c1_101, %c0_102, %c0_103] : memref<8x2x8x64xf32, #tpu.memory_space<vmem>>, vector<1x1x8x64xf32>
    %98 = vector.shape_cast %97 : vector<1x1x8x64xf32> to vector<8x64xf32>
    %99 = vector.shape_cast %96 : vector<8x64xf32> to vector<1x1x8x64xf32>
    tpu.vector_store %arg3[%c4_100, %c1_101, %c0_102, %c0_103], %99 {strides = array<i32>} : memref<8x2x8x64xf32, #tpu.memory_space<vmem>>, vector<1x1x8x64xf32>,
    %c5 = arith.constant 5 : index
    %c0_104 = arith.constant 0 : index
    %c0_105 = arith.constant 0 : index
    %100 = vector.load %arg1[%c5, %c0_104, %c0_105] : memref<8x32x64xf32, #tpu.memory_space<vmem>>, vector<1x32x64xf32>
    %101 = vector.shape_cast %100 : vector<1x32x64xf32> to vector<32x64xf32>
    %c5_106 = arith.constant 5 : index
    %c0_107 = arith.constant 0 : index
    %c0_108 = arith.constant 0 : index
    %102 = vector.load %arg2[%c5_106, %c0_107, %c0_108] : memref<8x1x64xf32, #tpu.memory_space<vmem>>, vector<1x1x64xf32>
    %103 = vector.shape_cast %102 : vector<1x1x64xf32> to vector<1x64xf32>
    %c0_109 = arith.constant 0 : index
    %c0_110 = arith.constant 0 : index
    %c0_111 = arith.constant 0 : index
    %104 = vector.load %arg0[%c0_109, %c0_110, %c0_111] : memref<2x8x32xf32, #tpu.memory_space<vmem>>, vector<1x8x32xf32>
    %105 = vector.shape_cast %104 : vector<1x8x32xf32> to vector<8x32xf32>
    %cst_112 = arith.constant dense<0.000000e+00> : vector<8x64xf32>
    %106 = tpu.matmul %105, %101, %cst_112 {dimension_numbers = #tpu.dot_dimension_numbers<[1], [0], [0], [1], [0, 0, 1, 1], [], []>} : vector<8x32xf32>, vector<32x64xf32>, vector<8x64xf32> -> vector<8x64xf32>
    %107 = vector.broadcast %103 : vector<1x64xf32> to vector<8x64xf32>
    %108 = arith.addf %106, %107 : vector<8x64xf32>
    %c5_113 = arith.constant 5 : index
    %c0_114 = arith.constant 0 : index
    %c0_115 = arith.constant 0 : index
    %c0_116 = arith.constant 0 : index
    %109 = vector.load %arg3[%c5_113, %c0_114, %c0_115, %c0_116] : memref<8x2x8x64xf32, #tpu.memory_space<vmem>>, vector<1x1x8x64xf32>
    %110 = vector.shape_cast %109 : vector<1x1x8x64xf32> to vector<8x64xf32>
    %111 = vector.shape_cast %108 : vector<8x64xf32> to vector<1x1x8x64xf32>
    tpu.vector_store %arg3[%c5_113, %c0_114, %c0_115, %c0_116], %111 {strides = array<i32>} : memref<8x2x8x64xf32, #tpu.memory_space<vmem>>, vector<1x1x8x64xf32>,
    %c1_117 = arith.constant 1 : index
    %c0_118 = arith.constant 0 : index
    %c0_119 = arith.constant 0 : index
    %112 = vector.load %arg0[%c1_117, %c0_118, %c0_119] : memref<2x8x32xf32, #tpu.memory_space<vmem>>, vector<1x8x32xf32>
    %113 = vector.shape_cast %112 : vector<1x8x32xf32> to vector<8x32xf32>
    %cst_120 = arith.constant dense<0.000000e+00> : vector<8x64xf32>
    %114 = tpu.matmul %113, %101, %cst_120 {dimension_numbers = #tpu.dot_dimension_numbers<[1], [0], [0], [1], [0, 0, 1, 1], [], []>} : vector<8x32xf32>, vector<32x64xf32>, vector<8x64xf32> -> vector<8x64xf32>
    %115 = vector.broadcast %103 : vector<1x64xf32> to vector<8x64xf32>
    %116 = arith.addf %114, %115 : vector<8x64xf32>
    %c5_121 = arith.constant 5 : index
    %c1_122 = arith.constant 1 : index
    %c0_123 = arith.constant 0 : index
    %c0_124 = arith.constant 0 : index
    %117 = vector.load %arg3[%c5_121, %c1_122, %c0_123, %c0_124] : memref<8x2x8x64xf32, #tpu.memory_space<vmem>>, vector<1x1x8x64xf32>
    %118 = vector.shape_cast %117 : vector<1x1x8x64xf32> to vector<8x64xf32>
    %119 = vector.shape_cast %116 : vector<8x64xf32> to vector<1x1x8x64xf32>
    tpu.vector_store %arg3[%c5_121, %c1_122, %c0_123, %c0_124], %119 {strides = array<i32>} : memref<8x2x8x64xf32, #tpu.memory_space<vmem>>, vector<1x1x8x64xf32>,
    %c6 = arith.constant 6 : index
    %c0_125 = arith.constant 0 : index
    %c0_126 = arith.constant 0 : index
    %120 = vector.load %arg1[%c6, %c0_125, %c0_126] : memref<8x32x64xf32, #tpu.memory_space<vmem>>, vector<1x32x64xf32>
    %121 = vector.shape_cast %120 : vector<1x32x64xf32> to vector<32x64xf32>
    %c6_127 = arith.constant 6 : index
    %c0_128 = arith.constant 0 : index
    %c0_129 = arith.constant 0 : index
    %122 = vector.load %arg2[%c6_127, %c0_128, %c0_129] : memref<8x1x64xf32, #tpu.memory_space<vmem>>, vector<1x1x64xf32>
    %123 = vector.shape_cast %122 : vector<1x1x64xf32> to vector<1x64xf32>
    %c0_130 = arith.constant 0 : index
    %c0_131 = arith.constant 0 : index
    %c0_132 = arith.constant 0 : index
    %124 = vector.load %arg0[%c0_130, %c0_131, %c0_132] : memref<2x8x32xf32, #tpu.memory_space<vmem>>, vector<1x8x32xf32>
    %125 = vector.shape_cast %124 : vector<1x8x32xf32> to vector<8x32xf32>
    %cst_133 = arith.constant dense<0.000000e+00> : vector<8x64xf32>
    %126 = tpu.matmul %125, %121, %cst_133 {dimension_numbers = #tpu.dot_dimension_numbers<[1], [0], [0], [1], [0, 0, 1, 1], [], []>} : vector<8x32xf32>, vector<32x64xf32>, vector<8x64xf32> -> vector<8x64xf32>
    %127 = vector.broadcast %123 : vector<1x64xf32> to vector<8x64xf32>
    %128 = arith.addf %126, %127 : vector<8x64xf32>
    %c6_134 = arith.constant 6 : index
    %c0_135 = arith.constant 0 : index
    %c0_136 = arith.constant 0 : index
    %c0_137 = arith.constant 0 : index
    %129 = vector.load %arg3[%c6_134, %c0_135, %c0_136, %c0_137] : memref<8x2x8x64xf32, #tpu.memory_space<vmem>>, vector<1x1x8x64xf32>
    %130 = vector.shape_cast %129 : vector<1x1x8x64xf32> to vector<8x64xf32>
    %131 = vector.shape_cast %128 : vector<8x64xf32> to vector<1x1x8x64xf32>
    tpu.vector_store %arg3[%c6_134, %c0_135, %c0_136, %c0_137], %131 {strides = array<i32>} : memref<8x2x8x64xf32, #tpu.memory_space<vmem>>, vector<1x1x8x64xf32>,
    %c1_138 = arith.constant 1 : index
    %c0_139 = arith.constant 0 : index
    %c0_140 = arith.constant 0 : index
    %132 = vector.load %arg0[%c1_138, %c0_139, %c0_140] : memref<2x8x32xf32, #tpu.memory_space<vmem>>, vector<1x8x32xf32>
    %133 = vector.shape_cast %132 : vector<1x8x32xf32> to vector<8x32xf32>
    %cst_141 = arith.constant dense<0.000000e+00> : vector<8x64xf32>
    %134 = tpu.matmul %133, %121, %cst_141 {dimension_numbers = #tpu.dot_dimension_numbers<[1], [0], [0], [1], [0, 0, 1, 1], [], []>} : vector<8x32xf32>, vector<32x64xf32>, vector<8x64xf32> -> vector<8x64xf32>
    %135 = vector.broadcast %123 : vector<1x64xf32> to vector<8x64xf32>
    %136 = arith.addf %134, %135 : vector<8x64xf32>
    %c6_142 = arith.constant 6 : index
    %c1_143 = arith.constant 1 : index
    %c0_144 = arith.constant 0 : index
    %c0_145 = arith.constant 0 : index
    %137 = vector.load %arg3[%c6_142, %c1_143, %c0_144, %c0_145] : memref<8x2x8x64xf32, #tpu.memory_space<vmem>>, vector<1x1x8x64xf32>
    %138 = vector.shape_cast %137 : vector<1x1x8x64xf32> to vector<8x64xf32>
    %139 = vector.shape_cast %136 : vector<8x64xf32> to vector<1x1x8x64xf32>
    tpu.vector_store %arg3[%c6_142, %c1_143, %c0_144, %c0_145], %139 {strides = array<i32>} : memref<8x2x8x64xf32, #tpu.memory_space<vmem>>, vector<1x1x8x64xf32>,
    %c7 = arith.constant 7 : index
    %c0_146 = arith.constant 0 : index
    %c0_147 = arith.constant 0 : index
    %140 = vector.load %arg1[%c7, %c0_146, %c0_147] : memref<8x32x64xf32, #tpu.memory_space<vmem>>, vector<1x32x64xf32>
    %141 = vector.shape_cast %140 : vector<1x32x64xf32> to vector<32x64xf32>
    %c7_148 = arith.constant 7 : index
    %c0_149 = arith.constant 0 : index
    %c0_150 = arith.constant 0 : index
    %142 = vector.load %arg2[%c7_148, %c0_149, %c0_150] : memref<8x1x64xf32, #tpu.memory_space<vmem>>, vector<1x1x64xf32>
    %143 = vector.shape_cast %142 : vector<1x1x64xf32> to vector<1x64xf32>
    %c0_151 = arith.constant 0 : index
    %c0_152 = arith.constant 0 : index
    %c0_153 = arith.constant 0 : index
    %144 = vector.load %arg0[%c0_151, %c0_152, %c0_153] : memref<2x8x32xf32, #tpu.memory_space<vmem>>, vector<1x8x32xf32>
    %145 = vector.shape_cast %144 : vector<1x8x32xf32> to vector<8x32xf32>
    %cst_154 = arith.constant dense<0.000000e+00> : vector<8x64xf32>
    %146 = tpu.matmul %145, %141, %cst_154 {dimension_numbers = #tpu.dot_dimension_numbers<[1], [0], [0], [1], [0, 0, 1, 1], [], []>} : vector<8x32xf32>, vector<32x64xf32>, vector<8x64xf32> -> vector<8x64xf32>
    %147 = vector.broadcast %143 : vector<1x64xf32> to vector<8x64xf32>
    %148 = arith.addf %146, %147 : vector<8x64xf32>
    %c7_155 = arith.constant 7 : index
    %c0_156 = arith.constant 0 : index
    %c0_157 = arith.constant 0 : index
    %c0_158 = arith.constant 0 : index
    %149 = vector.load %arg3[%c7_155, %c0_156, %c0_157, %c0_158] : memref<8x2x8x64xf32, #tpu.memory_space<vmem>>, vector<1x1x8x64xf32>
    %150 = vector.shape_cast %149 : vector<1x1x8x64xf32> to vector<8x64xf32>
    %151 = vector.shape_cast %148 : vector<8x64xf32> to vector<1x1x8x64xf32>
    tpu.vector_store %arg3[%c7_155, %c0_156, %c0_157, %c0_158], %151 {strides = array<i32>} : memref<8x2x8x64xf32, #tpu.memory_space<vmem>>, vector<1x1x8x64xf32>,
    %c1_159 = arith.constant 1 : index
    %c0_160 = arith.constant 0 : index
    %c0_161 = arith.constant 0 : index
    %152 = vector.load %arg0[%c1_159, %c0_160, %c0_161] : memref<2x8x32xf32, #tpu.memory_space<vmem>>, vector<1x8x32xf32>
    %153 = vector.shape_cast %152 : vector<1x8x32xf32> to vector<8x32xf32>
    %cst_162 = arith.constant dense<0.000000e+00> : vector<8x64xf32>
    %154 = tpu.matmul %153, %141, %cst_162 {dimension_numbers = #tpu.dot_dimension_numbers<[1], [0], [0], [1], [0, 0, 1, 1], [], []>} : vector<8x32xf32>, vector<32x64xf32>, vector<8x64xf32> -> vector<8x64xf32>
    %155 = vector.broadcast %143 : vector<1x64xf32> to vector<8x64xf32>
    %156 = arith.addf %154, %155 : vector<8x64xf32>
    %c7_163 = arith.constant 7 : index
    %c1_164 = arith.constant 1 : index
    %c0_165 = arith.constant 0 : index
    %c0_166 = arith.constant 0 : index
    %157 = vector.load %arg3[%c7_163, %c1_164, %c0_165, %c0_166] : memref<8x2x8x64xf32, #tpu.memory_space<vmem>>, vector<1x1x8x64xf32>
    %158 = vector.shape_cast %157 : vector<1x1x8x64xf32> to vector<8x64xf32>
    %159 = vector.shape_cast %156 : vector<8x64xf32> to vector<1x1x8x64xf32>
    tpu.vector_store %arg3[%c7_163, %c1_164, %c0_165, %c0_166], %159 {strides = array<i32>} : memref<8x2x8x64xf32, #tpu.memory_space<vmem>>, vector<1x1x8x64xf32>,
    return
  }
}

module attributes {stable_mosaic.version = 11 : i64} {
  func.func @_encoder_kernel(%arg0: i32, %arg1: memref<2x8x32xf32, #tpu.memory_space<vmem>>, %arg2: memref<1x32x96xf32, #tpu.memory_space<vmem>>, %arg3: memref<1x1x96xf32, #tpu.memory_space<vmem>>, %arg4: memref<1x32x32xf32, #tpu.memory_space<vmem>>, %arg5: memref<1x1x32xf32, #tpu.memory_space<vmem>>, %arg6: memref<1x1x32xf32, #tpu.memory_space<vmem>>, %arg7: memref<1x1x32xf32, #tpu.memory_space<vmem>>, %arg8: memref<1x32x64xf32, #tpu.memory_space<vmem>>, %arg9: memref<1x1x64xf32, #tpu.memory_space<vmem>>, %arg10: memref<1x64x32xf32, #tpu.memory_space<vmem>>, %arg11: memref<1x1x32xf32, #tpu.memory_space<vmem>>, %arg12: memref<1x1x32xf32, #tpu.memory_space<vmem>>, %arg13: memref<1x1x32xf32, #tpu.memory_space<vmem>>, %arg14: memref<2x8x32xf32, #tpu.memory_space<vmem>>, %arg15: memref<2x8x96xf32, #tpu.memory_space<vmem>>, %arg16: memref<2x8x32xf32, #tpu.memory_space<vmem>>) attributes {dimension_semantics = [#tpu.dimension_semantics<arbitrary>], iteration_bounds = array<i64: 8>, scalar_prefetch = 0 : i64, scratch_operands = 2 : i64, tpu.core_type = #tpu.core_type<tc>, window_params = [{pipeline_mode = #tpu.pipeline_mode<synchronous>, transform_indices = @transform_0, window_bounds = array<i64: 2, 8, 32>}, {transform_indices = @transform_1, window_bounds = array<i64: 1, 32, 96>}, {transform_indices = @transform_2, window_bounds = array<i64: 1, 1, 96>}, {transform_indices = @transform_3, window_bounds = array<i64: 1, 32, 32>}, {transform_indices = @transform_4, window_bounds = array<i64: 1, 1, 32>}, {transform_indices = @transform_5, window_bounds = array<i64: 1, 1, 32>}, {transform_indices = @transform_6, window_bounds = array<i64: 1, 1, 32>}, {transform_indices = @transform_7, window_bounds = array<i64: 1, 32, 64>}, {transform_indices = @transform_8, window_bounds = array<i64: 1, 1, 64>}, {transform_indices = @transform_9, window_bounds = array<i64: 1, 64, 32>}, {transform_indices = @transform_10, window_bounds = array<i64: 1, 1, 32>}, {transform_indices = @transform_11, window_bounds = array<i64: 1, 1, 32>}, {transform_indices = @transform_12, window_bounds = array<i64: 1, 1, 32>}, {pipeline_mode = #tpu.pipeline_mode<synchronous>, transform_indices = @transform_13, window_bounds = array<i64: 2, 8, 32>}]} {
    %c0_i32 = arith.constant 0 : i32
    %0 = arith.cmpi eq, %arg0, %c0_i32 : i32
    %1 = arith.extui %0 : i1 to i32
    %c0_i32_0 = arith.constant 0 : i32
    %2 = arith.cmpi ne, %1, %c0_i32_0 : i32
    scf.if %2 {
      %c0_337 = arith.constant 0 : index
      %c0_338 = arith.constant 0 : index
      %c0_339 = arith.constant 0 : index
      %535 = vector.load %arg1[%c0_337, %c0_338, %c0_339] : memref<2x8x32xf32, #tpu.memory_space<vmem>>, vector<2x8x32xf32>
      %c0_340 = arith.constant 0 : index
      %c0_341 = arith.constant 0 : index
      %c0_342 = arith.constant 0 : index
      %536 = vector.load %arg14[%c0_340, %c0_341, %c0_342] : memref<2x8x32xf32, #tpu.memory_space<vmem>>, vector<2x8x32xf32>
      tpu.vector_store %arg14[%c0_340, %c0_341, %c0_342], %535 {strides = array<i32>} : memref<2x8x32xf32, #tpu.memory_space<vmem>>, vector<2x8x32xf32>,
    } else {
    }
    %c0 = arith.constant 0 : index
    %c0_1 = arith.constant 0 : index
    %c0_2 = arith.constant 0 : index
    %3 = vector.load %arg2[%c0, %c0_1, %c0_2] : memref<1x32x96xf32, #tpu.memory_space<vmem>>, vector<1x32x96xf32>
    %4 = vector.shape_cast %3 : vector<1x32x96xf32> to vector<32x96xf32>
    %c0_3 = arith.constant 0 : index
    %c0_4 = arith.constant 0 : index
    %c0_5 = arith.constant 0 : index
    %5 = vector.load %arg3[%c0_3, %c0_4, %c0_5] : memref<1x1x96xf32, #tpu.memory_space<vmem>>, vector<1x1x96xf32>
    %6 = vector.shape_cast %5 : vector<1x1x96xf32> to vector<1x96xf32>
    %c0_6 = arith.constant 0 : index
    %c0_7 = arith.constant 0 : index
    %c0_8 = arith.constant 0 : index
    %7 = vector.load %arg4[%c0_6, %c0_7, %c0_8] : memref<1x32x32xf32, #tpu.memory_space<vmem>>, vector<1x32x32xf32>
    %8 = vector.shape_cast %7 : vector<1x32x32xf32> to vector<32x32xf32>
    %c0_9 = arith.constant 0 : index
    %c0_10 = arith.constant 0 : index
    %c0_11 = arith.constant 0 : index
    %9 = vector.load %arg5[%c0_9, %c0_10, %c0_11] : memref<1x1x32xf32, #tpu.memory_space<vmem>>, vector<1x1x32xf32>
    %10 = vector.shape_cast %9 : vector<1x1x32xf32> to vector<1x32xf32>
    %c0_12 = arith.constant 0 : index
    %c0_13 = arith.constant 0 : index
    %c0_14 = arith.constant 0 : index
    %11 = vector.load %arg6[%c0_12, %c0_13, %c0_14] : memref<1x1x32xf32, #tpu.memory_space<vmem>>, vector<1x1x32xf32>
    %12 = vector.shape_cast %11 : vector<1x1x32xf32> to vector<1x32xf32>
    %c0_15 = arith.constant 0 : index
    %c0_16 = arith.constant 0 : index
    %c0_17 = arith.constant 0 : index
    %13 = vector.load %arg7[%c0_15, %c0_16, %c0_17] : memref<1x1x32xf32, #tpu.memory_space<vmem>>, vector<1x1x32xf32>
    %14 = vector.shape_cast %13 : vector<1x1x32xf32> to vector<1x32xf32>
    %c0_18 = arith.constant 0 : index
    %c0_19 = arith.constant 0 : index
    %c0_20 = arith.constant 0 : index
    %15 = vector.load %arg8[%c0_18, %c0_19, %c0_20] : memref<1x32x64xf32, #tpu.memory_space<vmem>>, vector<1x32x64xf32>
    %16 = vector.shape_cast %15 : vector<1x32x64xf32> to vector<32x64xf32>
    %c0_21 = arith.constant 0 : index
    %c0_22 = arith.constant 0 : index
    %c0_23 = arith.constant 0 : index
    %17 = vector.load %arg9[%c0_21, %c0_22, %c0_23] : memref<1x1x64xf32, #tpu.memory_space<vmem>>, vector<1x1x64xf32>
    %18 = vector.shape_cast %17 : vector<1x1x64xf32> to vector<1x64xf32>
    %c0_24 = arith.constant 0 : index
    %c0_25 = arith.constant 0 : index
    %c0_26 = arith.constant 0 : index
    %19 = vector.load %arg10[%c0_24, %c0_25, %c0_26] : memref<1x64x32xf32, #tpu.memory_space<vmem>>, vector<1x64x32xf32>
    %20 = vector.shape_cast %19 : vector<1x64x32xf32> to vector<64x32xf32>
    %c0_27 = arith.constant 0 : index
    %c0_28 = arith.constant 0 : index
    %c0_29 = arith.constant 0 : index
    %21 = vector.load %arg11[%c0_27, %c0_28, %c0_29] : memref<1x1x32xf32, #tpu.memory_space<vmem>>, vector<1x1x32xf32>
    %22 = vector.shape_cast %21 : vector<1x1x32xf32> to vector<1x32xf32>
    %c0_30 = arith.constant 0 : index
    %c0_31 = arith.constant 0 : index
    %c0_32 = arith.constant 0 : index
    %23 = vector.load %arg12[%c0_30, %c0_31, %c0_32] : memref<1x1x32xf32, #tpu.memory_space<vmem>>, vector<1x1x32xf32>
    %24 = vector.shape_cast %23 : vector<1x1x32xf32> to vector<1x32xf32>
    %c0_33 = arith.constant 0 : index
    %c0_34 = arith.constant 0 : index
    %c0_35 = arith.constant 0 : index
    %25 = vector.load %arg13[%c0_33, %c0_34, %c0_35] : memref<1x1x32xf32, #tpu.memory_space<vmem>>, vector<1x1x32xf32>
    %26 = vector.shape_cast %25 : vector<1x1x32xf32> to vector<1x32xf32>
    %c0_36 = arith.constant 0 : index
    %c0_37 = arith.constant 0 : index
    %c0_38 = arith.constant 0 : index
    %27 = vector.load %arg14[%c0_36, %c0_37, %c0_38] : memref<2x8x32xf32, #tpu.memory_space<vmem>>, vector<1x8x32xf32>
    %28 = vector.shape_cast %27 : vector<1x8x32xf32> to vector<8x32xf32>
    %cst = arith.constant dense<0.000000e+00> : vector<8x96xf32>
    %29 = tpu.matmul %28, %4, %cst {dimension_numbers = #tpu.dot_dimension_numbers<[1], [0], [0], [1], [0, 0, 1, 1], [], []>} : vector<8x32xf32>, vector<32x96xf32>, vector<8x96xf32> -> vector<8x96xf32>
    %30 = vector.broadcast %6 : vector<1x96xf32> to vector<8x96xf32>
    %31 = arith.addf %29, %30 : vector<8x96xf32>
    %c0_39 = arith.constant 0 : index
    %c0_40 = arith.constant 0 : index
    %c0_41 = arith.constant 0 : index
    %32 = vector.load %arg15[%c0_39, %c0_40, %c0_41] : memref<2x8x96xf32, #tpu.memory_space<vmem>>, vector<1x8x96xf32>
    %33 = vector.shape_cast %32 : vector<1x8x96xf32> to vector<8x96xf32>
    %34 = vector.shape_cast %31 : vector<8x96xf32> to vector<1x8x96xf32>
    tpu.vector_store %arg15[%c0_39, %c0_40, %c0_41], %34 {strides = array<i32>} : memref<2x8x96xf32, #tpu.memory_space<vmem>>, vector<1x8x96xf32>,
    %c0_42 = arith.constant 0 : index
    %c0_43 = arith.constant 0 : index
    %c0_44 = arith.constant 0 : index
    %35 = vector.load %arg15[%c0_42, %c0_43, %c0_44] : memref<2x8x96xf32, #tpu.memory_space<vmem>>, vector<1x8x4xf32>
    %36 = vector.shape_cast %35 : vector<1x8x4xf32> to vector<8x4xf32>
    %cst_45 = arith.constant 5.000000e-01 : f32
    %37 = vector.broadcast %cst_45 : f32 to vector<8x4xf32>
    %38 = arith.mulf %36, %37 : vector<8x4xf32>
    %c0_46 = arith.constant 0 : index
    %c0_47 = arith.constant 0 : index
    %c32 = arith.constant 32 : index
    %39 = vector.load %arg15[%c0_46, %c0_47, %c32] : memref<2x8x96xf32, #tpu.memory_space<vmem>>, vector<1x8x4xf32>
    %40 = vector.shape_cast %39 : vector<1x8x4xf32> to vector<8x4xf32>
    %c0_48 = arith.constant 0 : index
    %c0_49 = arith.constant 0 : index
    %c64 = arith.constant 64 : index
    %41 = vector.load %arg15[%c0_48, %c0_49, %c64] : memref<2x8x96xf32, #tpu.memory_space<vmem>>, vector<1x8x4xf32>
    %42 = vector.shape_cast %41 : vector<1x8x4xf32> to vector<8x4xf32>
    %cst_50 = arith.constant dense<0.000000e+00> : vector<8x8xf32>
    %43 = tpu.matmul %38, %40, %cst_50 {dimension_numbers = #tpu.dot_dimension_numbers<[1], [1], [0], [0], [0, 0, 1, 0], [], []>} : vector<8x4xf32>, vector<8x4xf32>, vector<8x8xf32> -> vector<8x8xf32>
    %cst_51 = arith.constant dense<0xFF800000> : vector<8xf32>
    %44 = vector.multi_reduction <maximumf>, %43, %cst_51 [1] : vector<8x8xf32> to vector<8xf32>
    %45 = vector.shape_cast %44 : vector<8xf32> to vector<8x1xf32>
    %46 = vector.broadcast %45 : vector<8x1xf32> to vector<8x8xf32>
    %47 = arith.subf %43, %46 : vector<8x8xf32>
    %48 = math.exp %47 : vector<8x8xf32>
    %cst_52 = arith.constant dense<0.000000e+00> : vector<8xf32>
    %49 = vector.multi_reduction <add>, %48, %cst_52 [1] : vector<8x8xf32> to vector<8xf32>
    %50 = vector.shape_cast %49 : vector<8xf32> to vector<8x1xf32>
    %51 = tpu.reciprocal %50 {approx = true} : vector<8x1xf32> -> vector<8x1xf32>
    %52 = vector.broadcast %51 : vector<8x1xf32> to vector<8x8xf32>
    %53 = arith.mulf %48, %52 : vector<8x8xf32>
    %cst_53 = arith.constant dense<0.000000e+00> : vector<8x4xf32>
    %54 = tpu.matmul %53, %42, %cst_53 {dimension_numbers = #tpu.dot_dimension_numbers<[1], [0], [0], [1], [0, 0, 1, 1], [], []>} : vector<8x8xf32>, vector<8x4xf32>, vector<8x4xf32> -> vector<8x4xf32>
    %c0_54 = arith.constant 0 : index
    %c0_55 = arith.constant 0 : index
    %c0_56 = arith.constant 0 : index
    %55 = vector.load %arg16[%c0_54, %c0_55, %c0_56] : memref<2x8x32xf32, #tpu.memory_space<vmem>>, vector<1x8x4xf32>
    %56 = vector.shape_cast %55 : vector<1x8x4xf32> to vector<8x4xf32>
    %57 = vector.shape_cast %54 : vector<8x4xf32> to vector<1x8x4xf32>
    tpu.vector_store %arg16[%c0_54, %c0_55, %c0_56], %57 {strides = array<i32>} : memref<2x8x32xf32, #tpu.memory_space<vmem>>, vector<1x8x4xf32>,
    %c0_57 = arith.constant 0 : index
    %c0_58 = arith.constant 0 : index
    %c4 = arith.constant 4 : index
    %58 = vector.load %arg15[%c0_57, %c0_58, %c4] : memref<2x8x96xf32, #tpu.memory_space<vmem>>, vector<1x8x4xf32>
    %59 = vector.shape_cast %58 : vector<1x8x4xf32> to vector<8x4xf32>
    %cst_59 = arith.constant 5.000000e-01 : f32
    %60 = vector.broadcast %cst_59 : f32 to vector<8x4xf32>
    %61 = arith.mulf %59, %60 : vector<8x4xf32>
    %c0_60 = arith.constant 0 : index
    %c0_61 = arith.constant 0 : index
    %c36 = arith.constant 36 : index
    %62 = vector.load %arg15[%c0_60, %c0_61, %c36] : memref<2x8x96xf32, #tpu.memory_space<vmem>>, vector<1x8x4xf32>
    %63 = vector.shape_cast %62 : vector<1x8x4xf32> to vector<8x4xf32>
    %c0_62 = arith.constant 0 : index
    %c0_63 = arith.constant 0 : index
    %c68 = arith.constant 68 : index
    %64 = vector.load %arg15[%c0_62, %c0_63, %c68] : memref<2x8x96xf32, #tpu.memory_space<vmem>>, vector<1x8x4xf32>
    %65 = vector.shape_cast %64 : vector<1x8x4xf32> to vector<8x4xf32>
    %cst_64 = arith.constant dense<0.000000e+00> : vector<8x8xf32>
    %66 = tpu.matmul %61, %63, %cst_64 {dimension_numbers = #tpu.dot_dimension_numbers<[1], [1], [0], [0], [0, 0, 1, 0], [], []>} : vector<8x4xf32>, vector<8x4xf32>, vector<8x8xf32> -> vector<8x8xf32>
    %cst_65 = arith.constant dense<0xFF800000> : vector<8xf32>
    %67 = vector.multi_reduction <maximumf>, %66, %cst_65 [1] : vector<8x8xf32> to vector<8xf32>
    %68 = vector.shape_cast %67 : vector<8xf32> to vector<8x1xf32>
    %69 = vector.broadcast %68 : vector<8x1xf32> to vector<8x8xf32>
    %70 = arith.subf %66, %69 : vector<8x8xf32>
    %71 = math.exp %70 : vector<8x8xf32>
    %cst_66 = arith.constant dense<0.000000e+00> : vector<8xf32>
    %72 = vector.multi_reduction <add>, %71, %cst_66 [1] : vector<8x8xf32> to vector<8xf32>
    %73 = vector.shape_cast %72 : vector<8xf32> to vector<8x1xf32>
    %74 = tpu.reciprocal %73 {approx = true} : vector<8x1xf32> -> vector<8x1xf32>
    %75 = vector.broadcast %74 : vector<8x1xf32> to vector<8x8xf32>
    %76 = arith.mulf %71, %75 : vector<8x8xf32>
    %cst_67 = arith.constant dense<0.000000e+00> : vector<8x4xf32>
    %77 = tpu.matmul %76, %65, %cst_67 {dimension_numbers = #tpu.dot_dimension_numbers<[1], [0], [0], [1], [0, 0, 1, 1], [], []>} : vector<8x8xf32>, vector<8x4xf32>, vector<8x4xf32> -> vector<8x4xf32>
    %c0_68 = arith.constant 0 : index
    %c0_69 = arith.constant 0 : index
    %c4_70 = arith.constant 4 : index
    %78 = vector.load %arg16[%c0_68, %c0_69, %c4_70] : memref<2x8x32xf32, #tpu.memory_space<vmem>>, vector<1x8x4xf32>
    %79 = vector.shape_cast %78 : vector<1x8x4xf32> to vector<8x4xf32>
    %80 = vector.shape_cast %77 : vector<8x4xf32> to vector<1x8x4xf32>
    tpu.vector_store %arg16[%c0_68, %c0_69, %c4_70], %80 {strides = array<i32>} : memref<2x8x32xf32, #tpu.memory_space<vmem>>, vector<1x8x4xf32>,
    %c0_71 = arith.constant 0 : index
    %c0_72 = arith.constant 0 : index
    %c8 = arith.constant 8 : index
    %81 = vector.load %arg15[%c0_71, %c0_72, %c8] : memref<2x8x96xf32, #tpu.memory_space<vmem>>, vector<1x8x4xf32>
    %82 = vector.shape_cast %81 : vector<1x8x4xf32> to vector<8x4xf32>
    %cst_73 = arith.constant 5.000000e-01 : f32
    %83 = vector.broadcast %cst_73 : f32 to vector<8x4xf32>
    %84 = arith.mulf %82, %83 : vector<8x4xf32>
    %c0_74 = arith.constant 0 : index
    %c0_75 = arith.constant 0 : index
    %c40 = arith.constant 40 : index
    %85 = vector.load %arg15[%c0_74, %c0_75, %c40] : memref<2x8x96xf32, #tpu.memory_space<vmem>>, vector<1x8x4xf32>
    %86 = vector.shape_cast %85 : vector<1x8x4xf32> to vector<8x4xf32>
    %c0_76 = arith.constant 0 : index
    %c0_77 = arith.constant 0 : index
    %c72 = arith.constant 72 : index
    %87 = vector.load %arg15[%c0_76, %c0_77, %c72] : memref<2x8x96xf32, #tpu.memory_space<vmem>>, vector<1x8x4xf32>
    %88 = vector.shape_cast %87 : vector<1x8x4xf32> to vector<8x4xf32>
    %cst_78 = arith.constant dense<0.000000e+00> : vector<8x8xf32>
    %89 = tpu.matmul %84, %86, %cst_78 {dimension_numbers = #tpu.dot_dimension_numbers<[1], [1], [0], [0], [0, 0, 1, 0], [], []>} : vector<8x4xf32>, vector<8x4xf32>, vector<8x8xf32> -> vector<8x8xf32>
    %cst_79 = arith.constant dense<0xFF800000> : vector<8xf32>
    %90 = vector.multi_reduction <maximumf>, %89, %cst_79 [1] : vector<8x8xf32> to vector<8xf32>
    %91 = vector.shape_cast %90 : vector<8xf32> to vector<8x1xf32>
    %92 = vector.broadcast %91 : vector<8x1xf32> to vector<8x8xf32>
    %93 = arith.subf %89, %92 : vector<8x8xf32>
    %94 = math.exp %93 : vector<8x8xf32>
    %cst_80 = arith.constant dense<0.000000e+00> : vector<8xf32>
    %95 = vector.multi_reduction <add>, %94, %cst_80 [1] : vector<8x8xf32> to vector<8xf32>
    %96 = vector.shape_cast %95 : vector<8xf32> to vector<8x1xf32>
    %97 = tpu.reciprocal %96 {approx = true} : vector<8x1xf32> -> vector<8x1xf32>
    %98 = vector.broadcast %97 : vector<8x1xf32> to vector<8x8xf32>
    %99 = arith.mulf %94, %98 : vector<8x8xf32>
    %cst_81 = arith.constant dense<0.000000e+00> : vector<8x4xf32>
    %100 = tpu.matmul %99, %88, %cst_81 {dimension_numbers = #tpu.dot_dimension_numbers<[1], [0], [0], [1], [0, 0, 1, 1], [], []>} : vector<8x8xf32>, vector<8x4xf32>, vector<8x4xf32> -> vector<8x4xf32>
    %c0_82 = arith.constant 0 : index
    %c0_83 = arith.constant 0 : index
    %c8_84 = arith.constant 8 : index
    %101 = vector.load %arg16[%c0_82, %c0_83, %c8_84] : memref<2x8x32xf32, #tpu.memory_space<vmem>>, vector<1x8x4xf32>
    %102 = vector.shape_cast %101 : vector<1x8x4xf32> to vector<8x4xf32>
    %103 = vector.shape_cast %100 : vector<8x4xf32> to vector<1x8x4xf32>
    tpu.vector_store %arg16[%c0_82, %c0_83, %c8_84], %103 {strides = array<i32>} : memref<2x8x32xf32, #tpu.memory_space<vmem>>, vector<1x8x4xf32>,
    %c0_85 = arith.constant 0 : index
    %c0_86 = arith.constant 0 : index
    %c12 = arith.constant 12 : index
    %104 = vector.load %arg15[%c0_85, %c0_86, %c12] : memref<2x8x96xf32, #tpu.memory_space<vmem>>, vector<1x8x4xf32>
    %105 = vector.shape_cast %104 : vector<1x8x4xf32> to vector<8x4xf32>
    %cst_87 = arith.constant 5.000000e-01 : f32
    %106 = vector.broadcast %cst_87 : f32 to vector<8x4xf32>
    %107 = arith.mulf %105, %106 : vector<8x4xf32>
    %c0_88 = arith.constant 0 : index
    %c0_89 = arith.constant 0 : index
    %c44 = arith.constant 44 : index
    %108 = vector.load %arg15[%c0_88, %c0_89, %c44] : memref<2x8x96xf32, #tpu.memory_space<vmem>>, vector<1x8x4xf32>
    %109 = vector.shape_cast %108 : vector<1x8x4xf32> to vector<8x4xf32>
    %c0_90 = arith.constant 0 : index
    %c0_91 = arith.constant 0 : index
    %c76 = arith.constant 76 : index
    %110 = vector.load %arg15[%c0_90, %c0_91, %c76] : memref<2x8x96xf32, #tpu.memory_space<vmem>>, vector<1x8x4xf32>
    %111 = vector.shape_cast %110 : vector<1x8x4xf32> to vector<8x4xf32>
    %cst_92 = arith.constant dense<0.000000e+00> : vector<8x8xf32>
    %112 = tpu.matmul %107, %109, %cst_92 {dimension_numbers = #tpu.dot_dimension_numbers<[1], [1], [0], [0], [0, 0, 1, 0], [], []>} : vector<8x4xf32>, vector<8x4xf32>, vector<8x8xf32> -> vector<8x8xf32>
    %cst_93 = arith.constant dense<0xFF800000> : vector<8xf32>
    %113 = vector.multi_reduction <maximumf>, %112, %cst_93 [1] : vector<8x8xf32> to vector<8xf32>
    %114 = vector.shape_cast %113 : vector<8xf32> to vector<8x1xf32>
    %115 = vector.broadcast %114 : vector<8x1xf32> to vector<8x8xf32>
    %116 = arith.subf %112, %115 : vector<8x8xf32>
    %117 = math.exp %116 : vector<8x8xf32>
    %cst_94 = arith.constant dense<0.000000e+00> : vector<8xf32>
    %118 = vector.multi_reduction <add>, %117, %cst_94 [1] : vector<8x8xf32> to vector<8xf32>
    %119 = vector.shape_cast %118 : vector<8xf32> to vector<8x1xf32>
    %120 = tpu.reciprocal %119 {approx = true} : vector<8x1xf32> -> vector<8x1xf32>
    %121 = vector.broadcast %120 : vector<8x1xf32> to vector<8x8xf32>
    %122 = arith.mulf %117, %121 : vector<8x8xf32>
    %cst_95 = arith.constant dense<0.000000e+00> : vector<8x4xf32>
    %123 = tpu.matmul %122, %111, %cst_95 {dimension_numbers = #tpu.dot_dimension_numbers<[1], [0], [0], [1], [0, 0, 1, 1], [], []>} : vector<8x8xf32>, vector<8x4xf32>, vector<8x4xf32> -> vector<8x4xf32>
    %c0_96 = arith.constant 0 : index
    %c0_97 = arith.constant 0 : index
    %c12_98 = arith.constant 12 : index
    %124 = vector.load %arg16[%c0_96, %c0_97, %c12_98] : memref<2x8x32xf32, #tpu.memory_space<vmem>>, vector<1x8x4xf32>
    %125 = vector.shape_cast %124 : vector<1x8x4xf32> to vector<8x4xf32>
    %126 = vector.shape_cast %123 : vector<8x4xf32> to vector<1x8x4xf32>
    tpu.vector_store %arg16[%c0_96, %c0_97, %c12_98], %126 {strides = array<i32>} : memref<2x8x32xf32, #tpu.memory_space<vmem>>, vector<1x8x4xf32>,
    %c0_99 = arith.constant 0 : index
    %c0_100 = arith.constant 0 : index
    %c16 = arith.constant 16 : index
    %127 = vector.load %arg15[%c0_99, %c0_100, %c16] : memref<2x8x96xf32, #tpu.memory_space<vmem>>, vector<1x8x4xf32>
    %128 = vector.shape_cast %127 : vector<1x8x4xf32> to vector<8x4xf32>
    %cst_101 = arith.constant 5.000000e-01 : f32
    %129 = vector.broadcast %cst_101 : f32 to vector<8x4xf32>
    %130 = arith.mulf %128, %129 : vector<8x4xf32>
    %c0_102 = arith.constant 0 : index
    %c0_103 = arith.constant 0 : index
    %c48 = arith.constant 48 : index
    %131 = vector.load %arg15[%c0_102, %c0_103, %c48] : memref<2x8x96xf32, #tpu.memory_space<vmem>>, vector<1x8x4xf32>
    %132 = vector.shape_cast %131 : vector<1x8x4xf32> to vector<8x4xf32>
    %c0_104 = arith.constant 0 : index
    %c0_105 = arith.constant 0 : index
    %c80 = arith.constant 80 : index
    %133 = vector.load %arg15[%c0_104, %c0_105, %c80] : memref<2x8x96xf32, #tpu.memory_space<vmem>>, vector<1x8x4xf32>
    %134 = vector.shape_cast %133 : vector<1x8x4xf32> to vector<8x4xf32>
    %cst_106 = arith.constant dense<0.000000e+00> : vector<8x8xf32>
    %135 = tpu.matmul %130, %132, %cst_106 {dimension_numbers = #tpu.dot_dimension_numbers<[1], [1], [0], [0], [0, 0, 1, 0], [], []>} : vector<8x4xf32>, vector<8x4xf32>, vector<8x8xf32> -> vector<8x8xf32>
    %cst_107 = arith.constant dense<0xFF800000> : vector<8xf32>
    %136 = vector.multi_reduction <maximumf>, %135, %cst_107 [1] : vector<8x8xf32> to vector<8xf32>
    %137 = vector.shape_cast %136 : vector<8xf32> to vector<8x1xf32>
    %138 = vector.broadcast %137 : vector<8x1xf32> to vector<8x8xf32>
    %139 = arith.subf %135, %138 : vector<8x8xf32>
    %140 = math.exp %139 : vector<8x8xf32>
    %cst_108 = arith.constant dense<0.000000e+00> : vector<8xf32>
    %141 = vector.multi_reduction <add>, %140, %cst_108 [1] : vector<8x8xf32> to vector<8xf32>
    %142 = vector.shape_cast %141 : vector<8xf32> to vector<8x1xf32>
    %143 = tpu.reciprocal %142 {approx = true} : vector<8x1xf32> -> vector<8x1xf32>
    %144 = vector.broadcast %143 : vector<8x1xf32> to vector<8x8xf32>
    %145 = arith.mulf %140, %144 : vector<8x8xf32>
    %cst_109 = arith.constant dense<0.000000e+00> : vector<8x4xf32>
    %146 = tpu.matmul %145, %134, %cst_109 {dimension_numbers = #tpu.dot_dimension_numbers<[1], [0], [0], [1], [0, 0, 1, 1], [], []>} : vector<8x8xf32>, vector<8x4xf32>, vector<8x4xf32> -> vector<8x4xf32>
    %c0_110 = arith.constant 0 : index
    %c0_111 = arith.constant 0 : index
    %c16_112 = arith.constant 16 : index
    %147 = vector.load %arg16[%c0_110, %c0_111, %c16_112] : memref<2x8x32xf32, #tpu.memory_space<vmem>>, vector<1x8x4xf32>
    %148 = vector.shape_cast %147 : vector<1x8x4xf32> to vector<8x4xf32>
    %149 = vector.shape_cast %146 : vector<8x4xf32> to vector<1x8x4xf32>
    tpu.vector_store %arg16[%c0_110, %c0_111, %c16_112], %149 {strides = array<i32>} : memref<2x8x32xf32, #tpu.memory_space<vmem>>, vector<1x8x4xf32>,
    %c0_113 = arith.constant 0 : index
    %c0_114 = arith.constant 0 : index
    %c20 = arith.constant 20 : index
    %150 = vector.load %arg15[%c0_113, %c0_114, %c20] : memref<2x8x96xf32, #tpu.memory_space<vmem>>, vector<1x8x4xf32>
    %151 = vector.shape_cast %150 : vector<1x8x4xf32> to vector<8x4xf32>
    %cst_115 = arith.constant 5.000000e-01 : f32
    %152 = vector.broadcast %cst_115 : f32 to vector<8x4xf32>
    %153 = arith.mulf %151, %152 : vector<8x4xf32>
    %c0_116 = arith.constant 0 : index
    %c0_117 = arith.constant 0 : index
    %c52 = arith.constant 52 : index
    %154 = vector.load %arg15[%c0_116, %c0_117, %c52] : memref<2x8x96xf32, #tpu.memory_space<vmem>>, vector<1x8x4xf32>
    %155 = vector.shape_cast %154 : vector<1x8x4xf32> to vector<8x4xf32>
    %c0_118 = arith.constant 0 : index
    %c0_119 = arith.constant 0 : index
    %c84 = arith.constant 84 : index
    %156 = vector.load %arg15[%c0_118, %c0_119, %c84] : memref<2x8x96xf32, #tpu.memory_space<vmem>>, vector<1x8x4xf32>
    %157 = vector.shape_cast %156 : vector<1x8x4xf32> to vector<8x4xf32>
    %cst_120 = arith.constant dense<0.000000e+00> : vector<8x8xf32>
    %158 = tpu.matmul %153, %155, %cst_120 {dimension_numbers = #tpu.dot_dimension_numbers<[1], [1], [0], [0], [0, 0, 1, 0], [], []>} : vector<8x4xf32>, vector<8x4xf32>, vector<8x8xf32> -> vector<8x8xf32>
    %cst_121 = arith.constant dense<0xFF800000> : vector<8xf32>
    %159 = vector.multi_reduction <maximumf>, %158, %cst_121 [1] : vector<8x8xf32> to vector<8xf32>
    %160 = vector.shape_cast %159 : vector<8xf32> to vector<8x1xf32>
    %161 = vector.broadcast %160 : vector<8x1xf32> to vector<8x8xf32>
    %162 = arith.subf %158, %161 : vector<8x8xf32>
    %163 = math.exp %162 : vector<8x8xf32>
    %cst_122 = arith.constant dense<0.000000e+00> : vector<8xf32>
    %164 = vector.multi_reduction <add>, %163, %cst_122 [1] : vector<8x8xf32> to vector<8xf32>
    %165 = vector.shape_cast %164 : vector<8xf32> to vector<8x1xf32>
    %166 = tpu.reciprocal %165 {approx = true} : vector<8x1xf32> -> vector<8x1xf32>
    %167 = vector.broadcast %166 : vector<8x1xf32> to vector<8x8xf32>
    %168 = arith.mulf %163, %167 : vector<8x8xf32>
    %cst_123 = arith.constant dense<0.000000e+00> : vector<8x4xf32>
    %169 = tpu.matmul %168, %157, %cst_123 {dimension_numbers = #tpu.dot_dimension_numbers<[1], [0], [0], [1], [0, 0, 1, 1], [], []>} : vector<8x8xf32>, vector<8x4xf32>, vector<8x4xf32> -> vector<8x4xf32>
    %c0_124 = arith.constant 0 : index
    %c0_125 = arith.constant 0 : index
    %c20_126 = arith.constant 20 : index
    %170 = vector.load %arg16[%c0_124, %c0_125, %c20_126] : memref<2x8x32xf32, #tpu.memory_space<vmem>>, vector<1x8x4xf32>
    %171 = vector.shape_cast %170 : vector<1x8x4xf32> to vector<8x4xf32>
    %172 = vector.shape_cast %169 : vector<8x4xf32> to vector<1x8x4xf32>
    tpu.vector_store %arg16[%c0_124, %c0_125, %c20_126], %172 {strides = array<i32>} : memref<2x8x32xf32, #tpu.memory_space<vmem>>, vector<1x8x4xf32>,
    %c0_127 = arith.constant 0 : index
    %c0_128 = arith.constant 0 : index
    %c24 = arith.constant 24 : index
    %173 = vector.load %arg15[%c0_127, %c0_128, %c24] : memref<2x8x96xf32, #tpu.memory_space<vmem>>, vector<1x8x4xf32>
    %174 = vector.shape_cast %173 : vector<1x8x4xf32> to vector<8x4xf32>
    %cst_129 = arith.constant 5.000000e-01 : f32
    %175 = vector.broadcast %cst_129 : f32 to vector<8x4xf32>
    %176 = arith.mulf %174, %175 : vector<8x4xf32>
    %c0_130 = arith.constant 0 : index
    %c0_131 = arith.constant 0 : index
    %c56 = arith.constant 56 : index
    %177 = vector.load %arg15[%c0_130, %c0_131, %c56] : memref<2x8x96xf32, #tpu.memory_space<vmem>>, vector<1x8x4xf32>
    %178 = vector.shape_cast %177 : vector<1x8x4xf32> to vector<8x4xf32>
    %c0_132 = arith.constant 0 : index
    %c0_133 = arith.constant 0 : index
    %c88 = arith.constant 88 : index
    %179 = vector.load %arg15[%c0_132, %c0_133, %c88] : memref<2x8x96xf32, #tpu.memory_space<vmem>>, vector<1x8x4xf32>
    %180 = vector.shape_cast %179 : vector<1x8x4xf32> to vector<8x4xf32>
    %cst_134 = arith.constant dense<0.000000e+00> : vector<8x8xf32>
    %181 = tpu.matmul %176, %178, %cst_134 {dimension_numbers = #tpu.dot_dimension_numbers<[1], [1], [0], [0], [0, 0, 1, 0], [], []>} : vector<8x4xf32>, vector<8x4xf32>, vector<8x8xf32> -> vector<8x8xf32>
    %cst_135 = arith.constant dense<0xFF800000> : vector<8xf32>
    %182 = vector.multi_reduction <maximumf>, %181, %cst_135 [1] : vector<8x8xf32> to vector<8xf32>
    %183 = vector.shape_cast %182 : vector<8xf32> to vector<8x1xf32>
    %184 = vector.broadcast %183 : vector<8x1xf32> to vector<8x8xf32>
    %185 = arith.subf %181, %184 : vector<8x8xf32>
    %186 = math.exp %185 : vector<8x8xf32>
    %cst_136 = arith.constant dense<0.000000e+00> : vector<8xf32>
    %187 = vector.multi_reduction <add>, %186, %cst_136 [1] : vector<8x8xf32> to vector<8xf32>
    %188 = vector.shape_cast %187 : vector<8xf32> to vector<8x1xf32>
    %189 = tpu.reciprocal %188 {approx = true} : vector<8x1xf32> -> vector<8x1xf32>
    %190 = vector.broadcast %189 : vector<8x1xf32> to vector<8x8xf32>
    %191 = arith.mulf %186, %190 : vector<8x8xf32>
    %cst_137 = arith.constant dense<0.000000e+00> : vector<8x4xf32>
    %192 = tpu.matmul %191, %180, %cst_137 {dimension_numbers = #tpu.dot_dimension_numbers<[1], [0], [0], [1], [0, 0, 1, 1], [], []>} : vector<8x8xf32>, vector<8x4xf32>, vector<8x4xf32> -> vector<8x4xf32>
    %c0_138 = arith.constant 0 : index
    %c0_139 = arith.constant 0 : index
    %c24_140 = arith.constant 24 : index
    %193 = vector.load %arg16[%c0_138, %c0_139, %c24_140] : memref<2x8x32xf32, #tpu.memory_space<vmem>>, vector<1x8x4xf32>
    %194 = vector.shape_cast %193 : vector<1x8x4xf32> to vector<8x4xf32>
    %195 = vector.shape_cast %192 : vector<8x4xf32> to vector<1x8x4xf32>
    tpu.vector_store %arg16[%c0_138, %c0_139, %c24_140], %195 {strides = array<i32>} : memref<2x8x32xf32, #tpu.memory_space<vmem>>, vector<1x8x4xf32>,
    %c0_141 = arith.constant 0 : index
    %c0_142 = arith.constant 0 : index
    %c28 = arith.constant 28 : index
    %196 = vector.load %arg15[%c0_141, %c0_142, %c28] : memref<2x8x96xf32, #tpu.memory_space<vmem>>, vector<1x8x4xf32>
    %197 = vector.shape_cast %196 : vector<1x8x4xf32> to vector<8x4xf32>
    %cst_143 = arith.constant 5.000000e-01 : f32
    %198 = vector.broadcast %cst_143 : f32 to vector<8x4xf32>
    %199 = arith.mulf %197, %198 : vector<8x4xf32>
    %c0_144 = arith.constant 0 : index
    %c0_145 = arith.constant 0 : index
    %c60 = arith.constant 60 : index
    %200 = vector.load %arg15[%c0_144, %c0_145, %c60] : memref<2x8x96xf32, #tpu.memory_space<vmem>>, vector<1x8x4xf32>
    %201 = vector.shape_cast %200 : vector<1x8x4xf32> to vector<8x4xf32>
    %c0_146 = arith.constant 0 : index
    %c0_147 = arith.constant 0 : index
    %c92 = arith.constant 92 : index
    %202 = vector.load %arg15[%c0_146, %c0_147, %c92] : memref<2x8x96xf32, #tpu.memory_space<vmem>>, vector<1x8x4xf32>
    %203 = vector.shape_cast %202 : vector<1x8x4xf32> to vector<8x4xf32>
    %cst_148 = arith.constant dense<0.000000e+00> : vector<8x8xf32>
    %204 = tpu.matmul %199, %201, %cst_148 {dimension_numbers = #tpu.dot_dimension_numbers<[1], [1], [0], [0], [0, 0, 1, 0], [], []>} : vector<8x4xf32>, vector<8x4xf32>, vector<8x8xf32> -> vector<8x8xf32>
    %cst_149 = arith.constant dense<0xFF800000> : vector<8xf32>
    %205 = vector.multi_reduction <maximumf>, %204, %cst_149 [1] : vector<8x8xf32> to vector<8xf32>
    %206 = vector.shape_cast %205 : vector<8xf32> to vector<8x1xf32>
    %207 = vector.broadcast %206 : vector<8x1xf32> to vector<8x8xf32>
    %208 = arith.subf %204, %207 : vector<8x8xf32>
    %209 = math.exp %208 : vector<8x8xf32>
    %cst_150 = arith.constant dense<0.000000e+00> : vector<8xf32>
    %210 = vector.multi_reduction <add>, %209, %cst_150 [1] : vector<8x8xf32> to vector<8xf32>
    %211 = vector.shape_cast %210 : vector<8xf32> to vector<8x1xf32>
    %212 = tpu.reciprocal %211 {approx = true} : vector<8x1xf32> -> vector<8x1xf32>
    %213 = vector.broadcast %212 : vector<8x1xf32> to vector<8x8xf32>
    %214 = arith.mulf %209, %213 : vector<8x8xf32>
    %cst_151 = arith.constant dense<0.000000e+00> : vector<8x4xf32>
    %215 = tpu.matmul %214, %203, %cst_151 {dimension_numbers = #tpu.dot_dimension_numbers<[1], [0], [0], [1], [0, 0, 1, 1], [], []>} : vector<8x8xf32>, vector<8x4xf32>, vector<8x4xf32> -> vector<8x4xf32>
    %c0_152 = arith.constant 0 : index
    %c0_153 = arith.constant 0 : index
    %c28_154 = arith.constant 28 : index
    %216 = vector.load %arg16[%c0_152, %c0_153, %c28_154] : memref<2x8x32xf32, #tpu.memory_space<vmem>>, vector<1x8x4xf32>
    %217 = vector.shape_cast %216 : vector<1x8x4xf32> to vector<8x4xf32>
    %218 = vector.shape_cast %215 : vector<8x4xf32> to vector<1x8x4xf32>
    tpu.vector_store %arg16[%c0_152, %c0_153, %c28_154], %218 {strides = array<i32>} : memref<2x8x32xf32, #tpu.memory_space<vmem>>, vector<1x8x4xf32>,
    %c0_155 = arith.constant 0 : index
    %c0_156 = arith.constant 0 : index
    %c0_157 = arith.constant 0 : index
    %219 = vector.load %arg16[%c0_155, %c0_156, %c0_157] : memref<2x8x32xf32, #tpu.memory_space<vmem>>, vector<1x8x32xf32>
    %220 = vector.shape_cast %219 : vector<1x8x32xf32> to vector<8x32xf32>
    %cst_158 = arith.constant dense<0.000000e+00> : vector<8x32xf32>
    %221 = tpu.matmul %220, %8, %cst_158 {dimension_numbers = #tpu.dot_dimension_numbers<[1], [0], [0], [1], [0, 0, 1, 1], [], []>} : vector<8x32xf32>, vector<32x32xf32>, vector<8x32xf32> -> vector<8x32xf32>
    %222 = vector.broadcast %10 : vector<1x32xf32> to vector<8x32xf32>
    %223 = arith.addf %221, %222 : vector<8x32xf32>
    %224 = arith.addf %28, %223 : vector<8x32xf32>
    %cst_159 = arith.constant dense<0.000000e+00> : vector<8xf32>
    %225 = vector.multi_reduction <add>, %224, %cst_159 [1] : vector<8x32xf32> to vector<8xf32>
    %226 = vector.shape_cast %225 : vector<8xf32> to vector<8x1xf32>
    %cst_160 = arith.constant 3.200000e+01 : f32
    %227 = vector.broadcast %cst_160 : f32 to vector<8x1xf32>
    %228 = arith.divf %226, %227 : vector<8x1xf32>
    %229 = vector.broadcast %228 : vector<8x1xf32> to vector<8x32xf32>
    %230 = arith.subf %224, %229 : vector<8x32xf32>
    %231 = arith.mulf %230, %230 : vector<8x32xf32>
    %cst_161 = arith.constant dense<0.000000e+00> : vector<8xf32>
    %232 = vector.multi_reduction <add>, %231, %cst_161 [1] : vector<8x32xf32> to vector<8xf32>
    %233 = vector.shape_cast %232 : vector<8xf32> to vector<8x1xf32>
    %cst_162 = arith.constant 3.200000e+01 : f32
    %234 = vector.broadcast %cst_162 : f32 to vector<8x1xf32>
    %235 = arith.divf %233, %234 : vector<8x1xf32>
    %236 = vector.broadcast %228 : vector<8x1xf32> to vector<8x32xf32>
    %237 = arith.subf %224, %236 : vector<8x32xf32>
    %cst_163 = arith.constant 9.99999974E-6 : f32
    %238 = vector.broadcast %cst_163 : f32 to vector<8x1xf32>
    %239 = arith.addf %235, %238 : vector<8x1xf32>
    %240 = math.rsqrt %239 : vector<8x1xf32>
    %241 = vector.broadcast %240 : vector<8x1xf32> to vector<8x32xf32>
    %242 = arith.mulf %237, %241 : vector<8x32xf32>
    %243 = vector.broadcast %12 : vector<1x32xf32> to vector<8x32xf32>
    %244 = arith.mulf %242, %243 : vector<8x32xf32>
    %245 = vector.broadcast %14 : vector<1x32xf32> to vector<8x32xf32>
    %246 = arith.addf %244, %245 : vector<8x32xf32>
    %cst_164 = arith.constant dense<0.000000e+00> : vector<8x64xf32>
    %247 = tpu.matmul %246, %16, %cst_164 {dimension_numbers = #tpu.dot_dimension_numbers<[1], [0], [0], [1], [0, 0, 1, 1], [], []>} : vector<8x32xf32>, vector<32x64xf32>, vector<8x64xf32> -> vector<8x64xf32>
    %248 = vector.broadcast %18 : vector<1x64xf32> to vector<8x64xf32>
    %249 = arith.addf %247, %248 : vector<8x64xf32>
    %cst_165 = arith.constant 0.000000e+00 : f32
    %250 = vector.broadcast %cst_165 : f32 to vector<8x64xf32>
    %251 = arith.maximumf %249, %250 : vector<8x64xf32>
    %cst_166 = arith.constant dense<0.000000e+00> : vector<8x32xf32>
    %252 = tpu.matmul %251, %20, %cst_166 {dimension_numbers = #tpu.dot_dimension_numbers<[1], [0], [0], [1], [0, 0, 1, 1], [], []>} : vector<8x64xf32>, vector<64x32xf32>, vector<8x32xf32> -> vector<8x32xf32>
    %253 = vector.broadcast %22 : vector<1x32xf32> to vector<8x32xf32>
    %254 = arith.addf %252, %253 : vector<8x32xf32>
    %255 = arith.addf %246, %254 : vector<8x32xf32>
    %cst_167 = arith.constant dense<0.000000e+00> : vector<8xf32>
    %256 = vector.multi_reduction <add>, %255, %cst_167 [1] : vector<8x32xf32> to vector<8xf32>
    %257 = vector.shape_cast %256 : vector<8xf32> to vector<8x1xf32>
    %cst_168 = arith.constant 3.200000e+01 : f32
    %258 = vector.broadcast %cst_168 : f32 to vector<8x1xf32>
    %259 = arith.divf %257, %258 : vector<8x1xf32>
    %260 = vector.broadcast %259 : vector<8x1xf32> to vector<8x32xf32>
    %261 = arith.subf %255, %260 : vector<8x32xf32>
    %262 = arith.mulf %261, %261 : vector<8x32xf32>
    %cst_169 = arith.constant dense<0.000000e+00> : vector<8xf32>
    %263 = vector.multi_reduction <add>, %262, %cst_169 [1] : vector<8x32xf32> to vector<8xf32>
    %264 = vector.shape_cast %263 : vector<8xf32> to vector<8x1xf32>
    %cst_170 = arith.constant 3.200000e+01 : f32
    %265 = vector.broadcast %cst_170 : f32 to vector<8x1xf32>
    %266 = arith.divf %264, %265 : vector<8x1xf32>
    %267 = vector.broadcast %259 : vector<8x1xf32> to vector<8x32xf32>
    %268 = arith.subf %255, %267 : vector<8x32xf32>
    %cst_171 = arith.constant 9.99999974E-6 : f32
    %269 = vector.broadcast %cst_171 : f32 to vector<8x1xf32>
    %270 = arith.addf %266, %269 : vector<8x1xf32>
    %271 = math.rsqrt %270 : vector<8x1xf32>
    %272 = vector.broadcast %271 : vector<8x1xf32> to vector<8x32xf32>
    %273 = arith.mulf %268, %272 : vector<8x32xf32>
    %274 = vector.broadcast %24 : vector<1x32xf32> to vector<8x32xf32>
    %275 = arith.mulf %273, %274 : vector<8x32xf32>
    %276 = vector.broadcast %26 : vector<1x32xf32> to vector<8x32xf32>
    %277 = arith.addf %275, %276 : vector<8x32xf32>
    %c0_172 = arith.constant 0 : index
    %c0_173 = arith.constant 0 : index
    %c0_174 = arith.constant 0 : index
    %278 = vector.load %arg14[%c0_172, %c0_173, %c0_174] : memref<2x8x32xf32, #tpu.memory_space<vmem>>, vector<1x8x32xf32>
    %279 = vector.shape_cast %278 : vector<1x8x32xf32> to vector<8x32xf32>
    %280 = vector.shape_cast %277 : vector<8x32xf32> to vector<1x8x32xf32>
    tpu.vector_store %arg14[%c0_172, %c0_173, %c0_174], %280 {strides = array<i32>} : memref<2x8x32xf32, #tpu.memory_space<vmem>>, vector<1x8x32xf32>,
    %c1 = arith.constant 1 : index
    %c0_175 = arith.constant 0 : index
    %c0_176 = arith.constant 0 : index
    %281 = vector.load %arg14[%c1, %c0_175, %c0_176] : memref<2x8x32xf32, #tpu.memory_space<vmem>>, vector<1x8x32xf32>
    %282 = vector.shape_cast %281 : vector<1x8x32xf32> to vector<8x32xf32>
    %cst_177 = arith.constant dense<0.000000e+00> : vector<8x96xf32>
    %283 = tpu.matmul %282, %4, %cst_177 {dimension_numbers = #tpu.dot_dimension_numbers<[1], [0], [0], [1], [0, 0, 1, 1], [], []>} : vector<8x32xf32>, vector<32x96xf32>, vector<8x96xf32> -> vector<8x96xf32>
    %284 = vector.broadcast %6 : vector<1x96xf32> to vector<8x96xf32>
    %285 = arith.addf %283, %284 : vector<8x96xf32>
    %c1_178 = arith.constant 1 : index
    %c0_179 = arith.constant 0 : index
    %c0_180 = arith.constant 0 : index
    %286 = vector.load %arg15[%c1_178, %c0_179, %c0_180] : memref<2x8x96xf32, #tpu.memory_space<vmem>>, vector<1x8x96xf32>
    %287 = vector.shape_cast %286 : vector<1x8x96xf32> to vector<8x96xf32>
    %288 = vector.shape_cast %285 : vector<8x96xf32> to vector<1x8x96xf32>
    tpu.vector_store %arg15[%c1_178, %c0_179, %c0_180], %288 {strides = array<i32>} : memref<2x8x96xf32, #tpu.memory_space<vmem>>, vector<1x8x96xf32>,
    %c1_181 = arith.constant 1 : index
    %c0_182 = arith.constant 0 : index
    %c0_183 = arith.constant 0 : index
    %289 = vector.load %arg15[%c1_181, %c0_182, %c0_183] : memref<2x8x96xf32, #tpu.memory_space<vmem>>, vector<1x8x4xf32>
    %290 = vector.shape_cast %289 : vector<1x8x4xf32> to vector<8x4xf32>
    %cst_184 = arith.constant 5.000000e-01 : f32
    %291 = vector.broadcast %cst_184 : f32 to vector<8x4xf32>
    %292 = arith.mulf %290, %291 : vector<8x4xf32>
    %c1_185 = arith.constant 1 : index
    %c0_186 = arith.constant 0 : index
    %c32_187 = arith.constant 32 : index
    %293 = vector.load %arg15[%c1_185, %c0_186, %c32_187] : memref<2x8x96xf32, #tpu.memory_space<vmem>>, vector<1x8x4xf32>
    %294 = vector.shape_cast %293 : vector<1x8x4xf32> to vector<8x4xf32>
    %c1_188 = arith.constant 1 : index
    %c0_189 = arith.constant 0 : index
    %c64_190 = arith.constant 64 : index
    %295 = vector.load %arg15[%c1_188, %c0_189, %c64_190] : memref<2x8x96xf32, #tpu.memory_space<vmem>>, vector<1x8x4xf32>
    %296 = vector.shape_cast %295 : vector<1x8x4xf32> to vector<8x4xf32>
    %cst_191 = arith.constant dense<0.000000e+00> : vector<8x8xf32>
    %297 = tpu.matmul %292, %294, %cst_191 {dimension_numbers = #tpu.dot_dimension_numbers<[1], [1], [0], [0], [0, 0, 1, 0], [], []>} : vector<8x4xf32>, vector<8x4xf32>, vector<8x8xf32> -> vector<8x8xf32>
    %cst_192 = arith.constant dense<0xFF800000> : vector<8xf32>
    %298 = vector.multi_reduction <maximumf>, %297, %cst_192 [1] : vector<8x8xf32> to vector<8xf32>
    %299 = vector.shape_cast %298 : vector<8xf32> to vector<8x1xf32>
    %300 = vector.broadcast %299 : vector<8x1xf32> to vector<8x8xf32>
    %301 = arith.subf %297, %300 : vector<8x8xf32>
    %302 = math.exp %301 : vector<8x8xf32>
    %cst_193 = arith.constant dense<0.000000e+00> : vector<8xf32>
    %303 = vector.multi_reduction <add>, %302, %cst_193 [1] : vector<8x8xf32> to vector<8xf32>
    %304 = vector.shape_cast %303 : vector<8xf32> to vector<8x1xf32>
    %305 = tpu.reciprocal %304 {approx = true} : vector<8x1xf32> -> vector<8x1xf32>
    %306 = vector.broadcast %305 : vector<8x1xf32> to vector<8x8xf32>
    %307 = arith.mulf %302, %306 : vector<8x8xf32>
    %cst_194 = arith.constant dense<0.000000e+00> : vector<8x4xf32>
    %308 = tpu.matmul %307, %296, %cst_194 {dimension_numbers = #tpu.dot_dimension_numbers<[1], [0], [0], [1], [0, 0, 1, 1], [], []>} : vector<8x8xf32>, vector<8x4xf32>, vector<8x4xf32> -> vector<8x4xf32>
    %c1_195 = arith.constant 1 : index
    %c0_196 = arith.constant 0 : index
    %c0_197 = arith.constant 0 : index
    %309 = vector.load %arg16[%c1_195, %c0_196, %c0_197] : memref<2x8x32xf32, #tpu.memory_space<vmem>>, vector<1x8x4xf32>
    %310 = vector.shape_cast %309 : vector<1x8x4xf32> to vector<8x4xf32>
    %311 = vector.shape_cast %308 : vector<8x4xf32> to vector<1x8x4xf32>
    tpu.vector_store %arg16[%c1_195, %c0_196, %c0_197], %311 {strides = array<i32>} : memref<2x8x32xf32, #tpu.memory_space<vmem>>, vector<1x8x4xf32>,
    %c1_198 = arith.constant 1 : index
    %c0_199 = arith.constant 0 : index
    %c4_200 = arith.constant 4 : index
    %312 = vector.load %arg15[%c1_198, %c0_199, %c4_200] : memref<2x8x96xf32, #tpu.memory_space<vmem>>, vector<1x8x4xf32>
    %313 = vector.shape_cast %312 : vector<1x8x4xf32> to vector<8x4xf32>
    %cst_201 = arith.constant 5.000000e-01 : f32
    %314 = vector.broadcast %cst_201 : f32 to vector<8x4xf32>
    %315 = arith.mulf %313, %314 : vector<8x4xf32>
    %c1_202 = arith.constant 1 : index
    %c0_203 = arith.constant 0 : index
    %c36_204 = arith.constant 36 : index
    %316 = vector.load %arg15[%c1_202, %c0_203, %c36_204] : memref<2x8x96xf32, #tpu.memory_space<vmem>>, vector<1x8x4xf32>
    %317 = vector.shape_cast %316 : vector<1x8x4xf32> to vector<8x4xf32>
    %c1_205 = arith.constant 1 : index
    %c0_206 = arith.constant 0 : index
    %c68_207 = arith.constant 68 : index
    %318 = vector.load %arg15[%c1_205, %c0_206, %c68_207] : memref<2x8x96xf32, #tpu.memory_space<vmem>>, vector<1x8x4xf32>
    %319 = vector.shape_cast %318 : vector<1x8x4xf32> to vector<8x4xf32>
    %cst_208 = arith.constant dense<0.000000e+00> : vector<8x8xf32>
    %320 = tpu.matmul %315, %317, %cst_208 {dimension_numbers = #tpu.dot_dimension_numbers<[1], [1], [0], [0], [0, 0, 1, 0], [], []>} : vector<8x4xf32>, vector<8x4xf32>, vector<8x8xf32> -> vector<8x8xf32>
    %cst_209 = arith.constant dense<0xFF800000> : vector<8xf32>
    %321 = vector.multi_reduction <maximumf>, %320, %cst_209 [1] : vector<8x8xf32> to vector<8xf32>
    %322 = vector.shape_cast %321 : vector<8xf32> to vector<8x1xf32>
    %323 = vector.broadcast %322 : vector<8x1xf32> to vector<8x8xf32>
    %324 = arith.subf %320, %323 : vector<8x8xf32>
    %325 = math.exp %324 : vector<8x8xf32>
    %cst_210 = arith.constant dense<0.000000e+00> : vector<8xf32>
    %326 = vector.multi_reduction <add>, %325, %cst_210 [1] : vector<8x8xf32> to vector<8xf32>
    %327 = vector.shape_cast %326 : vector<8xf32> to vector<8x1xf32>
    %328 = tpu.reciprocal %327 {approx = true} : vector<8x1xf32> -> vector<8x1xf32>
    %329 = vector.broadcast %328 : vector<8x1xf32> to vector<8x8xf32>
    %330 = arith.mulf %325, %329 : vector<8x8xf32>
    %cst_211 = arith.constant dense<0.000000e+00> : vector<8x4xf32>
    %331 = tpu.matmul %330, %319, %cst_211 {dimension_numbers = #tpu.dot_dimension_numbers<[1], [0], [0], [1], [0, 0, 1, 1], [], []>} : vector<8x8xf32>, vector<8x4xf32>, vector<8x4xf32> -> vector<8x4xf32>
    %c1_212 = arith.constant 1 : index
    %c0_213 = arith.constant 0 : index
    %c4_214 = arith.constant 4 : index
    %332 = vector.load %arg16[%c1_212, %c0_213, %c4_214] : memref<2x8x32xf32, #tpu.memory_space<vmem>>, vector<1x8x4xf32>
    %333 = vector.shape_cast %332 : vector<1x8x4xf32> to vector<8x4xf32>
    %334 = vector.shape_cast %331 : vector<8x4xf32> to vector<1x8x4xf32>
    tpu.vector_store %arg16[%c1_212, %c0_213, %c4_214], %334 {strides = array<i32>} : memref<2x8x32xf32, #tpu.memory_space<vmem>>, vector<1x8x4xf32>,
    %c1_215 = arith.constant 1 : index
    %c0_216 = arith.constant 0 : index
    %c8_217 = arith.constant 8 : index
    %335 = vector.load %arg15[%c1_215, %c0_216, %c8_217] : memref<2x8x96xf32, #tpu.memory_space<vmem>>, vector<1x8x4xf32>
    %336 = vector.shape_cast %335 : vector<1x8x4xf32> to vector<8x4xf32>
    %cst_218 = arith.constant 5.000000e-01 : f32
    %337 = vector.broadcast %cst_218 : f32 to vector<8x4xf32>
    %338 = arith.mulf %336, %337 : vector<8x4xf32>
    %c1_219 = arith.constant 1 : index
    %c0_220 = arith.constant 0 : index
    %c40_221 = arith.constant 40 : index
    %339 = vector.load %arg15[%c1_219, %c0_220, %c40_221] : memref<2x8x96xf32, #tpu.memory_space<vmem>>, vector<1x8x4xf32>
    %340 = vector.shape_cast %339 : vector<1x8x4xf32> to vector<8x4xf32>
    %c1_222 = arith.constant 1 : index
    %c0_223 = arith.constant 0 : index
    %c72_224 = arith.constant 72 : index
    %341 = vector.load %arg15[%c1_222, %c0_223, %c72_224] : memref<2x8x96xf32, #tpu.memory_space<vmem>>, vector<1x8x4xf32>
    %342 = vector.shape_cast %341 : vector<1x8x4xf32> to vector<8x4xf32>
    %cst_225 = arith.constant dense<0.000000e+00> : vector<8x8xf32>
    %343 = tpu.matmul %338, %340, %cst_225 {dimension_numbers = #tpu.dot_dimension_numbers<[1], [1], [0], [0], [0, 0, 1, 0], [], []>} : vector<8x4xf32>, vector<8x4xf32>, vector<8x8xf32> -> vector<8x8xf32>
    %cst_226 = arith.constant dense<0xFF800000> : vector<8xf32>
    %344 = vector.multi_reduction <maximumf>, %343, %cst_226 [1] : vector<8x8xf32> to vector<8xf32>
    %345 = vector.shape_cast %344 : vector<8xf32> to vector<8x1xf32>
    %346 = vector.broadcast %345 : vector<8x1xf32> to vector<8x8xf32>
    %347 = arith.subf %343, %346 : vector<8x8xf32>
    %348 = math.exp %347 : vector<8x8xf32>
    %cst_227 = arith.constant dense<0.000000e+00> : vector<8xf32>
    %349 = vector.multi_reduction <add>, %348, %cst_227 [1] : vector<8x8xf32> to vector<8xf32>
    %350 = vector.shape_cast %349 : vector<8xf32> to vector<8x1xf32>
    %351 = tpu.reciprocal %350 {approx = true} : vector<8x1xf32> -> vector<8x1xf32>
    %352 = vector.broadcast %351 : vector<8x1xf32> to vector<8x8xf32>
    %353 = arith.mulf %348, %352 : vector<8x8xf32>
    %cst_228 = arith.constant dense<0.000000e+00> : vector<8x4xf32>
    %354 = tpu.matmul %353, %342, %cst_228 {dimension_numbers = #tpu.dot_dimension_numbers<[1], [0], [0], [1], [0, 0, 1, 1], [], []>} : vector<8x8xf32>, vector<8x4xf32>, vector<8x4xf32> -> vector<8x4xf32>
    %c1_229 = arith.constant 1 : index
    %c0_230 = arith.constant 0 : index
    %c8_231 = arith.constant 8 : index
    %355 = vector.load %arg16[%c1_229, %c0_230, %c8_231] : memref<2x8x32xf32, #tpu.memory_space<vmem>>, vector<1x8x4xf32>
    %356 = vector.shape_cast %355 : vector<1x8x4xf32> to vector<8x4xf32>
    %357 = vector.shape_cast %354 : vector<8x4xf32> to vector<1x8x4xf32>
    tpu.vector_store %arg16[%c1_229, %c0_230, %c8_231], %357 {strides = array<i32>} : memref<2x8x32xf32, #tpu.memory_space<vmem>>, vector<1x8x4xf32>,
    %c1_232 = arith.constant 1 : index
    %c0_233 = arith.constant 0 : index
    %c12_234 = arith.constant 12 : index
    %358 = vector.load %arg15[%c1_232, %c0_233, %c12_234] : memref<2x8x96xf32, #tpu.memory_space<vmem>>, vector<1x8x4xf32>
    %359 = vector.shape_cast %358 : vector<1x8x4xf32> to vector<8x4xf32>
    %cst_235 = arith.constant 5.000000e-01 : f32
    %360 = vector.broadcast %cst_235 : f32 to vector<8x4xf32>
    %361 = arith.mulf %359, %360 : vector<8x4xf32>
    %c1_236 = arith.constant 1 : index
    %c0_237 = arith.constant 0 : index
    %c44_238 = arith.constant 44 : index
    %362 = vector.load %arg15[%c1_236, %c0_237, %c44_238] : memref<2x8x96xf32, #tpu.memory_space<vmem>>, vector<1x8x4xf32>
    %363 = vector.shape_cast %362 : vector<1x8x4xf32> to vector<8x4xf32>
    %c1_239 = arith.constant 1 : index
    %c0_240 = arith.constant 0 : index
    %c76_241 = arith.constant 76 : index
    %364 = vector.load %arg15[%c1_239, %c0_240, %c76_241] : memref<2x8x96xf32, #tpu.memory_space<vmem>>, vector<1x8x4xf32>
    %365 = vector.shape_cast %364 : vector<1x8x4xf32> to vector<8x4xf32>
    %cst_242 = arith.constant dense<0.000000e+00> : vector<8x8xf32>
    %366 = tpu.matmul %361, %363, %cst_242 {dimension_numbers = #tpu.dot_dimension_numbers<[1], [1], [0], [0], [0, 0, 1, 0], [], []>} : vector<8x4xf32>, vector<8x4xf32>, vector<8x8xf32> -> vector<8x8xf32>
    %cst_243 = arith.constant dense<0xFF800000> : vector<8xf32>
    %367 = vector.multi_reduction <maximumf>, %366, %cst_243 [1] : vector<8x8xf32> to vector<8xf32>
    %368 = vector.shape_cast %367 : vector<8xf32> to vector<8x1xf32>
    %369 = vector.broadcast %368 : vector<8x1xf32> to vector<8x8xf32>
    %370 = arith.subf %366, %369 : vector<8x8xf32>
    %371 = math.exp %370 : vector<8x8xf32>
    %cst_244 = arith.constant dense<0.000000e+00> : vector<8xf32>
    %372 = vector.multi_reduction <add>, %371, %cst_244 [1] : vector<8x8xf32> to vector<8xf32>
    %373 = vector.shape_cast %372 : vector<8xf32> to vector<8x1xf32>
    %374 = tpu.reciprocal %373 {approx = true} : vector<8x1xf32> -> vector<8x1xf32>
    %375 = vector.broadcast %374 : vector<8x1xf32> to vector<8x8xf32>
    %376 = arith.mulf %371, %375 : vector<8x8xf32>
    %cst_245 = arith.constant dense<0.000000e+00> : vector<8x4xf32>
    %377 = tpu.matmul %376, %365, %cst_245 {dimension_numbers = #tpu.dot_dimension_numbers<[1], [0], [0], [1], [0, 0, 1, 1], [], []>} : vector<8x8xf32>, vector<8x4xf32>, vector<8x4xf32> -> vector<8x4xf32>
    %c1_246 = arith.constant 1 : index
    %c0_247 = arith.constant 0 : index
    %c12_248 = arith.constant 12 : index
    %378 = vector.load %arg16[%c1_246, %c0_247, %c12_248] : memref<2x8x32xf32, #tpu.memory_space<vmem>>, vector<1x8x4xf32>
    %379 = vector.shape_cast %378 : vector<1x8x4xf32> to vector<8x4xf32>
    %380 = vector.shape_cast %377 : vector<8x4xf32> to vector<1x8x4xf32>
    tpu.vector_store %arg16[%c1_246, %c0_247, %c12_248], %380 {strides = array<i32>} : memref<2x8x32xf32, #tpu.memory_space<vmem>>, vector<1x8x4xf32>,
    %c1_249 = arith.constant 1 : index
    %c0_250 = arith.constant 0 : index
    %c16_251 = arith.constant 16 : index
    %381 = vector.load %arg15[%c1_249, %c0_250, %c16_251] : memref<2x8x96xf32, #tpu.memory_space<vmem>>, vector<1x8x4xf32>
    %382 = vector.shape_cast %381 : vector<1x8x4xf32> to vector<8x4xf32>
    %cst_252 = arith.constant 5.000000e-01 : f32
    %383 = vector.broadcast %cst_252 : f32 to vector<8x4xf32>
    %384 = arith.mulf %382, %383 : vector<8x4xf32>
    %c1_253 = arith.constant 1 : index
    %c0_254 = arith.constant 0 : index
    %c48_255 = arith.constant 48 : index
    %385 = vector.load %arg15[%c1_253, %c0_254, %c48_255] : memref<2x8x96xf32, #tpu.memory_space<vmem>>, vector<1x8x4xf32>
    %386 = vector.shape_cast %385 : vector<1x8x4xf32> to vector<8x4xf32>
    %c1_256 = arith.constant 1 : index
    %c0_257 = arith.constant 0 : index
    %c80_258 = arith.constant 80 : index
    %387 = vector.load %arg15[%c1_256, %c0_257, %c80_258] : memref<2x8x96xf32, #tpu.memory_space<vmem>>, vector<1x8x4xf32>
    %388 = vector.shape_cast %387 : vector<1x8x4xf32> to vector<8x4xf32>
    %cst_259 = arith.constant dense<0.000000e+00> : vector<8x8xf32>
    %389 = tpu.matmul %384, %386, %cst_259 {dimension_numbers = #tpu.dot_dimension_numbers<[1], [1], [0], [0], [0, 0, 1, 0], [], []>} : vector<8x4xf32>, vector<8x4xf32>, vector<8x8xf32> -> vector<8x8xf32>
    %cst_260 = arith.constant dense<0xFF800000> : vector<8xf32>
    %390 = vector.multi_reduction <maximumf>, %389, %cst_260 [1] : vector<8x8xf32> to vector<8xf32>
    %391 = vector.shape_cast %390 : vector<8xf32> to vector<8x1xf32>
    %392 = vector.broadcast %391 : vector<8x1xf32> to vector<8x8xf32>
    %393 = arith.subf %389, %392 : vector<8x8xf32>
    %394 = math.exp %393 : vector<8x8xf32>
    %cst_261 = arith.constant dense<0.000000e+00> : vector<8xf32>
    %395 = vector.multi_reduction <add>, %394, %cst_261 [1] : vector<8x8xf32> to vector<8xf32>
    %396 = vector.shape_cast %395 : vector<8xf32> to vector<8x1xf32>
    %397 = tpu.reciprocal %396 {approx = true} : vector<8x1xf32> -> vector<8x1xf32>
    %398 = vector.broadcast %397 : vector<8x1xf32> to vector<8x8xf32>
    %399 = arith.mulf %394, %398 : vector<8x8xf32>
    %cst_262 = arith.constant dense<0.000000e+00> : vector<8x4xf32>
    %400 = tpu.matmul %399, %388, %cst_262 {dimension_numbers = #tpu.dot_dimension_numbers<[1], [0], [0], [1], [0, 0, 1, 1], [], []>} : vector<8x8xf32>, vector<8x4xf32>, vector<8x4xf32> -> vector<8x4xf32>
    %c1_263 = arith.constant 1 : index
    %c0_264 = arith.constant 0 : index
    %c16_265 = arith.constant 16 : index
    %401 = vector.load %arg16[%c1_263, %c0_264, %c16_265] : memref<2x8x32xf32, #tpu.memory_space<vmem>>, vector<1x8x4xf32>
    %402 = vector.shape_cast %401 : vector<1x8x4xf32> to vector<8x4xf32>
    %403 = vector.shape_cast %400 : vector<8x4xf32> to vector<1x8x4xf32>
    tpu.vector_store %arg16[%c1_263, %c0_264, %c16_265], %403 {strides = array<i32>} : memref<2x8x32xf32, #tpu.memory_space<vmem>>, vector<1x8x4xf32>,
    %c1_266 = arith.constant 1 : index
    %c0_267 = arith.constant 0 : index
    %c20_268 = arith.constant 20 : index
    %404 = vector.load %arg15[%c1_266, %c0_267, %c20_268] : memref<2x8x96xf32, #tpu.memory_space<vmem>>, vector<1x8x4xf32>
    %405 = vector.shape_cast %404 : vector<1x8x4xf32> to vector<8x4xf32>
    %cst_269 = arith.constant 5.000000e-01 : f32
    %406 = vector.broadcast %cst_269 : f32 to vector<8x4xf32>
    %407 = arith.mulf %405, %406 : vector<8x4xf32>
    %c1_270 = arith.constant 1 : index
    %c0_271 = arith.constant 0 : index
    %c52_272 = arith.constant 52 : index
    %408 = vector.load %arg15[%c1_270, %c0_271, %c52_272] : memref<2x8x96xf32, #tpu.memory_space<vmem>>, vector<1x8x4xf32>
    %409 = vector.shape_cast %408 : vector<1x8x4xf32> to vector<8x4xf32>
    %c1_273 = arith.constant 1 : index
    %c0_274 = arith.constant 0 : index
    %c84_275 = arith.constant 84 : index
    %410 = vector.load %arg15[%c1_273, %c0_274, %c84_275] : memref<2x8x96xf32, #tpu.memory_space<vmem>>, vector<1x8x4xf32>
    %411 = vector.shape_cast %410 : vector<1x8x4xf32> to vector<8x4xf32>
    %cst_276 = arith.constant dense<0.000000e+00> : vector<8x8xf32>
    %412 = tpu.matmul %407, %409, %cst_276 {dimension_numbers = #tpu.dot_dimension_numbers<[1], [1], [0], [0], [0, 0, 1, 0], [], []>} : vector<8x4xf32>, vector<8x4xf32>, vector<8x8xf32> -> vector<8x8xf32>
    %cst_277 = arith.constant dense<0xFF800000> : vector<8xf32>
    %413 = vector.multi_reduction <maximumf>, %412, %cst_277 [1] : vector<8x8xf32> to vector<8xf32>
    %414 = vector.shape_cast %413 : vector<8xf32> to vector<8x1xf32>
    %415 = vector.broadcast %414 : vector<8x1xf32> to vector<8x8xf32>
    %416 = arith.subf %412, %415 : vector<8x8xf32>
    %417 = math.exp %416 : vector<8x8xf32>
    %cst_278 = arith.constant dense<0.000000e+00> : vector<8xf32>
    %418 = vector.multi_reduction <add>, %417, %cst_278 [1] : vector<8x8xf32> to vector<8xf32>
    %419 = vector.shape_cast %418 : vector<8xf32> to vector<8x1xf32>
    %420 = tpu.reciprocal %419 {approx = true} : vector<8x1xf32> -> vector<8x1xf32>
    %421 = vector.broadcast %420 : vector<8x1xf32> to vector<8x8xf32>
    %422 = arith.mulf %417, %421 : vector<8x8xf32>
    %cst_279 = arith.constant dense<0.000000e+00> : vector<8x4xf32>
    %423 = tpu.matmul %422, %411, %cst_279 {dimension_numbers = #tpu.dot_dimension_numbers<[1], [0], [0], [1], [0, 0, 1, 1], [], []>} : vector<8x8xf32>, vector<8x4xf32>, vector<8x4xf32> -> vector<8x4xf32>
    %c1_280 = arith.constant 1 : index
    %c0_281 = arith.constant 0 : index
    %c20_282 = arith.constant 20 : index
    %424 = vector.load %arg16[%c1_280, %c0_281, %c20_282] : memref<2x8x32xf32, #tpu.memory_space<vmem>>, vector<1x8x4xf32>
    %425 = vector.shape_cast %424 : vector<1x8x4xf32> to vector<8x4xf32>
    %426 = vector.shape_cast %423 : vector<8x4xf32> to vector<1x8x4xf32>
    tpu.vector_store %arg16[%c1_280, %c0_281, %c20_282], %426 {strides = array<i32>} : memref<2x8x32xf32, #tpu.memory_space<vmem>>, vector<1x8x4xf32>,
    %c1_283 = arith.constant 1 : index
    %c0_284 = arith.constant 0 : index
    %c24_285 = arith.constant 24 : index
    %427 = vector.load %arg15[%c1_283, %c0_284, %c24_285] : memref<2x8x96xf32, #tpu.memory_space<vmem>>, vector<1x8x4xf32>
    %428 = vector.shape_cast %427 : vector<1x8x4xf32> to vector<8x4xf32>
    %cst_286 = arith.constant 5.000000e-01 : f32
    %429 = vector.broadcast %cst_286 : f32 to vector<8x4xf32>
    %430 = arith.mulf %428, %429 : vector<8x4xf32>
    %c1_287 = arith.constant 1 : index
    %c0_288 = arith.constant 0 : index
    %c56_289 = arith.constant 56 : index
    %431 = vector.load %arg15[%c1_287, %c0_288, %c56_289] : memref<2x8x96xf32, #tpu.memory_space<vmem>>, vector<1x8x4xf32>
    %432 = vector.shape_cast %431 : vector<1x8x4xf32> to vector<8x4xf32>
    %c1_290 = arith.constant 1 : index
    %c0_291 = arith.constant 0 : index
    %c88_292 = arith.constant 88 : index
    %433 = vector.load %arg15[%c1_290, %c0_291, %c88_292] : memref<2x8x96xf32, #tpu.memory_space<vmem>>, vector<1x8x4xf32>
    %434 = vector.shape_cast %433 : vector<1x8x4xf32> to vector<8x4xf32>
    %cst_293 = arith.constant dense<0.000000e+00> : vector<8x8xf32>
    %435 = tpu.matmul %430, %432, %cst_293 {dimension_numbers = #tpu.dot_dimension_numbers<[1], [1], [0], [0], [0, 0, 1, 0], [], []>} : vector<8x4xf32>, vector<8x4xf32>, vector<8x8xf32> -> vector<8x8xf32>
    %cst_294 = arith.constant dense<0xFF800000> : vector<8xf32>
    %436 = vector.multi_reduction <maximumf>, %435, %cst_294 [1] : vector<8x8xf32> to vector<8xf32>
    %437 = vector.shape_cast %436 : vector<8xf32> to vector<8x1xf32>
    %438 = vector.broadcast %437 : vector<8x1xf32> to vector<8x8xf32>
    %439 = arith.subf %435, %438 : vector<8x8xf32>
    %440 = math.exp %439 : vector<8x8xf32>
    %cst_295 = arith.constant dense<0.000000e+00> : vector<8xf32>
    %441 = vector.multi_reduction <add>, %440, %cst_295 [1] : vector<8x8xf32> to vector<8xf32>
    %442 = vector.shape_cast %441 : vector<8xf32> to vector<8x1xf32>
    %443 = tpu.reciprocal %442 {approx = true} : vector<8x1xf32> -> vector<8x1xf32>
    %444 = vector.broadcast %443 : vector<8x1xf32> to vector<8x8xf32>
    %445 = arith.mulf %440, %444 : vector<8x8xf32>
    %cst_296 = arith.constant dense<0.000000e+00> : vector<8x4xf32>
    %446 = tpu.matmul %445, %434, %cst_296 {dimension_numbers = #tpu.dot_dimension_numbers<[1], [0], [0], [1], [0, 0, 1, 1], [], []>} : vector<8x8xf32>, vector<8x4xf32>, vector<8x4xf32> -> vector<8x4xf32>
    %c1_297 = arith.constant 1 : index
    %c0_298 = arith.constant 0 : index
    %c24_299 = arith.constant 24 : index
    %447 = vector.load %arg16[%c1_297, %c0_298, %c24_299] : memref<2x8x32xf32, #tpu.memory_space<vmem>>, vector<1x8x4xf32>
    %448 = vector.shape_cast %447 : vector<1x8x4xf32> to vector<8x4xf32>
    %449 = vector.shape_cast %446 : vector<8x4xf32> to vector<1x8x4xf32>
    tpu.vector_store %arg16[%c1_297, %c0_298, %c24_299], %449 {strides = array<i32>} : memref<2x8x32xf32, #tpu.memory_space<vmem>>, vector<1x8x4xf32>,
    %c1_300 = arith.constant 1 : index
    %c0_301 = arith.constant 0 : index
    %c28_302 = arith.constant 28 : index
    %450 = vector.load %arg15[%c1_300, %c0_301, %c28_302] : memref<2x8x96xf32, #tpu.memory_space<vmem>>, vector<1x8x4xf32>
    %451 = vector.shape_cast %450 : vector<1x8x4xf32> to vector<8x4xf32>
    %cst_303 = arith.constant 5.000000e-01 : f32
    %452 = vector.broadcast %cst_303 : f32 to vector<8x4xf32>
    %453 = arith.mulf %451, %452 : vector<8x4xf32>
    %c1_304 = arith.constant 1 : index
    %c0_305 = arith.constant 0 : index
    %c60_306 = arith.constant 60 : index
    %454 = vector.load %arg15[%c1_304, %c0_305, %c60_306] : memref<2x8x96xf32, #tpu.memory_space<vmem>>, vector<1x8x4xf32>
    %455 = vector.shape_cast %454 : vector<1x8x4xf32> to vector<8x4xf32>
    %c1_307 = arith.constant 1 : index
    %c0_308 = arith.constant 0 : index
    %c92_309 = arith.constant 92 : index
    %456 = vector.load %arg15[%c1_307, %c0_308, %c92_309] : memref<2x8x96xf32, #tpu.memory_space<vmem>>, vector<1x8x4xf32>
    %457 = vector.shape_cast %456 : vector<1x8x4xf32> to vector<8x4xf32>
    %cst_310 = arith.constant dense<0.000000e+00> : vector<8x8xf32>
    %458 = tpu.matmul %453, %455, %cst_310 {dimension_numbers = #tpu.dot_dimension_numbers<[1], [1], [0], [0], [0, 0, 1, 0], [], []>} : vector<8x4xf32>, vector<8x4xf32>, vector<8x8xf32> -> vector<8x8xf32>
    %cst_311 = arith.constant dense<0xFF800000> : vector<8xf32>
    %459 = vector.multi_reduction <maximumf>, %458, %cst_311 [1] : vector<8x8xf32> to vector<8xf32>
    %460 = vector.shape_cast %459 : vector<8xf32> to vector<8x1xf32>
    %461 = vector.broadcast %460 : vector<8x1xf32> to vector<8x8xf32>
    %462 = arith.subf %458, %461 : vector<8x8xf32>
    %463 = math.exp %462 : vector<8x8xf32>
    %cst_312 = arith.constant dense<0.000000e+00> : vector<8xf32>
    %464 = vector.multi_reduction <add>, %463, %cst_312 [1] : vector<8x8xf32> to vector<8xf32>
    %465 = vector.shape_cast %464 : vector<8xf32> to vector<8x1xf32>
    %466 = tpu.reciprocal %465 {approx = true} : vector<8x1xf32> -> vector<8x1xf32>
    %467 = vector.broadcast %466 : vector<8x1xf32> to vector<8x8xf32>
    %468 = arith.mulf %463, %467 : vector<8x8xf32>
    %cst_313 = arith.constant dense<0.000000e+00> : vector<8x4xf32>
    %469 = tpu.matmul %468, %457, %cst_313 {dimension_numbers = #tpu.dot_dimension_numbers<[1], [0], [0], [1], [0, 0, 1, 1], [], []>} : vector<8x8xf32>, vector<8x4xf32>, vector<8x4xf32> -> vector<8x4xf32>
    %c1_314 = arith.constant 1 : index
    %c0_315 = arith.constant 0 : index
    %c28_316 = arith.constant 28 : index
    %470 = vector.load %arg16[%c1_314, %c0_315, %c28_316] : memref<2x8x32xf32, #tpu.memory_space<vmem>>, vector<1x8x4xf32>
    %471 = vector.shape_cast %470 : vector<1x8x4xf32> to vector<8x4xf32>
    %472 = vector.shape_cast %469 : vector<8x4xf32> to vector<1x8x4xf32>
    tpu.vector_store %arg16[%c1_314, %c0_315, %c28_316], %472 {strides = array<i32>} : memref<2x8x32xf32, #tpu.memory_space<vmem>>, vector<1x8x4xf32>,
    %c1_317 = arith.constant 1 : index
    %c0_318 = arith.constant 0 : index
    %c0_319 = arith.constant 0 : index
    %473 = vector.load %arg16[%c1_317, %c0_318, %c0_319] : memref<2x8x32xf32, #tpu.memory_space<vmem>>, vector<1x8x32xf32>
    %474 = vector.shape_cast %473 : vector<1x8x32xf32> to vector<8x32xf32>
    %cst_320 = arith.constant dense<0.000000e+00> : vector<8x32xf32>
    %475 = tpu.matmul %474, %8, %cst_320 {dimension_numbers = #tpu.dot_dimension_numbers<[1], [0], [0], [1], [0, 0, 1, 1], [], []>} : vector<8x32xf32>, vector<32x32xf32>, vector<8x32xf32> -> vector<8x32xf32>
    %476 = vector.broadcast %10 : vector<1x32xf32> to vector<8x32xf32>
    %477 = arith.addf %475, %476 : vector<8x32xf32>
    %478 = arith.addf %282, %477 : vector<8x32xf32>
    %cst_321 = arith.constant dense<0.000000e+00> : vector<8xf32>
    %479 = vector.multi_reduction <add>, %478, %cst_321 [1] : vector<8x32xf32> to vector<8xf32>
    %480 = vector.shape_cast %479 : vector<8xf32> to vector<8x1xf32>
    %cst_322 = arith.constant 3.200000e+01 : f32
    %481 = vector.broadcast %cst_322 : f32 to vector<8x1xf32>
    %482 = arith.divf %480, %481 : vector<8x1xf32>
    %483 = vector.broadcast %482 : vector<8x1xf32> to vector<8x32xf32>
    %484 = arith.subf %478, %483 : vector<8x32xf32>
    %485 = arith.mulf %484, %484 : vector<8x32xf32>
    %cst_323 = arith.constant dense<0.000000e+00> : vector<8xf32>
    %486 = vector.multi_reduction <add>, %485, %cst_323 [1] : vector<8x32xf32> to vector<8xf32>
    %487 = vector.shape_cast %486 : vector<8xf32> to vector<8x1xf32>
    %cst_324 = arith.constant 3.200000e+01 : f32
    %488 = vector.broadcast %cst_324 : f32 to vector<8x1xf32>
    %489 = arith.divf %487, %488 : vector<8x1xf32>
    %490 = vector.broadcast %482 : vector<8x1xf32> to vector<8x32xf32>
    %491 = arith.subf %478, %490 : vector<8x32xf32>
    %cst_325 = arith.constant 9.99999974E-6 : f32
    %492 = vector.broadcast %cst_325 : f32 to vector<8x1xf32>
    %493 = arith.addf %489, %492 : vector<8x1xf32>
    %494 = math.rsqrt %493 : vector<8x1xf32>
    %495 = vector.broadcast %494 : vector<8x1xf32> to vector<8x32xf32>
    %496 = arith.mulf %491, %495 : vector<8x32xf32>
    %497 = vector.broadcast %12 : vector<1x32xf32> to vector<8x32xf32>
    %498 = arith.mulf %496, %497 : vector<8x32xf32>
    %499 = vector.broadcast %14 : vector<1x32xf32> to vector<8x32xf32>
    %500 = arith.addf %498, %499 : vector<8x32xf32>
    %cst_326 = arith.constant dense<0.000000e+00> : vector<8x64xf32>
    %501 = tpu.matmul %500, %16, %cst_326 {dimension_numbers = #tpu.dot_dimension_numbers<[1], [0], [0], [1], [0, 0, 1, 1], [], []>} : vector<8x32xf32>, vector<32x64xf32>, vector<8x64xf32> -> vector<8x64xf32>
    %502 = vector.broadcast %18 : vector<1x64xf32> to vector<8x64xf32>
    %503 = arith.addf %501, %502 : vector<8x64xf32>
    %cst_327 = arith.constant 0.000000e+00 : f32
    %504 = vector.broadcast %cst_327 : f32 to vector<8x64xf32>
    %505 = arith.maximumf %503, %504 : vector<8x64xf32>
    %cst_328 = arith.constant dense<0.000000e+00> : vector<8x32xf32>
    %506 = tpu.matmul %505, %20, %cst_328 {dimension_numbers = #tpu.dot_dimension_numbers<[1], [0], [0], [1], [0, 0, 1, 1], [], []>} : vector<8x64xf32>, vector<64x32xf32>, vector<8x32xf32> -> vector<8x32xf32>
    %507 = vector.broadcast %22 : vector<1x32xf32> to vector<8x32xf32>
    %508 = arith.addf %506, %507 : vector<8x32xf32>
    %509 = arith.addf %500, %508 : vector<8x32xf32>
    %cst_329 = arith.constant dense<0.000000e+00> : vector<8xf32>
    %510 = vector.multi_reduction <add>, %509, %cst_329 [1] : vector<8x32xf32> to vector<8xf32>
    %511 = vector.shape_cast %510 : vector<8xf32> to vector<8x1xf32>
    %cst_330 = arith.constant 3.200000e+01 : f32
    %512 = vector.broadcast %cst_330 : f32 to vector<8x1xf32>
    %513 = arith.divf %511, %512 : vector<8x1xf32>
    %514 = vector.broadcast %513 : vector<8x1xf32> to vector<8x32xf32>
    %515 = arith.subf %509, %514 : vector<8x32xf32>
    %516 = arith.mulf %515, %515 : vector<8x32xf32>
    %cst_331 = arith.constant dense<0.000000e+00> : vector<8xf32>
    %517 = vector.multi_reduction <add>, %516, %cst_331 [1] : vector<8x32xf32> to vector<8xf32>
    %518 = vector.shape_cast %517 : vector<8xf32> to vector<8x1xf32>
    %cst_332 = arith.constant 3.200000e+01 : f32
    %519 = vector.broadcast %cst_332 : f32 to vector<8x1xf32>
    %520 = arith.divf %518, %519 : vector<8x1xf32>
    %521 = vector.broadcast %513 : vector<8x1xf32> to vector<8x32xf32>
    %522 = arith.subf %509, %521 : vector<8x32xf32>
    %cst_333 = arith.constant 9.99999974E-6 : f32
    %523 = vector.broadcast %cst_333 : f32 to vector<8x1xf32>
    %524 = arith.addf %520, %523 : vector<8x1xf32>
    %525 = math.rsqrt %524 : vector<8x1xf32>
    %526 = vector.broadcast %525 : vector<8x1xf32> to vector<8x32xf32>
    %527 = arith.mulf %522, %526 : vector<8x32xf32>
    %528 = vector.broadcast %24 : vector<1x32xf32> to vector<8x32xf32>
    %529 = arith.mulf %527, %528 : vector<8x32xf32>
    %530 = vector.broadcast %26 : vector<1x32xf32> to vector<8x32xf32>
    %531 = arith.addf %529, %530 : vector<8x32xf32>
    %c1_334 = arith.constant 1 : index
    %c0_335 = arith.constant 0 : index
    %c0_336 = arith.constant 0 : index
    %532 = vector.load %arg14[%c1_334, %c0_335, %c0_336] : memref<2x8x32xf32, #tpu.memory_space<vmem>>, vector<1x8x32xf32>
    %533 = vector.shape_cast %532 : vector<1x8x32xf32> to vector<8x32xf32>
    %534 = vector.shape_cast %531 : vector<8x32xf32> to vector<1x8x32xf32>
    tpu.vector_store %arg14[%c1_334, %c0_335, %c0_336], %534 {strides = array<i32>} : memref<2x8x32xf32, #tpu.memory_space<vmem>>, vector<1x8x32xf32>,
    return
  }
  func.func @transform_0(%arg0: i32) -> (i32, i32, i32) {
    %c0_i32 = arith.constant 0 : i32
    %c0_i32_0 = arith.constant 0 : i32
    %c0_i32_1 = arith.constant 0 : i32
    %c0_i32_2 = arith.constant 0 : i32
    return %c0_i32, %c0_i32_0, %c0_i32_1 : i32, i32, i32
  }
  func.func @transform_1(%arg0: i32) -> (i32, i32, i32) {
    %c0_i32 = arith.constant 0 : i32
    %c0_i32_0 = arith.constant 0 : i32
    %c0_i32_1 = arith.constant 0 : i32
    return %arg0, %c0_i32, %c0_i32_0 : i32, i32, i32
  }
  func.func @transform_2(%arg0: i32) -> (i32, i32, i32) {
    %c0_i32 = arith.constant 0 : i32
    %c0_i32_0 = arith.constant 0 : i32
    %c0_i32_1 = arith.constant 0 : i32
    return %arg0, %c0_i32, %c0_i32_0 : i32, i32, i32
  }
  func.func @transform_3(%arg0: i32) -> (i32, i32, i32) {
    %c0_i32 = arith.constant 0 : i32
    %c0_i32_0 = arith.constant 0 : i32
    %c0_i32_1 = arith.constant 0 : i32
    return %arg0, %c0_i32, %c0_i32_0 : i32, i32, i32
  }
  func.func @transform_4(%arg0: i32) -> (i32, i32, i32) {
    %c0_i32 = arith.constant 0 : i32
    %c0_i32_0 = arith.constant 0 : i32
    %c0_i32_1 = arith.constant 0 : i32
    return %arg0, %c0_i32, %c0_i32_0 : i32, i32, i32
  }
  func.func @transform_5(%arg0: i32) -> (i32, i32, i32) {
    %c0_i32 = arith.constant 0 : i32
    %c0_i32_0 = arith.constant 0 : i32
    %c0_i32_1 = arith.constant 0 : i32
    return %arg0, %c0_i32, %c0_i32_0 : i32, i32, i32
  }
  func.func @transform_6(%arg0: i32) -> (i32, i32, i32) {
    %c0_i32 = arith.constant 0 : i32
    %c0_i32_0 = arith.constant 0 : i32
    %c0_i32_1 = arith.constant 0 : i32
    return %arg0, %c0_i32, %c0_i32_0 : i32, i32, i32
  }
  func.func @transform_7(%arg0: i32) -> (i32, i32, i32) {
    %c0_i32 = arith.constant 0 : i32
    %c0_i32_0 = arith.constant 0 : i32
    %c0_i32_1 = arith.constant 0 : i32
    return %arg0, %c0_i32, %c0_i32_0 : i32, i32, i32
  }
  func.func @transform_8(%arg0: i32) -> (i32, i32, i32) {
    %c0_i32 = arith.constant 0 : i32
    %c0_i32_0 = arith.constant 0 : i32
    %c0_i32_1 = arith.constant 0 : i32
    return %arg0, %c0_i32, %c0_i32_0 : i32, i32, i32
  }
  func.func @transform_9(%arg0: i32) -> (i32, i32, i32) {
    %c0_i32 = arith.constant 0 : i32
    %c0_i32_0 = arith.constant 0 : i32
    %c0_i32_1 = arith.constant 0 : i32
    return %arg0, %c0_i32, %c0_i32_0 : i32, i32, i32
  }
  func.func @transform_10(%arg0: i32) -> (i32, i32, i32) {
    %c0_i32 = arith.constant 0 : i32
    %c0_i32_0 = arith.constant 0 : i32
    %c0_i32_1 = arith.constant 0 : i32
    return %arg0, %c0_i32, %c0_i32_0 : i32, i32, i32
  }
  func.func @transform_11(%arg0: i32) -> (i32, i32, i32) {
    %c0_i32 = arith.constant 0 : i32
    %c0_i32_0 = arith.constant 0 : i32
    %c0_i32_1 = arith.constant 0 : i32
    return %arg0, %c0_i32, %c0_i32_0 : i32, i32, i32
  }
  func.func @transform_12(%arg0: i32) -> (i32, i32, i32) {
    %c0_i32 = arith.constant 0 : i32
    %c0_i32_0 = arith.constant 0 : i32
    %c0_i32_1 = arith.constant 0 : i32
    return %arg0, %c0_i32, %c0_i32_0 : i32, i32, i32
  }
  func.func @transform_13(%arg0: i32) -> (i32, i32, i32) {
    %c0_i32 = arith.constant 0 : i32
    %c0_i32_0 = arith.constant 0 : i32
    %c0_i32_1 = arith.constant 0 : i32
    %c0_i32_2 = arith.constant 0 : i32
    return %c0_i32, %c0_i32_0, %c0_i32_1 : i32, i32, i32
  }
}

module attributes {stable_mosaic.version = 11 : i64} {
  func.func @_decoder_step_kernel(%arg0: i32, %arg1: memref<2x6x32xf32, #tpu.memory_space<vmem>>, %arg2: memref<6x32xf32, #tpu.memory_space<vmem>>, %arg3: memref<1x1xi32, #tpu.memory_space<smem>>, %arg4: memref<1x1xf32, #tpu.memory_space<smem>>, %arg5: memref<1x2x8x64xf32, #tpu.memory_space<vmem>>, %arg6: memref<1x32x96xf32, #tpu.memory_space<vmem>>, %arg7: memref<1x1x96xf32, #tpu.memory_space<vmem>>, %arg8: memref<1x32x32xf32, #tpu.memory_space<vmem>>, %arg9: memref<1x1x32xf32, #tpu.memory_space<vmem>>, %arg10: memref<1x1x32xf32, #tpu.memory_space<vmem>>, %arg11: memref<1x1x32xf32, #tpu.memory_space<vmem>>, %arg12: memref<1x32x32xf32, #tpu.memory_space<vmem>>, %arg13: memref<1x1x32xf32, #tpu.memory_space<vmem>>, %arg14: memref<1x32x32xf32, #tpu.memory_space<vmem>>, %arg15: memref<1x1x32xf32, #tpu.memory_space<vmem>>, %arg16: memref<1x1x32xf32, #tpu.memory_space<vmem>>, %arg17: memref<1x1x32xf32, #tpu.memory_space<vmem>>, %arg18: memref<1x32x64xf32, #tpu.memory_space<vmem>>, %arg19: memref<1x1x64xf32, #tpu.memory_space<vmem>>, %arg20: memref<1x64x32xf32, #tpu.memory_space<vmem>>, %arg21: memref<1x1x32xf32, #tpu.memory_space<vmem>>, %arg22: memref<1x1x32xf32, #tpu.memory_space<vmem>>, %arg23: memref<1x1x32xf32, #tpu.memory_space<vmem>>, %arg24: memref<32x32xf32, #tpu.memory_space<vmem>>, %arg25: memref<1x32xf32, #tpu.memory_space<vmem>>, %arg26: memref<32x32xf32, #tpu.memory_space<vmem>>, %arg27: memref<1x32xf32, #tpu.memory_space<vmem>>, %arg28: memref<2x6x32xf32, #tpu.memory_space<vmem>>, %arg29: memref<2x1x32xf32, #tpu.memory_space<vmem>>, %arg30: memref<2x6x96xf32, #tpu.memory_space<vmem>>, %arg31: memref<2x6x32xf32, #tpu.memory_space<vmem>>, %arg32: memref<2x6x32xf32, #tpu.memory_space<vmem>>) attributes {dimension_semantics = [#tpu.dimension_semantics<arbitrary>], iteration_bounds = array<i64: 8>, scalar_prefetch = 0 : i64, scratch_operands = 3 : i64, tpu.core_type = #tpu.core_type<tc>, window_params = [{pipeline_mode = #tpu.pipeline_mode<synchronous>, transform_indices = @transform_0, window_bounds = array<i64: 2, 6, 32>}, {pipeline_mode = #tpu.pipeline_mode<synchronous>, transform_indices = @transform_1, window_bounds = array<i64: 6, 32>}, {transform_indices = @transform_2, window_bounds = array<i64: 1, 1>}, {transform_indices = @transform_3, window_bounds = array<i64: 1, 1>}, {transform_indices = @transform_4, window_bounds = array<i64: 1, 2, 8, 64>}, {transform_indices = @transform_5, window_bounds = array<i64: 1, 32, 96>}, {transform_indices = @transform_6, window_bounds = array<i64: 1, 1, 96>}, {transform_indices = @transform_7, window_bounds = array<i64: 1, 32, 32>}, {transform_indices = @transform_8, window_bounds = array<i64: 1, 1, 32>}, {transform_indices = @transform_9, window_bounds = array<i64: 1, 1, 32>}, {transform_indices = @transform_10, window_bounds = array<i64: 1, 1, 32>}, {transform_indices = @transform_11, window_bounds = array<i64: 1, 32, 32>}, {transform_indices = @transform_12, window_bounds = array<i64: 1, 1, 32>}, {transform_indices = @transform_13, window_bounds = array<i64: 1, 32, 32>}, {transform_indices = @transform_14, window_bounds = array<i64: 1, 1, 32>}, {transform_indices = @transform_15, window_bounds = array<i64: 1, 1, 32>}, {transform_indices = @transform_16, window_bounds = array<i64: 1, 1, 32>}, {transform_indices = @transform_17, window_bounds = array<i64: 1, 32, 64>}, {transform_indices = @transform_18, window_bounds = array<i64: 1, 1, 64>}, {transform_indices = @transform_19, window_bounds = array<i64: 1, 64, 32>}, {transform_indices = @transform_20, window_bounds = array<i64: 1, 1, 32>}, {transform_indices = @transform_21, window_bounds = array<i64: 1, 1, 32>}, {transform_indices = @transform_22, window_bounds = array<i64: 1, 1, 32>}, {pipeline_mode = #tpu.pipeline_mode<synchronous>, transform_indices = @transform_23, window_bounds = array<i64: 32, 32>}, {pipeline_mode = #tpu.pipeline_mode<synchronous>, transform_indices = @transform_24, window_bounds = array<i64: 1, 32>}, {pipeline_mode = #tpu.pipeline_mode<synchronous>, transform_indices = @transform_25, window_bounds = array<i64: 32, 32>}, {pipeline_mode = #tpu.pipeline_mode<synchronous>, transform_indices = @transform_26, window_bounds = array<i64: 1, 32>}, {pipeline_mode = #tpu.pipeline_mode<synchronous>, transform_indices = @transform_27, window_bounds = array<i64: 2, 6, 32>}, {pipeline_mode = #tpu.pipeline_mode<synchronous>, transform_indices = @transform_28, window_bounds = array<i64: 2, 1, 32>}]} {
    %c0 = arith.constant 0 : index
    %c0_0 = arith.constant 0 : index
    %0 = memref.load %arg3[%c0, %c0_0] : memref<1x1xi32, #tpu.memory_space<smem>>
    %c0_i32 = arith.constant 0 : i32
    %1 = arith.cmpi eq, %arg0, %c0_i32 : i32
    %2 = arith.extui %1 : i1 to i32
    %c0_i32_1 = arith.constant 0 : i32
    %3 = arith.cmpi ne, %2, %c0_i32_1 : i32
    scf.if %3 {
      %c0_704 = arith.constant 0 : index
      %c0_705 = arith.constant 0 : index
      %c0_706 = arith.constant 0 : index
      %1054 = vector.load %arg1[%c0_704, %c0_705, %c0_706] : memref<2x6x32xf32, #tpu.memory_space<vmem>>, vector<1x6x32xf32>
      %1055 = vector.shape_cast %1054 : vector<1x6x32xf32> to vector<6x32xf32>
      %c0_707 = arith.constant 0 : index
      %c0_708 = arith.constant 0 : index
      %1056 = vector.load %arg2[%c0_707, %c0_708] : memref<6x32xf32, #tpu.memory_space<vmem>>, vector<6x32xf32>
      %1057 = arith.addf %1055, %1056 : vector<6x32xf32>
      %c0_709 = arith.constant 0 : index
      %c0_710 = arith.constant 0 : index
      %c0_711 = arith.constant 0 : index
      %1058 = vector.load %arg28[%c0_709, %c0_710, %c0_711] : memref<2x6x32xf32, #tpu.memory_space<vmem>>, vector<1x6x32xf32>
      %1059 = vector.shape_cast %1058 : vector<1x6x32xf32> to vector<6x32xf32>
      %1060 = vector.shape_cast %1057 : vector<6x32xf32> to vector<1x6x32xf32>
      tpu.vector_store %arg28[%c0_709, %c0_710, %c0_711], %1060 {strides = array<i32>} : memref<2x6x32xf32, #tpu.memory_space<vmem>>, vector<1x6x32xf32>,
      %c1_712 = arith.constant 1 : index
      %c0_713 = arith.constant 0 : index
      %c0_714 = arith.constant 0 : index
      %1061 = vector.load %arg1[%c1_712, %c0_713, %c0_714] : memref<2x6x32xf32, #tpu.memory_space<vmem>>, vector<1x6x32xf32>
      %1062 = vector.shape_cast %1061 : vector<1x6x32xf32> to vector<6x32xf32>
      %c0_715 = arith.constant 0 : index
      %c0_716 = arith.constant 0 : index
      %1063 = vector.load %arg2[%c0_715, %c0_716] : memref<6x32xf32, #tpu.memory_space<vmem>>, vector<6x32xf32>
      %1064 = arith.addf %1062, %1063 : vector<6x32xf32>
      %c1_717 = arith.constant 1 : index
      %c0_718 = arith.constant 0 : index
      %c0_719 = arith.constant 0 : index
      %1065 = vector.load %arg28[%c1_717, %c0_718, %c0_719] : memref<2x6x32xf32, #tpu.memory_space<vmem>>, vector<1x6x32xf32>
      %1066 = vector.shape_cast %1065 : vector<1x6x32xf32> to vector<6x32xf32>
      %1067 = vector.shape_cast %1064 : vector<6x32xf32> to vector<1x6x32xf32>
      tpu.vector_store %arg28[%c1_717, %c0_718, %c0_719], %1067 {strides = array<i32>} : memref<2x6x32xf32, #tpu.memory_space<vmem>>, vector<1x6x32xf32>,
    } else {
    }
    %c0_2 = arith.constant 0 : index
    %c0_3 = arith.constant 0 : index
    %c0_4 = arith.constant 0 : index
    %4 = vector.load %arg6[%c0_2, %c0_3, %c0_4] : memref<1x32x96xf32, #tpu.memory_space<vmem>>, vector<1x32x96xf32>
    %5 = vector.shape_cast %4 : vector<1x32x96xf32> to vector<32x96xf32>
    %c0_5 = arith.constant 0 : index
    %c0_6 = arith.constant 0 : index
    %c0_7 = arith.constant 0 : index
    %6 = vector.load %arg7[%c0_5, %c0_6, %c0_7] : memref<1x1x96xf32, #tpu.memory_space<vmem>>, vector<1x1x96xf32>
    %7 = vector.shape_cast %6 : vector<1x1x96xf32> to vector<1x96xf32>
    %c0_8 = arith.constant 0 : index
    %c0_9 = arith.constant 0 : index
    %c0_10 = arith.constant 0 : index
    %8 = vector.load %arg8[%c0_8, %c0_9, %c0_10] : memref<1x32x32xf32, #tpu.memory_space<vmem>>, vector<1x32x32xf32>
    %9 = vector.shape_cast %8 : vector<1x32x32xf32> to vector<32x32xf32>
    %c0_11 = arith.constant 0 : index
    %c0_12 = arith.constant 0 : index
    %c0_13 = arith.constant 0 : index
    %10 = vector.load %arg9[%c0_11, %c0_12, %c0_13] : memref<1x1x32xf32, #tpu.memory_space<vmem>>, vector<1x1x32xf32>
    %11 = vector.shape_cast %10 : vector<1x1x32xf32> to vector<1x32xf32>
    %c0_14 = arith.constant 0 : index
    %c0_15 = arith.constant 0 : index
    %c0_16 = arith.constant 0 : index
    %12 = vector.load %arg10[%c0_14, %c0_15, %c0_16] : memref<1x1x32xf32, #tpu.memory_space<vmem>>, vector<1x1x32xf32>
    %13 = vector.shape_cast %12 : vector<1x1x32xf32> to vector<1x32xf32>
    %c0_17 = arith.constant 0 : index
    %c0_18 = arith.constant 0 : index
    %c0_19 = arith.constant 0 : index
    %14 = vector.load %arg11[%c0_17, %c0_18, %c0_19] : memref<1x1x32xf32, #tpu.memory_space<vmem>>, vector<1x1x32xf32>
    %15 = vector.shape_cast %14 : vector<1x1x32xf32> to vector<1x32xf32>
    %c0_20 = arith.constant 0 : index
    %c0_21 = arith.constant 0 : index
    %c0_22 = arith.constant 0 : index
    %16 = vector.load %arg12[%c0_20, %c0_21, %c0_22] : memref<1x32x32xf32, #tpu.memory_space<vmem>>, vector<1x32x32xf32>
    %17 = vector.shape_cast %16 : vector<1x32x32xf32> to vector<32x32xf32>
    %c0_23 = arith.constant 0 : index
    %c0_24 = arith.constant 0 : index
    %c0_25 = arith.constant 0 : index
    %18 = vector.load %arg13[%c0_23, %c0_24, %c0_25] : memref<1x1x32xf32, #tpu.memory_space<vmem>>, vector<1x1x32xf32>
    %19 = vector.shape_cast %18 : vector<1x1x32xf32> to vector<1x32xf32>
    %c0_26 = arith.constant 0 : index
    %c0_27 = arith.constant 0 : index
    %c0_28 = arith.constant 0 : index
    %20 = vector.load %arg14[%c0_26, %c0_27, %c0_28] : memref<1x32x32xf32, #tpu.memory_space<vmem>>, vector<1x32x32xf32>
    %21 = vector.shape_cast %20 : vector<1x32x32xf32> to vector<32x32xf32>
    %c0_29 = arith.constant 0 : index
    %c0_30 = arith.constant 0 : index
    %c0_31 = arith.constant 0 : index
    %22 = vector.load %arg15[%c0_29, %c0_30, %c0_31] : memref<1x1x32xf32, #tpu.memory_space<vmem>>, vector<1x1x32xf32>
    %23 = vector.shape_cast %22 : vector<1x1x32xf32> to vector<1x32xf32>
    %c0_32 = arith.constant 0 : index
    %c0_33 = arith.constant 0 : index
    %c0_34 = arith.constant 0 : index
    %24 = vector.load %arg16[%c0_32, %c0_33, %c0_34] : memref<1x1x32xf32, #tpu.memory_space<vmem>>, vector<1x1x32xf32>
    %25 = vector.shape_cast %24 : vector<1x1x32xf32> to vector<1x32xf32>
    %c0_35 = arith.constant 0 : index
    %c0_36 = arith.constant 0 : index
    %c0_37 = arith.constant 0 : index
    %26 = vector.load %arg17[%c0_35, %c0_36, %c0_37] : memref<1x1x32xf32, #tpu.memory_space<vmem>>, vector<1x1x32xf32>
    %27 = vector.shape_cast %26 : vector<1x1x32xf32> to vector<1x32xf32>
    %c0_38 = arith.constant 0 : index
    %c0_39 = arith.constant 0 : index
    %c0_40 = arith.constant 0 : index
    %28 = vector.load %arg18[%c0_38, %c0_39, %c0_40] : memref<1x32x64xf32, #tpu.memory_space<vmem>>, vector<1x32x64xf32>
    %29 = vector.shape_cast %28 : vector<1x32x64xf32> to vector<32x64xf32>
    %c0_41 = arith.constant 0 : index
    %c0_42 = arith.constant 0 : index
    %c0_43 = arith.constant 0 : index
    %30 = vector.load %arg19[%c0_41, %c0_42, %c0_43] : memref<1x1x64xf32, #tpu.memory_space<vmem>>, vector<1x1x64xf32>
    %31 = vector.shape_cast %30 : vector<1x1x64xf32> to vector<1x64xf32>
    %c0_44 = arith.constant 0 : index
    %c0_45 = arith.constant 0 : index
    %c0_46 = arith.constant 0 : index
    %32 = vector.load %arg20[%c0_44, %c0_45, %c0_46] : memref<1x64x32xf32, #tpu.memory_space<vmem>>, vector<1x64x32xf32>
    %33 = vector.shape_cast %32 : vector<1x64x32xf32> to vector<64x32xf32>
    %c0_47 = arith.constant 0 : index
    %c0_48 = arith.constant 0 : index
    %c0_49 = arith.constant 0 : index
    %34 = vector.load %arg21[%c0_47, %c0_48, %c0_49] : memref<1x1x32xf32, #tpu.memory_space<vmem>>, vector<1x1x32xf32>
    %35 = vector.shape_cast %34 : vector<1x1x32xf32> to vector<1x32xf32>
    %c0_50 = arith.constant 0 : index
    %c0_51 = arith.constant 0 : index
    %c0_52 = arith.constant 0 : index
    %36 = vector.load %arg22[%c0_50, %c0_51, %c0_52] : memref<1x1x32xf32, #tpu.memory_space<vmem>>, vector<1x1x32xf32>
    %37 = vector.shape_cast %36 : vector<1x1x32xf32> to vector<1x32xf32>
    %c0_53 = arith.constant 0 : index
    %c0_54 = arith.constant 0 : index
    %c0_55 = arith.constant 0 : index
    %38 = vector.load %arg23[%c0_53, %c0_54, %c0_55] : memref<1x1x32xf32, #tpu.memory_space<vmem>>, vector<1x1x32xf32>
    %39 = vector.shape_cast %38 : vector<1x1x32xf32> to vector<1x32xf32>
    %40 = tpu.iota {dimensions = array<i32: 1>} : vector<1x6xi32>
    %41 = vector.broadcast %0 : i32 to vector<1x6xi32>
    %42 = arith.cmpi slt, %40, %41 : vector<1x6xi32>
    %c0_56 = arith.constant 0 : index
    %c0_57 = arith.constant 0 : index
    %c0_58 = arith.constant 0 : index
    %43 = vector.load %arg28[%c0_56, %c0_57, %c0_58] : memref<2x6x32xf32, #tpu.memory_space<vmem>>, vector<1x6x32xf32>
    %44 = vector.shape_cast %43 : vector<1x6x32xf32> to vector<6x32xf32>
    %cst = arith.constant dense<0.000000e+00> : vector<6x96xf32>
    %45 = tpu.matmul %44, %5, %cst {dimension_numbers = #tpu.dot_dimension_numbers<[1], [0], [0], [1], [0, 0, 1, 1], [], []>} : vector<6x32xf32>, vector<32x96xf32>, vector<6x96xf32> -> vector<6x96xf32>
    %46 = vector.broadcast %7 : vector<1x96xf32> to vector<6x96xf32>
    %47 = arith.addf %45, %46 : vector<6x96xf32>
    %c0_59 = arith.constant 0 : index
    %c0_60 = arith.constant 0 : index
    %c0_61 = arith.constant 0 : index
    %48 = vector.load %arg30[%c0_59, %c0_60, %c0_61] : memref<2x6x96xf32, #tpu.memory_space<vmem>>, vector<1x6x96xf32>
    %49 = vector.shape_cast %48 : vector<1x6x96xf32> to vector<6x96xf32>
    %50 = vector.shape_cast %47 : vector<6x96xf32> to vector<1x6x96xf32>
    tpu.vector_store %arg30[%c0_59, %c0_60, %c0_61], %50 {strides = array<i32>} : memref<2x6x96xf32, #tpu.memory_space<vmem>>, vector<1x6x96xf32>,
    %c0_62 = arith.constant 0 : index
    %c0_63 = arith.constant 0 : index
    %c0_64 = arith.constant 0 : index
    %51 = vector.load %arg30[%c0_62, %c0_63, %c0_64] : memref<2x6x96xf32, #tpu.memory_space<vmem>>, vector<1x6x4xf32>
    %52 = vector.shape_cast %51 : vector<1x6x4xf32> to vector<6x4xf32>
    %cst_65 = arith.constant 5.000000e-01 : f32
    %53 = vector.broadcast %cst_65 : f32 to vector<6x4xf32>
    %54 = arith.mulf %52, %53 : vector<6x4xf32>
    %c0_66 = arith.constant 0 : index
    %c0_67 = arith.constant 0 : index
    %c32 = arith.constant 32 : index
    %55 = vector.load %arg30[%c0_66, %c0_67, %c32] : memref<2x6x96xf32, #tpu.memory_space<vmem>>, vector<1x6x4xf32>
    %56 = vector.shape_cast %55 : vector<1x6x4xf32> to vector<6x4xf32>
    %c0_68 = arith.constant 0 : index
    %c0_69 = arith.constant 0 : index
    %c64 = arith.constant 64 : index
    %57 = vector.load %arg30[%c0_68, %c0_69, %c64] : memref<2x6x96xf32, #tpu.memory_space<vmem>>, vector<1x6x4xf32>
    %58 = vector.shape_cast %57 : vector<1x6x4xf32> to vector<6x4xf32>
    %cst_70 = arith.constant dense<0.000000e+00> : vector<6x6xf32>
    %59 = tpu.matmul %54, %56, %cst_70 {dimension_numbers = #tpu.dot_dimension_numbers<[1], [1], [0], [0], [0, 0, 1, 0], [], []>} : vector<6x4xf32>, vector<6x4xf32>, vector<6x6xf32> -> vector<6x6xf32>
    %cst_71 = arith.constant -1.000000e+30 : f32
    %60 = vector.shape_cast %42 : vector<1x6xi1> to vector<1x6xi1>
    %61 = vector.broadcast %60 : vector<1x6xi1> to vector<6x6xi1>
    %62 = vector.broadcast %cst_71 : f32 to vector<6x6xf32>
    %63 = arith.select %61, %59, %62 : vector<6x6xi1>, vector<6x6xf32>
    %cst_72 = arith.constant dense<0xFF800000> : vector<6xf32>
    %64 = vector.multi_reduction <maximumf>, %63, %cst_72 [1] : vector<6x6xf32> to vector<6xf32>
    %65 = vector.shape_cast %64 : vector<6xf32> to vector<6x1xf32>
    %66 = vector.broadcast %65 : vector<6x1xf32> to vector<6x6xf32>
    %67 = arith.subf %63, %66 : vector<6x6xf32>
    %68 = math.exp %67 : vector<6x6xf32>
    %cst_73 = arith.constant dense<0.000000e+00> : vector<6xf32>
    %69 = vector.multi_reduction <add>, %68, %cst_73 [1] : vector<6x6xf32> to vector<6xf32>
    %70 = vector.shape_cast %69 : vector<6xf32> to vector<6x1xf32>
    %71 = tpu.reciprocal %70 {approx = true} : vector<6x1xf32> -> vector<6x1xf32>
    %72 = vector.broadcast %71 : vector<6x1xf32> to vector<6x6xf32>
    %73 = arith.mulf %68, %72 : vector<6x6xf32>
    %cst_74 = arith.constant dense<0.000000e+00> : vector<6x4xf32>
    %74 = tpu.matmul %73, %58, %cst_74 {dimension_numbers = #tpu.dot_dimension_numbers<[1], [0], [0], [1], [0, 0, 1, 1], [], []>} : vector<6x6xf32>, vector<6x4xf32>, vector<6x4xf32> -> vector<6x4xf32>
    %c0_75 = arith.constant 0 : index
    %c0_76 = arith.constant 0 : index
    %c0_77 = arith.constant 0 : index
    %75 = vector.load %arg32[%c0_75, %c0_76, %c0_77] : memref<2x6x32xf32, #tpu.memory_space<vmem>>, vector<1x6x4xf32>
    %76 = vector.shape_cast %75 : vector<1x6x4xf32> to vector<6x4xf32>
    %77 = vector.shape_cast %74 : vector<6x4xf32> to vector<1x6x4xf32>
    tpu.vector_store %arg32[%c0_75, %c0_76, %c0_77], %77 {strides = array<i32>} : memref<2x6x32xf32, #tpu.memory_space<vmem>>, vector<1x6x4xf32>,
    %c0_78 = arith.constant 0 : index
    %c0_79 = arith.constant 0 : index
    %c4 = arith.constant 4 : index
    %78 = vector.load %arg30[%c0_78, %c0_79, %c4] : memref<2x6x96xf32, #tpu.memory_space<vmem>>, vector<1x6x4xf32>
    %79 = vector.shape_cast %78 : vector<1x6x4xf32> to vector<6x4xf32>
    %cst_80 = arith.constant 5.000000e-01 : f32
    %80 = vector.broadcast %cst_80 : f32 to vector<6x4xf32>
    %81 = arith.mulf %79, %80 : vector<6x4xf32>
    %c0_81 = arith.constant 0 : index
    %c0_82 = arith.constant 0 : index
    %c36 = arith.constant 36 : index
    %82 = vector.load %arg30[%c0_81, %c0_82, %c36] : memref<2x6x96xf32, #tpu.memory_space<vmem>>, vector<1x6x4xf32>
    %83 = vector.shape_cast %82 : vector<1x6x4xf32> to vector<6x4xf32>
    %c0_83 = arith.constant 0 : index
    %c0_84 = arith.constant 0 : index
    %c68 = arith.constant 68 : index
    %84 = vector.load %arg30[%c0_83, %c0_84, %c68] : memref<2x6x96xf32, #tpu.memory_space<vmem>>, vector<1x6x4xf32>
    %85 = vector.shape_cast %84 : vector<1x6x4xf32> to vector<6x4xf32>
    %cst_85 = arith.constant dense<0.000000e+00> : vector<6x6xf32>
    %86 = tpu.matmul %81, %83, %cst_85 {dimension_numbers = #tpu.dot_dimension_numbers<[1], [1], [0], [0], [0, 0, 1, 0], [], []>} : vector<6x4xf32>, vector<6x4xf32>, vector<6x6xf32> -> vector<6x6xf32>
    %cst_86 = arith.constant -1.000000e+30 : f32
    %87 = vector.shape_cast %42 : vector<1x6xi1> to vector<1x6xi1>
    %88 = vector.broadcast %87 : vector<1x6xi1> to vector<6x6xi1>
    %89 = vector.broadcast %cst_86 : f32 to vector<6x6xf32>
    %90 = arith.select %88, %86, %89 : vector<6x6xi1>, vector<6x6xf32>
    %cst_87 = arith.constant dense<0xFF800000> : vector<6xf32>
    %91 = vector.multi_reduction <maximumf>, %90, %cst_87 [1] : vector<6x6xf32> to vector<6xf32>
    %92 = vector.shape_cast %91 : vector<6xf32> to vector<6x1xf32>
    %93 = vector.broadcast %92 : vector<6x1xf32> to vector<6x6xf32>
    %94 = arith.subf %90, %93 : vector<6x6xf32>
    %95 = math.exp %94 : vector<6x6xf32>
    %cst_88 = arith.constant dense<0.000000e+00> : vector<6xf32>
    %96 = vector.multi_reduction <add>, %95, %cst_88 [1] : vector<6x6xf32> to vector<6xf32>
    %97 = vector.shape_cast %96 : vector<6xf32> to vector<6x1xf32>
    %98 = tpu.reciprocal %97 {approx = true} : vector<6x1xf32> -> vector<6x1xf32>
    %99 = vector.broadcast %98 : vector<6x1xf32> to vector<6x6xf32>
    %100 = arith.mulf %95, %99 : vector<6x6xf32>
    %cst_89 = arith.constant dense<0.000000e+00> : vector<6x4xf32>
    %101 = tpu.matmul %100, %85, %cst_89 {dimension_numbers = #tpu.dot_dimension_numbers<[1], [0], [0], [1], [0, 0, 1, 1], [], []>} : vector<6x6xf32>, vector<6x4xf32>, vector<6x4xf32> -> vector<6x4xf32>
    %c0_90 = arith.constant 0 : index
    %c0_91 = arith.constant 0 : index
    %c4_92 = arith.constant 4 : index
    %102 = vector.load %arg32[%c0_90, %c0_91, %c4_92] : memref<2x6x32xf32, #tpu.memory_space<vmem>>, vector<1x6x4xf32>
    %103 = vector.shape_cast %102 : vector<1x6x4xf32> to vector<6x4xf32>
    %104 = vector.shape_cast %101 : vector<6x4xf32> to vector<1x6x4xf32>
    tpu.vector_store %arg32[%c0_90, %c0_91, %c4_92], %104 {strides = array<i32>} : memref<2x6x32xf32, #tpu.memory_space<vmem>>, vector<1x6x4xf32>,
    %c0_93 = arith.constant 0 : index
    %c0_94 = arith.constant 0 : index
    %c8 = arith.constant 8 : index
    %105 = vector.load %arg30[%c0_93, %c0_94, %c8] : memref<2x6x96xf32, #tpu.memory_space<vmem>>, vector<1x6x4xf32>
    %106 = vector.shape_cast %105 : vector<1x6x4xf32> to vector<6x4xf32>
    %cst_95 = arith.constant 5.000000e-01 : f32
    %107 = vector.broadcast %cst_95 : f32 to vector<6x4xf32>
    %108 = arith.mulf %106, %107 : vector<6x4xf32>
    %c0_96 = arith.constant 0 : index
    %c0_97 = arith.constant 0 : index
    %c40 = arith.constant 40 : index
    %109 = vector.load %arg30[%c0_96, %c0_97, %c40] : memref<2x6x96xf32, #tpu.memory_space<vmem>>, vector<1x6x4xf32>
    %110 = vector.shape_cast %109 : vector<1x6x4xf32> to vector<6x4xf32>
    %c0_98 = arith.constant 0 : index
    %c0_99 = arith.constant 0 : index
    %c72 = arith.constant 72 : index
    %111 = vector.load %arg30[%c0_98, %c0_99, %c72] : memref<2x6x96xf32, #tpu.memory_space<vmem>>, vector<1x6x4xf32>
    %112 = vector.shape_cast %111 : vector<1x6x4xf32> to vector<6x4xf32>
    %cst_100 = arith.constant dense<0.000000e+00> : vector<6x6xf32>
    %113 = tpu.matmul %108, %110, %cst_100 {dimension_numbers = #tpu.dot_dimension_numbers<[1], [1], [0], [0], [0, 0, 1, 0], [], []>} : vector<6x4xf32>, vector<6x4xf32>, vector<6x6xf32> -> vector<6x6xf32>
    %cst_101 = arith.constant -1.000000e+30 : f32
    %114 = vector.shape_cast %42 : vector<1x6xi1> to vector<1x6xi1>
    %115 = vector.broadcast %114 : vector<1x6xi1> to vector<6x6xi1>
    %116 = vector.broadcast %cst_101 : f32 to vector<6x6xf32>
    %117 = arith.select %115, %113, %116 : vector<6x6xi1>, vector<6x6xf32>
    %cst_102 = arith.constant dense<0xFF800000> : vector<6xf32>
    %118 = vector.multi_reduction <maximumf>, %117, %cst_102 [1] : vector<6x6xf32> to vector<6xf32>
    %119 = vector.shape_cast %118 : vector<6xf32> to vector<6x1xf32>
    %120 = vector.broadcast %119 : vector<6x1xf32> to vector<6x6xf32>
    %121 = arith.subf %117, %120 : vector<6x6xf32>
    %122 = math.exp %121 : vector<6x6xf32>
    %cst_103 = arith.constant dense<0.000000e+00> : vector<6xf32>
    %123 = vector.multi_reduction <add>, %122, %cst_103 [1] : vector<6x6xf32> to vector<6xf32>
    %124 = vector.shape_cast %123 : vector<6xf32> to vector<6x1xf32>
    %125 = tpu.reciprocal %124 {approx = true} : vector<6x1xf32> -> vector<6x1xf32>
    %126 = vector.broadcast %125 : vector<6x1xf32> to vector<6x6xf32>
    %127 = arith.mulf %122, %126 : vector<6x6xf32>
    %cst_104 = arith.constant dense<0.000000e+00> : vector<6x4xf32>
    %128 = tpu.matmul %127, %112, %cst_104 {dimension_numbers = #tpu.dot_dimension_numbers<[1], [0], [0], [1], [0, 0, 1, 1], [], []>} : vector<6x6xf32>, vector<6x4xf32>, vector<6x4xf32> -> vector<6x4xf32>
    %c0_105 = arith.constant 0 : index
    %c0_106 = arith.constant 0 : index
    %c8_107 = arith.constant 8 : index
    %129 = vector.load %arg32[%c0_105, %c0_106, %c8_107] : memref<2x6x32xf32, #tpu.memory_space<vmem>>, vector<1x6x4xf32>
    %130 = vector.shape_cast %129 : vector<1x6x4xf32> to vector<6x4xf32>
    %131 = vector.shape_cast %128 : vector<6x4xf32> to vector<1x6x4xf32>
    tpu.vector_store %arg32[%c0_105, %c0_106, %c8_107], %131 {strides = array<i32>} : memref<2x6x32xf32, #tpu.memory_space<vmem>>, vector<1x6x4xf32>,
    %c0_108 = arith.constant 0 : index
    %c0_109 = arith.constant 0 : index
    %c12 = arith.constant 12 : index
    %132 = vector.load %arg30[%c0_108, %c0_109, %c12] : memref<2x6x96xf32, #tpu.memory_space<vmem>>, vector<1x6x4xf32>
    %133 = vector.shape_cast %132 : vector<1x6x4xf32> to vector<6x4xf32>
    %cst_110 = arith.constant 5.000000e-01 : f32
    %134 = vector.broadcast %cst_110 : f32 to vector<6x4xf32>
    %135 = arith.mulf %133, %134 : vector<6x4xf32>
    %c0_111 = arith.constant 0 : index
    %c0_112 = arith.constant 0 : index
    %c44 = arith.constant 44 : index
    %136 = vector.load %arg30[%c0_111, %c0_112, %c44] : memref<2x6x96xf32, #tpu.memory_space<vmem>>, vector<1x6x4xf32>
    %137 = vector.shape_cast %136 : vector<1x6x4xf32> to vector<6x4xf32>
    %c0_113 = arith.constant 0 : index
    %c0_114 = arith.constant 0 : index
    %c76 = arith.constant 76 : index
    %138 = vector.load %arg30[%c0_113, %c0_114, %c76] : memref<2x6x96xf32, #tpu.memory_space<vmem>>, vector<1x6x4xf32>
    %139 = vector.shape_cast %138 : vector<1x6x4xf32> to vector<6x4xf32>
    %cst_115 = arith.constant dense<0.000000e+00> : vector<6x6xf32>
    %140 = tpu.matmul %135, %137, %cst_115 {dimension_numbers = #tpu.dot_dimension_numbers<[1], [1], [0], [0], [0, 0, 1, 0], [], []>} : vector<6x4xf32>, vector<6x4xf32>, vector<6x6xf32> -> vector<6x6xf32>
    %cst_116 = arith.constant -1.000000e+30 : f32
    %141 = vector.shape_cast %42 : vector<1x6xi1> to vector<1x6xi1>
    %142 = vector.broadcast %141 : vector<1x6xi1> to vector<6x6xi1>
    %143 = vector.broadcast %cst_116 : f32 to vector<6x6xf32>
    %144 = arith.select %142, %140, %143 : vector<6x6xi1>, vector<6x6xf32>
    %cst_117 = arith.constant dense<0xFF800000> : vector<6xf32>
    %145 = vector.multi_reduction <maximumf>, %144, %cst_117 [1] : vector<6x6xf32> to vector<6xf32>
    %146 = vector.shape_cast %145 : vector<6xf32> to vector<6x1xf32>
    %147 = vector.broadcast %146 : vector<6x1xf32> to vector<6x6xf32>
    %148 = arith.subf %144, %147 : vector<6x6xf32>
    %149 = math.exp %148 : vector<6x6xf32>
    %cst_118 = arith.constant dense<0.000000e+00> : vector<6xf32>
    %150 = vector.multi_reduction <add>, %149, %cst_118 [1] : vector<6x6xf32> to vector<6xf32>
    %151 = vector.shape_cast %150 : vector<6xf32> to vector<6x1xf32>
    %152 = tpu.reciprocal %151 {approx = true} : vector<6x1xf32> -> vector<6x1xf32>
    %153 = vector.broadcast %152 : vector<6x1xf32> to vector<6x6xf32>
    %154 = arith.mulf %149, %153 : vector<6x6xf32>
    %cst_119 = arith.constant dense<0.000000e+00> : vector<6x4xf32>
    %155 = tpu.matmul %154, %139, %cst_119 {dimension_numbers = #tpu.dot_dimension_numbers<[1], [0], [0], [1], [0, 0, 1, 1], [], []>} : vector<6x6xf32>, vector<6x4xf32>, vector<6x4xf32> -> vector<6x4xf32>
    %c0_120 = arith.constant 0 : index
    %c0_121 = arith.constant 0 : index
    %c12_122 = arith.constant 12 : index
    %156 = vector.load %arg32[%c0_120, %c0_121, %c12_122] : memref<2x6x32xf32, #tpu.memory_space<vmem>>, vector<1x6x4xf32>
    %157 = vector.shape_cast %156 : vector<1x6x4xf32> to vector<6x4xf32>
    %158 = vector.shape_cast %155 : vector<6x4xf32> to vector<1x6x4xf32>
    tpu.vector_store %arg32[%c0_120, %c0_121, %c12_122], %158 {strides = array<i32>} : memref<2x6x32xf32, #tpu.memory_space<vmem>>, vector<1x6x4xf32>,
    %c0_123 = arith.constant 0 : index
    %c0_124 = arith.constant 0 : index
    %c16 = arith.constant 16 : index
    %159 = vector.load %arg30[%c0_123, %c0_124, %c16] : memref<2x6x96xf32, #tpu.memory_space<vmem>>, vector<1x6x4xf32>
    %160 = vector.shape_cast %159 : vector<1x6x4xf32> to vector<6x4xf32>
    %cst_125 = arith.constant 5.000000e-01 : f32
    %161 = vector.broadcast %cst_125 : f32 to vector<6x4xf32>
    %162 = arith.mulf %160, %161 : vector<6x4xf32>
    %c0_126 = arith.constant 0 : index
    %c0_127 = arith.constant 0 : index
    %c48 = arith.constant 48 : index
    %163 = vector.load %arg30[%c0_126, %c0_127, %c48] : memref<2x6x96xf32, #tpu.memory_space<vmem>>, vector<1x6x4xf32>
    %164 = vector.shape_cast %163 : vector<1x6x4xf32> to vector<6x4xf32>
    %c0_128 = arith.constant 0 : index
    %c0_129 = arith.constant 0 : index
    %c80 = arith.constant 80 : index
    %165 = vector.load %arg30[%c0_128, %c0_129, %c80] : memref<2x6x96xf32, #tpu.memory_space<vmem>>, vector<1x6x4xf32>
    %166 = vector.shape_cast %165 : vector<1x6x4xf32> to vector<6x4xf32>
    %cst_130 = arith.constant dense<0.000000e+00> : vector<6x6xf32>
    %167 = tpu.matmul %162, %164, %cst_130 {dimension_numbers = #tpu.dot_dimension_numbers<[1], [1], [0], [0], [0, 0, 1, 0], [], []>} : vector<6x4xf32>, vector<6x4xf32>, vector<6x6xf32> -> vector<6x6xf32>
    %cst_131 = arith.constant -1.000000e+30 : f32
    %168 = vector.shape_cast %42 : vector<1x6xi1> to vector<1x6xi1>
    %169 = vector.broadcast %168 : vector<1x6xi1> to vector<6x6xi1>
    %170 = vector.broadcast %cst_131 : f32 to vector<6x6xf32>
    %171 = arith.select %169, %167, %170 : vector<6x6xi1>, vector<6x6xf32>
    %cst_132 = arith.constant dense<0xFF800000> : vector<6xf32>
    %172 = vector.multi_reduction <maximumf>, %171, %cst_132 [1] : vector<6x6xf32> to vector<6xf32>
    %173 = vector.shape_cast %172 : vector<6xf32> to vector<6x1xf32>
    %174 = vector.broadcast %173 : vector<6x1xf32> to vector<6x6xf32>
    %175 = arith.subf %171, %174 : vector<6x6xf32>
    %176 = math.exp %175 : vector<6x6xf32>
    %cst_133 = arith.constant dense<0.000000e+00> : vector<6xf32>
    %177 = vector.multi_reduction <add>, %176, %cst_133 [1] : vector<6x6xf32> to vector<6xf32>
    %178 = vector.shape_cast %177 : vector<6xf32> to vector<6x1xf32>
    %179 = tpu.reciprocal %178 {approx = true} : vector<6x1xf32> -> vector<6x1xf32>
    %180 = vector.broadcast %179 : vector<6x1xf32> to vector<6x6xf32>
    %181 = arith.mulf %176, %180 : vector<6x6xf32>
    %cst_134 = arith.constant dense<0.000000e+00> : vector<6x4xf32>
    %182 = tpu.matmul %181, %166, %cst_134 {dimension_numbers = #tpu.dot_dimension_numbers<[1], [0], [0], [1], [0, 0, 1, 1], [], []>} : vector<6x6xf32>, vector<6x4xf32>, vector<6x4xf32> -> vector<6x4xf32>
    %c0_135 = arith.constant 0 : index
    %c0_136 = arith.constant 0 : index
    %c16_137 = arith.constant 16 : index
    %183 = vector.load %arg32[%c0_135, %c0_136, %c16_137] : memref<2x6x32xf32, #tpu.memory_space<vmem>>, vector<1x6x4xf32>
    %184 = vector.shape_cast %183 : vector<1x6x4xf32> to vector<6x4xf32>
    %185 = vector.shape_cast %182 : vector<6x4xf32> to vector<1x6x4xf32>
    tpu.vector_store %arg32[%c0_135, %c0_136, %c16_137], %185 {strides = array<i32>} : memref<2x6x32xf32, #tpu.memory_space<vmem>>, vector<1x6x4xf32>,
    %c0_138 = arith.constant 0 : index
    %c0_139 = arith.constant 0 : index
    %c20 = arith.constant 20 : index
    %186 = vector.load %arg30[%c0_138, %c0_139, %c20] : memref<2x6x96xf32, #tpu.memory_space<vmem>>, vector<1x6x4xf32>
    %187 = vector.shape_cast %186 : vector<1x6x4xf32> to vector<6x4xf32>
    %cst_140 = arith.constant 5.000000e-01 : f32
    %188 = vector.broadcast %cst_140 : f32 to vector<6x4xf32>
    %189 = arith.mulf %187, %188 : vector<6x4xf32>
    %c0_141 = arith.constant 0 : index
    %c0_142 = arith.constant 0 : index
    %c52 = arith.constant 52 : index
    %190 = vector.load %arg30[%c0_141, %c0_142, %c52] : memref<2x6x96xf32, #tpu.memory_space<vmem>>, vector<1x6x4xf32>
    %191 = vector.shape_cast %190 : vector<1x6x4xf32> to vector<6x4xf32>
    %c0_143 = arith.constant 0 : index
    %c0_144 = arith.constant 0 : index
    %c84 = arith.constant 84 : index
    %192 = vector.load %arg30[%c0_143, %c0_144, %c84] : memref<2x6x96xf32, #tpu.memory_space<vmem>>, vector<1x6x4xf32>
    %193 = vector.shape_cast %192 : vector<1x6x4xf32> to vector<6x4xf32>
    %cst_145 = arith.constant dense<0.000000e+00> : vector<6x6xf32>
    %194 = tpu.matmul %189, %191, %cst_145 {dimension_numbers = #tpu.dot_dimension_numbers<[1], [1], [0], [0], [0, 0, 1, 0], [], []>} : vector<6x4xf32>, vector<6x4xf32>, vector<6x6xf32> -> vector<6x6xf32>
    %cst_146 = arith.constant -1.000000e+30 : f32
    %195 = vector.shape_cast %42 : vector<1x6xi1> to vector<1x6xi1>
    %196 = vector.broadcast %195 : vector<1x6xi1> to vector<6x6xi1>
    %197 = vector.broadcast %cst_146 : f32 to vector<6x6xf32>
    %198 = arith.select %196, %194, %197 : vector<6x6xi1>, vector<6x6xf32>
    %cst_147 = arith.constant dense<0xFF800000> : vector<6xf32>
    %199 = vector.multi_reduction <maximumf>, %198, %cst_147 [1] : vector<6x6xf32> to vector<6xf32>
    %200 = vector.shape_cast %199 : vector<6xf32> to vector<6x1xf32>
    %201 = vector.broadcast %200 : vector<6x1xf32> to vector<6x6xf32>
    %202 = arith.subf %198, %201 : vector<6x6xf32>
    %203 = math.exp %202 : vector<6x6xf32>
    %cst_148 = arith.constant dense<0.000000e+00> : vector<6xf32>
    %204 = vector.multi_reduction <add>, %203, %cst_148 [1] : vector<6x6xf32> to vector<6xf32>
    %205 = vector.shape_cast %204 : vector<6xf32> to vector<6x1xf32>
    %206 = tpu.reciprocal %205 {approx = true} : vector<6x1xf32> -> vector<6x1xf32>
    %207 = vector.broadcast %206 : vector<6x1xf32> to vector<6x6xf32>
    %208 = arith.mulf %203, %207 : vector<6x6xf32>
    %cst_149 = arith.constant dense<0.000000e+00> : vector<6x4xf32>
    %209 = tpu.matmul %208, %193, %cst_149 {dimension_numbers = #tpu.dot_dimension_numbers<[1], [0], [0], [1], [0, 0, 1, 1], [], []>} : vector<6x6xf32>, vector<6x4xf32>, vector<6x4xf32> -> vector<6x4xf32>
    %c0_150 = arith.constant 0 : index
    %c0_151 = arith.constant 0 : index
    %c20_152 = arith.constant 20 : index
    %210 = vector.load %arg32[%c0_150, %c0_151, %c20_152] : memref<2x6x32xf32, #tpu.memory_space<vmem>>, vector<1x6x4xf32>
    %211 = vector.shape_cast %210 : vector<1x6x4xf32> to vector<6x4xf32>
    %212 = vector.shape_cast %209 : vector<6x4xf32> to vector<1x6x4xf32>
    tpu.vector_store %arg32[%c0_150, %c0_151, %c20_152], %212 {strides = array<i32>} : memref<2x6x32xf32, #tpu.memory_space<vmem>>, vector<1x6x4xf32>,
    %c0_153 = arith.constant 0 : index
    %c0_154 = arith.constant 0 : index
    %c24 = arith.constant 24 : index
    %213 = vector.load %arg30[%c0_153, %c0_154, %c24] : memref<2x6x96xf32, #tpu.memory_space<vmem>>, vector<1x6x4xf32>
    %214 = vector.shape_cast %213 : vector<1x6x4xf32> to vector<6x4xf32>
    %cst_155 = arith.constant 5.000000e-01 : f32
    %215 = vector.broadcast %cst_155 : f32 to vector<6x4xf32>
    %216 = arith.mulf %214, %215 : vector<6x4xf32>
    %c0_156 = arith.constant 0 : index
    %c0_157 = arith.constant 0 : index
    %c56 = arith.constant 56 : index
    %217 = vector.load %arg30[%c0_156, %c0_157, %c56] : memref<2x6x96xf32, #tpu.memory_space<vmem>>, vector<1x6x4xf32>
    %218 = vector.shape_cast %217 : vector<1x6x4xf32> to vector<6x4xf32>
    %c0_158 = arith.constant 0 : index
    %c0_159 = arith.constant 0 : index
    %c88 = arith.constant 88 : index
    %219 = vector.load %arg30[%c0_158, %c0_159, %c88] : memref<2x6x96xf32, #tpu.memory_space<vmem>>, vector<1x6x4xf32>
    %220 = vector.shape_cast %219 : vector<1x6x4xf32> to vector<6x4xf32>
    %cst_160 = arith.constant dense<0.000000e+00> : vector<6x6xf32>
    %221 = tpu.matmul %216, %218, %cst_160 {dimension_numbers = #tpu.dot_dimension_numbers<[1], [1], [0], [0], [0, 0, 1, 0], [], []>} : vector<6x4xf32>, vector<6x4xf32>, vector<6x6xf32> -> vector<6x6xf32>
    %cst_161 = arith.constant -1.000000e+30 : f32
    %222 = vector.shape_cast %42 : vector<1x6xi1> to vector<1x6xi1>
    %223 = vector.broadcast %222 : vector<1x6xi1> to vector<6x6xi1>
    %224 = vector.broadcast %cst_161 : f32 to vector<6x6xf32>
    %225 = arith.select %223, %221, %224 : vector<6x6xi1>, vector<6x6xf32>
    %cst_162 = arith.constant dense<0xFF800000> : vector<6xf32>
    %226 = vector.multi_reduction <maximumf>, %225, %cst_162 [1] : vector<6x6xf32> to vector<6xf32>
    %227 = vector.shape_cast %226 : vector<6xf32> to vector<6x1xf32>
    %228 = vector.broadcast %227 : vector<6x1xf32> to vector<6x6xf32>
    %229 = arith.subf %225, %228 : vector<6x6xf32>
    %230 = math.exp %229 : vector<6x6xf32>
    %cst_163 = arith.constant dense<0.000000e+00> : vector<6xf32>
    %231 = vector.multi_reduction <add>, %230, %cst_163 [1] : vector<6x6xf32> to vector<6xf32>
    %232 = vector.shape_cast %231 : vector<6xf32> to vector<6x1xf32>
    %233 = tpu.reciprocal %232 {approx = true} : vector<6x1xf32> -> vector<6x1xf32>
    %234 = vector.broadcast %233 : vector<6x1xf32> to vector<6x6xf32>
    %235 = arith.mulf %230, %234 : vector<6x6xf32>
    %cst_164 = arith.constant dense<0.000000e+00> : vector<6x4xf32>
    %236 = tpu.matmul %235, %220, %cst_164 {dimension_numbers = #tpu.dot_dimension_numbers<[1], [0], [0], [1], [0, 0, 1, 1], [], []>} : vector<6x6xf32>, vector<6x4xf32>, vector<6x4xf32> -> vector<6x4xf32>
    %c0_165 = arith.constant 0 : index
    %c0_166 = arith.constant 0 : index
    %c24_167 = arith.constant 24 : index
    %237 = vector.load %arg32[%c0_165, %c0_166, %c24_167] : memref<2x6x32xf32, #tpu.memory_space<vmem>>, vector<1x6x4xf32>
    %238 = vector.shape_cast %237 : vector<1x6x4xf32> to vector<6x4xf32>
    %239 = vector.shape_cast %236 : vector<6x4xf32> to vector<1x6x4xf32>
    tpu.vector_store %arg32[%c0_165, %c0_166, %c24_167], %239 {strides = array<i32>} : memref<2x6x32xf32, #tpu.memory_space<vmem>>, vector<1x6x4xf32>,
    %c0_168 = arith.constant 0 : index
    %c0_169 = arith.constant 0 : index
    %c28 = arith.constant 28 : index
    %240 = vector.load %arg30[%c0_168, %c0_169, %c28] : memref<2x6x96xf32, #tpu.memory_space<vmem>>, vector<1x6x4xf32>
    %241 = vector.shape_cast %240 : vector<1x6x4xf32> to vector<6x4xf32>
    %cst_170 = arith.constant 5.000000e-01 : f32
    %242 = vector.broadcast %cst_170 : f32 to vector<6x4xf32>
    %243 = arith.mulf %241, %242 : vector<6x4xf32>
    %c0_171 = arith.constant 0 : index
    %c0_172 = arith.constant 0 : index
    %c60 = arith.constant 60 : index
    %244 = vector.load %arg30[%c0_171, %c0_172, %c60] : memref<2x6x96xf32, #tpu.memory_space<vmem>>, vector<1x6x4xf32>
    %245 = vector.shape_cast %244 : vector<1x6x4xf32> to vector<6x4xf32>
    %c0_173 = arith.constant 0 : index
    %c0_174 = arith.constant 0 : index
    %c92 = arith.constant 92 : index
    %246 = vector.load %arg30[%c0_173, %c0_174, %c92] : memref<2x6x96xf32, #tpu.memory_space<vmem>>, vector<1x6x4xf32>
    %247 = vector.shape_cast %246 : vector<1x6x4xf32> to vector<6x4xf32>
    %cst_175 = arith.constant dense<0.000000e+00> : vector<6x6xf32>
    %248 = tpu.matmul %243, %245, %cst_175 {dimension_numbers = #tpu.dot_dimension_numbers<[1], [1], [0], [0], [0, 0, 1, 0], [], []>} : vector<6x4xf32>, vector<6x4xf32>, vector<6x6xf32> -> vector<6x6xf32>
    %cst_176 = arith.constant -1.000000e+30 : f32
    %249 = vector.shape_cast %42 : vector<1x6xi1> to vector<1x6xi1>
    %250 = vector.broadcast %249 : vector<1x6xi1> to vector<6x6xi1>
    %251 = vector.broadcast %cst_176 : f32 to vector<6x6xf32>
    %252 = arith.select %250, %248, %251 : vector<6x6xi1>, vector<6x6xf32>
    %cst_177 = arith.constant dense<0xFF800000> : vector<6xf32>
    %253 = vector.multi_reduction <maximumf>, %252, %cst_177 [1] : vector<6x6xf32> to vector<6xf32>
    %254 = vector.shape_cast %253 : vector<6xf32> to vector<6x1xf32>
    %255 = vector.broadcast %254 : vector<6x1xf32> to vector<6x6xf32>
    %256 = arith.subf %252, %255 : vector<6x6xf32>
    %257 = math.exp %256 : vector<6x6xf32>
    %cst_178 = arith.constant dense<0.000000e+00> : vector<6xf32>
    %258 = vector.multi_reduction <add>, %257, %cst_178 [1] : vector<6x6xf32> to vector<6xf32>
    %259 = vector.shape_cast %258 : vector<6xf32> to vector<6x1xf32>
    %260 = tpu.reciprocal %259 {approx = true} : vector<6x1xf32> -> vector<6x1xf32>
    %261 = vector.broadcast %260 : vector<6x1xf32> to vector<6x6xf32>
    %262 = arith.mulf %257, %261 : vector<6x6xf32>
    %cst_179 = arith.constant dense<0.000000e+00> : vector<6x4xf32>
    %263 = tpu.matmul %262, %247, %cst_179 {dimension_numbers = #tpu.dot_dimension_numbers<[1], [0], [0], [1], [0, 0, 1, 1], [], []>} : vector<6x6xf32>, vector<6x4xf32>, vector<6x4xf32> -> vector<6x4xf32>
    %c0_180 = arith.constant 0 : index
    %c0_181 = arith.constant 0 : index
    %c28_182 = arith.constant 28 : index
    %264 = vector.load %arg32[%c0_180, %c0_181, %c28_182] : memref<2x6x32xf32, #tpu.memory_space<vmem>>, vector<1x6x4xf32>
    %265 = vector.shape_cast %264 : vector<1x6x4xf32> to vector<6x4xf32>
    %266 = vector.shape_cast %263 : vector<6x4xf32> to vector<1x6x4xf32>
    tpu.vector_store %arg32[%c0_180, %c0_181, %c28_182], %266 {strides = array<i32>} : memref<2x6x32xf32, #tpu.memory_space<vmem>>, vector<1x6x4xf32>,
    %c0_183 = arith.constant 0 : index
    %c0_184 = arith.constant 0 : index
    %c0_185 = arith.constant 0 : index
    %267 = vector.load %arg32[%c0_183, %c0_184, %c0_185] : memref<2x6x32xf32, #tpu.memory_space<vmem>>, vector<1x6x32xf32>
    %268 = vector.shape_cast %267 : vector<1x6x32xf32> to vector<6x32xf32>
    %cst_186 = arith.constant dense<0.000000e+00> : vector<6x32xf32>
    %269 = tpu.matmul %268, %9, %cst_186 {dimension_numbers = #tpu.dot_dimension_numbers<[1], [0], [0], [1], [0, 0, 1, 1], [], []>} : vector<6x32xf32>, vector<32x32xf32>, vector<6x32xf32> -> vector<6x32xf32>
    %270 = vector.broadcast %11 : vector<1x32xf32> to vector<6x32xf32>
    %271 = arith.addf %269, %270 : vector<6x32xf32>
    %272 = arith.addf %44, %271 : vector<6x32xf32>
    %cst_187 = arith.constant dense<0.000000e+00> : vector<6xf32>
    %273 = vector.multi_reduction <add>, %272, %cst_187 [1] : vector<6x32xf32> to vector<6xf32>
    %274 = vector.shape_cast %273 : vector<6xf32> to vector<6x1xf32>
    %cst_188 = arith.constant 3.200000e+01 : f32
    %275 = vector.broadcast %cst_188 : f32 to vector<6x1xf32>
    %276 = arith.divf %274, %275 : vector<6x1xf32>
    %277 = vector.broadcast %276 : vector<6x1xf32> to vector<6x32xf32>
    %278 = arith.subf %272, %277 : vector<6x32xf32>
    %279 = arith.mulf %278, %278 : vector<6x32xf32>
    %cst_189 = arith.constant dense<0.000000e+00> : vector<6xf32>
    %280 = vector.multi_reduction <add>, %279, %cst_189 [1] : vector<6x32xf32> to vector<6xf32>
    %281 = vector.shape_cast %280 : vector<6xf32> to vector<6x1xf32>
    %cst_190 = arith.constant 3.200000e+01 : f32
    %282 = vector.broadcast %cst_190 : f32 to vector<6x1xf32>
    %283 = arith.divf %281, %282 : vector<6x1xf32>
    %284 = vector.broadcast %276 : vector<6x1xf32> to vector<6x32xf32>
    %285 = arith.subf %272, %284 : vector<6x32xf32>
    %cst_191 = arith.constant 9.99999974E-6 : f32
    %286 = vector.broadcast %cst_191 : f32 to vector<6x1xf32>
    %287 = arith.addf %283, %286 : vector<6x1xf32>
    %288 = math.rsqrt %287 : vector<6x1xf32>
    %289 = vector.broadcast %288 : vector<6x1xf32> to vector<6x32xf32>
    %290 = arith.mulf %285, %289 : vector<6x32xf32>
    %291 = vector.broadcast %13 : vector<1x32xf32> to vector<6x32xf32>
    %292 = arith.mulf %290, %291 : vector<6x32xf32>
    %293 = vector.broadcast %15 : vector<1x32xf32> to vector<6x32xf32>
    %294 = arith.addf %292, %293 : vector<6x32xf32>
    %cst_192 = arith.constant dense<0.000000e+00> : vector<6x32xf32>
    %295 = tpu.matmul %294, %17, %cst_192 {dimension_numbers = #tpu.dot_dimension_numbers<[1], [0], [0], [1], [0, 0, 1, 1], [], []>} : vector<6x32xf32>, vector<32x32xf32>, vector<6x32xf32> -> vector<6x32xf32>
    %296 = vector.broadcast %19 : vector<1x32xf32> to vector<6x32xf32>
    %297 = arith.addf %295, %296 : vector<6x32xf32>
    %c0_193 = arith.constant 0 : index
    %c0_194 = arith.constant 0 : index
    %c0_195 = arith.constant 0 : index
    %298 = vector.load %arg31[%c0_193, %c0_194, %c0_195] : memref<2x6x32xf32, #tpu.memory_space<vmem>>, vector<1x6x32xf32>
    %299 = vector.shape_cast %298 : vector<1x6x32xf32> to vector<6x32xf32>
    %300 = vector.shape_cast %297 : vector<6x32xf32> to vector<1x6x32xf32>
    tpu.vector_store %arg31[%c0_193, %c0_194, %c0_195], %300 {strides = array<i32>} : memref<2x6x32xf32, #tpu.memory_space<vmem>>, vector<1x6x32xf32>,
    %c0_196 = arith.constant 0 : index
    %c0_197 = arith.constant 0 : index
    %c0_198 = arith.constant 0 : index
    %301 = vector.load %arg31[%c0_196, %c0_197, %c0_198] : memref<2x6x32xf32, #tpu.memory_space<vmem>>, vector<1x6x4xf32>
    %302 = vector.shape_cast %301 : vector<1x6x4xf32> to vector<6x4xf32>
    %cst_199 = arith.constant 5.000000e-01 : f32
    %303 = vector.broadcast %cst_199 : f32 to vector<6x4xf32>
    %304 = arith.mulf %302, %303 : vector<6x4xf32>
    %c0_200 = arith.constant 0 : index
    %c0_201 = arith.constant 0 : index
    %c0_202 = arith.constant 0 : index
    %c0_203 = arith.constant 0 : index
    %305 = vector.load %arg5[%c0_200, %c0_201, %c0_202, %c0_203] : memref<1x2x8x64xf32, #tpu.memory_space<vmem>>, vector<1x1x8x4xf32>
    %306 = vector.shape_cast %305 : vector<1x1x8x4xf32> to vector<8x4xf32>
    %c0_204 = arith.constant 0 : index
    %c0_205 = arith.constant 0 : index
    %c0_206 = arith.constant 0 : index
    %c32_207 = arith.constant 32 : index
    %307 = vector.load %arg5[%c0_204, %c0_205, %c0_206, %c32_207] : memref<1x2x8x64xf32, #tpu.memory_space<vmem>>, vector<1x1x8x4xf32>
    %308 = vector.shape_cast %307 : vector<1x1x8x4xf32> to vector<8x4xf32>
    %cst_208 = arith.constant dense<0.000000e+00> : vector<6x8xf32>
    %309 = tpu.matmul %304, %306, %cst_208 {dimension_numbers = #tpu.dot_dimension_numbers<[1], [1], [0], [0], [0, 0, 1, 0], [], []>} : vector<6x4xf32>, vector<8x4xf32>, vector<6x8xf32> -> vector<6x8xf32>
    %cst_209 = arith.constant dense<0xFF800000> : vector<6xf32>
    %310 = vector.multi_reduction <maximumf>, %309, %cst_209 [1] : vector<6x8xf32> to vector<6xf32>
    %311 = vector.shape_cast %310 : vector<6xf32> to vector<6x1xf32>
    %312 = vector.broadcast %311 : vector<6x1xf32> to vector<6x8xf32>
    %313 = arith.subf %309, %312 : vector<6x8xf32>
    %314 = math.exp %313 : vector<6x8xf32>
    %cst_210 = arith.constant dense<0.000000e+00> : vector<6xf32>
    %315 = vector.multi_reduction <add>, %314, %cst_210 [1] : vector<6x8xf32> to vector<6xf32>
    %316 = vector.shape_cast %315 : vector<6xf32> to vector<6x1xf32>
    %317 = tpu.reciprocal %316 {approx = true} : vector<6x1xf32> -> vector<6x1xf32>
    %318 = vector.broadcast %317 : vector<6x1xf32> to vector<6x8xf32>
    %319 = arith.mulf %314, %318 : vector<6x8xf32>
    %cst_211 = arith.constant dense<0.000000e+00> : vector<6x4xf32>
    %320 = tpu.matmul %319, %308, %cst_211 {dimension_numbers = #tpu.dot_dimension_numbers<[1], [0], [0], [1], [0, 0, 1, 1], [], []>} : vector<6x8xf32>, vector<8x4xf32>, vector<6x4xf32> -> vector<6x4xf32>
    %c0_212 = arith.constant 0 : index
    %c0_213 = arith.constant 0 : index
    %c0_214 = arith.constant 0 : index
    %321 = vector.load %arg32[%c0_212, %c0_213, %c0_214] : memref<2x6x32xf32, #tpu.memory_space<vmem>>, vector<1x6x4xf32>
    %322 = vector.shape_cast %321 : vector<1x6x4xf32> to vector<6x4xf32>
    %323 = vector.shape_cast %320 : vector<6x4xf32> to vector<1x6x4xf32>
    tpu.vector_store %arg32[%c0_212, %c0_213, %c0_214], %323 {strides = array<i32>} : memref<2x6x32xf32, #tpu.memory_space<vmem>>, vector<1x6x4xf32>,
    %c0_215 = arith.constant 0 : index
    %c0_216 = arith.constant 0 : index
    %c4_217 = arith.constant 4 : index
    %324 = vector.load %arg31[%c0_215, %c0_216, %c4_217] : memref<2x6x32xf32, #tpu.memory_space<vmem>>, vector<1x6x4xf32>
    %325 = vector.shape_cast %324 : vector<1x6x4xf32> to vector<6x4xf32>
    %cst_218 = arith.constant 5.000000e-01 : f32
    %326 = vector.broadcast %cst_218 : f32 to vector<6x4xf32>
    %327 = arith.mulf %325, %326 : vector<6x4xf32>
    %c0_219 = arith.constant 0 : index
    %c0_220 = arith.constant 0 : index
    %c0_221 = arith.constant 0 : index
    %c4_222 = arith.constant 4 : index
    %328 = vector.load %arg5[%c0_219, %c0_220, %c0_221, %c4_222] : memref<1x2x8x64xf32, #tpu.memory_space<vmem>>, vector<1x1x8x4xf32>
    %329 = vector.shape_cast %328 : vector<1x1x8x4xf32> to vector<8x4xf32>
    %c0_223 = arith.constant 0 : index
    %c0_224 = arith.constant 0 : index
    %c0_225 = arith.constant 0 : index
    %c36_226 = arith.constant 36 : index
    %330 = vector.load %arg5[%c0_223, %c0_224, %c0_225, %c36_226] : memref<1x2x8x64xf32, #tpu.memory_space<vmem>>, vector<1x1x8x4xf32>
    %331 = vector.shape_cast %330 : vector<1x1x8x4xf32> to vector<8x4xf32>
    %cst_227 = arith.constant dense<0.000000e+00> : vector<6x8xf32>
    %332 = tpu.matmul %327, %329, %cst_227 {dimension_numbers = #tpu.dot_dimension_numbers<[1], [1], [0], [0], [0, 0, 1, 0], [], []>} : vector<6x4xf32>, vector<8x4xf32>, vector<6x8xf32> -> vector<6x8xf32>
    %cst_228 = arith.constant dense<0xFF800000> : vector<6xf32>
    %333 = vector.multi_reduction <maximumf>, %332, %cst_228 [1] : vector<6x8xf32> to vector<6xf32>
    %334 = vector.shape_cast %333 : vector<6xf32> to vector<6x1xf32>
    %335 = vector.broadcast %334 : vector<6x1xf32> to vector<6x8xf32>
    %336 = arith.subf %332, %335 : vector<6x8xf32>
    %337 = math.exp %336 : vector<6x8xf32>
    %cst_229 = arith.constant dense<0.000000e+00> : vector<6xf32>
    %338 = vector.multi_reduction <add>, %337, %cst_229 [1] : vector<6x8xf32> to vector<6xf32>
    %339 = vector.shape_cast %338 : vector<6xf32> to vector<6x1xf32>
    %340 = tpu.reciprocal %339 {approx = true} : vector<6x1xf32> -> vector<6x1xf32>
    %341 = vector.broadcast %340 : vector<6x1xf32> to vector<6x8xf32>
    %342 = arith.mulf %337, %341 : vector<6x8xf32>
    %cst_230 = arith.constant dense<0.000000e+00> : vector<6x4xf32>
    %343 = tpu.matmul %342, %331, %cst_230 {dimension_numbers = #tpu.dot_dimension_numbers<[1], [0], [0], [1], [0, 0, 1, 1], [], []>} : vector<6x8xf32>, vector<8x4xf32>, vector<6x4xf32> -> vector<6x4xf32>
    %c0_231 = arith.constant 0 : index
    %c0_232 = arith.constant 0 : index
    %c4_233 = arith.constant 4 : index
    %344 = vector.load %arg32[%c0_231, %c0_232, %c4_233] : memref<2x6x32xf32, #tpu.memory_space<vmem>>, vector<1x6x4xf32>
    %345 = vector.shape_cast %344 : vector<1x6x4xf32> to vector<6x4xf32>
    %346 = vector.shape_cast %343 : vector<6x4xf32> to vector<1x6x4xf32>
    tpu.vector_store %arg32[%c0_231, %c0_232, %c4_233], %346 {strides = array<i32>} : memref<2x6x32xf32, #tpu.memory_space<vmem>>, vector<1x6x4xf32>,
    %c0_234 = arith.constant 0 : index
    %c0_235 = arith.constant 0 : index
    %c8_236 = arith.constant 8 : index
    %347 = vector.load %arg31[%c0_234, %c0_235, %c8_236] : memref<2x6x32xf32, #tpu.memory_space<vmem>>, vector<1x6x4xf32>
    %348 = vector.shape_cast %347 : vector<1x6x4xf32> to vector<6x4xf32>
    %cst_237 = arith.constant 5.000000e-01 : f32
    %349 = vector.broadcast %cst_237 : f32 to vector<6x4xf32>
    %350 = arith.mulf %348, %349 : vector<6x4xf32>
    %c0_238 = arith.constant 0 : index
    %c0_239 = arith.constant 0 : index
    %c0_240 = arith.constant 0 : index
    %c8_241 = arith.constant 8 : index
    %351 = vector.load %arg5[%c0_238, %c0_239, %c0_240, %c8_241] : memref<1x2x8x64xf32, #tpu.memory_space<vmem>>, vector<1x1x8x4xf32>
    %352 = vector.shape_cast %351 : vector<1x1x8x4xf32> to vector<8x4xf32>
    %c0_242 = arith.constant 0 : index
    %c0_243 = arith.constant 0 : index
    %c0_244 = arith.constant 0 : index
    %c40_245 = arith.constant 40 : index
    %353 = vector.load %arg5[%c0_242, %c0_243, %c0_244, %c40_245] : memref<1x2x8x64xf32, #tpu.memory_space<vmem>>, vector<1x1x8x4xf32>
    %354 = vector.shape_cast %353 : vector<1x1x8x4xf32> to vector<8x4xf32>
    %cst_246 = arith.constant dense<0.000000e+00> : vector<6x8xf32>
    %355 = tpu.matmul %350, %352, %cst_246 {dimension_numbers = #tpu.dot_dimension_numbers<[1], [1], [0], [0], [0, 0, 1, 0], [], []>} : vector<6x4xf32>, vector<8x4xf32>, vector<6x8xf32> -> vector<6x8xf32>
    %cst_247 = arith.constant dense<0xFF800000> : vector<6xf32>
    %356 = vector.multi_reduction <maximumf>, %355, %cst_247 [1] : vector<6x8xf32> to vector<6xf32>
    %357 = vector.shape_cast %356 : vector<6xf32> to vector<6x1xf32>
    %358 = vector.broadcast %357 : vector<6x1xf32> to vector<6x8xf32>
    %359 = arith.subf %355, %358 : vector<6x8xf32>
    %360 = math.exp %359 : vector<6x8xf32>
    %cst_248 = arith.constant dense<0.000000e+00> : vector<6xf32>
    %361 = vector.multi_reduction <add>, %360, %cst_248 [1] : vector<6x8xf32> to vector<6xf32>
    %362 = vector.shape_cast %361 : vector<6xf32> to vector<6x1xf32>
    %363 = tpu.reciprocal %362 {approx = true} : vector<6x1xf32> -> vector<6x1xf32>
    %364 = vector.broadcast %363 : vector<6x1xf32> to vector<6x8xf32>
    %365 = arith.mulf %360, %364 : vector<6x8xf32>
    %cst_249 = arith.constant dense<0.000000e+00> : vector<6x4xf32>
    %366 = tpu.matmul %365, %354, %cst_249 {dimension_numbers = #tpu.dot_dimension_numbers<[1], [0], [0], [1], [0, 0, 1, 1], [], []>} : vector<6x8xf32>, vector<8x4xf32>, vector<6x4xf32> -> vector<6x4xf32>
    %c0_250 = arith.constant 0 : index
    %c0_251 = arith.constant 0 : index
    %c8_252 = arith.constant 8 : index
    %367 = vector.load %arg32[%c0_250, %c0_251, %c8_252] : memref<2x6x32xf32, #tpu.memory_space<vmem>>, vector<1x6x4xf32>
    %368 = vector.shape_cast %367 : vector<1x6x4xf32> to vector<6x4xf32>
    %369 = vector.shape_cast %366 : vector<6x4xf32> to vector<1x6x4xf32>
    tpu.vector_store %arg32[%c0_250, %c0_251, %c8_252], %369 {strides = array<i32>} : memref<2x6x32xf32, #tpu.memory_space<vmem>>, vector<1x6x4xf32>,
    %c0_253 = arith.constant 0 : index
    %c0_254 = arith.constant 0 : index
    %c12_255 = arith.constant 12 : index
    %370 = vector.load %arg31[%c0_253, %c0_254, %c12_255] : memref<2x6x32xf32, #tpu.memory_space<vmem>>, vector<1x6x4xf32>
    %371 = vector.shape_cast %370 : vector<1x6x4xf32> to vector<6x4xf32>
    %cst_256 = arith.constant 5.000000e-01 : f32
    %372 = vector.broadcast %cst_256 : f32 to vector<6x4xf32>
    %373 = arith.mulf %371, %372 : vector<6x4xf32>
    %c0_257 = arith.constant 0 : index
    %c0_258 = arith.constant 0 : index
    %c0_259 = arith.constant 0 : index
    %c12_260 = arith.constant 12 : index
    %374 = vector.load %arg5[%c0_257, %c0_258, %c0_259, %c12_260] : memref<1x2x8x64xf32, #tpu.memory_space<vmem>>, vector<1x1x8x4xf32>
    %375 = vector.shape_cast %374 : vector<1x1x8x4xf32> to vector<8x4xf32>
    %c0_261 = arith.constant 0 : index
    %c0_262 = arith.constant 0 : index
    %c0_263 = arith.constant 0 : index
    %c44_264 = arith.constant 44 : index
    %376 = vector.load %arg5[%c0_261, %c0_262, %c0_263, %c44_264] : memref<1x2x8x64xf32, #tpu.memory_space<vmem>>, vector<1x1x8x4xf32>
    %377 = vector.shape_cast %376 : vector<1x1x8x4xf32> to vector<8x4xf32>
    %cst_265 = arith.constant dense<0.000000e+00> : vector<6x8xf32>
    %378 = tpu.matmul %373, %375, %cst_265 {dimension_numbers = #tpu.dot_dimension_numbers<[1], [1], [0], [0], [0, 0, 1, 0], [], []>} : vector<6x4xf32>, vector<8x4xf32>, vector<6x8xf32> -> vector<6x8xf32>
    %cst_266 = arith.constant dense<0xFF800000> : vector<6xf32>
    %379 = vector.multi_reduction <maximumf>, %378, %cst_266 [1] : vector<6x8xf32> to vector<6xf32>
    %380 = vector.shape_cast %379 : vector<6xf32> to vector<6x1xf32>
    %381 = vector.broadcast %380 : vector<6x1xf32> to vector<6x8xf32>
    %382 = arith.subf %378, %381 : vector<6x8xf32>
    %383 = math.exp %382 : vector<6x8xf32>
    %cst_267 = arith.constant dense<0.000000e+00> : vector<6xf32>
    %384 = vector.multi_reduction <add>, %383, %cst_267 [1] : vector<6x8xf32> to vector<6xf32>
    %385 = vector.shape_cast %384 : vector<6xf32> to vector<6x1xf32>
    %386 = tpu.reciprocal %385 {approx = true} : vector<6x1xf32> -> vector<6x1xf32>
    %387 = vector.broadcast %386 : vector<6x1xf32> to vector<6x8xf32>
    %388 = arith.mulf %383, %387 : vector<6x8xf32>
    %cst_268 = arith.constant dense<0.000000e+00> : vector<6x4xf32>
    %389 = tpu.matmul %388, %377, %cst_268 {dimension_numbers = #tpu.dot_dimension_numbers<[1], [0], [0], [1], [0, 0, 1, 1], [], []>} : vector<6x8xf32>, vector<8x4xf32>, vector<6x4xf32> -> vector<6x4xf32>
    %c0_269 = arith.constant 0 : index
    %c0_270 = arith.constant 0 : index
    %c12_271 = arith.constant 12 : index
    %390 = vector.load %arg32[%c0_269, %c0_270, %c12_271] : memref<2x6x32xf32, #tpu.memory_space<vmem>>, vector<1x6x4xf32>
    %391 = vector.shape_cast %390 : vector<1x6x4xf32> to vector<6x4xf32>
    %392 = vector.shape_cast %389 : vector<6x4xf32> to vector<1x6x4xf32>
    tpu.vector_store %arg32[%c0_269, %c0_270, %c12_271], %392 {strides = array<i32>} : memref<2x6x32xf32, #tpu.memory_space<vmem>>, vector<1x6x4xf32>,
    %c0_272 = arith.constant 0 : index
    %c0_273 = arith.constant 0 : index
    %c16_274 = arith.constant 16 : index
    %393 = vector.load %arg31[%c0_272, %c0_273, %c16_274] : memref<2x6x32xf32, #tpu.memory_space<vmem>>, vector<1x6x4xf32>
    %394 = vector.shape_cast %393 : vector<1x6x4xf32> to vector<6x4xf32>
    %cst_275 = arith.constant 5.000000e-01 : f32
    %395 = vector.broadcast %cst_275 : f32 to vector<6x4xf32>
    %396 = arith.mulf %394, %395 : vector<6x4xf32>
    %c0_276 = arith.constant 0 : index
    %c0_277 = arith.constant 0 : index
    %c0_278 = arith.constant 0 : index
    %c16_279 = arith.constant 16 : index
    %397 = vector.load %arg5[%c0_276, %c0_277, %c0_278, %c16_279] : memref<1x2x8x64xf32, #tpu.memory_space<vmem>>, vector<1x1x8x4xf32>
    %398 = vector.shape_cast %397 : vector<1x1x8x4xf32> to vector<8x4xf32>
    %c0_280 = arith.constant 0 : index
    %c0_281 = arith.constant 0 : index
    %c0_282 = arith.constant 0 : index
    %c48_283 = arith.constant 48 : index
    %399 = vector.load %arg5[%c0_280, %c0_281, %c0_282, %c48_283] : memref<1x2x8x64xf32, #tpu.memory_space<vmem>>, vector<1x1x8x4xf32>
    %400 = vector.shape_cast %399 : vector<1x1x8x4xf32> to vector<8x4xf32>
    %cst_284 = arith.constant dense<0.000000e+00> : vector<6x8xf32>
    %401 = tpu.matmul %396, %398, %cst_284 {dimension_numbers = #tpu.dot_dimension_numbers<[1], [1], [0], [0], [0, 0, 1, 0], [], []>} : vector<6x4xf32>, vector<8x4xf32>, vector<6x8xf32> -> vector<6x8xf32>
    %cst_285 = arith.constant dense<0xFF800000> : vector<6xf32>
    %402 = vector.multi_reduction <maximumf>, %401, %cst_285 [1] : vector<6x8xf32> to vector<6xf32>
    %403 = vector.shape_cast %402 : vector<6xf32> to vector<6x1xf32>
    %404 = vector.broadcast %403 : vector<6x1xf32> to vector<6x8xf32>
    %405 = arith.subf %401, %404 : vector<6x8xf32>
    %406 = math.exp %405 : vector<6x8xf32>
    %cst_286 = arith.constant dense<0.000000e+00> : vector<6xf32>
    %407 = vector.multi_reduction <add>, %406, %cst_286 [1] : vector<6x8xf32> to vector<6xf32>
    %408 = vector.shape_cast %407 : vector<6xf32> to vector<6x1xf32>
    %409 = tpu.reciprocal %408 {approx = true} : vector<6x1xf32> -> vector<6x1xf32>
    %410 = vector.broadcast %409 : vector<6x1xf32> to vector<6x8xf32>
    %411 = arith.mulf %406, %410 : vector<6x8xf32>
    %cst_287 = arith.constant dense<0.000000e+00> : vector<6x4xf32>
    %412 = tpu.matmul %411, %400, %cst_287 {dimension_numbers = #tpu.dot_dimension_numbers<[1], [0], [0], [1], [0, 0, 1, 1], [], []>} : vector<6x8xf32>, vector<8x4xf32>, vector<6x4xf32> -> vector<6x4xf32>
    %c0_288 = arith.constant 0 : index
    %c0_289 = arith.constant 0 : index
    %c16_290 = arith.constant 16 : index
    %413 = vector.load %arg32[%c0_288, %c0_289, %c16_290] : memref<2x6x32xf32, #tpu.memory_space<vmem>>, vector<1x6x4xf32>
    %414 = vector.shape_cast %413 : vector<1x6x4xf32> to vector<6x4xf32>
    %415 = vector.shape_cast %412 : vector<6x4xf32> to vector<1x6x4xf32>
    tpu.vector_store %arg32[%c0_288, %c0_289, %c16_290], %415 {strides = array<i32>} : memref<2x6x32xf32, #tpu.memory_space<vmem>>, vector<1x6x4xf32>,
    %c0_291 = arith.constant 0 : index
    %c0_292 = arith.constant 0 : index
    %c20_293 = arith.constant 20 : index
    %416 = vector.load %arg31[%c0_291, %c0_292, %c20_293] : memref<2x6x32xf32, #tpu.memory_space<vmem>>, vector<1x6x4xf32>
    %417 = vector.shape_cast %416 : vector<1x6x4xf32> to vector<6x4xf32>
    %cst_294 = arith.constant 5.000000e-01 : f32
    %418 = vector.broadcast %cst_294 : f32 to vector<6x4xf32>
    %419 = arith.mulf %417, %418 : vector<6x4xf32>
    %c0_295 = arith.constant 0 : index
    %c0_296 = arith.constant 0 : index
    %c0_297 = arith.constant 0 : index
    %c20_298 = arith.constant 20 : index
    %420 = vector.load %arg5[%c0_295, %c0_296, %c0_297, %c20_298] : memref<1x2x8x64xf32, #tpu.memory_space<vmem>>, vector<1x1x8x4xf32>
    %421 = vector.shape_cast %420 : vector<1x1x8x4xf32> to vector<8x4xf32>
    %c0_299 = arith.constant 0 : index
    %c0_300 = arith.constant 0 : index
    %c0_301 = arith.constant 0 : index
    %c52_302 = arith.constant 52 : index
    %422 = vector.load %arg5[%c0_299, %c0_300, %c0_301, %c52_302] : memref<1x2x8x64xf32, #tpu.memory_space<vmem>>, vector<1x1x8x4xf32>
    %423 = vector.shape_cast %422 : vector<1x1x8x4xf32> to vector<8x4xf32>
    %cst_303 = arith.constant dense<0.000000e+00> : vector<6x8xf32>
    %424 = tpu.matmul %419, %421, %cst_303 {dimension_numbers = #tpu.dot_dimension_numbers<[1], [1], [0], [0], [0, 0, 1, 0], [], []>} : vector<6x4xf32>, vector<8x4xf32>, vector<6x8xf32> -> vector<6x8xf32>
    %cst_304 = arith.constant dense<0xFF800000> : vector<6xf32>
    %425 = vector.multi_reduction <maximumf>, %424, %cst_304 [1] : vector<6x8xf32> to vector<6xf32>
    %426 = vector.shape_cast %425 : vector<6xf32> to vector<6x1xf32>
    %427 = vector.broadcast %426 : vector<6x1xf32> to vector<6x8xf32>
    %428 = arith.subf %424, %427 : vector<6x8xf32>
    %429 = math.exp %428 : vector<6x8xf32>
    %cst_305 = arith.constant dense<0.000000e+00> : vector<6xf32>
    %430 = vector.multi_reduction <add>, %429, %cst_305 [1] : vector<6x8xf32> to vector<6xf32>
    %431 = vector.shape_cast %430 : vector<6xf32> to vector<6x1xf32>
    %432 = tpu.reciprocal %431 {approx = true} : vector<6x1xf32> -> vector<6x1xf32>
    %433 = vector.broadcast %432 : vector<6x1xf32> to vector<6x8xf32>
    %434 = arith.mulf %429, %433 : vector<6x8xf32>
    %cst_306 = arith.constant dense<0.000000e+00> : vector<6x4xf32>
    %435 = tpu.matmul %434, %423, %cst_306 {dimension_numbers = #tpu.dot_dimension_numbers<[1], [0], [0], [1], [0, 0, 1, 1], [], []>} : vector<6x8xf32>, vector<8x4xf32>, vector<6x4xf32> -> vector<6x4xf32>
    %c0_307 = arith.constant 0 : index
    %c0_308 = arith.constant 0 : index
    %c20_309 = arith.constant 20 : index
    %436 = vector.load %arg32[%c0_307, %c0_308, %c20_309] : memref<2x6x32xf32, #tpu.memory_space<vmem>>, vector<1x6x4xf32>
    %437 = vector.shape_cast %436 : vector<1x6x4xf32> to vector<6x4xf32>
    %438 = vector.shape_cast %435 : vector<6x4xf32> to vector<1x6x4xf32>
    tpu.vector_store %arg32[%c0_307, %c0_308, %c20_309], %438 {strides = array<i32>} : memref<2x6x32xf32, #tpu.memory_space<vmem>>, vector<1x6x4xf32>,
    %c0_310 = arith.constant 0 : index
    %c0_311 = arith.constant 0 : index
    %c24_312 = arith.constant 24 : index
    %439 = vector.load %arg31[%c0_310, %c0_311, %c24_312] : memref<2x6x32xf32, #tpu.memory_space<vmem>>, vector<1x6x4xf32>
    %440 = vector.shape_cast %439 : vector<1x6x4xf32> to vector<6x4xf32>
    %cst_313 = arith.constant 5.000000e-01 : f32
    %441 = vector.broadcast %cst_313 : f32 to vector<6x4xf32>
    %442 = arith.mulf %440, %441 : vector<6x4xf32>
    %c0_314 = arith.constant 0 : index
    %c0_315 = arith.constant 0 : index
    %c0_316 = arith.constant 0 : index
    %c24_317 = arith.constant 24 : index
    %443 = vector.load %arg5[%c0_314, %c0_315, %c0_316, %c24_317] : memref<1x2x8x64xf32, #tpu.memory_space<vmem>>, vector<1x1x8x4xf32>
    %444 = vector.shape_cast %443 : vector<1x1x8x4xf32> to vector<8x4xf32>
    %c0_318 = arith.constant 0 : index
    %c0_319 = arith.constant 0 : index
    %c0_320 = arith.constant 0 : index
    %c56_321 = arith.constant 56 : index
    %445 = vector.load %arg5[%c0_318, %c0_319, %c0_320, %c56_321] : memref<1x2x8x64xf32, #tpu.memory_space<vmem>>, vector<1x1x8x4xf32>
    %446 = vector.shape_cast %445 : vector<1x1x8x4xf32> to vector<8x4xf32>
    %cst_322 = arith.constant dense<0.000000e+00> : vector<6x8xf32>
    %447 = tpu.matmul %442, %444, %cst_322 {dimension_numbers = #tpu.dot_dimension_numbers<[1], [1], [0], [0], [0, 0, 1, 0], [], []>} : vector<6x4xf32>, vector<8x4xf32>, vector<6x8xf32> -> vector<6x8xf32>
    %cst_323 = arith.constant dense<0xFF800000> : vector<6xf32>
    %448 = vector.multi_reduction <maximumf>, %447, %cst_323 [1] : vector<6x8xf32> to vector<6xf32>
    %449 = vector.shape_cast %448 : vector<6xf32> to vector<6x1xf32>
    %450 = vector.broadcast %449 : vector<6x1xf32> to vector<6x8xf32>
    %451 = arith.subf %447, %450 : vector<6x8xf32>
    %452 = math.exp %451 : vector<6x8xf32>
    %cst_324 = arith.constant dense<0.000000e+00> : vector<6xf32>
    %453 = vector.multi_reduction <add>, %452, %cst_324 [1] : vector<6x8xf32> to vector<6xf32>
    %454 = vector.shape_cast %453 : vector<6xf32> to vector<6x1xf32>
    %455 = tpu.reciprocal %454 {approx = true} : vector<6x1xf32> -> vector<6x1xf32>
    %456 = vector.broadcast %455 : vector<6x1xf32> to vector<6x8xf32>
    %457 = arith.mulf %452, %456 : vector<6x8xf32>
    %cst_325 = arith.constant dense<0.000000e+00> : vector<6x4xf32>
    %458 = tpu.matmul %457, %446, %cst_325 {dimension_numbers = #tpu.dot_dimension_numbers<[1], [0], [0], [1], [0, 0, 1, 1], [], []>} : vector<6x8xf32>, vector<8x4xf32>, vector<6x4xf32> -> vector<6x4xf32>
    %c0_326 = arith.constant 0 : index
    %c0_327 = arith.constant 0 : index
    %c24_328 = arith.constant 24 : index
    %459 = vector.load %arg32[%c0_326, %c0_327, %c24_328] : memref<2x6x32xf32, #tpu.memory_space<vmem>>, vector<1x6x4xf32>
    %460 = vector.shape_cast %459 : vector<1x6x4xf32> to vector<6x4xf32>
    %461 = vector.shape_cast %458 : vector<6x4xf32> to vector<1x6x4xf32>
    tpu.vector_store %arg32[%c0_326, %c0_327, %c24_328], %461 {strides = array<i32>} : memref<2x6x32xf32, #tpu.memory_space<vmem>>, vector<1x6x4xf32>,
    %c0_329 = arith.constant 0 : index
    %c0_330 = arith.constant 0 : index
    %c28_331 = arith.constant 28 : index
    %462 = vector.load %arg31[%c0_329, %c0_330, %c28_331] : memref<2x6x32xf32, #tpu.memory_space<vmem>>, vector<1x6x4xf32>
    %463 = vector.shape_cast %462 : vector<1x6x4xf32> to vector<6x4xf32>
    %cst_332 = arith.constant 5.000000e-01 : f32
    %464 = vector.broadcast %cst_332 : f32 to vector<6x4xf32>
    %465 = arith.mulf %463, %464 : vector<6x4xf32>
    %c0_333 = arith.constant 0 : index
    %c0_334 = arith.constant 0 : index
    %c0_335 = arith.constant 0 : index
    %c28_336 = arith.constant 28 : index
    %466 = vector.load %arg5[%c0_333, %c0_334, %c0_335, %c28_336] : memref<1x2x8x64xf32, #tpu.memory_space<vmem>>, vector<1x1x8x4xf32>
    %467 = vector.shape_cast %466 : vector<1x1x8x4xf32> to vector<8x4xf32>
    %c0_337 = arith.constant 0 : index
    %c0_338 = arith.constant 0 : index
    %c0_339 = arith.constant 0 : index
    %c60_340 = arith.constant 60 : index
    %468 = vector.load %arg5[%c0_337, %c0_338, %c0_339, %c60_340] : memref<1x2x8x64xf32, #tpu.memory_space<vmem>>, vector<1x1x8x4xf32>
    %469 = vector.shape_cast %468 : vector<1x1x8x4xf32> to vector<8x4xf32>
    %cst_341 = arith.constant dense<0.000000e+00> : vector<6x8xf32>
    %470 = tpu.matmul %465, %467, %cst_341 {dimension_numbers = #tpu.dot_dimension_numbers<[1], [1], [0], [0], [0, 0, 1, 0], [], []>} : vector<6x4xf32>, vector<8x4xf32>, vector<6x8xf32> -> vector<6x8xf32>
    %cst_342 = arith.constant dense<0xFF800000> : vector<6xf32>
    %471 = vector.multi_reduction <maximumf>, %470, %cst_342 [1] : vector<6x8xf32> to vector<6xf32>
    %472 = vector.shape_cast %471 : vector<6xf32> to vector<6x1xf32>
    %473 = vector.broadcast %472 : vector<6x1xf32> to vector<6x8xf32>
    %474 = arith.subf %470, %473 : vector<6x8xf32>
    %475 = math.exp %474 : vector<6x8xf32>
    %cst_343 = arith.constant dense<0.000000e+00> : vector<6xf32>
    %476 = vector.multi_reduction <add>, %475, %cst_343 [1] : vector<6x8xf32> to vector<6xf32>
    %477 = vector.shape_cast %476 : vector<6xf32> to vector<6x1xf32>
    %478 = tpu.reciprocal %477 {approx = true} : vector<6x1xf32> -> vector<6x1xf32>
    %479 = vector.broadcast %478 : vector<6x1xf32> to vector<6x8xf32>
    %480 = arith.mulf %475, %479 : vector<6x8xf32>
    %cst_344 = arith.constant dense<0.000000e+00> : vector<6x4xf32>
    %481 = tpu.matmul %480, %469, %cst_344 {dimension_numbers = #tpu.dot_dimension_numbers<[1], [0], [0], [1], [0, 0, 1, 1], [], []>} : vector<6x8xf32>, vector<8x4xf32>, vector<6x4xf32> -> vector<6x4xf32>
    %c0_345 = arith.constant 0 : index
    %c0_346 = arith.constant 0 : index
    %c28_347 = arith.constant 28 : index
    %482 = vector.load %arg32[%c0_345, %c0_346, %c28_347] : memref<2x6x32xf32, #tpu.memory_space<vmem>>, vector<1x6x4xf32>
    %483 = vector.shape_cast %482 : vector<1x6x4xf32> to vector<6x4xf32>
    %484 = vector.shape_cast %481 : vector<6x4xf32> to vector<1x6x4xf32>
    tpu.vector_store %arg32[%c0_345, %c0_346, %c28_347], %484 {strides = array<i32>} : memref<2x6x32xf32, #tpu.memory_space<vmem>>, vector<1x6x4xf32>,
    %c0_348 = arith.constant 0 : index
    %c0_349 = arith.constant 0 : index
    %c0_350 = arith.constant 0 : index
    %485 = vector.load %arg32[%c0_348, %c0_349, %c0_350] : memref<2x6x32xf32, #tpu.memory_space<vmem>>, vector<1x6x32xf32>
    %486 = vector.shape_cast %485 : vector<1x6x32xf32> to vector<6x32xf32>
    %cst_351 = arith.constant dense<0.000000e+00> : vector<6x32xf32>
    %487 = tpu.matmul %486, %21, %cst_351 {dimension_numbers = #tpu.dot_dimension_numbers<[1], [0], [0], [1], [0, 0, 1, 1], [], []>} : vector<6x32xf32>, vector<32x32xf32>, vector<6x32xf32> -> vector<6x32xf32>
    %488 = vector.broadcast %23 : vector<1x32xf32> to vector<6x32xf32>
    %489 = arith.addf %487, %488 : vector<6x32xf32>
    %490 = arith.addf %294, %489 : vector<6x32xf32>
    %cst_352 = arith.constant dense<0.000000e+00> : vector<6xf32>
    %491 = vector.multi_reduction <add>, %490, %cst_352 [1] : vector<6x32xf32> to vector<6xf32>
    %492 = vector.shape_cast %491 : vector<6xf32> to vector<6x1xf32>
    %cst_353 = arith.constant 3.200000e+01 : f32
    %493 = vector.broadcast %cst_353 : f32 to vector<6x1xf32>
    %494 = arith.divf %492, %493 : vector<6x1xf32>
    %495 = vector.broadcast %494 : vector<6x1xf32> to vector<6x32xf32>
    %496 = arith.subf %490, %495 : vector<6x32xf32>
    %497 = arith.mulf %496, %496 : vector<6x32xf32>
    %cst_354 = arith.constant dense<0.000000e+00> : vector<6xf32>
    %498 = vector.multi_reduction <add>, %497, %cst_354 [1] : vector<6x32xf32> to vector<6xf32>
    %499 = vector.shape_cast %498 : vector<6xf32> to vector<6x1xf32>
    %cst_355 = arith.constant 3.200000e+01 : f32
    %500 = vector.broadcast %cst_355 : f32 to vector<6x1xf32>
    %501 = arith.divf %499, %500 : vector<6x1xf32>
    %502 = vector.broadcast %494 : vector<6x1xf32> to vector<6x32xf32>
    %503 = arith.subf %490, %502 : vector<6x32xf32>
    %cst_356 = arith.constant 9.99999974E-6 : f32
    %504 = vector.broadcast %cst_356 : f32 to vector<6x1xf32>
    %505 = arith.addf %501, %504 : vector<6x1xf32>
    %506 = math.rsqrt %505 : vector<6x1xf32>
    %507 = vector.broadcast %506 : vector<6x1xf32> to vector<6x32xf32>
    %508 = arith.mulf %503, %507 : vector<6x32xf32>
    %509 = vector.broadcast %25 : vector<1x32xf32> to vector<6x32xf32>
    %510 = arith.mulf %508, %509 : vector<6x32xf32>
    %511 = vector.broadcast %27 : vector<1x32xf32> to vector<6x32xf32>
    %512 = arith.addf %510, %511 : vector<6x32xf32>
    %cst_357 = arith.constant dense<0.000000e+00> : vector<6x64xf32>
    %513 = tpu.matmul %512, %29, %cst_357 {dimension_numbers = #tpu.dot_dimension_numbers<[1], [0], [0], [1], [0, 0, 1, 1], [], []>} : vector<6x32xf32>, vector<32x64xf32>, vector<6x64xf32> -> vector<6x64xf32>
    %514 = vector.broadcast %31 : vector<1x64xf32> to vector<6x64xf32>
    %515 = arith.addf %513, %514 : vector<6x64xf32>
    %cst_358 = arith.constant 0.000000e+00 : f32
    %516 = vector.broadcast %cst_358 : f32 to vector<6x64xf32>
    %517 = arith.maximumf %515, %516 : vector<6x64xf32>
    %cst_359 = arith.constant dense<0.000000e+00> : vector<6x32xf32>
    %518 = tpu.matmul %517, %33, %cst_359 {dimension_numbers = #tpu.dot_dimension_numbers<[1], [0], [0], [1], [0, 0, 1, 1], [], []>} : vector<6x64xf32>, vector<64x32xf32>, vector<6x32xf32> -> vector<6x32xf32>
    %519 = vector.broadcast %35 : vector<1x32xf32> to vector<6x32xf32>
    %520 = arith.addf %518, %519 : vector<6x32xf32>
    %521 = arith.addf %512, %520 : vector<6x32xf32>
    %cst_360 = arith.constant dense<0.000000e+00> : vector<6xf32>
    %522 = vector.multi_reduction <add>, %521, %cst_360 [1] : vector<6x32xf32> to vector<6xf32>
    %523 = vector.shape_cast %522 : vector<6xf32> to vector<6x1xf32>
    %cst_361 = arith.constant 3.200000e+01 : f32
    %524 = vector.broadcast %cst_361 : f32 to vector<6x1xf32>
    %525 = arith.divf %523, %524 : vector<6x1xf32>
    %526 = vector.broadcast %525 : vector<6x1xf32> to vector<6x32xf32>
    %527 = arith.subf %521, %526 : vector<6x32xf32>
    %528 = arith.mulf %527, %527 : vector<6x32xf32>
    %cst_362 = arith.constant dense<0.000000e+00> : vector<6xf32>
    %529 = vector.multi_reduction <add>, %528, %cst_362 [1] : vector<6x32xf32> to vector<6xf32>
    %530 = vector.shape_cast %529 : vector<6xf32> to vector<6x1xf32>
    %cst_363 = arith.constant 3.200000e+01 : f32
    %531 = vector.broadcast %cst_363 : f32 to vector<6x1xf32>
    %532 = arith.divf %530, %531 : vector<6x1xf32>
    %533 = vector.broadcast %525 : vector<6x1xf32> to vector<6x32xf32>
    %534 = arith.subf %521, %533 : vector<6x32xf32>
    %cst_364 = arith.constant 9.99999974E-6 : f32
    %535 = vector.broadcast %cst_364 : f32 to vector<6x1xf32>
    %536 = arith.addf %532, %535 : vector<6x1xf32>
    %537 = math.rsqrt %536 : vector<6x1xf32>
    %538 = vector.broadcast %537 : vector<6x1xf32> to vector<6x32xf32>
    %539 = arith.mulf %534, %538 : vector<6x32xf32>
    %540 = vector.broadcast %37 : vector<1x32xf32> to vector<6x32xf32>
    %541 = arith.mulf %539, %540 : vector<6x32xf32>
    %542 = vector.broadcast %39 : vector<1x32xf32> to vector<6x32xf32>
    %543 = arith.addf %541, %542 : vector<6x32xf32>
    %c0_365 = arith.constant 0 : index
    %c0_366 = arith.constant 0 : index
    %c0_367 = arith.constant 0 : index
    %544 = vector.load %arg28[%c0_365, %c0_366, %c0_367] : memref<2x6x32xf32, #tpu.memory_space<vmem>>, vector<1x6x32xf32>
    %545 = vector.shape_cast %544 : vector<1x6x32xf32> to vector<6x32xf32>
    %546 = vector.shape_cast %543 : vector<6x32xf32> to vector<1x6x32xf32>
    tpu.vector_store %arg28[%c0_365, %c0_366, %c0_367], %546 {strides = array<i32>} : memref<2x6x32xf32, #tpu.memory_space<vmem>>, vector<1x6x32xf32>,
    %c1 = arith.constant 1 : index
    %c0_368 = arith.constant 0 : index
    %c0_369 = arith.constant 0 : index
    %547 = vector.load %arg28[%c1, %c0_368, %c0_369] : memref<2x6x32xf32, #tpu.memory_space<vmem>>, vector<1x6x32xf32>
    %548 = vector.shape_cast %547 : vector<1x6x32xf32> to vector<6x32xf32>
    %cst_370 = arith.constant dense<0.000000e+00> : vector<6x96xf32>
    %549 = tpu.matmul %548, %5, %cst_370 {dimension_numbers = #tpu.dot_dimension_numbers<[1], [0], [0], [1], [0, 0, 1, 1], [], []>} : vector<6x32xf32>, vector<32x96xf32>, vector<6x96xf32> -> vector<6x96xf32>
    %550 = vector.broadcast %7 : vector<1x96xf32> to vector<6x96xf32>
    %551 = arith.addf %549, %550 : vector<6x96xf32>
    %c1_371 = arith.constant 1 : index
    %c0_372 = arith.constant 0 : index
    %c0_373 = arith.constant 0 : index
    %552 = vector.load %arg30[%c1_371, %c0_372, %c0_373] : memref<2x6x96xf32, #tpu.memory_space<vmem>>, vector<1x6x96xf32>
    %553 = vector.shape_cast %552 : vector<1x6x96xf32> to vector<6x96xf32>
    %554 = vector.shape_cast %551 : vector<6x96xf32> to vector<1x6x96xf32>
    tpu.vector_store %arg30[%c1_371, %c0_372, %c0_373], %554 {strides = array<i32>} : memref<2x6x96xf32, #tpu.memory_space<vmem>>, vector<1x6x96xf32>,
    %c1_374 = arith.constant 1 : index
    %c0_375 = arith.constant 0 : index
    %c0_376 = arith.constant 0 : index
    %555 = vector.load %arg30[%c1_374, %c0_375, %c0_376] : memref<2x6x96xf32, #tpu.memory_space<vmem>>, vector<1x6x4xf32>
    %556 = vector.shape_cast %555 : vector<1x6x4xf32> to vector<6x4xf32>
    %cst_377 = arith.constant 5.000000e-01 : f32
    %557 = vector.broadcast %cst_377 : f32 to vector<6x4xf32>
    %558 = arith.mulf %556, %557 : vector<6x4xf32>
    %c1_378 = arith.constant 1 : index
    %c0_379 = arith.constant 0 : index
    %c32_380 = arith.constant 32 : index
    %559 = vector.load %arg30[%c1_378, %c0_379, %c32_380] : memref<2x6x96xf32, #tpu.memory_space<vmem>>, vector<1x6x4xf32>
    %560 = vector.shape_cast %559 : vector<1x6x4xf32> to vector<6x4xf32>
    %c1_381 = arith.constant 1 : index
    %c0_382 = arith.constant 0 : index
    %c64_383 = arith.constant 64 : index
    %561 = vector.load %arg30[%c1_381, %c0_382, %c64_383] : memref<2x6x96xf32, #tpu.memory_space<vmem>>, vector<1x6x4xf32>
    %562 = vector.shape_cast %561 : vector<1x6x4xf32> to vector<6x4xf32>
    %cst_384 = arith.constant dense<0.000000e+00> : vector<6x6xf32>
    %563 = tpu.matmul %558, %560, %cst_384 {dimension_numbers = #tpu.dot_dimension_numbers<[1], [1], [0], [0], [0, 0, 1, 0], [], []>} : vector<6x4xf32>, vector<6x4xf32>, vector<6x6xf32> -> vector<6x6xf32>
    %cst_385 = arith.constant -1.000000e+30 : f32
    %564 = vector.shape_cast %42 : vector<1x6xi1> to vector<1x6xi1>
    %565 = vector.broadcast %564 : vector<1x6xi1> to vector<6x6xi1>
    %566 = vector.broadcast %cst_385 : f32 to vector<6x6xf32>
    %567 = arith.select %565, %563, %566 : vector<6x6xi1>, vector<6x6xf32>
    %cst_386 = arith.constant dense<0xFF800000> : vector<6xf32>
    %568 = vector.multi_reduction <maximumf>, %567, %cst_386 [1] : vector<6x6xf32> to vector<6xf32>
    %569 = vector.shape_cast %568 : vector<6xf32> to vector<6x1xf32>
    %570 = vector.broadcast %569 : vector<6x1xf32> to vector<6x6xf32>
    %571 = arith.subf %567, %570 : vector<6x6xf32>
    %572 = math.exp %571 : vector<6x6xf32>
    %cst_387 = arith.constant dense<0.000000e+00> : vector<6xf32>
    %573 = vector.multi_reduction <add>, %572, %cst_387 [1] : vector<6x6xf32> to vector<6xf32>
    %574 = vector.shape_cast %573 : vector<6xf32> to vector<6x1xf32>
    %575 = tpu.reciprocal %574 {approx = true} : vector<6x1xf32> -> vector<6x1xf32>
    %576 = vector.broadcast %575 : vector<6x1xf32> to vector<6x6xf32>
    %577 = arith.mulf %572, %576 : vector<6x6xf32>
    %cst_388 = arith.constant dense<0.000000e+00> : vector<6x4xf32>
    %578 = tpu.matmul %577, %562, %cst_388 {dimension_numbers = #tpu.dot_dimension_numbers<[1], [0], [0], [1], [0, 0, 1, 1], [], []>} : vector<6x6xf32>, vector<6x4xf32>, vector<6x4xf32> -> vector<6x4xf32>
    %c1_389 = arith.constant 1 : index
    %c0_390 = arith.constant 0 : index
    %c0_391 = arith.constant 0 : index
    %579 = vector.load %arg32[%c1_389, %c0_390, %c0_391] : memref<2x6x32xf32, #tpu.memory_space<vmem>>, vector<1x6x4xf32>
    %580 = vector.shape_cast %579 : vector<1x6x4xf32> to vector<6x4xf32>
    %581 = vector.shape_cast %578 : vector<6x4xf32> to vector<1x6x4xf32>
    tpu.vector_store %arg32[%c1_389, %c0_390, %c0_391], %581 {strides = array<i32>} : memref<2x6x32xf32, #tpu.memory_space<vmem>>, vector<1x6x4xf32>,
    %c1_392 = arith.constant 1 : index
    %c0_393 = arith.constant 0 : index
    %c4_394 = arith.constant 4 : index
    %582 = vector.load %arg30[%c1_392, %c0_393, %c4_394] : memref<2x6x96xf32, #tpu.memory_space<vmem>>, vector<1x6x4xf32>
    %583 = vector.shape_cast %582 : vector<1x6x4xf32> to vector<6x4xf32>
    %cst_395 = arith.constant 5.000000e-01 : f32
    %584 = vector.broadcast %cst_395 : f32 to vector<6x4xf32>
    %585 = arith.mulf %583, %584 : vector<6x4xf32>
    %c1_396 = arith.constant 1 : index
    %c0_397 = arith.constant 0 : index
    %c36_398 = arith.constant 36 : index
    %586 = vector.load %arg30[%c1_396, %c0_397, %c36_398] : memref<2x6x96xf32, #tpu.memory_space<vmem>>, vector<1x6x4xf32>
    %587 = vector.shape_cast %586 : vector<1x6x4xf32> to vector<6x4xf32>
    %c1_399 = arith.constant 1 : index
    %c0_400 = arith.constant 0 : index
    %c68_401 = arith.constant 68 : index
    %588 = vector.load %arg30[%c1_399, %c0_400, %c68_401] : memref<2x6x96xf32, #tpu.memory_space<vmem>>, vector<1x6x4xf32>
    %589 = vector.shape_cast %588 : vector<1x6x4xf32> to vector<6x4xf32>
    %cst_402 = arith.constant dense<0.000000e+00> : vector<6x6xf32>
    %590 = tpu.matmul %585, %587, %cst_402 {dimension_numbers = #tpu.dot_dimension_numbers<[1], [1], [0], [0], [0, 0, 1, 0], [], []>} : vector<6x4xf32>, vector<6x4xf32>, vector<6x6xf32> -> vector<6x6xf32>
    %cst_403 = arith.constant -1.000000e+30 : f32
    %591 = vector.shape_cast %42 : vector<1x6xi1> to vector<1x6xi1>
    %592 = vector.broadcast %591 : vector<1x6xi1> to vector<6x6xi1>
    %593 = vector.broadcast %cst_403 : f32 to vector<6x6xf32>
    %594 = arith.select %592, %590, %593 : vector<6x6xi1>, vector<6x6xf32>
    %cst_404 = arith.constant dense<0xFF800000> : vector<6xf32>
    %595 = vector.multi_reduction <maximumf>, %594, %cst_404 [1] : vector<6x6xf32> to vector<6xf32>
    %596 = vector.shape_cast %595 : vector<6xf32> to vector<6x1xf32>
    %597 = vector.broadcast %596 : vector<6x1xf32> to vector<6x6xf32>
    %598 = arith.subf %594, %597 : vector<6x6xf32>
    %599 = math.exp %598 : vector<6x6xf32>
    %cst_405 = arith.constant dense<0.000000e+00> : vector<6xf32>
    %600 = vector.multi_reduction <add>, %599, %cst_405 [1] : vector<6x6xf32> to vector<6xf32>
    %601 = vector.shape_cast %600 : vector<6xf32> to vector<6x1xf32>
    %602 = tpu.reciprocal %601 {approx = true} : vector<6x1xf32> -> vector<6x1xf32>
    %603 = vector.broadcast %602 : vector<6x1xf32> to vector<6x6xf32>
    %604 = arith.mulf %599, %603 : vector<6x6xf32>
    %cst_406 = arith.constant dense<0.000000e+00> : vector<6x4xf32>
    %605 = tpu.matmul %604, %589, %cst_406 {dimension_numbers = #tpu.dot_dimension_numbers<[1], [0], [0], [1], [0, 0, 1, 1], [], []>} : vector<6x6xf32>, vector<6x4xf32>, vector<6x4xf32> -> vector<6x4xf32>
    %c1_407 = arith.constant 1 : index
    %c0_408 = arith.constant 0 : index
    %c4_409 = arith.constant 4 : index
    %606 = vector.load %arg32[%c1_407, %c0_408, %c4_409] : memref<2x6x32xf32, #tpu.memory_space<vmem>>, vector<1x6x4xf32>
    %607 = vector.shape_cast %606 : vector<1x6x4xf32> to vector<6x4xf32>
    %608 = vector.shape_cast %605 : vector<6x4xf32> to vector<1x6x4xf32>
    tpu.vector_store %arg32[%c1_407, %c0_408, %c4_409], %608 {strides = array<i32>} : memref<2x6x32xf32, #tpu.memory_space<vmem>>, vector<1x6x4xf32>,
    %c1_410 = arith.constant 1 : index
    %c0_411 = arith.constant 0 : index
    %c8_412 = arith.constant 8 : index
    %609 = vector.load %arg30[%c1_410, %c0_411, %c8_412] : memref<2x6x96xf32, #tpu.memory_space<vmem>>, vector<1x6x4xf32>
    %610 = vector.shape_cast %609 : vector<1x6x4xf32> to vector<6x4xf32>
    %cst_413 = arith.constant 5.000000e-01 : f32
    %611 = vector.broadcast %cst_413 : f32 to vector<6x4xf32>
    %612 = arith.mulf %610, %611 : vector<6x4xf32>
    %c1_414 = arith.constant 1 : index
    %c0_415 = arith.constant 0 : index
    %c40_416 = arith.constant 40 : index
    %613 = vector.load %arg30[%c1_414, %c0_415, %c40_416] : memref<2x6x96xf32, #tpu.memory_space<vmem>>, vector<1x6x4xf32>
    %614 = vector.shape_cast %613 : vector<1x6x4xf32> to vector<6x4xf32>
    %c1_417 = arith.constant 1 : index
    %c0_418 = arith.constant 0 : index
    %c72_419 = arith.constant 72 : index
    %615 = vector.load %arg30[%c1_417, %c0_418, %c72_419] : memref<2x6x96xf32, #tpu.memory_space<vmem>>, vector<1x6x4xf32>
    %616 = vector.shape_cast %615 : vector<1x6x4xf32> to vector<6x4xf32>
    %cst_420 = arith.constant dense<0.000000e+00> : vector<6x6xf32>
    %617 = tpu.matmul %612, %614, %cst_420 {dimension_numbers = #tpu.dot_dimension_numbers<[1], [1], [0], [0], [0, 0, 1, 0], [], []>} : vector<6x4xf32>, vector<6x4xf32>, vector<6x6xf32> -> vector<6x6xf32>
    %cst_421 = arith.constant -1.000000e+30 : f32
    %618 = vector.shape_cast %42 : vector<1x6xi1> to vector<1x6xi1>
    %619 = vector.broadcast %618 : vector<1x6xi1> to vector<6x6xi1>
    %620 = vector.broadcast %cst_421 : f32 to vector<6x6xf32>
    %621 = arith.select %619, %617, %620 : vector<6x6xi1>, vector<6x6xf32>
    %cst_422 = arith.constant dense<0xFF800000> : vector<6xf32>
    %622 = vector.multi_reduction <maximumf>, %621, %cst_422 [1] : vector<6x6xf32> to vector<6xf32>
    %623 = vector.shape_cast %622 : vector<6xf32> to vector<6x1xf32>
    %624 = vector.broadcast %623 : vector<6x1xf32> to vector<6x6xf32>
    %625 = arith.subf %621, %624 : vector<6x6xf32>
    %626 = math.exp %625 : vector<6x6xf32>
    %cst_423 = arith.constant dense<0.000000e+00> : vector<6xf32>
    %627 = vector.multi_reduction <add>, %626, %cst_423 [1] : vector<6x6xf32> to vector<6xf32>
    %628 = vector.shape_cast %627 : vector<6xf32> to vector<6x1xf32>
    %629 = tpu.reciprocal %628 {approx = true} : vector<6x1xf32> -> vector<6x1xf32>
    %630 = vector.broadcast %629 : vector<6x1xf32> to vector<6x6xf32>
    %631 = arith.mulf %626, %630 : vector<6x6xf32>
    %cst_424 = arith.constant dense<0.000000e+00> : vector<6x4xf32>
    %632 = tpu.matmul %631, %616, %cst_424 {dimension_numbers = #tpu.dot_dimension_numbers<[1], [0], [0], [1], [0, 0, 1, 1], [], []>} : vector<6x6xf32>, vector<6x4xf32>, vector<6x4xf32> -> vector<6x4xf32>
    %c1_425 = arith.constant 1 : index
    %c0_426 = arith.constant 0 : index
    %c8_427 = arith.constant 8 : index
    %633 = vector.load %arg32[%c1_425, %c0_426, %c8_427] : memref<2x6x32xf32, #tpu.memory_space<vmem>>, vector<1x6x4xf32>
    %634 = vector.shape_cast %633 : vector<1x6x4xf32> to vector<6x4xf32>
    %635 = vector.shape_cast %632 : vector<6x4xf32> to vector<1x6x4xf32>
    tpu.vector_store %arg32[%c1_425, %c0_426, %c8_427], %635 {strides = array<i32>} : memref<2x6x32xf32, #tpu.memory_space<vmem>>, vector<1x6x4xf32>,
    %c1_428 = arith.constant 1 : index
    %c0_429 = arith.constant 0 : index
    %c12_430 = arith.constant 12 : index
    %636 = vector.load %arg30[%c1_428, %c0_429, %c12_430] : memref<2x6x96xf32, #tpu.memory_space<vmem>>, vector<1x6x4xf32>
    %637 = vector.shape_cast %636 : vector<1x6x4xf32> to vector<6x4xf32>
    %cst_431 = arith.constant 5.000000e-01 : f32
    %638 = vector.broadcast %cst_431 : f32 to vector<6x4xf32>
    %639 = arith.mulf %637, %638 : vector<6x4xf32>
    %c1_432 = arith.constant 1 : index
    %c0_433 = arith.constant 0 : index
    %c44_434 = arith.constant 44 : index
    %640 = vector.load %arg30[%c1_432, %c0_433, %c44_434] : memref<2x6x96xf32, #tpu.memory_space<vmem>>, vector<1x6x4xf32>
    %641 = vector.shape_cast %640 : vector<1x6x4xf32> to vector<6x4xf32>
    %c1_435 = arith.constant 1 : index
    %c0_436 = arith.constant 0 : index
    %c76_437 = arith.constant 76 : index
    %642 = vector.load %arg30[%c1_435, %c0_436, %c76_437] : memref<2x6x96xf32, #tpu.memory_space<vmem>>, vector<1x6x4xf32>
    %643 = vector.shape_cast %642 : vector<1x6x4xf32> to vector<6x4xf32>
    %cst_438 = arith.constant dense<0.000000e+00> : vector<6x6xf32>
    %644 = tpu.matmul %639, %641, %cst_438 {dimension_numbers = #tpu.dot_dimension_numbers<[1], [1], [0], [0], [0, 0, 1, 0], [], []>} : vector<6x4xf32>, vector<6x4xf32>, vector<6x6xf32> -> vector<6x6xf32>
    %cst_439 = arith.constant -1.000000e+30 : f32
    %645 = vector.shape_cast %42 : vector<1x6xi1> to vector<1x6xi1>
    %646 = vector.broadcast %645 : vector<1x6xi1> to vector<6x6xi1>
    %647 = vector.broadcast %cst_439 : f32 to vector<6x6xf32>
    %648 = arith.select %646, %644, %647 : vector<6x6xi1>, vector<6x6xf32>
    %cst_440 = arith.constant dense<0xFF800000> : vector<6xf32>
    %649 = vector.multi_reduction <maximumf>, %648, %cst_440 [1] : vector<6x6xf32> to vector<6xf32>
    %650 = vector.shape_cast %649 : vector<6xf32> to vector<6x1xf32>
    %651 = vector.broadcast %650 : vector<6x1xf32> to vector<6x6xf32>
    %652 = arith.subf %648, %651 : vector<6x6xf32>
    %653 = math.exp %652 : vector<6x6xf32>
    %cst_441 = arith.constant dense<0.000000e+00> : vector<6xf32>
    %654 = vector.multi_reduction <add>, %653, %cst_441 [1] : vector<6x6xf32> to vector<6xf32>
    %655 = vector.shape_cast %654 : vector<6xf32> to vector<6x1xf32>
    %656 = tpu.reciprocal %655 {approx = true} : vector<6x1xf32> -> vector<6x1xf32>
    %657 = vector.broadcast %656 : vector<6x1xf32> to vector<6x6xf32>
    %658 = arith.mulf %653, %657 : vector<6x6xf32>
    %cst_442 = arith.constant dense<0.000000e+00> : vector<6x4xf32>
    %659 = tpu.matmul %658, %643, %cst_442 {dimension_numbers = #tpu.dot_dimension_numbers<[1], [0], [0], [1], [0, 0, 1, 1], [], []>} : vector<6x6xf32>, vector<6x4xf32>, vector<6x4xf32> -> vector<6x4xf32>
    %c1_443 = arith.constant 1 : index
    %c0_444 = arith.constant 0 : index
    %c12_445 = arith.constant 12 : index
    %660 = vector.load %arg32[%c1_443, %c0_444, %c12_445] : memref<2x6x32xf32, #tpu.memory_space<vmem>>, vector<1x6x4xf32>
    %661 = vector.shape_cast %660 : vector<1x6x4xf32> to vector<6x4xf32>
    %662 = vector.shape_cast %659 : vector<6x4xf32> to vector<1x6x4xf32>
    tpu.vector_store %arg32[%c1_443, %c0_444, %c12_445], %662 {strides = array<i32>} : memref<2x6x32xf32, #tpu.memory_space<vmem>>, vector<1x6x4xf32>,
    %c1_446 = arith.constant 1 : index
    %c0_447 = arith.constant 0 : index
    %c16_448 = arith.constant 16 : index
    %663 = vector.load %arg30[%c1_446, %c0_447, %c16_448] : memref<2x6x96xf32, #tpu.memory_space<vmem>>, vector<1x6x4xf32>
    %664 = vector.shape_cast %663 : vector<1x6x4xf32> to vector<6x4xf32>
    %cst_449 = arith.constant 5.000000e-01 : f32
    %665 = vector.broadcast %cst_449 : f32 to vector<6x4xf32>
    %666 = arith.mulf %664, %665 : vector<6x4xf32>
    %c1_450 = arith.constant 1 : index
    %c0_451 = arith.constant 0 : index
    %c48_452 = arith.constant 48 : index
    %667 = vector.load %arg30[%c1_450, %c0_451, %c48_452] : memref<2x6x96xf32, #tpu.memory_space<vmem>>, vector<1x6x4xf32>
    %668 = vector.shape_cast %667 : vector<1x6x4xf32> to vector<6x4xf32>
    %c1_453 = arith.constant 1 : index
    %c0_454 = arith.constant 0 : index
    %c80_455 = arith.constant 80 : index
    %669 = vector.load %arg30[%c1_453, %c0_454, %c80_455] : memref<2x6x96xf32, #tpu.memory_space<vmem>>, vector<1x6x4xf32>
    %670 = vector.shape_cast %669 : vector<1x6x4xf32> to vector<6x4xf32>
    %cst_456 = arith.constant dense<0.000000e+00> : vector<6x6xf32>
    %671 = tpu.matmul %666, %668, %cst_456 {dimension_numbers = #tpu.dot_dimension_numbers<[1], [1], [0], [0], [0, 0, 1, 0], [], []>} : vector<6x4xf32>, vector<6x4xf32>, vector<6x6xf32> -> vector<6x6xf32>
    %cst_457 = arith.constant -1.000000e+30 : f32
    %672 = vector.shape_cast %42 : vector<1x6xi1> to vector<1x6xi1>
    %673 = vector.broadcast %672 : vector<1x6xi1> to vector<6x6xi1>
    %674 = vector.broadcast %cst_457 : f32 to vector<6x6xf32>
    %675 = arith.select %673, %671, %674 : vector<6x6xi1>, vector<6x6xf32>
    %cst_458 = arith.constant dense<0xFF800000> : vector<6xf32>
    %676 = vector.multi_reduction <maximumf>, %675, %cst_458 [1] : vector<6x6xf32> to vector<6xf32>
    %677 = vector.shape_cast %676 : vector<6xf32> to vector<6x1xf32>
    %678 = vector.broadcast %677 : vector<6x1xf32> to vector<6x6xf32>
    %679 = arith.subf %675, %678 : vector<6x6xf32>
    %680 = math.exp %679 : vector<6x6xf32>
    %cst_459 = arith.constant dense<0.000000e+00> : vector<6xf32>
    %681 = vector.multi_reduction <add>, %680, %cst_459 [1] : vector<6x6xf32> to vector<6xf32>
    %682 = vector.shape_cast %681 : vector<6xf32> to vector<6x1xf32>
    %683 = tpu.reciprocal %682 {approx = true} : vector<6x1xf32> -> vector<6x1xf32>
    %684 = vector.broadcast %683 : vector<6x1xf32> to vector<6x6xf32>
    %685 = arith.mulf %680, %684 : vector<6x6xf32>
    %cst_460 = arith.constant dense<0.000000e+00> : vector<6x4xf32>
    %686 = tpu.matmul %685, %670, %cst_460 {dimension_numbers = #tpu.dot_dimension_numbers<[1], [0], [0], [1], [0, 0, 1, 1], [], []>} : vector<6x6xf32>, vector<6x4xf32>, vector<6x4xf32> -> vector<6x4xf32>
    %c1_461 = arith.constant 1 : index
    %c0_462 = arith.constant 0 : index
    %c16_463 = arith.constant 16 : index
    %687 = vector.load %arg32[%c1_461, %c0_462, %c16_463] : memref<2x6x32xf32, #tpu.memory_space<vmem>>, vector<1x6x4xf32>
    %688 = vector.shape_cast %687 : vector<1x6x4xf32> to vector<6x4xf32>
    %689 = vector.shape_cast %686 : vector<6x4xf32> to vector<1x6x4xf32>
    tpu.vector_store %arg32[%c1_461, %c0_462, %c16_463], %689 {strides = array<i32>} : memref<2x6x32xf32, #tpu.memory_space<vmem>>, vector<1x6x4xf32>,
    %c1_464 = arith.constant 1 : index
    %c0_465 = arith.constant 0 : index
    %c20_466 = arith.constant 20 : index
    %690 = vector.load %arg30[%c1_464, %c0_465, %c20_466] : memref<2x6x96xf32, #tpu.memory_space<vmem>>, vector<1x6x4xf32>
    %691 = vector.shape_cast %690 : vector<1x6x4xf32> to vector<6x4xf32>
    %cst_467 = arith.constant 5.000000e-01 : f32
    %692 = vector.broadcast %cst_467 : f32 to vector<6x4xf32>
    %693 = arith.mulf %691, %692 : vector<6x4xf32>
    %c1_468 = arith.constant 1 : index
    %c0_469 = arith.constant 0 : index
    %c52_470 = arith.constant 52 : index
    %694 = vector.load %arg30[%c1_468, %c0_469, %c52_470] : memref<2x6x96xf32, #tpu.memory_space<vmem>>, vector<1x6x4xf32>
    %695 = vector.shape_cast %694 : vector<1x6x4xf32> to vector<6x4xf32>
    %c1_471 = arith.constant 1 : index
    %c0_472 = arith.constant 0 : index
    %c84_473 = arith.constant 84 : index
    %696 = vector.load %arg30[%c1_471, %c0_472, %c84_473] : memref<2x6x96xf32, #tpu.memory_space<vmem>>, vector<1x6x4xf32>
    %697 = vector.shape_cast %696 : vector<1x6x4xf32> to vector<6x4xf32>
    %cst_474 = arith.constant dense<0.000000e+00> : vector<6x6xf32>
    %698 = tpu.matmul %693, %695, %cst_474 {dimension_numbers = #tpu.dot_dimension_numbers<[1], [1], [0], [0], [0, 0, 1, 0], [], []>} : vector<6x4xf32>, vector<6x4xf32>, vector<6x6xf32> -> vector<6x6xf32>
    %cst_475 = arith.constant -1.000000e+30 : f32
    %699 = vector.shape_cast %42 : vector<1x6xi1> to vector<1x6xi1>
    %700 = vector.broadcast %699 : vector<1x6xi1> to vector<6x6xi1>
    %701 = vector.broadcast %cst_475 : f32 to vector<6x6xf32>
    %702 = arith.select %700, %698, %701 : vector<6x6xi1>, vector<6x6xf32>
    %cst_476 = arith.constant dense<0xFF800000> : vector<6xf32>
    %703 = vector.multi_reduction <maximumf>, %702, %cst_476 [1] : vector<6x6xf32> to vector<6xf32>
    %704 = vector.shape_cast %703 : vector<6xf32> to vector<6x1xf32>
    %705 = vector.broadcast %704 : vector<6x1xf32> to vector<6x6xf32>
    %706 = arith.subf %702, %705 : vector<6x6xf32>
    %707 = math.exp %706 : vector<6x6xf32>
    %cst_477 = arith.constant dense<0.000000e+00> : vector<6xf32>
    %708 = vector.multi_reduction <add>, %707, %cst_477 [1] : vector<6x6xf32> to vector<6xf32>
    %709 = vector.shape_cast %708 : vector<6xf32> to vector<6x1xf32>
    %710 = tpu.reciprocal %709 {approx = true} : vector<6x1xf32> -> vector<6x1xf32>
    %711 = vector.broadcast %710 : vector<6x1xf32> to vector<6x6xf32>
    %712 = arith.mulf %707, %711 : vector<6x6xf32>
    %cst_478 = arith.constant dense<0.000000e+00> : vector<6x4xf32>
    %713 = tpu.matmul %712, %697, %cst_478 {dimension_numbers = #tpu.dot_dimension_numbers<[1], [0], [0], [1], [0, 0, 1, 1], [], []>} : vector<6x6xf32>, vector<6x4xf32>, vector<6x4xf32> -> vector<6x4xf32>
    %c1_479 = arith.constant 1 : index
    %c0_480 = arith.constant 0 : index
    %c20_481 = arith.constant 20 : index
    %714 = vector.load %arg32[%c1_479, %c0_480, %c20_481] : memref<2x6x32xf32, #tpu.memory_space<vmem>>, vector<1x6x4xf32>
    %715 = vector.shape_cast %714 : vector<1x6x4xf32> to vector<6x4xf32>
    %716 = vector.shape_cast %713 : vector<6x4xf32> to vector<1x6x4xf32>
    tpu.vector_store %arg32[%c1_479, %c0_480, %c20_481], %716 {strides = array<i32>} : memref<2x6x32xf32, #tpu.memory_space<vmem>>, vector<1x6x4xf32>,
    %c1_482 = arith.constant 1 : index
    %c0_483 = arith.constant 0 : index
    %c24_484 = arith.constant 24 : index
    %717 = vector.load %arg30[%c1_482, %c0_483, %c24_484] : memref<2x6x96xf32, #tpu.memory_space<vmem>>, vector<1x6x4xf32>
    %718 = vector.shape_cast %717 : vector<1x6x4xf32> to vector<6x4xf32>
    %cst_485 = arith.constant 5.000000e-01 : f32
    %719 = vector.broadcast %cst_485 : f32 to vector<6x4xf32>
    %720 = arith.mulf %718, %719 : vector<6x4xf32>
    %c1_486 = arith.constant 1 : index
    %c0_487 = arith.constant 0 : index
    %c56_488 = arith.constant 56 : index
    %721 = vector.load %arg30[%c1_486, %c0_487, %c56_488] : memref<2x6x96xf32, #tpu.memory_space<vmem>>, vector<1x6x4xf32>
    %722 = vector.shape_cast %721 : vector<1x6x4xf32> to vector<6x4xf32>
    %c1_489 = arith.constant 1 : index
    %c0_490 = arith.constant 0 : index
    %c88_491 = arith.constant 88 : index
    %723 = vector.load %arg30[%c1_489, %c0_490, %c88_491] : memref<2x6x96xf32, #tpu.memory_space<vmem>>, vector<1x6x4xf32>
    %724 = vector.shape_cast %723 : vector<1x6x4xf32> to vector<6x4xf32>
    %cst_492 = arith.constant dense<0.000000e+00> : vector<6x6xf32>
    %725 = tpu.matmul %720, %722, %cst_492 {dimension_numbers = #tpu.dot_dimension_numbers<[1], [1], [0], [0], [0, 0, 1, 0], [], []>} : vector<6x4xf32>, vector<6x4xf32>, vector<6x6xf32> -> vector<6x6xf32>
    %cst_493 = arith.constant -1.000000e+30 : f32
    %726 = vector.shape_cast %42 : vector<1x6xi1> to vector<1x6xi1>
    %727 = vector.broadcast %726 : vector<1x6xi1> to vector<6x6xi1>
    %728 = vector.broadcast %cst_493 : f32 to vector<6x6xf32>
    %729 = arith.select %727, %725, %728 : vector<6x6xi1>, vector<6x6xf32>
    %cst_494 = arith.constant dense<0xFF800000> : vector<6xf32>
    %730 = vector.multi_reduction <maximumf>, %729, %cst_494 [1] : vector<6x6xf32> to vector<6xf32>
    %731 = vector.shape_cast %730 : vector<6xf32> to vector<6x1xf32>
    %732 = vector.broadcast %731 : vector<6x1xf32> to vector<6x6xf32>
    %733 = arith.subf %729, %732 : vector<6x6xf32>
    %734 = math.exp %733 : vector<6x6xf32>
    %cst_495 = arith.constant dense<0.000000e+00> : vector<6xf32>
    %735 = vector.multi_reduction <add>, %734, %cst_495 [1] : vector<6x6xf32> to vector<6xf32>
    %736 = vector.shape_cast %735 : vector<6xf32> to vector<6x1xf32>
    %737 = tpu.reciprocal %736 {approx = true} : vector<6x1xf32> -> vector<6x1xf32>
    %738 = vector.broadcast %737 : vector<6x1xf32> to vector<6x6xf32>
    %739 = arith.mulf %734, %738 : vector<6x6xf32>
    %cst_496 = arith.constant dense<0.000000e+00> : vector<6x4xf32>
    %740 = tpu.matmul %739, %724, %cst_496 {dimension_numbers = #tpu.dot_dimension_numbers<[1], [0], [0], [1], [0, 0, 1, 1], [], []>} : vector<6x6xf32>, vector<6x4xf32>, vector<6x4xf32> -> vector<6x4xf32>
    %c1_497 = arith.constant 1 : index
    %c0_498 = arith.constant 0 : index
    %c24_499 = arith.constant 24 : index
    %741 = vector.load %arg32[%c1_497, %c0_498, %c24_499] : memref<2x6x32xf32, #tpu.memory_space<vmem>>, vector<1x6x4xf32>
    %742 = vector.shape_cast %741 : vector<1x6x4xf32> to vector<6x4xf32>
    %743 = vector.shape_cast %740 : vector<6x4xf32> to vector<1x6x4xf32>
    tpu.vector_store %arg32[%c1_497, %c0_498, %c24_499], %743 {strides = array<i32>} : memref<2x6x32xf32, #tpu.memory_space<vmem>>, vector<1x6x4xf32>,
    %c1_500 = arith.constant 1 : index
    %c0_501 = arith.constant 0 : index
    %c28_502 = arith.constant 28 : index
    %744 = vector.load %arg30[%c1_500, %c0_501, %c28_502] : memref<2x6x96xf32, #tpu.memory_space<vmem>>, vector<1x6x4xf32>
    %745 = vector.shape_cast %744 : vector<1x6x4xf32> to vector<6x4xf32>
    %cst_503 = arith.constant 5.000000e-01 : f32
    %746 = vector.broadcast %cst_503 : f32 to vector<6x4xf32>
    %747 = arith.mulf %745, %746 : vector<6x4xf32>
    %c1_504 = arith.constant 1 : index
    %c0_505 = arith.constant 0 : index
    %c60_506 = arith.constant 60 : index
    %748 = vector.load %arg30[%c1_504, %c0_505, %c60_506] : memref<2x6x96xf32, #tpu.memory_space<vmem>>, vector<1x6x4xf32>
    %749 = vector.shape_cast %748 : vector<1x6x4xf32> to vector<6x4xf32>
    %c1_507 = arith.constant 1 : index
    %c0_508 = arith.constant 0 : index
    %c92_509 = arith.constant 92 : index
    %750 = vector.load %arg30[%c1_507, %c0_508, %c92_509] : memref<2x6x96xf32, #tpu.memory_space<vmem>>, vector<1x6x4xf32>
    %751 = vector.shape_cast %750 : vector<1x6x4xf32> to vector<6x4xf32>
    %cst_510 = arith.constant dense<0.000000e+00> : vector<6x6xf32>
    %752 = tpu.matmul %747, %749, %cst_510 {dimension_numbers = #tpu.dot_dimension_numbers<[1], [1], [0], [0], [0, 0, 1, 0], [], []>} : vector<6x4xf32>, vector<6x4xf32>, vector<6x6xf32> -> vector<6x6xf32>
    %cst_511 = arith.constant -1.000000e+30 : f32
    %753 = vector.shape_cast %42 : vector<1x6xi1> to vector<1x6xi1>
    %754 = vector.broadcast %753 : vector<1x6xi1> to vector<6x6xi1>
    %755 = vector.broadcast %cst_511 : f32 to vector<6x6xf32>
    %756 = arith.select %754, %752, %755 : vector<6x6xi1>, vector<6x6xf32>
    %cst_512 = arith.constant dense<0xFF800000> : vector<6xf32>
    %757 = vector.multi_reduction <maximumf>, %756, %cst_512 [1] : vector<6x6xf32> to vector<6xf32>
    %758 = vector.shape_cast %757 : vector<6xf32> to vector<6x1xf32>
    %759 = vector.broadcast %758 : vector<6x1xf32> to vector<6x6xf32>
    %760 = arith.subf %756, %759 : vector<6x6xf32>
    %761 = math.exp %760 : vector<6x6xf32>
    %cst_513 = arith.constant dense<0.000000e+00> : vector<6xf32>
    %762 = vector.multi_reduction <add>, %761, %cst_513 [1] : vector<6x6xf32> to vector<6xf32>
    %763 = vector.shape_cast %762 : vector<6xf32> to vector<6x1xf32>
    %764 = tpu.reciprocal %763 {approx = true} : vector<6x1xf32> -> vector<6x1xf32>
    %765 = vector.broadcast %764 : vector<6x1xf32> to vector<6x6xf32>
    %766 = arith.mulf %761, %765 : vector<6x6xf32>
    %cst_514 = arith.constant dense<0.000000e+00> : vector<6x4xf32>
    %767 = tpu.matmul %766, %751, %cst_514 {dimension_numbers = #tpu.dot_dimension_numbers<[1], [0], [0], [1], [0, 0, 1, 1], [], []>} : vector<6x6xf32>, vector<6x4xf32>, vector<6x4xf32> -> vector<6x4xf32>
    %c1_515 = arith.constant 1 : index
    %c0_516 = arith.constant 0 : index
    %c28_517 = arith.constant 28 : index
    %768 = vector.load %arg32[%c1_515, %c0_516, %c28_517] : memref<2x6x32xf32, #tpu.memory_space<vmem>>, vector<1x6x4xf32>
    %769 = vector.shape_cast %768 : vector<1x6x4xf32> to vector<6x4xf32>
    %770 = vector.shape_cast %767 : vector<6x4xf32> to vector<1x6x4xf32>
    tpu.vector_store %arg32[%c1_515, %c0_516, %c28_517], %770 {strides = array<i32>} : memref<2x6x32xf32, #tpu.memory_space<vmem>>, vector<1x6x4xf32>,
    %c1_518 = arith.constant 1 : index
    %c0_519 = arith.constant 0 : index
    %c0_520 = arith.constant 0 : index
    %771 = vector.load %arg32[%c1_518, %c0_519, %c0_520] : memref<2x6x32xf32, #tpu.memory_space<vmem>>, vector<1x6x32xf32>
    %772 = vector.shape_cast %771 : vector<1x6x32xf32> to vector<6x32xf32>
    %cst_521 = arith.constant dense<0.000000e+00> : vector<6x32xf32>
    %773 = tpu.matmul %772, %9, %cst_521 {dimension_numbers = #tpu.dot_dimension_numbers<[1], [0], [0], [1], [0, 0, 1, 1], [], []>} : vector<6x32xf32>, vector<32x32xf32>, vector<6x32xf32> -> vector<6x32xf32>
    %774 = vector.broadcast %11 : vector<1x32xf32> to vector<6x32xf32>
    %775 = arith.addf %773, %774 : vector<6x32xf32>
    %776 = arith.addf %548, %775 : vector<6x32xf32>
    %cst_522 = arith.constant dense<0.000000e+00> : vector<6xf32>
    %777 = vector.multi_reduction <add>, %776, %cst_522 [1] : vector<6x32xf32> to vector<6xf32>
    %778 = vector.shape_cast %777 : vector<6xf32> to vector<6x1xf32>
    %cst_523 = arith.constant 3.200000e+01 : f32
    %779 = vector.broadcast %cst_523 : f32 to vector<6x1xf32>
    %780 = arith.divf %778, %779 : vector<6x1xf32>
    %781 = vector.broadcast %780 : vector<6x1xf32> to vector<6x32xf32>
    %782 = arith.subf %776, %781 : vector<6x32xf32>
    %783 = arith.mulf %782, %782 : vector<6x32xf32>
    %cst_524 = arith.constant dense<0.000000e+00> : vector<6xf32>
    %784 = vector.multi_reduction <add>, %783, %cst_524 [1] : vector<6x32xf32> to vector<6xf32>
    %785 = vector.shape_cast %784 : vector<6xf32> to vector<6x1xf32>
    %cst_525 = arith.constant 3.200000e+01 : f32
    %786 = vector.broadcast %cst_525 : f32 to vector<6x1xf32>
    %787 = arith.divf %785, %786 : vector<6x1xf32>
    %788 = vector.broadcast %780 : vector<6x1xf32> to vector<6x32xf32>
    %789 = arith.subf %776, %788 : vector<6x32xf32>
    %cst_526 = arith.constant 9.99999974E-6 : f32
    %790 = vector.broadcast %cst_526 : f32 to vector<6x1xf32>
    %791 = arith.addf %787, %790 : vector<6x1xf32>
    %792 = math.rsqrt %791 : vector<6x1xf32>
    %793 = vector.broadcast %792 : vector<6x1xf32> to vector<6x32xf32>
    %794 = arith.mulf %789, %793 : vector<6x32xf32>
    %795 = vector.broadcast %13 : vector<1x32xf32> to vector<6x32xf32>
    %796 = arith.mulf %794, %795 : vector<6x32xf32>
    %797 = vector.broadcast %15 : vector<1x32xf32> to vector<6x32xf32>
    %798 = arith.addf %796, %797 : vector<6x32xf32>
    %cst_527 = arith.constant dense<0.000000e+00> : vector<6x32xf32>
    %799 = tpu.matmul %798, %17, %cst_527 {dimension_numbers = #tpu.dot_dimension_numbers<[1], [0], [0], [1], [0, 0, 1, 1], [], []>} : vector<6x32xf32>, vector<32x32xf32>, vector<6x32xf32> -> vector<6x32xf32>
    %800 = vector.broadcast %19 : vector<1x32xf32> to vector<6x32xf32>
    %801 = arith.addf %799, %800 : vector<6x32xf32>
    %c1_528 = arith.constant 1 : index
    %c0_529 = arith.constant 0 : index
    %c0_530 = arith.constant 0 : index
    %802 = vector.load %arg31[%c1_528, %c0_529, %c0_530] : memref<2x6x32xf32, #tpu.memory_space<vmem>>, vector<1x6x32xf32>
    %803 = vector.shape_cast %802 : vector<1x6x32xf32> to vector<6x32xf32>
    %804 = vector.shape_cast %801 : vector<6x32xf32> to vector<1x6x32xf32>
    tpu.vector_store %arg31[%c1_528, %c0_529, %c0_530], %804 {strides = array<i32>} : memref<2x6x32xf32, #tpu.memory_space<vmem>>, vector<1x6x32xf32>,
    %c1_531 = arith.constant 1 : index
    %c0_532 = arith.constant 0 : index
    %c0_533 = arith.constant 0 : index
    %805 = vector.load %arg31[%c1_531, %c0_532, %c0_533] : memref<2x6x32xf32, #tpu.memory_space<vmem>>, vector<1x6x4xf32>
    %806 = vector.shape_cast %805 : vector<1x6x4xf32> to vector<6x4xf32>
    %cst_534 = arith.constant 5.000000e-01 : f32
    %807 = vector.broadcast %cst_534 : f32 to vector<6x4xf32>
    %808 = arith.mulf %806, %807 : vector<6x4xf32>
    %c0_535 = arith.constant 0 : index
    %c1_536 = arith.constant 1 : index
    %c0_537 = arith.constant 0 : index
    %c0_538 = arith.constant 0 : index
    %809 = vector.load %arg5[%c0_535, %c1_536, %c0_537, %c0_538] : memref<1x2x8x64xf32, #tpu.memory_space<vmem>>, vector<1x1x8x4xf32>
    %810 = vector.shape_cast %809 : vector<1x1x8x4xf32> to vector<8x4xf32>
    %c0_539 = arith.constant 0 : index
    %c1_540 = arith.constant 1 : index
    %c0_541 = arith.constant 0 : index
    %c32_542 = arith.constant 32 : index
    %811 = vector.load %arg5[%c0_539, %c1_540, %c0_541, %c32_542] : memref<1x2x8x64xf32, #tpu.memory_space<vmem>>, vector<1x1x8x4xf32>
    %812 = vector.shape_cast %811 : vector<1x1x8x4xf32> to vector<8x4xf32>
    %cst_543 = arith.constant dense<0.000000e+00> : vector<6x8xf32>
    %813 = tpu.matmul %808, %810, %cst_543 {dimension_numbers = #tpu.dot_dimension_numbers<[1], [1], [0], [0], [0, 0, 1, 0], [], []>} : vector<6x4xf32>, vector<8x4xf32>, vector<6x8xf32> -> vector<6x8xf32>
    %cst_544 = arith.constant dense<0xFF800000> : vector<6xf32>
    %814 = vector.multi_reduction <maximumf>, %813, %cst_544 [1] : vector<6x8xf32> to vector<6xf32>
    %815 = vector.shape_cast %814 : vector<6xf32> to vector<6x1xf32>
    %816 = vector.broadcast %815 : vector<6x1xf32> to vector<6x8xf32>
    %817 = arith.subf %813, %816 : vector<6x8xf32>
    %818 = math.exp %817 : vector<6x8xf32>
    %cst_545 = arith.constant dense<0.000000e+00> : vector<6xf32>
    %819 = vector.multi_reduction <add>, %818, %cst_545 [1] : vector<6x8xf32> to vector<6xf32>
    %820 = vector.shape_cast %819 : vector<6xf32> to vector<6x1xf32>
    %821 = tpu.reciprocal %820 {approx = true} : vector<6x1xf32> -> vector<6x1xf32>
    %822 = vector.broadcast %821 : vector<6x1xf32> to vector<6x8xf32>
    %823 = arith.mulf %818, %822 : vector<6x8xf32>
    %cst_546 = arith.constant dense<0.000000e+00> : vector<6x4xf32>
    %824 = tpu.matmul %823, %812, %cst_546 {dimension_numbers = #tpu.dot_dimension_numbers<[1], [0], [0], [1], [0, 0, 1, 1], [], []>} : vector<6x8xf32>, vector<8x4xf32>, vector<6x4xf32> -> vector<6x4xf32>
    %c1_547 = arith.constant 1 : index
    %c0_548 = arith.constant 0 : index
    %c0_549 = arith.constant 0 : index
    %825 = vector.load %arg32[%c1_547, %c0_548, %c0_549] : memref<2x6x32xf32, #tpu.memory_space<vmem>>, vector<1x6x4xf32>
    %826 = vector.shape_cast %825 : vector<1x6x4xf32> to vector<6x4xf32>
    %827 = vector.shape_cast %824 : vector<6x4xf32> to vector<1x6x4xf32>
    tpu.vector_store %arg32[%c1_547, %c0_548, %c0_549], %827 {strides = array<i32>} : memref<2x6x32xf32, #tpu.memory_space<vmem>>, vector<1x6x4xf32>,
    %c1_550 = arith.constant 1 : index
    %c0_551 = arith.constant 0 : index
    %c4_552 = arith.constant 4 : index
    %828 = vector.load %arg31[%c1_550, %c0_551, %c4_552] : memref<2x6x32xf32, #tpu.memory_space<vmem>>, vector<1x6x4xf32>
    %829 = vector.shape_cast %828 : vector<1x6x4xf32> to vector<6x4xf32>
    %cst_553 = arith.constant 5.000000e-01 : f32
    %830 = vector.broadcast %cst_553 : f32 to vector<6x4xf32>
    %831 = arith.mulf %829, %830 : vector<6x4xf32>
    %c0_554 = arith.constant 0 : index
    %c1_555 = arith.constant 1 : index
    %c0_556 = arith.constant 0 : index
    %c4_557 = arith.constant 4 : index
    %832 = vector.load %arg5[%c0_554, %c1_555, %c0_556, %c4_557] : memref<1x2x8x64xf32, #tpu.memory_space<vmem>>, vector<1x1x8x4xf32>
    %833 = vector.shape_cast %832 : vector<1x1x8x4xf32> to vector<8x4xf32>
    %c0_558 = arith.constant 0 : index
    %c1_559 = arith.constant 1 : index
    %c0_560 = arith.constant 0 : index
    %c36_561 = arith.constant 36 : index
    %834 = vector.load %arg5[%c0_558, %c1_559, %c0_560, %c36_561] : memref<1x2x8x64xf32, #tpu.memory_space<vmem>>, vector<1x1x8x4xf32>
    %835 = vector.shape_cast %834 : vector<1x1x8x4xf32> to vector<8x4xf32>
    %cst_562 = arith.constant dense<0.000000e+00> : vector<6x8xf32>
    %836 = tpu.matmul %831, %833, %cst_562 {dimension_numbers = #tpu.dot_dimension_numbers<[1], [1], [0], [0], [0, 0, 1, 0], [], []>} : vector<6x4xf32>, vector<8x4xf32>, vector<6x8xf32> -> vector<6x8xf32>
    %cst_563 = arith.constant dense<0xFF800000> : vector<6xf32>
    %837 = vector.multi_reduction <maximumf>, %836, %cst_563 [1] : vector<6x8xf32> to vector<6xf32>
    %838 = vector.shape_cast %837 : vector<6xf32> to vector<6x1xf32>
    %839 = vector.broadcast %838 : vector<6x1xf32> to vector<6x8xf32>
    %840 = arith.subf %836, %839 : vector<6x8xf32>
    %841 = math.exp %840 : vector<6x8xf32>
    %cst_564 = arith.constant dense<0.000000e+00> : vector<6xf32>
    %842 = vector.multi_reduction <add>, %841, %cst_564 [1] : vector<6x8xf32> to vector<6xf32>
    %843 = vector.shape_cast %842 : vector<6xf32> to vector<6x1xf32>
    %844 = tpu.reciprocal %843 {approx = true} : vector<6x1xf32> -> vector<6x1xf32>
    %845 = vector.broadcast %844 : vector<6x1xf32> to vector<6x8xf32>
    %846 = arith.mulf %841, %845 : vector<6x8xf32>
    %cst_565 = arith.constant dense<0.000000e+00> : vector<6x4xf32>
    %847 = tpu.matmul %846, %835, %cst_565 {dimension_numbers = #tpu.dot_dimension_numbers<[1], [0], [0], [1], [0, 0, 1, 1], [], []>} : vector<6x8xf32>, vector<8x4xf32>, vector<6x4xf32> -> vector<6x4xf32>
    %c1_566 = arith.constant 1 : index
    %c0_567 = arith.constant 0 : index
    %c4_568 = arith.constant 4 : index
    %848 = vector.load %arg32[%c1_566, %c0_567, %c4_568] : memref<2x6x32xf32, #tpu.memory_space<vmem>>, vector<1x6x4xf32>
    %849 = vector.shape_cast %848 : vector<1x6x4xf32> to vector<6x4xf32>
    %850 = vector.shape_cast %847 : vector<6x4xf32> to vector<1x6x4xf32>
    tpu.vector_store %arg32[%c1_566, %c0_567, %c4_568], %850 {strides = array<i32>} : memref<2x6x32xf32, #tpu.memory_space<vmem>>, vector<1x6x4xf32>,
    %c1_569 = arith.constant 1 : index
    %c0_570 = arith.constant 0 : index
    %c8_571 = arith.constant 8 : index
    %851 = vector.load %arg31[%c1_569, %c0_570, %c8_571] : memref<2x6x32xf32, #tpu.memory_space<vmem>>, vector<1x6x4xf32>
    %852 = vector.shape_cast %851 : vector<1x6x4xf32> to vector<6x4xf32>
    %cst_572 = arith.constant 5.000000e-01 : f32
    %853 = vector.broadcast %cst_572 : f32 to vector<6x4xf32>
    %854 = arith.mulf %852, %853 : vector<6x4xf32>
    %c0_573 = arith.constant 0 : index
    %c1_574 = arith.constant 1 : index
    %c0_575 = arith.constant 0 : index
    %c8_576 = arith.constant 8 : index
    %855 = vector.load %arg5[%c0_573, %c1_574, %c0_575, %c8_576] : memref<1x2x8x64xf32, #tpu.memory_space<vmem>>, vector<1x1x8x4xf32>
    %856 = vector.shape_cast %855 : vector<1x1x8x4xf32> to vector<8x4xf32>
    %c0_577 = arith.constant 0 : index
    %c1_578 = arith.constant 1 : index
    %c0_579 = arith.constant 0 : index
    %c40_580 = arith.constant 40 : index
    %857 = vector.load %arg5[%c0_577, %c1_578, %c0_579, %c40_580] : memref<1x2x8x64xf32, #tpu.memory_space<vmem>>, vector<1x1x8x4xf32>
    %858 = vector.shape_cast %857 : vector<1x1x8x4xf32> to vector<8x4xf32>
    %cst_581 = arith.constant dense<0.000000e+00> : vector<6x8xf32>
    %859 = tpu.matmul %854, %856, %cst_581 {dimension_numbers = #tpu.dot_dimension_numbers<[1], [1], [0], [0], [0, 0, 1, 0], [], []>} : vector<6x4xf32>, vector<8x4xf32>, vector<6x8xf32> -> vector<6x8xf32>
    %cst_582 = arith.constant dense<0xFF800000> : vector<6xf32>
    %860 = vector.multi_reduction <maximumf>, %859, %cst_582 [1] : vector<6x8xf32> to vector<6xf32>
    %861 = vector.shape_cast %860 : vector<6xf32> to vector<6x1xf32>
    %862 = vector.broadcast %861 : vector<6x1xf32> to vector<6x8xf32>
    %863 = arith.subf %859, %862 : vector<6x8xf32>
    %864 = math.exp %863 : vector<6x8xf32>
    %cst_583 = arith.constant dense<0.000000e+00> : vector<6xf32>
    %865 = vector.multi_reduction <add>, %864, %cst_583 [1] : vector<6x8xf32> to vector<6xf32>
    %866 = vector.shape_cast %865 : vector<6xf32> to vector<6x1xf32>
    %867 = tpu.reciprocal %866 {approx = true} : vector<6x1xf32> -> vector<6x1xf32>
    %868 = vector.broadcast %867 : vector<6x1xf32> to vector<6x8xf32>
    %869 = arith.mulf %864, %868 : vector<6x8xf32>
    %cst_584 = arith.constant dense<0.000000e+00> : vector<6x4xf32>
    %870 = tpu.matmul %869, %858, %cst_584 {dimension_numbers = #tpu.dot_dimension_numbers<[1], [0], [0], [1], [0, 0, 1, 1], [], []>} : vector<6x8xf32>, vector<8x4xf32>, vector<6x4xf32> -> vector<6x4xf32>
    %c1_585 = arith.constant 1 : index
    %c0_586 = arith.constant 0 : index
    %c8_587 = arith.constant 8 : index
    %871 = vector.load %arg32[%c1_585, %c0_586, %c8_587] : memref<2x6x32xf32, #tpu.memory_space<vmem>>, vector<1x6x4xf32>
    %872 = vector.shape_cast %871 : vector<1x6x4xf32> to vector<6x4xf32>
    %873 = vector.shape_cast %870 : vector<6x4xf32> to vector<1x6x4xf32>
    tpu.vector_store %arg32[%c1_585, %c0_586, %c8_587], %873 {strides = array<i32>} : memref<2x6x32xf32, #tpu.memory_space<vmem>>, vector<1x6x4xf32>,
    %c1_588 = arith.constant 1 : index
    %c0_589 = arith.constant 0 : index
    %c12_590 = arith.constant 12 : index
    %874 = vector.load %arg31[%c1_588, %c0_589, %c12_590] : memref<2x6x32xf32, #tpu.memory_space<vmem>>, vector<1x6x4xf32>
    %875 = vector.shape_cast %874 : vector<1x6x4xf32> to vector<6x4xf32>
    %cst_591 = arith.constant 5.000000e-01 : f32
    %876 = vector.broadcast %cst_591 : f32 to vector<6x4xf32>
    %877 = arith.mulf %875, %876 : vector<6x4xf32>
    %c0_592 = arith.constant 0 : index
    %c1_593 = arith.constant 1 : index
    %c0_594 = arith.constant 0 : index
    %c12_595 = arith.constant 12 : index
    %878 = vector.load %arg5[%c0_592, %c1_593, %c0_594, %c12_595] : memref<1x2x8x64xf32, #tpu.memory_space<vmem>>, vector<1x1x8x4xf32>
    %879 = vector.shape_cast %878 : vector<1x1x8x4xf32> to vector<8x4xf32>
    %c0_596 = arith.constant 0 : index
    %c1_597 = arith.constant 1 : index
    %c0_598 = arith.constant 0 : index
    %c44_599 = arith.constant 44 : index
    %880 = vector.load %arg5[%c0_596, %c1_597, %c0_598, %c44_599] : memref<1x2x8x64xf32, #tpu.memory_space<vmem>>, vector<1x1x8x4xf32>
    %881 = vector.shape_cast %880 : vector<1x1x8x4xf32> to vector<8x4xf32>
    %cst_600 = arith.constant dense<0.000000e+00> : vector<6x8xf32>
    %882 = tpu.matmul %877, %879, %cst_600 {dimension_numbers = #tpu.dot_dimension_numbers<[1], [1], [0], [0], [0, 0, 1, 0], [], []>} : vector<6x4xf32>, vector<8x4xf32>, vector<6x8xf32> -> vector<6x8xf32>
    %cst_601 = arith.constant dense<0xFF800000> : vector<6xf32>
    %883 = vector.multi_reduction <maximumf>, %882, %cst_601 [1] : vector<6x8xf32> to vector<6xf32>
    %884 = vector.shape_cast %883 : vector<6xf32> to vector<6x1xf32>
    %885 = vector.broadcast %884 : vector<6x1xf32> to vector<6x8xf32>
    %886 = arith.subf %882, %885 : vector<6x8xf32>
    %887 = math.exp %886 : vector<6x8xf32>
    %cst_602 = arith.constant dense<0.000000e+00> : vector<6xf32>
    %888 = vector.multi_reduction <add>, %887, %cst_602 [1] : vector<6x8xf32> to vector<6xf32>
    %889 = vector.shape_cast %888 : vector<6xf32> to vector<6x1xf32>
    %890 = tpu.reciprocal %889 {approx = true} : vector<6x1xf32> -> vector<6x1xf32>
    %891 = vector.broadcast %890 : vector<6x1xf32> to vector<6x8xf32>
    %892 = arith.mulf %887, %891 : vector<6x8xf32>
    %cst_603 = arith.constant dense<0.000000e+00> : vector<6x4xf32>
    %893 = tpu.matmul %892, %881, %cst_603 {dimension_numbers = #tpu.dot_dimension_numbers<[1], [0], [0], [1], [0, 0, 1, 1], [], []>} : vector<6x8xf32>, vector<8x4xf32>, vector<6x4xf32> -> vector<6x4xf32>
    %c1_604 = arith.constant 1 : index
    %c0_605 = arith.constant 0 : index
    %c12_606 = arith.constant 12 : index
    %894 = vector.load %arg32[%c1_604, %c0_605, %c12_606] : memref<2x6x32xf32, #tpu.memory_space<vmem>>, vector<1x6x4xf32>
    %895 = vector.shape_cast %894 : vector<1x6x4xf32> to vector<6x4xf32>
    %896 = vector.shape_cast %893 : vector<6x4xf32> to vector<1x6x4xf32>
    tpu.vector_store %arg32[%c1_604, %c0_605, %c12_606], %896 {strides = array<i32>} : memref<2x6x32xf32, #tpu.memory_space<vmem>>, vector<1x6x4xf32>,
    %c1_607 = arith.constant 1 : index
    %c0_608 = arith.constant 0 : index
    %c16_609 = arith.constant 16 : index
    %897 = vector.load %arg31[%c1_607, %c0_608, %c16_609] : memref<2x6x32xf32, #tpu.memory_space<vmem>>, vector<1x6x4xf32>
    %898 = vector.shape_cast %897 : vector<1x6x4xf32> to vector<6x4xf32>
    %cst_610 = arith.constant 5.000000e-01 : f32
    %899 = vector.broadcast %cst_610 : f32 to vector<6x4xf32>
    %900 = arith.mulf %898, %899 : vector<6x4xf32>
    %c0_611 = arith.constant 0 : index
    %c1_612 = arith.constant 1 : index
    %c0_613 = arith.constant 0 : index
    %c16_614 = arith.constant 16 : index
    %901 = vector.load %arg5[%c0_611, %c1_612, %c0_613, %c16_614] : memref<1x2x8x64xf32, #tpu.memory_space<vmem>>, vector<1x1x8x4xf32>
    %902 = vector.shape_cast %901 : vector<1x1x8x4xf32> to vector<8x4xf32>
    %c0_615 = arith.constant 0 : index
    %c1_616 = arith.constant 1 : index
    %c0_617 = arith.constant 0 : index
    %c48_618 = arith.constant 48 : index
    %903 = vector.load %arg5[%c0_615, %c1_616, %c0_617, %c48_618] : memref<1x2x8x64xf32, #tpu.memory_space<vmem>>, vector<1x1x8x4xf32>
    %904 = vector.shape_cast %903 : vector<1x1x8x4xf32> to vector<8x4xf32>
    %cst_619 = arith.constant dense<0.000000e+00> : vector<6x8xf32>
    %905 = tpu.matmul %900, %902, %cst_619 {dimension_numbers = #tpu.dot_dimension_numbers<[1], [1], [0], [0], [0, 0, 1, 0], [], []>} : vector<6x4xf32>, vector<8x4xf32>, vector<6x8xf32> -> vector<6x8xf32>
    %cst_620 = arith.constant dense<0xFF800000> : vector<6xf32>
    %906 = vector.multi_reduction <maximumf>, %905, %cst_620 [1] : vector<6x8xf32> to vector<6xf32>
    %907 = vector.shape_cast %906 : vector<6xf32> to vector<6x1xf32>
    %908 = vector.broadcast %907 : vector<6x1xf32> to vector<6x8xf32>
    %909 = arith.subf %905, %908 : vector<6x8xf32>
    %910 = math.exp %909 : vector<6x8xf32>
    %cst_621 = arith.constant dense<0.000000e+00> : vector<6xf32>
    %911 = vector.multi_reduction <add>, %910, %cst_621 [1] : vector<6x8xf32> to vector<6xf32>
    %912 = vector.shape_cast %911 : vector<6xf32> to vector<6x1xf32>
    %913 = tpu.reciprocal %912 {approx = true} : vector<6x1xf32> -> vector<6x1xf32>
    %914 = vector.broadcast %913 : vector<6x1xf32> to vector<6x8xf32>
    %915 = arith.mulf %910, %914 : vector<6x8xf32>
    %cst_622 = arith.constant dense<0.000000e+00> : vector<6x4xf32>
    %916 = tpu.matmul %915, %904, %cst_622 {dimension_numbers = #tpu.dot_dimension_numbers<[1], [0], [0], [1], [0, 0, 1, 1], [], []>} : vector<6x8xf32>, vector<8x4xf32>, vector<6x4xf32> -> vector<6x4xf32>
    %c1_623 = arith.constant 1 : index
    %c0_624 = arith.constant 0 : index
    %c16_625 = arith.constant 16 : index
    %917 = vector.load %arg32[%c1_623, %c0_624, %c16_625] : memref<2x6x32xf32, #tpu.memory_space<vmem>>, vector<1x6x4xf32>
    %918 = vector.shape_cast %917 : vector<1x6x4xf32> to vector<6x4xf32>
    %919 = vector.shape_cast %916 : vector<6x4xf32> to vector<1x6x4xf32>
    tpu.vector_store %arg32[%c1_623, %c0_624, %c16_625], %919 {strides = array<i32>} : memref<2x6x32xf32, #tpu.memory_space<vmem>>, vector<1x6x4xf32>,
    %c1_626 = arith.constant 1 : index
    %c0_627 = arith.constant 0 : index
    %c20_628 = arith.constant 20 : index
    %920 = vector.load %arg31[%c1_626, %c0_627, %c20_628] : memref<2x6x32xf32, #tpu.memory_space<vmem>>, vector<1x6x4xf32>
    %921 = vector.shape_cast %920 : vector<1x6x4xf32> to vector<6x4xf32>
    %cst_629 = arith.constant 5.000000e-01 : f32
    %922 = vector.broadcast %cst_629 : f32 to vector<6x4xf32>
    %923 = arith.mulf %921, %922 : vector<6x4xf32>
    %c0_630 = arith.constant 0 : index
    %c1_631 = arith.constant 1 : index
    %c0_632 = arith.constant 0 : index
    %c20_633 = arith.constant 20 : index
    %924 = vector.load %arg5[%c0_630, %c1_631, %c0_632, %c20_633] : memref<1x2x8x64xf32, #tpu.memory_space<vmem>>, vector<1x1x8x4xf32>
    %925 = vector.shape_cast %924 : vector<1x1x8x4xf32> to vector<8x4xf32>
    %c0_634 = arith.constant 0 : index
    %c1_635 = arith.constant 1 : index
    %c0_636 = arith.constant 0 : index
    %c52_637 = arith.constant 52 : index
    %926 = vector.load %arg5[%c0_634, %c1_635, %c0_636, %c52_637] : memref<1x2x8x64xf32, #tpu.memory_space<vmem>>, vector<1x1x8x4xf32>
    %927 = vector.shape_cast %926 : vector<1x1x8x4xf32> to vector<8x4xf32>
    %cst_638 = arith.constant dense<0.000000e+00> : vector<6x8xf32>
    %928 = tpu.matmul %923, %925, %cst_638 {dimension_numbers = #tpu.dot_dimension_numbers<[1], [1], [0], [0], [0, 0, 1, 0], [], []>} : vector<6x4xf32>, vector<8x4xf32>, vector<6x8xf32> -> vector<6x8xf32>
    %cst_639 = arith.constant dense<0xFF800000> : vector<6xf32>
    %929 = vector.multi_reduction <maximumf>, %928, %cst_639 [1] : vector<6x8xf32> to vector<6xf32>
    %930 = vector.shape_cast %929 : vector<6xf32> to vector<6x1xf32>
    %931 = vector.broadcast %930 : vector<6x1xf32> to vector<6x8xf32>
    %932 = arith.subf %928, %931 : vector<6x8xf32>
    %933 = math.exp %932 : vector<6x8xf32>
    %cst_640 = arith.constant dense<0.000000e+00> : vector<6xf32>
    %934 = vector.multi_reduction <add>, %933, %cst_640 [1] : vector<6x8xf32> to vector<6xf32>
    %935 = vector.shape_cast %934 : vector<6xf32> to vector<6x1xf32>
    %936 = tpu.reciprocal %935 {approx = true} : vector<6x1xf32> -> vector<6x1xf32>
    %937 = vector.broadcast %936 : vector<6x1xf32> to vector<6x8xf32>
    %938 = arith.mulf %933, %937 : vector<6x8xf32>
    %cst_641 = arith.constant dense<0.000000e+00> : vector<6x4xf32>
    %939 = tpu.matmul %938, %927, %cst_641 {dimension_numbers = #tpu.dot_dimension_numbers<[1], [0], [0], [1], [0, 0, 1, 1], [], []>} : vector<6x8xf32>, vector<8x4xf32>, vector<6x4xf32> -> vector<6x4xf32>
    %c1_642 = arith.constant 1 : index
    %c0_643 = arith.constant 0 : index
    %c20_644 = arith.constant 20 : index
    %940 = vector.load %arg32[%c1_642, %c0_643, %c20_644] : memref<2x6x32xf32, #tpu.memory_space<vmem>>, vector<1x6x4xf32>
    %941 = vector.shape_cast %940 : vector<1x6x4xf32> to vector<6x4xf32>
    %942 = vector.shape_cast %939 : vector<6x4xf32> to vector<1x6x4xf32>
    tpu.vector_store %arg32[%c1_642, %c0_643, %c20_644], %942 {strides = array<i32>} : memref<2x6x32xf32, #tpu.memory_space<vmem>>, vector<1x6x4xf32>,
    %c1_645 = arith.constant 1 : index
    %c0_646 = arith.constant 0 : index
    %c24_647 = arith.constant 24 : index
    %943 = vector.load %arg31[%c1_645, %c0_646, %c24_647] : memref<2x6x32xf32, #tpu.memory_space<vmem>>, vector<1x6x4xf32>
    %944 = vector.shape_cast %943 : vector<1x6x4xf32> to vector<6x4xf32>
    %cst_648 = arith.constant 5.000000e-01 : f32
    %945 = vector.broadcast %cst_648 : f32 to vector<6x4xf32>
    %946 = arith.mulf %944, %945 : vector<6x4xf32>
    %c0_649 = arith.constant 0 : index
    %c1_650 = arith.constant 1 : index
    %c0_651 = arith.constant 0 : index
    %c24_652 = arith.constant 24 : index
    %947 = vector.load %arg5[%c0_649, %c1_650, %c0_651, %c24_652] : memref<1x2x8x64xf32, #tpu.memory_space<vmem>>, vector<1x1x8x4xf32>
    %948 = vector.shape_cast %947 : vector<1x1x8x4xf32> to vector<8x4xf32>
    %c0_653 = arith.constant 0 : index
    %c1_654 = arith.constant 1 : index
    %c0_655 = arith.constant 0 : index
    %c56_656 = arith.constant 56 : index
    %949 = vector.load %arg5[%c0_653, %c1_654, %c0_655, %c56_656] : memref<1x2x8x64xf32, #tpu.memory_space<vmem>>, vector<1x1x8x4xf32>
    %950 = vector.shape_cast %949 : vector<1x1x8x4xf32> to vector<8x4xf32>
    %cst_657 = arith.constant dense<0.000000e+00> : vector<6x8xf32>
    %951 = tpu.matmul %946, %948, %cst_657 {dimension_numbers = #tpu.dot_dimension_numbers<[1], [1], [0], [0], [0, 0, 1, 0], [], []>} : vector<6x4xf32>, vector<8x4xf32>, vector<6x8xf32> -> vector<6x8xf32>
    %cst_658 = arith.constant dense<0xFF800000> : vector<6xf32>
    %952 = vector.multi_reduction <maximumf>, %951, %cst_658 [1] : vector<6x8xf32> to vector<6xf32>
    %953 = vector.shape_cast %952 : vector<6xf32> to vector<6x1xf32>
    %954 = vector.broadcast %953 : vector<6x1xf32> to vector<6x8xf32>
    %955 = arith.subf %951, %954 : vector<6x8xf32>
    %956 = math.exp %955 : vector<6x8xf32>
    %cst_659 = arith.constant dense<0.000000e+00> : vector<6xf32>
    %957 = vector.multi_reduction <add>, %956, %cst_659 [1] : vector<6x8xf32> to vector<6xf32>
    %958 = vector.shape_cast %957 : vector<6xf32> to vector<6x1xf32>
    %959 = tpu.reciprocal %958 {approx = true} : vector<6x1xf32> -> vector<6x1xf32>
    %960 = vector.broadcast %959 : vector<6x1xf32> to vector<6x8xf32>
    %961 = arith.mulf %956, %960 : vector<6x8xf32>
    %cst_660 = arith.constant dense<0.000000e+00> : vector<6x4xf32>
    %962 = tpu.matmul %961, %950, %cst_660 {dimension_numbers = #tpu.dot_dimension_numbers<[1], [0], [0], [1], [0, 0, 1, 1], [], []>} : vector<6x8xf32>, vector<8x4xf32>, vector<6x4xf32> -> vector<6x4xf32>
    %c1_661 = arith.constant 1 : index
    %c0_662 = arith.constant 0 : index
    %c24_663 = arith.constant 24 : index
    %963 = vector.load %arg32[%c1_661, %c0_662, %c24_663] : memref<2x6x32xf32, #tpu.memory_space<vmem>>, vector<1x6x4xf32>
    %964 = vector.shape_cast %963 : vector<1x6x4xf32> to vector<6x4xf32>
    %965 = vector.shape_cast %962 : vector<6x4xf32> to vector<1x6x4xf32>
    tpu.vector_store %arg32[%c1_661, %c0_662, %c24_663], %965 {strides = array<i32>} : memref<2x6x32xf32, #tpu.memory_space<vmem>>, vector<1x6x4xf32>,
    %c1_664 = arith.constant 1 : index
    %c0_665 = arith.constant 0 : index
    %c28_666 = arith.constant 28 : index
    %966 = vector.load %arg31[%c1_664, %c0_665, %c28_666] : memref<2x6x32xf32, #tpu.memory_space<vmem>>, vector<1x6x4xf32>
    %967 = vector.shape_cast %966 : vector<1x6x4xf32> to vector<6x4xf32>
    %cst_667 = arith.constant 5.000000e-01 : f32
    %968 = vector.broadcast %cst_667 : f32 to vector<6x4xf32>
    %969 = arith.mulf %967, %968 : vector<6x4xf32>
    %c0_668 = arith.constant 0 : index
    %c1_669 = arith.constant 1 : index
    %c0_670 = arith.constant 0 : index
    %c28_671 = arith.constant 28 : index
    %970 = vector.load %arg5[%c0_668, %c1_669, %c0_670, %c28_671] : memref<1x2x8x64xf32, #tpu.memory_space<vmem>>, vector<1x1x8x4xf32>
    %971 = vector.shape_cast %970 : vector<1x1x8x4xf32> to vector<8x4xf32>
    %c0_672 = arith.constant 0 : index
    %c1_673 = arith.constant 1 : index
    %c0_674 = arith.constant 0 : index
    %c60_675 = arith.constant 60 : index
    %972 = vector.load %arg5[%c0_672, %c1_673, %c0_674, %c60_675] : memref<1x2x8x64xf32, #tpu.memory_space<vmem>>, vector<1x1x8x4xf32>
    %973 = vector.shape_cast %972 : vector<1x1x8x4xf32> to vector<8x4xf32>
    %cst_676 = arith.constant dense<0.000000e+00> : vector<6x8xf32>
    %974 = tpu.matmul %969, %971, %cst_676 {dimension_numbers = #tpu.dot_dimension_numbers<[1], [1], [0], [0], [0, 0, 1, 0], [], []>} : vector<6x4xf32>, vector<8x4xf32>, vector<6x8xf32> -> vector<6x8xf32>
    %cst_677 = arith.constant dense<0xFF800000> : vector<6xf32>
    %975 = vector.multi_reduction <maximumf>, %974, %cst_677 [1] : vector<6x8xf32> to vector<6xf32>
    %976 = vector.shape_cast %975 : vector<6xf32> to vector<6x1xf32>
    %977 = vector.broadcast %976 : vector<6x1xf32> to vector<6x8xf32>
    %978 = arith.subf %974, %977 : vector<6x8xf32>
    %979 = math.exp %978 : vector<6x8xf32>
    %cst_678 = arith.constant dense<0.000000e+00> : vector<6xf32>
    %980 = vector.multi_reduction <add>, %979, %cst_678 [1] : vector<6x8xf32> to vector<6xf32>
    %981 = vector.shape_cast %980 : vector<6xf32> to vector<6x1xf32>
    %982 = tpu.reciprocal %981 {approx = true} : vector<6x1xf32> -> vector<6x1xf32>
    %983 = vector.broadcast %982 : vector<6x1xf32> to vector<6x8xf32>
    %984 = arith.mulf %979, %983 : vector<6x8xf32>
    %cst_679 = arith.constant dense<0.000000e+00> : vector<6x4xf32>
    %985 = tpu.matmul %984, %973, %cst_679 {dimension_numbers = #tpu.dot_dimension_numbers<[1], [0], [0], [1], [0, 0, 1, 1], [], []>} : vector<6x8xf32>, vector<8x4xf32>, vector<6x4xf32> -> vector<6x4xf32>
    %c1_680 = arith.constant 1 : index
    %c0_681 = arith.constant 0 : index
    %c28_682 = arith.constant 28 : index
    %986 = vector.load %arg32[%c1_680, %c0_681, %c28_682] : memref<2x6x32xf32, #tpu.memory_space<vmem>>, vector<1x6x4xf32>
    %987 = vector.shape_cast %986 : vector<1x6x4xf32> to vector<6x4xf32>
    %988 = vector.shape_cast %985 : vector<6x4xf32> to vector<1x6x4xf32>
    tpu.vector_store %arg32[%c1_680, %c0_681, %c28_682], %988 {strides = array<i32>} : memref<2x6x32xf32, #tpu.memory_space<vmem>>, vector<1x6x4xf32>,
    %c1_683 = arith.constant 1 : index
    %c0_684 = arith.constant 0 : index
    %c0_685 = arith.constant 0 : index
    %989 = vector.load %arg32[%c1_683, %c0_684, %c0_685] : memref<2x6x32xf32, #tpu.memory_space<vmem>>, vector<1x6x32xf32>
    %990 = vector.shape_cast %989 : vector<1x6x32xf32> to vector<6x32xf32>
    %cst_686 = arith.constant dense<0.000000e+00> : vector<6x32xf32>
    %991 = tpu.matmul %990, %21, %cst_686 {dimension_numbers = #tpu.dot_dimension_numbers<[1], [0], [0], [1], [0, 0, 1, 1], [], []>} : vector<6x32xf32>, vector<32x32xf32>, vector<6x32xf32> -> vector<6x32xf32>
    %992 = vector.broadcast %23 : vector<1x32xf32> to vector<6x32xf32>
    %993 = arith.addf %991, %992 : vector<6x32xf32>
    %994 = arith.addf %798, %993 : vector<6x32xf32>
    %cst_687 = arith.constant dense<0.000000e+00> : vector<6xf32>
    %995 = vector.multi_reduction <add>, %994, %cst_687 [1] : vector<6x32xf32> to vector<6xf32>
    %996 = vector.shape_cast %995 : vector<6xf32> to vector<6x1xf32>
    %cst_688 = arith.constant 3.200000e+01 : f32
    %997 = vector.broadcast %cst_688 : f32 to vector<6x1xf32>
    %998 = arith.divf %996, %997 : vector<6x1xf32>
    %999 = vector.broadcast %998 : vector<6x1xf32> to vector<6x32xf32>
    %1000 = arith.subf %994, %999 : vector<6x32xf32>
    %1001 = arith.mulf %1000, %1000 : vector<6x32xf32>
    %cst_689 = arith.constant dense<0.000000e+00> : vector<6xf32>
    %1002 = vector.multi_reduction <add>, %1001, %cst_689 [1] : vector<6x32xf32> to vector<6xf32>
    %1003 = vector.shape_cast %1002 : vector<6xf32> to vector<6x1xf32>
    %cst_690 = arith.constant 3.200000e+01 : f32
    %1004 = vector.broadcast %cst_690 : f32 to vector<6x1xf32>
    %1005 = arith.divf %1003, %1004 : vector<6x1xf32>
    %1006 = vector.broadcast %998 : vector<6x1xf32> to vector<6x32xf32>
    %1007 = arith.subf %994, %1006 : vector<6x32xf32>
    %cst_691 = arith.constant 9.99999974E-6 : f32
    %1008 = vector.broadcast %cst_691 : f32 to vector<6x1xf32>
    %1009 = arith.addf %1005, %1008 : vector<6x1xf32>
    %1010 = math.rsqrt %1009 : vector<6x1xf32>
    %1011 = vector.broadcast %1010 : vector<6x1xf32> to vector<6x32xf32>
    %1012 = arith.mulf %1007, %1011 : vector<6x32xf32>
    %1013 = vector.broadcast %25 : vector<1x32xf32> to vector<6x32xf32>
    %1014 = arith.mulf %1012, %1013 : vector<6x32xf32>
    %1015 = vector.broadcast %27 : vector<1x32xf32> to vector<6x32xf32>
    %1016 = arith.addf %1014, %1015 : vector<6x32xf32>
    %cst_692 = arith.constant dense<0.000000e+00> : vector<6x64xf32>
    %1017 = tpu.matmul %1016, %29, %cst_692 {dimension_numbers = #tpu.dot_dimension_numbers<[1], [0], [0], [1], [0, 0, 1, 1], [], []>} : vector<6x32xf32>, vector<32x64xf32>, vector<6x64xf32> -> vector<6x64xf32>
    %1018 = vector.broadcast %31 : vector<1x64xf32> to vector<6x64xf32>
    %1019 = arith.addf %1017, %1018 : vector<6x64xf32>
    %cst_693 = arith.constant 0.000000e+00 : f32
    %1020 = vector.broadcast %cst_693 : f32 to vector<6x64xf32>
    %1021 = arith.maximumf %1019, %1020 : vector<6x64xf32>
    %cst_694 = arith.constant dense<0.000000e+00> : vector<6x32xf32>
    %1022 = tpu.matmul %1021, %33, %cst_694 {dimension_numbers = #tpu.dot_dimension_numbers<[1], [0], [0], [1], [0, 0, 1, 1], [], []>} : vector<6x64xf32>, vector<64x32xf32>, vector<6x32xf32> -> vector<6x32xf32>
    %1023 = vector.broadcast %35 : vector<1x32xf32> to vector<6x32xf32>
    %1024 = arith.addf %1022, %1023 : vector<6x32xf32>
    %1025 = arith.addf %1016, %1024 : vector<6x32xf32>
    %cst_695 = arith.constant dense<0.000000e+00> : vector<6xf32>
    %1026 = vector.multi_reduction <add>, %1025, %cst_695 [1] : vector<6x32xf32> to vector<6xf32>
    %1027 = vector.shape_cast %1026 : vector<6xf32> to vector<6x1xf32>
    %cst_696 = arith.constant 3.200000e+01 : f32
    %1028 = vector.broadcast %cst_696 : f32 to vector<6x1xf32>
    %1029 = arith.divf %1027, %1028 : vector<6x1xf32>
    %1030 = vector.broadcast %1029 : vector<6x1xf32> to vector<6x32xf32>
    %1031 = arith.subf %1025, %1030 : vector<6x32xf32>
    %1032 = arith.mulf %1031, %1031 : vector<6x32xf32>
    %cst_697 = arith.constant dense<0.000000e+00> : vector<6xf32>
    %1033 = vector.multi_reduction <add>, %1032, %cst_697 [1] : vector<6x32xf32> to vector<6xf32>
    %1034 = vector.shape_cast %1033 : vector<6xf32> to vector<6x1xf32>
    %cst_698 = arith.constant 3.200000e+01 : f32
    %1035 = vector.broadcast %cst_698 : f32 to vector<6x1xf32>
    %1036 = arith.divf %1034, %1035 : vector<6x1xf32>
    %1037 = vector.broadcast %1029 : vector<6x1xf32> to vector<6x32xf32>
    %1038 = arith.subf %1025, %1037 : vector<6x32xf32>
    %cst_699 = arith.constant 9.99999974E-6 : f32
    %1039 = vector.broadcast %cst_699 : f32 to vector<6x1xf32>
    %1040 = arith.addf %1036, %1039 : vector<6x1xf32>
    %1041 = math.rsqrt %1040 : vector<6x1xf32>
    %1042 = vector.broadcast %1041 : vector<6x1xf32> to vector<6x32xf32>
    %1043 = arith.mulf %1038, %1042 : vector<6x32xf32>
    %1044 = vector.broadcast %37 : vector<1x32xf32> to vector<6x32xf32>
    %1045 = arith.mulf %1043, %1044 : vector<6x32xf32>
    %1046 = vector.broadcast %39 : vector<1x32xf32> to vector<6x32xf32>
    %1047 = arith.addf %1045, %1046 : vector<6x32xf32>
    %c1_700 = arith.constant 1 : index
    %c0_701 = arith.constant 0 : index
    %c0_702 = arith.constant 0 : index
    %1048 = vector.load %arg28[%c1_700, %c0_701, %c0_702] : memref<2x6x32xf32, #tpu.memory_space<vmem>>, vector<1x6x32xf32>
    %1049 = vector.shape_cast %1048 : vector<1x6x32xf32> to vector<6x32xf32>
    %1050 = vector.shape_cast %1047 : vector<6x32xf32> to vector<1x6x32xf32>
    tpu.vector_store %arg28[%c1_700, %c0_701, %c0_702], %1050 {strides = array<i32>} : memref<2x6x32xf32, #tpu.memory_space<vmem>>, vector<1x6x32xf32>,
    %c7_i32 = arith.constant 7 : i32
    %1051 = arith.cmpi eq, %arg0, %c7_i32 : i32
    %1052 = arith.extui %1051 : i1 to i32
    %c0_i32_703 = arith.constant 0 : i32
    %1053 = arith.cmpi ne, %1052, %c0_i32_703 : i32
    scf.if %1053 {
      %c0_704 = arith.constant 0 : index
      %c0_705 = arith.constant 0 : index
      %1054 = memref.load %arg4[%c0_704, %c0_705] : memref<1x1xf32, #tpu.memory_space<smem>>
      %1055 = tpu.iota {dimensions = array<i32: 1>} : vector<1x6xi32>
      %c1_i32 = arith.constant 1 : i32
      %1056 = arith.subi %0, %c1_i32 : i32
      %1057 = vector.broadcast %1056 : i32 to vector<1x6xi32>
      %1058 = arith.cmpi eq, %1055, %1057 : vector<1x6xi32>
      %1059 = arith.extui %1058 : vector<1x6xi1> to vector<1x6xi32>
      %1060 = arith.sitofp %1059 : vector<1x6xi32> to vector<1x6xf32>
      %c0_706 = arith.constant 0 : index
      %c0_707 = arith.constant 0 : index
      %c0_708 = arith.constant 0 : index
      %1061 = vector.load %arg28[%c0_706, %c0_707, %c0_708] : memref<2x6x32xf32, #tpu.memory_space<vmem>>, vector<1x6x32xf32>
      %1062 = vector.shape_cast %1061 : vector<1x6x32xf32> to vector<6x32xf32>
      %cst_709 = arith.constant dense<0.000000e+00> : vector<1x32xf32>
      %1063 = tpu.matmul %1060, %1062, %cst_709 {dimension_numbers = #tpu.dot_dimension_numbers<[1], [0], [0], [1], [0, 0, 1, 1], [], []>} : vector<1x6xf32>, vector<6x32xf32>, vector<1x32xf32> -> vector<1x32xf32>
      %c0_710 = arith.constant 0 : index
      %c0_711 = arith.constant 0 : index
      %1064 = vector.load %arg24[%c0_710, %c0_711] : memref<32x32xf32, #tpu.memory_space<vmem>>, vector<32x32xf32>
      %cst_712 = arith.constant dense<0.000000e+00> : vector<1x32xf32>
      %1065 = tpu.matmul %1063, %1064, %cst_712 {dimension_numbers = #tpu.dot_dimension_numbers<[1], [0], [0], [1], [0, 0, 1, 1], [], []>} : vector<1x32xf32>, vector<32x32xf32>, vector<1x32xf32> -> vector<1x32xf32>
      %c0_713 = arith.constant 0 : index
      %c0_714 = arith.constant 0 : index
      %1066 = vector.load %arg25[%c0_713, %c0_714] : memref<1x32xf32, #tpu.memory_space<vmem>>, vector<1x32xf32>
      %1067 = arith.addf %1065, %1066 : vector<1x32xf32>
      %c0_715 = arith.constant 0 : index
      %c0_716 = arith.constant 0 : index
      %1068 = vector.load %arg26[%c0_715, %c0_716] : memref<32x32xf32, #tpu.memory_space<vmem>>, vector<32x32xf32>
      %cst_717 = arith.constant dense<0.000000e+00> : vector<1x32xf32>
      %1069 = tpu.matmul %1063, %1068, %cst_717 {dimension_numbers = #tpu.dot_dimension_numbers<[1], [0], [0], [1], [0, 0, 1, 1], [], []>} : vector<1x32xf32>, vector<32x32xf32>, vector<1x32xf32> -> vector<1x32xf32>
      %c0_718 = arith.constant 0 : index
      %c0_719 = arith.constant 0 : index
      %1070 = vector.load %arg27[%c0_718, %c0_719] : memref<1x32xf32, #tpu.memory_space<vmem>>, vector<1x32xf32>
      %1071 = arith.addf %1069, %1070 : vector<1x32xf32>
      %1072 = vector.broadcast %1054 : f32 to vector<1x32xf32>
      %1073 = arith.mulf %1071, %1072 : vector<1x32xf32>
      %1074 = arith.addf %1067, %1073 : vector<1x32xf32>
      %c0_720 = arith.constant 0 : index
      %c0_721 = arith.constant 0 : index
      %c0_722 = arith.constant 0 : index
      %1075 = vector.load %arg29[%c0_720, %c0_721, %c0_722] : memref<2x1x32xf32, #tpu.memory_space<vmem>>, vector<1x1x32xf32>
      %1076 = vector.shape_cast %1075 : vector<1x1x32xf32> to vector<1x32xf32>
      %1077 = vector.shape_cast %1074 : vector<1x32xf32> to vector<1x1x32xf32>
      tpu.vector_store %arg29[%c0_720, %c0_721, %c0_722], %1077 {strides = array<i32>} : memref<2x1x32xf32, #tpu.memory_space<vmem>>, vector<1x1x32xf32>,
      %c1_723 = arith.constant 1 : index
      %c0_724 = arith.constant 0 : index
      %c0_725 = arith.constant 0 : index
      %1078 = vector.load %arg28[%c1_723, %c0_724, %c0_725] : memref<2x6x32xf32, #tpu.memory_space<vmem>>, vector<1x6x32xf32>
      %1079 = vector.shape_cast %1078 : vector<1x6x32xf32> to vector<6x32xf32>
      %cst_726 = arith.constant dense<0.000000e+00> : vector<1x32xf32>
      %1080 = tpu.matmul %1060, %1079, %cst_726 {dimension_numbers = #tpu.dot_dimension_numbers<[1], [0], [0], [1], [0, 0, 1, 1], [], []>} : vector<1x6xf32>, vector<6x32xf32>, vector<1x32xf32> -> vector<1x32xf32>
      %c0_727 = arith.constant 0 : index
      %c0_728 = arith.constant 0 : index
      %1081 = vector.load %arg24[%c0_727, %c0_728] : memref<32x32xf32, #tpu.memory_space<vmem>>, vector<32x32xf32>
      %cst_729 = arith.constant dense<0.000000e+00> : vector<1x32xf32>
      %1082 = tpu.matmul %1080, %1081, %cst_729 {dimension_numbers = #tpu.dot_dimension_numbers<[1], [0], [0], [1], [0, 0, 1, 1], [], []>} : vector<1x32xf32>, vector<32x32xf32>, vector<1x32xf32> -> vector<1x32xf32>
      %c0_730 = arith.constant 0 : index
      %c0_731 = arith.constant 0 : index
      %1083 = vector.load %arg25[%c0_730, %c0_731] : memref<1x32xf32, #tpu.memory_space<vmem>>, vector<1x32xf32>
      %1084 = arith.addf %1082, %1083 : vector<1x32xf32>
      %c0_732 = arith.constant 0 : index
      %c0_733 = arith.constant 0 : index
      %1085 = vector.load %arg26[%c0_732, %c0_733] : memref<32x32xf32, #tpu.memory_space<vmem>>, vector<32x32xf32>
      %cst_734 = arith.constant dense<0.000000e+00> : vector<1x32xf32>
      %1086 = tpu.matmul %1080, %1085, %cst_734 {dimension_numbers = #tpu.dot_dimension_numbers<[1], [0], [0], [1], [0, 0, 1, 1], [], []>} : vector<1x32xf32>, vector<32x32xf32>, vector<1x32xf32> -> vector<1x32xf32>
      %c0_735 = arith.constant 0 : index
      %c0_736 = arith.constant 0 : index
      %1087 = vector.load %arg27[%c0_735, %c0_736] : memref<1x32xf32, #tpu.memory_space<vmem>>, vector<1x32xf32>
      %1088 = arith.addf %1086, %1087 : vector<1x32xf32>
      %1089 = vector.broadcast %1054 : f32 to vector<1x32xf32>
      %1090 = arith.mulf %1088, %1089 : vector<1x32xf32>
      %1091 = arith.addf %1084, %1090 : vector<1x32xf32>
      %c1_737 = arith.constant 1 : index
      %c0_738 = arith.constant 0 : index
      %c0_739 = arith.constant 0 : index
      %1092 = vector.load %arg29[%c1_737, %c0_738, %c0_739] : memref<2x1x32xf32, #tpu.memory_space<vmem>>, vector<1x1x32xf32>
      %1093 = vector.shape_cast %1092 : vector<1x1x32xf32> to vector<1x32xf32>
      %1094 = vector.shape_cast %1091 : vector<1x32xf32> to vector<1x1x32xf32>
      tpu.vector_store %arg29[%c1_737, %c0_738, %c0_739], %1094 {strides = array<i32>} : memref<2x1x32xf32, #tpu.memory_space<vmem>>, vector<1x1x32xf32>,
    } else {
    }
    return
  }
  func.func @transform_0(%arg0: i32) -> (i32, i32, i32) {
    %c0_i32 = arith.constant 0 : i32
    %c0_i32_0 = arith.constant 0 : i32
    %c0_i32_1 = arith.constant 0 : i32
    %c0_i32_2 = arith.constant 0 : i32
    return %c0_i32, %c0_i32_0, %c0_i32_1 : i32, i32, i32
  }
  func.func @transform_1(%arg0: i32) -> (i32, i32) {
    %c0_i32 = arith.constant 0 : i32
    %c0_i32_0 = arith.constant 0 : i32
    %c0_i32_1 = arith.constant 0 : i32
    return %c0_i32, %c0_i32_0 : i32, i32
  }
  func.func @transform_2(%arg0: i32) -> (i32, i32) {
    %c0_i32 = arith.constant 0 : i32
    %c0_i32_0 = arith.constant 0 : i32
    %c0_i32_1 = arith.constant 0 : i32
    return %c0_i32, %c0_i32_0 : i32, i32
  }
  func.func @transform_3(%arg0: i32) -> (i32, i32) {
    %c0_i32 = arith.constant 0 : i32
    %c0_i32_0 = arith.constant 0 : i32
    %c0_i32_1 = arith.constant 0 : i32
    return %c0_i32, %c0_i32_0 : i32, i32
  }
  func.func @transform_4(%arg0: i32) -> (i32, i32, i32, i32) {
    %c0_i32 = arith.constant 0 : i32
    %c0_i32_0 = arith.constant 0 : i32
    %c0_i32_1 = arith.constant 0 : i32
    %c0_i32_2 = arith.constant 0 : i32
    return %arg0, %c0_i32, %c0_i32_0, %c0_i32_1 : i32, i32, i32, i32
  }
  func.func @transform_5(%arg0: i32) -> (i32, i32, i32) {
    %c0_i32 = arith.constant 0 : i32
    %c0_i32_0 = arith.constant 0 : i32
    %c0_i32_1 = arith.constant 0 : i32
    return %arg0, %c0_i32, %c0_i32_0 : i32, i32, i32
  }
  func.func @transform_6(%arg0: i32) -> (i32, i32, i32) {
    %c0_i32 = arith.constant 0 : i32
    %c0_i32_0 = arith.constant 0 : i32
    %c0_i32_1 = arith.constant 0 : i32
    return %arg0, %c0_i32, %c0_i32_0 : i32, i32, i32
  }
  func.func @transform_7(%arg0: i32) -> (i32, i32, i32) {
    %c0_i32 = arith.constant 0 : i32
    %c0_i32_0 = arith.constant 0 : i32
    %c0_i32_1 = arith.constant 0 : i32
    return %arg0, %c0_i32, %c0_i32_0 : i32, i32, i32
  }
  func.func @transform_8(%arg0: i32) -> (i32, i32, i32) {
    %c0_i32 = arith.constant 0 : i32
    %c0_i32_0 = arith.constant 0 : i32
    %c0_i32_1 = arith.constant 0 : i32
    return %arg0, %c0_i32, %c0_i32_0 : i32, i32, i32
  }
  func.func @transform_9(%arg0: i32) -> (i32, i32, i32) {
    %c0_i32 = arith.constant 0 : i32
    %c0_i32_0 = arith.constant 0 : i32
    %c0_i32_1 = arith.constant 0 : i32
    return %arg0, %c0_i32, %c0_i32_0 : i32, i32, i32
  }
  func.func @transform_10(%arg0: i32) -> (i32, i32, i32) {
    %c0_i32 = arith.constant 0 : i32
    %c0_i32_0 = arith.constant 0 : i32
    %c0_i32_1 = arith.constant 0 : i32
    return %arg0, %c0_i32, %c0_i32_0 : i32, i32, i32
  }
  func.func @transform_11(%arg0: i32) -> (i32, i32, i32) {
    %c0_i32 = arith.constant 0 : i32
    %c0_i32_0 = arith.constant 0 : i32
    %c0_i32_1 = arith.constant 0 : i32
    return %arg0, %c0_i32, %c0_i32_0 : i32, i32, i32
  }
  func.func @transform_12(%arg0: i32) -> (i32, i32, i32) {
    %c0_i32 = arith.constant 0 : i32
    %c0_i32_0 = arith.constant 0 : i32
    %c0_i32_1 = arith.constant 0 : i32
    return %arg0, %c0_i32, %c0_i32_0 : i32, i32, i32
  }
  func.func @transform_13(%arg0: i32) -> (i32, i32, i32) {
    %c0_i32 = arith.constant 0 : i32
    %c0_i32_0 = arith.constant 0 : i32
    %c0_i32_1 = arith.constant 0 : i32
    return %arg0, %c0_i32, %c0_i32_0 : i32, i32, i32
  }
  func.func @transform_14(%arg0: i32) -> (i32, i32, i32) {
    %c0_i32 = arith.constant 0 : i32
    %c0_i32_0 = arith.constant 0 : i32
    %c0_i32_1 = arith.constant 0 : i32
    return %arg0, %c0_i32, %c0_i32_0 : i32, i32, i32
  }
  func.func @transform_15(%arg0: i32) -> (i32, i32, i32) {
    %c0_i32 = arith.constant 0 : i32
    %c0_i32_0 = arith.constant 0 : i32
    %c0_i32_1 = arith.constant 0 : i32
    return %arg0, %c0_i32, %c0_i32_0 : i32, i32, i32
  }
  func.func @transform_16(%arg0: i32) -> (i32, i32, i32) {
    %c0_i32 = arith.constant 0 : i32
    %c0_i32_0 = arith.constant 0 : i32
    %c0_i32_1 = arith.constant 0 : i32
    return %arg0, %c0_i32, %c0_i32_0 : i32, i32, i32
  }
  func.func @transform_17(%arg0: i32) -> (i32, i32, i32) {
    %c0_i32 = arith.constant 0 : i32
    %c0_i32_0 = arith.constant 0 : i32
    %c0_i32_1 = arith.constant 0 : i32
    return %arg0, %c0_i32, %c0_i32_0 : i32, i32, i32
  }
  func.func @transform_18(%arg0: i32) -> (i32, i32, i32) {
    %c0_i32 = arith.constant 0 : i32
    %c0_i32_0 = arith.constant 0 : i32
    %c0_i32_1 = arith.constant 0 : i32
    return %arg0, %c0_i32, %c0_i32_0 : i32, i32, i32
  }
  func.func @transform_19(%arg0: i32) -> (i32, i32, i32) {
    %c0_i32 = arith.constant 0 : i32
    %c0_i32_0 = arith.constant 0 : i32
    %c0_i32_1 = arith.constant 0 : i32
    return %arg0, %c0_i32, %c0_i32_0 : i32, i32, i32
  }
  func.func @transform_20(%arg0: i32) -> (i32, i32, i32) {
    %c0_i32 = arith.constant 0 : i32
    %c0_i32_0 = arith.constant 0 : i32
    %c0_i32_1 = arith.constant 0 : i32
    return %arg0, %c0_i32, %c0_i32_0 : i32, i32, i32
  }
  func.func @transform_21(%arg0: i32) -> (i32, i32, i32) {
    %c0_i32 = arith.constant 0 : i32
    %c0_i32_0 = arith.constant 0 : i32
    %c0_i32_1 = arith.constant 0 : i32
    return %arg0, %c0_i32, %c0_i32_0 : i32, i32, i32
  }
  func.func @transform_22(%arg0: i32) -> (i32, i32, i32) {
    %c0_i32 = arith.constant 0 : i32
    %c0_i32_0 = arith.constant 0 : i32
    %c0_i32_1 = arith.constant 0 : i32
    return %arg0, %c0_i32, %c0_i32_0 : i32, i32, i32
  }
  func.func @transform_23(%arg0: i32) -> (i32, i32) {
    %c0_i32 = arith.constant 0 : i32
    %c0_i32_0 = arith.constant 0 : i32
    %c0_i32_1 = arith.constant 0 : i32
    return %c0_i32, %c0_i32_0 : i32, i32
  }
  func.func @transform_24(%arg0: i32) -> (i32, i32) {
    %c0_i32 = arith.constant 0 : i32
    %c0_i32_0 = arith.constant 0 : i32
    %c0_i32_1 = arith.constant 0 : i32
    return %c0_i32, %c0_i32_0 : i32, i32
  }
  func.func @transform_25(%arg0: i32) -> (i32, i32) {
    %c0_i32 = arith.constant 0 : i32
    %c0_i32_0 = arith.constant 0 : i32
    %c0_i32_1 = arith.constant 0 : i32
    return %c0_i32, %c0_i32_0 : i32, i32
  }
  func.func @transform_26(%arg0: i32) -> (i32, i32) {
    %c0_i32 = arith.constant 0 : i32
    %c0_i32_0 = arith.constant 0 : i32
    %c0_i32_1 = arith.constant 0 : i32
    return %c0_i32, %c0_i32_0 : i32, i32
  }
  func.func @transform_27(%arg0: i32) -> (i32, i32, i32) {
    %c0_i32 = arith.constant 0 : i32
    %c0_i32_0 = arith.constant 0 : i32
    %c0_i32_1 = arith.constant 0 : i32
    %c0_i32_2 = arith.constant 0 : i32
    return %c0_i32, %c0_i32_0, %c0_i32_1 : i32, i32, i32
  }
  func.func @transform_28(%arg0: i32) -> (i32, i32, i32) {
    %c0_i32 = arith.constant 0 : i32
    %c0_i32_0 = arith.constant 0 : i32
    %c0_i32_1 = arith.constant 0 : i32
    %c0_i32_2 = arith.constant 0 : i32
    return %c0_i32, %c0_i32_0, %c0_i32_1 : i32, i32, i32
  }
}

</mosaic_0001>

<bundles_post_ra>
// kernel: custom-call
= control target key start
LH: loop header
LB: loop body
LE: loop exit
PB: predicated region body
PF: predicated region fallthrough
CT: control target
= control target key end

     0   :  { %s6_s0 = inlined_call_operand.hbm [shape: f32[2,6,32], index: 0, kind: output, shape index: {}]  }

// kernel: comment_encoded_to_skills_forward.3
= control target key start
LH: loop header
LB: loop body
LE: loop exit
PB: predicated region body
PF: predicated region fallthrough
CT: control target
= control target key end

     0   :  { %8 = vsyncpa [#allocation3], 0  ;;  %s791_s0 = inlined_call_operand.vmem [shape: f32[2,8,32], index: 0, kind: input, shape index: {}]   ;;  %s792_s1 = inlined_call_operand.hbm [shape: f32[8,32,64], index: 1, kind: input, shape index: {}]   ;;  %s793_s2 = inlined_call_operand.hbm [shape: f32[8,1,64], index: 2, kind: input, shape index: {}]   ;;  %s794_s3 = inlined_call_operand.vmem [shape: f32[8,2,8,64], index: 3, kind: output, shape index: {}]  }
   0x1   :  { %s16_s14 = sshll.u32 %s792_s1, 4  ;;  %s17_s14 = int_to_ptr.hbm [resolvable:$true] %s16_s14 }
   0x2   :  { %9 = vsyncpa [#allocation5], 0  ;;  %s653_s15 = smov [#allocation2]   ;;  %s29_s19 = sshll.u32 %s793_s2, 4  ;;  %s30_s19 = int_to_ptr.hbm [resolvable:$true] %s29_s19 }
   0x3   :  { %s18_s16 = sshll.u32 %s653_s15, 4  ;;  %s654_s20 = smov 128   ;;  %s19_s16 = int_to_ptr.vmem [resolvable:$true] %s18_s16 }
   0x4   :  { %s655_s21 = smov 8   ;;  %s656_s22 = smov [#allocation4]  }
   0x5   :  { %24 = dma.hbm_to_vmem [thread:$0]  %s17_s14, 4096, %s19_s16, [#allocation3], %s654_s20, %s654_s20, %s655_s21  }
   0x6   :  { %s31_s23 = sshll.u32 %s656_s22, 4  ;;  %s657_s24 = smov 16   ;;  %s32_s23 = int_to_ptr.vmem [resolvable:$true] %s31_s23 }
   0x7   :  { %s658_s25 = smov 1  }
   0x8   :  { %37 = dma.hbm_to_vmem [thread:$0]  %s30_s19, 128, %s32_s23, [#allocation5], %s657_s24, %s657_s24, %s658_s25  }
   0x9   :  { %649 = dma.done.wait [#allocation3], 4096  }
   0xa   :  { %650 = vsyncadd [#allocation3], 4294963200 }
   0xb   :  { %651 = dma.done.wait [#allocation5], 128  }
   0xc   :  { %652 = vsyncadd [#allocation5], 4294967168  ;;  %v112_v0 = vld [vmem:[#allocation2 + $0x38] sm:$0xff]  ;;  %v111_v1 = vld [vmem:[#allocation2 + $0x30] sm:$0xff]  ;;  %vm55_vm0 = vcmask 261120   ;;  %vm79_vm1 = vcmask 523264  }
   0xd   :  { %134 = vmatpush.msra.mxu2 %v112_v0  ;;  %160 = vmatpush.msra.mxu3 %v112_v0  ;;  %v49_v2 = vld [vmem:[#allocation2 + $0x18] sm:$0xff]  ;;  %v110_v3 = vld [vmem:[#allocation2 + $0x28] sm:$0xff]  ;;  %v48_v4 = vld [vmem:[#allocation2 + $0x10] sm:$0xff] }
   0xe   :  { %71 = vmatpush.msra.mxu0 %v49_v2  ;;  %98 = vmatpush.msra.mxu1 %v49_v2  ;;  %v47_v5 = vld [vmem:[#allocation2 + $0x8] sm:$0xff]  ;;  %v109_v6 = vld [vmem:[#allocation2 + $0x20] sm:$0xff]  ;;  %v236_v9 = vld [vmem:[#allocation2 + $0x78] sm:$0xff] }
   0xf   :  { %135 = vmatpush.msra.mxu2 %v111_v1  ;;  %161 = vmatpush.msra.mxu3 %v111_v1  ;;  %v688_v7 = vld [vmem:[%s791_s0] sm:$0xff]  ;;  %v693_v8 = vld [vmem:[%s791_s0 + $0x8] sm:$0xff]  ;;  %v235_v11 = vld [vmem:[#allocation2 + $0x70] sm:$0xff] }
  0x10   :  { %72 = vmatpush.msra.mxu0 %v48_v4  ;;  %99 = vmatpush.msra.mxu1 %v48_v4  ;;  %v46_v10 = vld [vmem:[#allocation2] sm:$0xff]  ;;  %v234_v12 = vld [vmem:[#allocation2 + $0x68] sm:$0xff]  ;;  %v174_v13 = vld [vmem:[#allocation2 + $0x58] sm:$0xff] }
  0x11   :  { %136 = vmatpush.msra.mxu2 %v110_v3  ;;  %162 = vmatpush.msra.mxu3 %v110_v3  ;;  %v233_v14 = vld [vmem:[#allocation2 + $0x60] sm:$0xff]  ;;  %v173_v15 = vld [vmem:[#allocation2 + $0x50] sm:$0xff]  ;;  %v360_v16 = vld [vmem:[#allocation2 + $0xb8] sm:$0xff] }
  0x12   :  { %73 = vmatpush.msra.mxu0 %v47_v5  ;;  %100 = vmatpush.msra.mxu1 %v47_v5  ;;  %v172_v17 = vld [vmem:[#allocation2 + $0x48] sm:$0xff]  ;;  %v359_v18 = vld [vmem:[#allocation2 + $0xb0] sm:$0xff]  ;;  %v171_v19 = vld [vmem:[#allocation2 + $0x40] sm:$0xff] }
  0x13   :  { %137 = vmatpush.msra.mxu2 %v109_v6  ;;  %163 = vmatpush.msra.mxu3 %v109_v6  ;;  %v358_v20 = vld [vmem:[#allocation2 + $0xa8] sm:$0xff]  ;;  %v298_v21 = vld [vmem:[#allocation2 + $0x98] sm:$0xff]  ;;  %v357_v22 = vld [vmem:[#allocation2 + $0xa0] sm:$0xff] }
  0x14   :  { %552 = vmatmul.msk.f32.vlgmr.msra.gmra.mxu2 %vm55_vm0, %v688_v7  ;;  %555 = vmatmul.msk.f32.vlgmr.msra.gmra.mxu3 %vm55_vm0, %v693_v8  ;;  %v297_v23 = vld [vmem:[#allocation2 + $0x90] sm:$0xff]  ;;  %v484_v24 = vld [vmem:[#allocation2 + $0xf8] sm:$0xff]  ;;  %v296_v25 = vld [vmem:[#allocation2 + $0x88] sm:$0xff] }
  0x15   :  { %258 = vmatpush.msrb.mxu2 %v236_v9  ;;  %284 = vmatpush.msrb.mxu3 %v236_v9  ;;  %v483_v26 = vld [vmem:[#allocation2 + $0xf0] sm:$0xff]  ;;  %v295_v27 = vld [vmem:[#allocation2 + $0x80] sm:$0xff]  ;;  %v482_v28 = vld [vmem:[#allocation2 + $0xe8] sm:$0xff] }
  0x16   :  { %74 = vmatpush.msra.mxu0 %v46_v10  ;;  %101 = vmatpush.msra.mxu1 %v46_v10  ;;  %v422_v29 = vld [vmem:[#allocation2 + $0xd8] sm:$0xff]  ;;  %v481_v30 = vld [vmem:[#allocation2 + $0xe0] sm:$0xff]  ;;  %v421_v31 = vld [vmem:[#allocation2 + $0xd0] sm:$0xff] }
  0x17   :  { %259 = vmatpush.msrb.mxu2 %v235_v11  ;;  %285 = vmatpush.msrb.mxu3 %v235_v11  ;;  %v420_v32 = vld [vmem:[#allocation2 + $0xc8] sm:$0xff]  ;;  %v419_v33 = vld [vmem:[#allocation2 + $0xc0] sm:$0xff] }
  0x18   :  { %548 = vmatmul.msk.f32.vlgmr.msra.gmra.mxu0 %vm55_vm0, %v688_v7  ;;  %550 = vmatmul.msk.f32.vlgmr.msra.gmra.mxu1 %vm55_vm0, %v693_v8  ;;  %v593_v34 = vld [vmem:[#allocation4] ss:$0 sm:$0xff]  ;;  %v594_v35 = vld [vmem:[#allocation4 + $0x1] ss:$0 sm:$0xff]  ;;  %v595_v44 = vld [vmem:[#allocation4 + $0x2] ss:$0 sm:$0xff] }
  0x19   :  { %260 = vmatpush.msrb.mxu2 %v234_v12  ;;  %286 = vmatpush.msrb.mxu3 %v234_v12  ;;  %v596_v45 = vld [vmem:[#allocation4 + $0x3] ss:$0 sm:$0xff]  ;;  %v597_v54 = vld [vmem:[#allocation4 + $0x4] ss:$0 sm:$0xff]  ;;  %v598_v55 = vld [vmem:[#allocation4 + $0x5] ss:$0 sm:$0xff] }
  0x1a   :  { %196 = vmatpush.msrb.mxu0 %v174_v13  ;;  %222 = vmatpush.msrb.mxu1 %v174_v13  ;;  %v599_v0 = vld [vmem:[#allocation4 + $0x6] ss:$0 sm:$0xff]  ;;  %v600_v1 = vld [vmem:[#allocation4 + $0x7] ss:$0 sm:$0xff] }
  0x1b   :  { %261 = vmatpush.msrb.mxu2 %v233_v14  ;;  %287 = vmatpush.msrb.mxu3 %v233_v14 }
  0x1c   :  { %197 = vmatpush.msrb.mxu0 %v173_v15  ;;  %223 = vmatpush.msrb.mxu1 %v173_v15 }
  0x1d   :  { %562 = vmatmul.msk.f32.vlgmr.msrb.gmra.mxu2 %vm55_vm0, %v688_v7  ;;  %565 = vmatmul.msk.f32.vlgmr.msrb.gmra.mxu3 %vm55_vm0, %v693_v8 }
  0x1e   :  { %382 = vmatpush.msra.mxu2 %v360_v16  ;;  %408 = vmatpush.msra.mxu3 %v360_v16 }
  0x1f   :  { %198 = vmatpush.msrb.mxu0 %v172_v17  ;;  %224 = vmatpush.msrb.mxu1 %v172_v17 }
  0x20   :  { %383 = vmatpush.msra.mxu2 %v359_v18  ;;  %409 = vmatpush.msra.mxu3 %v359_v18 }
  0x21   :  { %199 = vmatpush.msrb.mxu0 %v171_v19  ;;  %225 = vmatpush.msrb.mxu1 %v171_v19 }
  0x22   :  { %384 = vmatpush.msra.mxu2 %v358_v20  ;;  %410 = vmatpush.msra.mxu3 %v358_v20 }
  0x23   :  { %557 = vmatmul.msk.f32.vlgmr.msrb.gmra.mxu0 %vm55_vm0, %v688_v7  ;;  %560 = vmatmul.msk.f32.vlgmr.msrb.gmra.mxu1 %vm55_vm0, %v693_v8 }
  0x24   :  { %320 = vmatpush.msra.mxu0 %v298_v21  ;;  %346 = vmatpush.msra.mxu1 %v298_v21 }
  0x25   :  { %385 = vmatpush.msra.mxu2 %v357_v22  ;;  %411 = vmatpush.msra.mxu3 %v357_v22 }
  0x26   :  { %321 = vmatpush.msra.mxu0 %v297_v23  ;;  %347 = vmatpush.msra.mxu1 %v297_v23 }
  0x27   :  { %572 = vmatmul.msk.f32.vlgmr.msra.gmra.mxu2 %vm55_vm0, %v688_v7  ;;  %575 = vmatmul.msk.f32.vlgmr.msra.gmra.mxu3 %vm55_vm0, %v693_v8 }
  0x28   :  { %506 = vmatpush.msrb.mxu2 %v484_v24  ;;  %532 = vmatpush.msrb.mxu3 %v484_v24 }
  0x29   :  { %322 = vmatpush.msra.mxu0 %v296_v25  ;;  %348 = vmatpush.msra.mxu1 %v296_v25 }
  0x2a   :  { %507 = vmatpush.msrb.mxu2 %v483_v26  ;;  %533 = vmatpush.msrb.mxu3 %v483_v26 }
  0x2b   :  { %323 = vmatpush.msra.mxu0 %v295_v27  ;;  %349 = vmatpush.msra.mxu1 %v295_v27 }
  0x2c   :  { %508 = vmatpush.msrb.mxu2 %v482_v28  ;;  %534 = vmatpush.msrb.mxu3 %v482_v28 }
  0x2d   :  { %567 = vmatmul.msk.f32.vlgmr.msra.gmra.mxu0 %vm55_vm0, %v688_v7  ;;  %570 = vmatmul.msk.f32.vlgmr.msra.gmra.mxu1 %vm55_vm0, %v693_v8 }
  0x2e   :  { %444 = vmatpush.msrb.mxu0 %v422_v29  ;;  %470 = vmatpush.msrb.mxu1 %v422_v29 }
  0x2f   :  { %509 = vmatpush.msrb.mxu2 %v481_v30  ;;  %535 = vmatpush.msrb.mxu3 %v481_v30 }
  0x30   :  { %445 = vmatpush.msrb.mxu0 %v421_v31  ;;  %471 = vmatpush.msrb.mxu1 %v421_v31 }
  0x31   :  { %582 = vmatmul.msk.f32.vlgmr.msrb.gmra.mxu2 %vm55_vm0, %v688_v7  ;;  %585 = vmatmul.msk.f32.vlgmr.msrb.gmra.mxu3 %vm55_vm0, %v693_v8 }
  0x32   :  { %446 = vmatpush.msrb.mxu0 %v420_v32  ;;  %472 = vmatpush.msrb.mxu1 %v420_v32 }
  0x34   :  { %447 = vmatpush.msrb.mxu0 %v419_v33  ;;  %473 = vmatpush.msrb.mxu1 %v419_v33 }
  0x35   :  { %577 = vmatmul.msk.f32.vlgmr.msrb.gmra.mxu0 %vm55_vm0, %v688_v7  ;;  %580 = vmatmul.msk.f32.vlgmr.msrb.gmra.mxu1 %vm55_vm0, %v693_v8 }
  0x95   :  { %v76_v36 = vpop.f32.mrf.mxu0  ;;  %v103_v37 = vpop.f32.mrf.mxu1 }
  0x96   :  { %v77_v38 = vadd.f32 %v593_v34, %v76_v36  ;;  %v104_v39 = vadd.f32 %v593_v34, %v103_v37 }
  0x97   :  { %v139_v40 = vpop.f32.mrf.mxu2  ;;  %v165_v41 = vpop.f32.mrf.mxu3 }
  0x98   :  { %80 = vst.msk [vmem:[%s794_s3] sm:$0xff] %vm79_vm1, %v77_v38  ;;  %v140_v42 = vadd.f32 %v594_v35, %v139_v40  ;;  %v166_v43 = vadd.f32 %v594_v35, %v165_v41 }
  0x99   :  { %551 = vst.msk [vmem:[%s794_s3 + $0x8] sm:$0xff] %vm79_vm1, %v104_v39 }
  0x9a   :  { %553 = vst.msk [vmem:[%s794_s3 + $0x10] sm:$0xff] %vm79_vm1, %v140_v42 }
  0x9b   :  { %556 = vst.msk [vmem:[%s794_s3 + $0x18] sm:$0xff] %vm79_vm1, %v166_v43 }
  0xa0   :  { %v201_v46 = vpop.f32.mrf.mxu0  ;;  %v227_v47 = vpop.f32.mrf.mxu1 }
  0xa1   :  { %v202_v48 = vadd.f32 %v595_v44, %v201_v46  ;;  %v228_v49 = vadd.f32 %v595_v44, %v227_v47  ;;  %v263_v50 = vpop.f32.mrf.mxu2  ;;  %v289_v51 = vpop.f32.mrf.mxu3 }
  0xa2   :  { %v264_v52 = vadd.f32 %v596_v45, %v263_v50  ;;  %v290_v53 = vadd.f32 %v596_v45, %v289_v51 }
  0xa3   :  { %558 = vst.msk [vmem:[%s794_s3 + $0x20] sm:$0xff] %vm79_vm1, %v202_v48 }
  0xa4   :  { %561 = vst.msk [vmem:[%s794_s3 + $0x28] sm:$0xff] %vm79_vm1, %v228_v49 }
  0xa5   :  { %563 = vst.msk [vmem:[%s794_s3 + $0x30] sm:$0xff] %vm79_vm1, %v264_v52 }
  0xa6   :  { %566 = vst.msk [vmem:[%s794_s3 + $0x38] sm:$0xff] %vm79_vm1, %v290_v53 }
  0xaa   :  { %v325_v56 = vpop.f32.mrf.mxu0  ;;  %v351_v57 = vpop.f32.mrf.mxu1 }
  0xab   :  { %v326_v58 = vadd.f32 %v597_v54, %v325_v56  ;;  %v352_v59 = vadd.f32 %v597_v54, %v351_v57  ;;  %v387_v60 = vpop.f32.mrf.mxu2  ;;  %v413_v61 = vpop.f32.mrf.mxu3 }
  0xac   :  { %v388_v62 = vadd.f32 %v598_v55, %v387_v60  ;;  %v414_v63 = vadd.f32 %v598_v55, %v413_v61 }
  0xad   :  { %568 = vst.msk [vmem:[%s794_s3 + $0x40] sm:$0xff] %vm79_vm1, %v326_v58 }
  0xae   :  { %571 = vst.msk [vmem:[%s794_s3 + $0x48] sm:$0xff] %vm79_vm1, %v352_v59 }
  0xaf   :  { %573 = vst.msk [vmem:[%s794_s3 + $0x50] sm:$0xff] %vm79_vm1, %v388_v62 }
  0xb0   :  { %576 = vst.msk [vmem:[%s794_s3 + $0x58] sm:$0xff] %vm79_vm1, %v414_v63 }
  0xb2   :  { %v449_v2 = vpop.f32.mrf.mxu0  ;;  %v475_v3 = vpop.f32.mrf.mxu1 }
  0xb3   :  { %v450_v4 = vadd.f32 %v599_v0, %v449_v2  ;;  %v476_v5 = vadd.f32 %v599_v0, %v475_v3 }
  0xb4   :  { %v511_v6 = vpop.f32.mrf.mxu2  ;;  %v537_v7 = vpop.f32.mrf.mxu3 }
  0xb5   :  { %578 = vst.msk [vmem:[%s794_s3 + $0x60] sm:$0xff] %vm79_vm1, %v450_v4  ;;  %v512_v8 = vadd.f32 %v600_v1, %v511_v6  ;;  %v538_v9 = vadd.f32 %v600_v1, %v537_v7 }
  0xb6   :  { %581 = vst.msk [vmem:[%s794_s3 + $0x68] sm:$0xff] %vm79_vm1, %v476_v5 }
  0xb7   :  { %583 = vst.msk [vmem:[%s794_s3 + $0x70] sm:$0xff] %vm79_vm1, %v512_v8 }
  0xb8   :  { %586 = vst.msk [vmem:[%s794_s3 + $0x78] sm:$0xff] %vm79_vm1, %v538_v9 }
  0xb9   :  { %546 = vsyncpa [#allocation3], 1 }
  0xba   :  { %547 = vsyncpa [#allocation5], 1 }

// kernel: comment_encoded_to_skills_forward.2
= control target key start
LH: loop header
LB: loop body
LE: loop exit
PB: predicated region body
PF: predicated region fallthrough
CT: control target
= control target key end

     0   :  { %s4052_s0 = inlined_call_operand.hbm [shape: f32[2,8,32], index: 0, kind: input, shape index: {}]   ;;  %s4053_s1 = inlined_call_operand.hbm [shape: f32[8,32,96], index: 1, kind: input, shape index: {}]   ;;  %s4054_s2 = inlined_call_operand.vmem [shape: f32[8,1,96], index: 2, kind: input, shape index: {}]   ;;  %s4055_s3 = inlined_call_operand.hbm [shape: f32[8,32,32], index: 3, kind: input, shape index: {}]   ;;  %s4056_s4 = inlined_call_operand.hbm [shape: f32[8,1,32], index: 4, kind: input, shape index: {}]   ;;  %s4057_s5 = inlined_call_operand.hbm [shape: f32[8,1,32], index: 5, kind: input, shape index: {}]   ;;  %s4058_s6 = inlined_call_operand.hbm [shape: f32[8,1,32], index: 6, kind: input, shape index: {}]   ;;  %s4059_s7 = inlined_call_operand.hbm [shape: f32[8,32,64], index: 7, kind: input, shape index: {}]   ;;  %s4060_s8 = inlined_call_operand.vmem [shape: f32[8,1,64], index: 8, kind: input, shape index: {}]   ;;  %s4061_s9 = inlined_call_operand.vmem [shape: f32[8,64,32], index: 9, kind: input, shape index: {}]   ;;  %s4062_s10 = inlined_call_operand.hbm [shape: f32[8,1,32], index: 10, kind: input, shape index: {}]   ;;  %s4063_s11 = inlined_call_operand.hbm [shape: f32[8,1,32], index: 11, kind: input, shape index: {}]   ;;  %s4064_s12 = inlined_call_operand.hbm [shape: f32[8,1,32], index: 12, kind: input, shape index: {}]   ;;  %s4065_s13 = inlined_call_operand.vmem [shape: f32[2,8,32], index: 13, kind: output, shape index: {}]  }
   0x1   :  { %4093 = sst [smem:[#allocation29_spill]] %s4052_s0 }
   0x2   :  { %4094 = sst [smem:[#allocation30_spill]] %s4053_s1 }
   0x3   :  { %4095 = sst [smem:[#allocation31_spill]] %s4054_s2 }
   0x4   :  { %4096 = sst [smem:[#allocation32_spill]] %s4059_s7 }
   0x5   :  { %4097 = sst [smem:[#allocation33_spill]] %s4060_s8 }
   0x6   :  { %4098 = sst [smem:[#allocation34_spill]] %s4061_s9 }
   0x7   :  { %4099 = sst [smem:[#allocation35_spill]] %s4063_s11 }
   0x8   :  { %4100 = sst [smem:[#allocation36_spill]] %s4064_s12 }
   0x9   :  { %4101 = sst [smem:[#allocation37_spill]] %s4065_s13 }
   0xa   :  { %18 = vsyncpa [#allocation5], 0 }
   0xb   :  { %19 = vsyncpa [#allocation7], 0 }
   0xc   :  { %21 = vsyncpa [#allocation7 + $0x1], 0 }
   0xd   :  { %22 = vsyncpa [#allocation10], 0 }
   0xe   :  { %24 = vsyncpa [#allocation10 + $0x1], 0 }
   0xf   :  { %25 = vsyncpa [#allocation13], 0 }
  0x10   :  { %27 = vsyncpa [#allocation13 + $0x1], 0 }
  0x11   :  { %28 = vsyncpa [#allocation16], 0 }
  0x12   :  { %30 = vsyncpa [#allocation16 + $0x1], 0 }
  0x13   :  { %31 = vsyncpa [#allocation19], 0 }
  0x14   :  { %33 = vsyncpa [#allocation19 + $0x1], 0  ;;  %s3323_s25 = smov 0   ;;  %s3325_s26 = smov 0  }
  0x15   :  { %s3327_s27 = smov 0   ;;  %s3329_s28 = smov 0  }
  0x16 LB: > { %4102 = sst [smem:[#allocation26_spill]] %s3213_s27  ;;  %s3344_s29 = sadd.s32 1, %s3217_s28   ;;  %s3217_s28 = sphi %s3329_s28, %s4147_s28   ;;  %s3213_s27 = sphi %s3327_s27, %s4149_s27   ;;  %s3209_s26 = sphi %s3325_s26, %s4151_s26   ;;  %s3205_s25 = sphi %s3323_s25, %s4150_s25  }
  0x17   : > { %4103 = sst [smem:[#allocation27_spill]] %s3344_s29  ;;  %s67_s30 = sadd.s32 1, %s3213_s27 }
  0x18   : > { %s64_s14 = ssub.s32 %s3217_s28, %s3344_s29  ;;  %p74_p0 = scmp.ne.s32.totalorder %s3213_s27, %s3209_s26 }
  0x19   : > { %p65_p1 = scmp.eq.s32.totalorder %s64_s14, 0  ;;  %p75_p2 = scmp.eq.s32.totalorder %s3217_s28, 0 }
  0x1a   : > { %p2713_p4 = scmp.lt.s32.totalorder %s3217_s28, 8  ;;  %s3357_s16 = sand.u32 1, %s3217_s28  }
  0x1b   : > { %s3353_s15 = scalar_select %p65_p1, %s3213_s27, %s67_s30  }
  0x1c   : > { %p76_p3 = por %p75_p2, %p74_p0  ;;  %s3360_s17 = sand.u32 1, %s3213_s27  }
  0x1d   : > { %4104 = sst [smem:[#allocation28_spill]] %s3353_s15  ;;  %s3363_s18 = sshll.u32 %s3360_s17, 5 }
  0x1e   : > { %s3366_s19 = sshll.u32 %s3217_s28, 5  ;;  %s4105_s1 = sld [smem:[#allocation30_spill]] }
  0x1f   : > { %s429_s24 = scalar_lea.vmem [#allocation6], %s3363_s18  ;;  %p3376_p5 = pnand %p2713_p4, %p76_p3 }
  0x20   : > { %s437_s30 = sshll.u32 %s429_s24, 4  ;;  %s481_s29 = scalar_lea.hbm %s4056_s4, %s3217_s28  ;;  %s438_s30 = int_to_ptr.vmem [resolvable:$true] %s437_s30 }
  0x21   : > { %s3384_s13 = sshll.u32 %s481_s29, 4  ;;  %p3389_p7 = pneg %p3376_p5  ;;  %s484_s13 = int_to_ptr.hbm [resolvable:$true] %s3384_s13 }
  0x24   : > { %s434_s22 = scalar_lea.hbm %s4105_s1, %s3366_s19  ;;  %s2870_s15 = scalar_lea.hbm %s4105_s1, 256 }
  0x25   : > { %s3372_s23 = sshll.u32 %s434_s22, 4  ;;  %s436_s23 = int_to_ptr.hbm [resolvable:$true] %s3372_s23 }
  0x26   : > { %s2863_s21 = sshra.s32 %s436_s23, 4  ;;  %s2864_s21 = int_to_ptr.hbm [resolvable:$true] %s2863_s21 }
  0x27   : > { %s2865_s22 = scalar_lea.hbm %s2864_s21, 32  ;;  %p2871_p10 = scmp.lt.s32.totalorder %s2864_s21, %s4105_s1 }
  0x28   : > { %p2866_p6 = scmp.ne.s32.totalorder %s2864_s21, %s2865_s22  ;;  %p2872_p11 = scmp.lt.s32.totalorder %s2870_s15, %s2865_s22 }
  0x2a   : > { %p2868_p8 = pnand %p3389_p7, %p2866_p6  ;;  %p2873_p12 = por %p2872_p11, %p2871_p10 }
  0x2c   : > { %p2869_p9 = pneg %p2868_p8 }
  0x2e   : > { %p2874_p13 = pnand %p2873_p12, %p2869_p9 }
  0x30   : > { %2877 = shalt.err (!%p2874_p13)
}
  0x31   : > { %s4077_s20 = smov 128   ;;  %s3220_s2 = smov 8  }
  0x32   : > { %s4108_s9 = scalar_lea.sflag [#allocation7], %s3357_s16  ;;  %s478_s8 = scalar_lea.vmem [#allocation9], %s3360_s17 }
  0x33   : > { %2687 = dma.hbm_to_vmem [thread:$0]  (!%p3376_p5), %s436_s23, 512, %s438_s30, %s4108_s9, %s4077_s20, %s4077_s20, %s3220_s2  }
  0x34   : > { %s485_s21 = sshll.u32 %s478_s8, 4  ;;  %s4074_s22 = scalar_lea.sflag [#allocation10], %s3357_s16  ;;  %s486_s21 = int_to_ptr.vmem [resolvable:$true] %s485_s21 }
  0x35   : > { %s2893_s27 = sshra.s32 %s484_s13, 4  ;;  %s2900_s12 = scalar_lea.hbm %s4056_s4, 8  ;;  %s2894_s27 = int_to_ptr.hbm [resolvable:$true] %s2893_s27 }
  0x36   : > { %s2895_s15 = scalar_lea.hbm %s2894_s27, 1  ;;  %p2901_p3 = scmp.lt.s32.totalorder %s2894_s27, %s4056_s4 }
  0x37   : > { %p2896_p0 = scmp.ne.s32.totalorder %s2894_s27, %s2895_s15  ;;  %p2902_p4 = scmp.lt.s32.totalorder %s2900_s12, %s2895_s15 }
  0x39   : > { %p2898_p1 = pnand %p2896_p0, %p3389_p7  ;;  %p2903_p6 = por %p2902_p4, %p2901_p3 }
  0x3b   : > { %p2899_p2 = pneg %p2898_p1 }
  0x3d   : > { %p2904_p8 = pnand %p2903_p6, %p2899_p2 }
  0x3f   : > { %2907 = shalt.err (!%p2904_p8)
}
  0x40   : > { %2693 = dma.hbm_to_vmem [thread:$0]  (!%p3376_p5), %s484_s13, 16, %s486_s21, %s4074_s22  }
  0x41   : > { %s515_s30 = scalar_lea.hbm %s4058_s6, %s3217_s28  ;;  %s512_s7 = scalar_lea.vmem [#allocation12], %s3360_s17 }
  0x42   : > { %s517_s9 = sshll.u32 %s515_s30, 4  ;;  %s519_s11 = sshll.u32 %s512_s7, 4  ;;  %s518_s9 = int_to_ptr.hbm [resolvable:$true] %s517_s9  ;;  %s520_s11 = int_to_ptr.vmem [resolvable:$true] %s519_s11 }
  0x43   : > { %s4076_s12 = scalar_lea.sflag [#allocation13], %s3357_s16  ;;  %s2923_s8 = sshra.s32 %s518_s9, 4  ;;  %s2924_s8 = int_to_ptr.hbm [resolvable:$true] %s2923_s8 }
  0x44   : > { %s2925_s27 = scalar_lea.hbm %s2924_s8, 1  ;;  %s2930_s13 = scalar_lea.hbm %s4058_s6, 8 }
  0x45   : > { %p2926_p9 = scmp.ne.s32.totalorder %s2924_s8, %s2925_s27  ;;  %p2931_p12 = scmp.lt.s32.totalorder %s2924_s8, %s4058_s6 }
  0x46   : > { %p2932_p13 = scmp.lt.s32.totalorder %s2930_s13, %s2925_s27 }
  0x47   : > { %p2928_p10 = pnand %p2926_p9, %p3389_p7 }
  0x48   : > { %p2933_p0 = por %p2932_p13, %p2931_p12 }
  0x49   : > { %p2929_p11 = pneg %p2928_p10 }
  0x4b   : > { %p2934_p1 = pnand %p2933_p0, %p2929_p11 }
  0x4d   : > { %2937 = shalt.err (!%p2934_p1)
}
  0x4e   : > { %2699 = dma.hbm_to_vmem [thread:$0]  (!%p3376_p5), %s518_s9, 16, %s520_s11, %s4076_s12  }
  0x4f   : > { %s568_s7 = scalar_lea.hbm %s4062_s10, %s3217_s28  ;;  %s565_s15 = scalar_lea.vmem [#allocation15], %s3360_s17 }
  0x50   : > { %s572_s29 = sshll.u32 %s565_s15, 4  ;;  %s570_s8 = sshll.u32 %s568_s7, 4  ;;  %s573_s29 = int_to_ptr.vmem [resolvable:$true] %s572_s29  ;;  %s571_s8 = int_to_ptr.hbm [resolvable:$true] %s570_s8 }
  0x51   : > { %s4075_s27 = scalar_lea.sflag [#allocation16], %s3357_s16  ;;  %s2953_s13 = sshra.s32 %s571_s8, 4  ;;  %s2954_s13 = int_to_ptr.hbm [resolvable:$true] %s2953_s13 }
  0x52   : > { %s2955_s21 = scalar_lea.hbm %s2954_s13, 1  ;;  %s2960_s9 = scalar_lea.hbm %s4062_s10, 8 }
  0x53   : > { %p2956_p2 = scmp.ne.s32.totalorder %s2954_s13, %s2955_s21  ;;  %p2961_p6 = scmp.lt.s32.totalorder %s2954_s13, %s4062_s10 }
  0x54   : > { %p2962_p8 = scmp.lt.s32.totalorder %s2960_s9, %s2955_s21 }
  0x55   : > { %p2958_p3 = pnand %p2956_p2, %p3389_p7 }
  0x56   : > { %p2963_p9 = por %p2962_p8, %p2961_p6 }
  0x57   : > { %p2959_p4 = pneg %p2958_p3 }
  0x59   : > { %p2964_p10 = pnand %p2963_p9, %p2959_p4 }
  0x5b   : > { %2967 = shalt.err (!%p2964_p10)
}
  0x5c   : > { %2705 = dma.hbm_to_vmem [thread:$0]  (!%p3376_p5), %s571_s8, 16, %s573_s29, %s4075_s27  }
  0x5d   : > { %s3460_s22 = sadd.s32 4294967295, %s3217_s28   ;;  %p80_p11 = scmp.ne.s32.totalorder %s3209_s26, %s3205_s25 }
  0x5e   : > { %p81_p12 = scmp.eq.s32.totalorder %s3460_s22, 0  ;;  %p2574_p13 = scmp.ge.s32.totalorder %s3217_s28, 1 }
  0x5f   : > { %p398_p0 = scmp.lt.s32.totalorder %s3217_s28, 9  ;;  %p2575_p2 = scmp.ne.s32.totalorder %s3460_s22, 0 }
  0x60   : > { %p3469_p1 = por %p81_p12, %p80_p11  ;;  %s4111_s0 = sld [smem:[#allocation29_spill]] }
  0x61   : > { %p3474_p3 = pnand %p2574_p13, %p398_p0  ;;  %s3221_s25 = smov [#allocation4]  }
  0x62   : > { %s411_s13 = sshll.u32 %s3221_s25, 4  ;;  %s462_s9 = scalar_lea.hbm %s4055_s3, %s3366_s19  ;;  %s412_s13 = int_to_ptr.vmem [resolvable:$true] %s411_s13 }
  0x63   : > { %p2680_p4 = pneg %p3474_p3  ;;  %s463_s11 = sshll.u32 %s462_s9, 4  ;;  %s464_s11 = int_to_ptr.hbm [resolvable:$true] %s463_s11 }
  0x64   : > { %s457_s1 = scalar_lea.vmem [#allocation8], %s3363_s18  ;;  %s3013_s15 = sshra.s32 %s464_s11, 4  ;;  %s3014_s15 = int_to_ptr.hbm [resolvable:$true] %s3013_s15 }
  0x65   : > { %p2681_p6 = pnand %p2680_p4, %p81_p12  ;;  %s465_s27 = sshll.u32 %s457_s1, 4  ;;  %s466_s27 = int_to_ptr.vmem [resolvable:$true] %s465_s27 }
  0x66   : > { %s409_s8 = sshll.u32 %s4111_s0, 4  ;;  %s3015_s29 = scalar_lea.hbm %s3014_s15, 32  ;;  %s410_s8 = int_to_ptr.hbm [resolvable:$true] %s409_s8 }
  0x67   : > { %2683 = dma.hbm_to_vmem [thread:$0]  (!%p2681_p6), %s410_s8, 256, %s412_s13, [#allocation5], %s4077_s20, %s4077_s20, %s3220_s2  }
  0x68   : > { %p3016_p8 = scmp.ne.s32.totalorder %s3014_s15, %s3015_s29  ;;  %s3020_s21 = scalar_lea.hbm %s4055_s3, 256 }
  0x69   : > { %p3021_p11 = scmp.lt.s32.totalorder %s3014_s15, %s4055_s3  ;;  %p3022_p13 = scmp.lt.s32.totalorder %s3020_s21, %s3015_s29 }
  0x6a   : > { %p3018_p9 = pnand %p3016_p8, %p3389_p7 }
  0x6b   : > { %p3023_p0 = por %p3022_p13, %p3021_p11 }
  0x6c   : > { %p3019_p10 = pneg %p3018_p9 }
  0x6e   : > { %p3024_p4 = pnand %p3023_p0, %p3019_p10 }
  0x70   : > { %3027 = shalt.err (!%p3024_p4)
}
  0x71   : > { %s4112_s8 = scalar_lea.sflag [#allocation7], %s3357_s16  ;;  %s498_s1 = scalar_lea.hbm %s4057_s5, %s3217_s28 }
  0x72   : > { %2690 = dma.hbm_to_vmem [thread:$0]  (!%p3376_p5), %s464_s11, 512, %s466_s27, %s4112_s8, %s4077_s20, %s4077_s20, %s3220_s2  }
  0x73   : > { %s495_s15 = scalar_lea.vmem [#allocation11], %s3360_s17  ;;  %s500_s25 = sshll.u32 %s498_s1, 4  ;;  %s501_s25 = int_to_ptr.hbm [resolvable:$true] %s500_s25 }
  0x74   : > { %s502_s29 = sshll.u32 %s495_s15, 4  ;;  %s3043_s21 = sshra.s32 %s501_s25, 4  ;;  %s503_s29 = int_to_ptr.vmem [resolvable:$true] %s502_s29  ;;  %s3044_s21 = int_to_ptr.hbm [resolvable:$true] %s3043_s21 }
  0x75   : > { %s3045_s23 = scalar_lea.hbm %s3044_s21, 1  ;;  %s3050_s27 = scalar_lea.hbm %s4057_s5, 8 }
  0x76   : > { %p3046_p6 = scmp.ne.s32.totalorder %s3044_s21, %s3045_s23  ;;  %p3051_p10 = scmp.lt.s32.totalorder %s3044_s21, %s4057_s5 }
  0x77   : > { %p3052_p11 = scmp.lt.s32.totalorder %s3050_s27, %s3045_s23 }
  0x78   : > { %p3048_p8 = pnand %p3046_p6, %p3389_p7 }
  0x79   : > { %p3053_p13 = por %p3052_p11, %p3051_p10 }
  0x7a   : > { %p3049_p9 = pneg %p3048_p8 }
  0x7c   : > { %p3054_p0 = pnand %p3053_p13, %p3049_p9 }
  0x7e   : > { %3057 = shalt.err (!%p3054_p0)
}
  0x7f   : > { %s4113_s12 = scalar_lea.sflag [#allocation10], %s3357_s16  ;;  %s4114_s0 = sld [smem:[#allocation32_spill]] }
  0x80   : > { %2696 = dma.hbm_to_vmem [thread:$0]  (!%p3376_p5), %s501_s25, 16, %s503_s29, %s4113_s12  }
  0x81   : > { %s530_s9 = scalar_lea.vmem [#allocation14], %s3363_s18 }
  0x82   : > { %s538_s20 = sshll.u32 %s530_s9, 4  ;;  %s539_s20 = int_to_ptr.vmem [resolvable:$true] %s538_s20 }
  0x85   : > { %s535_s15 = scalar_lea.hbm %s4114_s0, %s3366_s19  ;;  %s3080_s29 = scalar_lea.hbm %s4114_s0, 256 }
  0x86   : > { %s536_s11 = sshll.u32 %s535_s15, 4  ;;  %s537_s11 = int_to_ptr.hbm [resolvable:$true] %s536_s11 }
  0x87   : > { %s3073_s21 = sshra.s32 %s537_s11, 4  ;;  %s3074_s21 = int_to_ptr.hbm [resolvable:$true] %s3073_s21 }
  0x88   : > { %s3075_s23 = scalar_lea.hbm %s3074_s21, 32  ;;  %p3081_p9 = scmp.lt.s32.totalorder %s3074_s21, %s4114_s0 }
  0x89   : > { %p3076_p4 = scmp.ne.s32.totalorder %s3074_s21, %s3075_s23  ;;  %p3082_p10 = scmp.lt.s32.totalorder %s3080_s29, %s3075_s23 }
  0x8b   : > { %p3078_p6 = pnand %p3076_p4, %p3389_p7  ;;  %p3083_p11 = por %p3082_p10, %p3081_p9 }
  0x8d   : > { %p3079_p8 = pneg %p3078_p6 }
  0x8f   : > { %p3084_p13 = pnand %p3083_p11, %p3079_p8 }
  0x91   : > { %3087 = shalt.err (!%p3084_p13)
}
  0x92   : > { %s4115_s18 = smov 128   ;;  %s4116_s19 = scalar_lea.sflag [#allocation13], %s3357_s16 }
  0x93   : > { %2702 = dma.hbm_to_vmem [thread:$0]  (!%p3376_p5), %s537_s11, 512, %s539_s20, %s4116_s19, %s4115_s18, %s4115_s18, %s3220_s2  }
  0x94   : > { %s4117_s15 = sld [smem:[#allocation35_spill]]  ;;  %s582_s21 = scalar_lea.vmem [#allocation17], %s3360_s17 }
  0x95   : > { %s589_s23 = sshll.u32 %s582_s21, 4  ;;  %s590_s23 = int_to_ptr.vmem [resolvable:$true] %s589_s23 }
  0x9a   : > { %s585_s9 = scalar_lea.hbm %s4117_s15, %s3217_s28  ;;  %s3110_s2 = scalar_lea.hbm %s4117_s15, 8 }
  0x9b   : > { %s587_s27 = sshll.u32 %s585_s9, 4  ;;  %s588_s27 = int_to_ptr.hbm [resolvable:$true] %s587_s27 }
  0x9c   : > { %s3103_s8 = sshra.s32 %s588_s27, 4  ;;  %s3104_s8 = int_to_ptr.hbm [resolvable:$true] %s3103_s8 }
  0x9d   : > { %s3105_s29 = scalar_lea.hbm %s3104_s8, 1  ;;  %p3111_p8 = scmp.lt.s32.totalorder %s3104_s8, %s4117_s15 }
  0x9e   : > { %p3106_p0 = scmp.ne.s32.totalorder %s3104_s8, %s3105_s29  ;;  %p3112_p9 = scmp.lt.s32.totalorder %s3110_s2, %s3105_s29 }
  0xa0   : > { %p3108_p4 = pnand %p3106_p0, %p3389_p7  ;;  %p3113_p10 = por %p3112_p9, %p3111_p8 }
  0xa2   : > { %p3109_p6 = pneg %p3108_p4 }
  0xa4   : > { %p3114_p11 = pnand %p3113_p10, %p3109_p6 }
  0xa6   : > { %3117 = shalt.err (!%p3114_p11)
}
  0xa7   : > { %s4118_s18 = scalar_lea.sflag [#allocation16], %s3357_s16  ;;  %s4119_s1 = sld [smem:[#allocation36_spill]] }
  0xa8   : > { %2708 = dma.hbm_to_vmem [thread:$0]  (!%p3376_p5), %s588_s27, 16, %s590_s23, %s4118_s18  }
  0xa9   : > { %s599_s25 = scalar_lea.vmem [#allocation18], %s3360_s17  ;;  %s597_s29 = scalar_lea.sflag [#allocation19], %s3360_s17 }
  0xaa   : > { %s606_s8 = sshll.u32 %s599_s25, 4  ;;  %s607_s8 = int_to_ptr.vmem [resolvable:$true] %s606_s8 }
  0xad   : > { %s602_s9 = scalar_lea.hbm %s4119_s1, %s3217_s28  ;;  %s3140_s23 = scalar_lea.hbm %s4119_s1, 8 }
  0xae   : > { %s604_s21 = sshll.u32 %s602_s9, 4  ;;  %s605_s21 = int_to_ptr.hbm [resolvable:$true] %s604_s21 }
  0xaf   : > { %s3133_s12 = sshra.s32 %s605_s21, 4  ;;  %s3134_s12 = int_to_ptr.hbm [resolvable:$true] %s3133_s12 }
  0xb0   : > { %s3135_s2 = scalar_lea.hbm %s3134_s12, 1  ;;  %p3141_p6 = scmp.lt.s32.totalorder %s3134_s12, %s4119_s1 }
  0xb1   : > { %p3136_p13 = scmp.ne.s32.totalorder %s3134_s12, %s3135_s2  ;;  %p3142_p8 = scmp.lt.s32.totalorder %s3140_s23, %s3135_s2 }
  0xb3   : > { %p3138_p0 = pnand %p3136_p13, %p3389_p7  ;;  %p3143_p9 = por %p3142_p8, %p3141_p6 }
  0xb5   : > { %p3139_p4 = pneg %p3138_p0 }
  0xb7   : > { %p3144_p10 = pnand %p3143_p9, %p3139_p4 }
  0xb9   : > { %3147 = shalt.err (!%p3144_p10)
}
  0xba   : > { %2711 = dma.hbm_to_vmem [thread:$0]  (!%p3376_p5), %s605_s21, 16, %s607_s8, %s597_s29  }
  0xbb   : > { %615 = sbr.rel (%p3474_p3) target bundleno = 3770 (0xeba), region = 72 }
  0xc0   : > { %3180 = dma.done.wait (%p81_p12), [#allocation5], 256  }
  0xc1   : > { %3182 = vsyncadd (%p81_p12), [#allocation5], 4294967040  ;;  %s622_s28 = sand.u32 1, %s3460_s22   ;;  %s3586_s17 = sand.u32 1, %s3209_s26  }
  0xc2   : > { %s2588_s24 = sshll.u32 %s3586_s17, 5  ;;  %s623_s18 = scalar_lea.sflag [#allocation7], %s622_s28 }
  0xc3   : > { %s3589_s14 = scalar_lea.vmem [#allocation6], %s2588_s24 }
  0xc4   : > { %3184 = dma.done.wait (%p3469_p1), %s623_s18, 1024  }
  0xc5   : > { %3186 = vsyncadd (%p3469_p1), %s623_s18, 4294966272  ;;  %s3595_s7 = scalar_lea.vmem [#allocation8], %s2588_s24  ;;  %s643_s19 = scalar_lea.sflag [#allocation10], %s622_s28 }
  0xc6   : > { %s645_s13 = scalar_lea.vmem [#allocation9], %s3586_s17 }
  0xc7   : > { %3188 = dma.done.wait (%p3469_p1), %s643_s19, 32  }
  0xc8   : > { %3190 = vsyncadd (%p3469_p1), %s643_s19, 4294967264  ;;  %s661_s21 = scalar_lea.sflag [#allocation13], %s622_s28 }
  0xc9   : > { %3192 = dma.done.wait (%p3469_p1), %s661_s21, 528  }
  0xca   : > { %3194 = vsyncadd (%p3469_p1), %s661_s21, 4294966768  ;;  %s3608_s8 = scalar_lea.vmem [#allocation14], %s2588_s24  ;;  %s680_s29 = scalar_lea.sflag [#allocation16], %s622_s28 }
  0xcb   : > { %3196 = dma.done.wait (%p3469_p1), %s680_s29, 32  }
  0xcc   : > { %3198 = vsyncadd (%p3469_p1), %s680_s29, 4294967264  ;;  %s698_s16 = scalar_lea.sflag [#allocation19], %s3586_s17 }
  0xcd   : > { %3200 = dma.done.wait (%p3469_p1), %s698_s16, 16  }
  0xce   : > { %3202 = vsyncadd (%p3469_p1), %s698_s16, 4294967280  ;;  %p784_p5 = scmp.lt.s32.totalorder %s3460_s22, 7  ;;  %s4120_s28 = sld [smem:[#allocation31_spill]] }
  0xcf   : > { %s4122_s16 = sld [smem:[#allocation34_spill]] }
  0xd0   : > { %s3624_s23 = scalar_select %p784_p5, %s3460_s22, 7 }
  0xd1   : > { %798 = sbr.rel (%p2575_p2) target bundleno = 217 (0xd9), region = 116  ;;  %s4123_s25 = sld [smem:[#allocation37_spill]] (!%p2575_p2) }
  0xd2   : > { %s2657_s20 = sshll.u32 %s3624_s23, 6 }
  0xd4   : > { %s786_s24 = scalar_lea.vmem %s4120_s28, %s3624_s23 }
  0xd5   : > { %s3638_s12 = scalar_lea.vmem %s4122_s16, %s2657_s20 }
  0xd6   : > { %v799_v0 = vld [vmem:[#allocation4] sm:$0xff]  ;;  %vm801_vm0 = vcmask 261120   ;;  %v800_v1 = vld [vmem:[#allocation4 + $0x8] sm:$0xff] }
  0xd7   : > { %802 = vst.msk [vmem:[%s4123_s25] sm:$0xff] %vm801_vm0, %v799_v0 }
  0xd8   : > { %803 = vst.msk [vmem:[%s4123_s25 + $0x8] sm:$0xff] %vm801_vm0, %v800_v1 }
  0xd9 PF: > { %v3649_v2 = vld [vmem:[%s3589_s14 + $0x18] sm:$0xff]  ;;  %v3652_v3 = vld [vmem:[%s3589_s14 + $0x10] sm:$0xff]  ;;  %v3656_v4 = vld [vmem:[%s3589_s14 + $0x8] sm:$0xff]  ;;  %s4124_s25 = sld [smem:[#allocation37_spill]]  ;;  %vm836_vm1 = vcmask 261120   ;;  %vm860_vm2 = vcmask 785408  }
  0xda   : > { %852 = vmatpush.msra.mxu0 %v3649_v2  ;;  %v3660_v5 = vld [vmem:[%s3589_s14] sm:$0xff]  ;;  %v3671_v7 = vld [vmem:[%s786_s24] ss:$0 sm:$0xff]  ;;  %s3222_s14 = smov 92   ;;  %s3223_s2 = smov 64   ;;  %vm867_vm3 = vcmask 31744  }
  0xdb   : > { %s3224_s20 = smov 96   ;;  %s3225_s24 = smov 124   ;;  %vm893_vm4 = vcmask 64512   ;;  %vm1005_vm5 = vcmask 64544   ;;  %vm1080_vm6 = vcmask 97344   ;;  %vm1155_vm7 = vcmask 130144  }
  0xdc   : > { %853 = vmatpush.msra.mxu0 %v3652_v3  ;;  %s3226_s18 = smov 116   ;;  %s3227_s19 = smov 88   ;;  %vm1230_vm8 = vcmask 162944   ;;  %vm1305_vm9 = vcmask 195744   ;;  %vm1380_vm10 = vcmask 228544   ;;  %vm1455_vm11 = vcmask 261344  }
  0xdd   : > { %s4083_s21 = smov 76   ;;  %s3229_s30 = smov 84   ;;  %vm1552_vm0 = vcmask 523264  }
  0xde   : > { %854 = vmatpush.msra.mxu0 %v3656_v4  ;;  %s4089_s16 = smov 120   ;;  %s3231_s27 = smov 80  }
  0xdf   : > { %v3666_v6 = vld [vmem:[%s4124_s25] sm:$0xff]  ;;  %s3232_s11 = smov 112   ;;  %s4080_s28 = smov 68  }
  0xe0   : > { %855 = vmatpush.msra.mxu0 %v3660_v5  ;;  %s4078_s22 = smov 100   ;;  %s4079_s9 = smov 72  }
  0xe1   : > { %2594 = vmatmul.msk.f32.vlgmr.msra.gmra.mxu0 %vm836_vm1, %v3666_v6  ;;  %s3236_s29 = smov 108  }
 0x15e   : > { %v857_v8 = vpop.f32.mrf.mxu0 }
 0x15f   : > { %v858_v9 = vadd.f32 %v3671_v7, %v857_v8 }
 0x161   : > { %861 = vst.msk [vmem:[#allocation2] sm:$0xff] %vm860_vm2, %v858_v9 }
 0x168   : > { %v3675_v10 = vld [vmem:[#allocation2] sm:$0xff] }
 0x169   : > { %938 = vrot.lane.b32.xlu2 %v3675_v10, %s3222_s14  ;;  %905 = vrot.lane.b32.xlu1 %v3675_v10, %s3223_s2  ;;  %v3684_v11 = vmul.f32 0.5, %v3675_v10 }
 0x16a   : > { %865 = vrot.lane.b32.xlu0 %v3675_v10, %s3224_s20 }
 0x171   : > { %935 = vrot.lane.b32.xlu2 %v3684_v11, %s3225_s24  ;;  %1085 = vrot.lane.b32.xlu1 %v3684_v11, %s3226_s18 }
 0x179   : > { %1013 = vrot.lane.b32.xlu2 %v3675_v10, %s3227_s19  ;;  %1238 = vrot.lane.b32.xlu1 %v3675_v10, %s4083_s21  ;;  %s4088_s21 = smov 60  }
 0x181   : > { %1088 = vrot.lane.b32.xlu2 %v3675_v10, %s3229_s30 }
 0x189   : > { %1010 = vrot.lane.b32.xlu2 %v3684_v11, %s4089_s16  ;;  %s3250_s16 = smov 28  }
 0x191   : > { %1163 = vrot.lane.b32.xlu2 %v3675_v10, %s3231_s27 }
 0x199   : > { %1160 = vrot.lane.b32.xlu2 %v3684_v11, %s3232_s11 }
 0x1a1   : > { %1388 = vrot.lane.b32.xlu2 %v3675_v10, %s4080_s28  ;;  %s4081_s28 = smov 48  }
 0x1a9   : > { %1385 = vrot.lane.b32.xlu2 %v3684_v11, %s4078_s22  ;;  %s3237_s22 = smov 104  }
 0x1c3   : > { %v939_v12 = vpop.permute.xlu2 %938 }
 0x1cb   : > { %v936_v13 = vpop.permute.xlu2 %935 }
 0x1d3   : > { %v1014_v14 = vpop.permute.xlu2 %1013 }
 0x1db   : > { %v1089_v15 = vpop.permute.xlu2 %1088  ;;  %v906_v16 = vpop.permute.xlu1 %905 }
 0x1dc   : > { %v866_v17 = vpop.permute.xlu0 %865  ;;  %926 = vmatpush.msra.mxu3 %v906_v16  ;;  %2604 = vmatpush.xpose.msk.msrb.mxu0 %vm867_vm3, %v1089_v15 }
 0x1dd   : > { %2595 = vmatpush.xpose.msk.msra.mxu1 %vm867_vm3, %v866_v17 }
 0x1de   : > { %2598 = vmatpush.xpose.msk.msrb.mxu3 %vm867_vm3, %v939_v12 }
 0x1e0   : > { %2596 = vmatmul.msk.f32.vlgmr.msra.gmra.mxu1 %vm867_vm3, %v3684_v11 }
 0x1e1   : > { %2601 = vmatpush.xpose.msk.msrb.mxu1 %vm867_vm3, %v1014_v14 }
 0x1e3   : > { %v1011_v18 = vpop.permute.xlu2 %1010  ;;  %v1086_v19 = vpop.permute.xlu1 %1085 }
 0x1e4   : > { %2605 = vmatmul.msk.f32.vlgmr.msrb.gmra.mxu0 %vm867_vm3, %v1086_v19 }
 0x1e8   : > { %2602 = vmatmul.msk.f32.vlgmr.msrb.gmra.mxu1 %vm867_vm3, %v1011_v18 }
 0x1eb   : > { %v1164_v20 = vpop.permute.xlu2 %1163  ;;  %v1239_v21 = vpop.permute.xlu1 %1238 }
 0x1ec   : > { %2607 = vmatpush.xpose.msk.msra.mxu1 %vm867_vm3, %v1164_v20  ;;  %2610 = vmatpush.xpose.msk.msra.mxu0 %vm867_vm3, %v1239_v21 }
 0x1f3   : > { %v1161_v22 = vpop.permute.xlu2 %1160 }
 0x1f4   : > { %2608 = vmatmul.msk.f32.vlgmr.msra.gmra.mxu1 %vm867_vm3, %v1161_v22 }
 0x1fb   : > { %v1389_v23 = vpop.permute.xlu2 %1388 }
 0x1fc   : > { %2616 = vmatpush.xpose.msk.msrb.mxu0 %vm867_vm3, %v1389_v23 }
 0x203   : > { %v1386_v42 = vpop.permute.xlu2 %1385 }
 0x25d   : > { %v890_v24 = vpop.f32.mrf.mxu1 }
 0x25e   : > { %v894_v25 = vsel %vm893_vm4, %v890_v24, -inf }
 0x25f   : > { %895 = vmax.xlane.f32.xlu0 %v894_v25 }
 0x261   : > { %v1111_v26 = vpop.f32.mrf.mxu0 }
 0x262   : > { %v1114_v27 = vsel %vm893_vm4, %v1111_v26, -inf }
 0x263   : > { %1115 = vmax.xlane.f32.xlu2 %v1114_v27 }
 0x265   : > { %v1036_v28 = vpop.f32.mrf.mxu1 }
 0x266   : > { %v1039_v29 = vsel %vm893_vm4, %v1036_v28, -inf }
 0x271   : > { %v1186_v36 = vpop.f32.mrf.mxu1 }
 0x272   : > { %v1189_v37 = vsel %vm893_vm4, %v1186_v36, -inf }
 0x273   : > { %1313 = vrot.lane.b32.xlu0 %v3675_v10, %s4079_s9  ;;  %s4082_s9 = smov 56  }
 0x29d   : > { %1040 = vmax.xlane.f32.xlu0 %v1039_v29 }
 0x2d2   : > { %v896_v30 = vpop.xlane.xlu0 %895 }
 0x2d3   : > { %v897_v31 = vsub.f32 %v890_v24, %v896_v30 }
 0x2d5   : > { %v898_v32 = vmul.f32 1.442695, %v897_v31 }
 0x2d6   : > { %v1116_v49 = vpop.xlane.xlu2 %1115 }
 0x2d7   : > { %2789 = vpow2.f32 %v898_v32  ;;  %v1117_v52 = vsub.f32 %v1111_v26, %v1116_v49 }
 0x2d9   : > { %v1118_v58 = vmul.f32 1.442695, %v1117_v52 }
 0x2dd   : > { %v2790_v33 = vpop.eup %2789 }
 0x2de   : > { %v900_v34 = vsel %vm893_vm4, %v2790_v33, 0.0 }
 0x2df   : > { %901 = vadd.xlane.f32.xlu1 %v900_v34 }
 0x2e5   : > { %v1314_v35 = vpop.permute.xlu0 %1313 }
 0x2e6   : > { %2613 = vmatpush.xpose.msk.msrb.mxu1 %vm867_vm3, %v1314_v35 }
 0x2f8   : > { %1235 = vrot.lane.b32.xlu1 %v3684_v11, %s3236_s29 }
 0x300   : > { %1310 = vrot.lane.b32.xlu1 %v3684_v11, %s3237_s22 }
 0x310   : > { %v1041_v45 = vpop.xlane.xlu0 %1040 }
 0x311   : > { %v1042_v46 = vsub.f32 %v1036_v28, %v1041_v45 }
 0x313   : > { %v1043_v50 = vmul.f32 1.442695, %v1042_v46 }
 0x32a   : > { %1190 = vmax.xlane.f32.xlu1 %v1189_v37 }
 0x352   : > { %v902_v38 = vpop.xlane.xlu1 %901 }
 0x353   : > { %2791 = vrcp.f32 %v902_v38 }
 0x354   : > { %2793 = vpow2.f32 %v1043_v50 }
 0x355   : > { %2795 = vpow2.f32 %v1118_v58 }
 0x359   : > { %v2792_v39 = vpop.eup %2791 }
 0x35a   : > { %v904_v40 = vmul.f32 %v2792_v39, %v2790_v33  ;;  %v2794_v60 = vpop.eup %2793 }
 0x35b   : > { %v1045_v63 = vsel %vm893_vm4, %v2794_v60, 0.0  ;;  %v3744_v0 = vpop.eup %2795 }
 0x35c   : > { %2597 = vmatmul.msk.f32.vlgmr.msra.gmra.mxu3 %vm893_vm4, %v904_v40  ;;  %v1120_v8 = vsel %vm893_vm4, %v3744_v0, 0.0 }
 0x364   : > { %2599 = vmatmul.msk.f32.vlgmr.msrb.gmra.mxu3 %vm867_vm3, %v936_v13 }
 0x36a   : > { %v1236_v41 = vpop.permute.xlu1 %1235 }
 0x36b   : > { %2611 = vmatmul.msk.f32.vlgmr.msra.gmra.mxu0 %vm867_vm3, %v1236_v41 }
 0x372   : > { %v1311_v43 = vpop.permute.xlu1 %1310 }
 0x373   : > { %2614 = vmatmul.msk.f32.vlgmr.msrb.gmra.mxu1 %vm867_vm3, %v1311_v43  ;;  %2617 = vmatmul.msk.f32.vlgmr.msrb.gmra.mxu0 %vm867_vm3, %v1386_v42 }
 0x39d   : > { %v1191_v51 = vpop.xlane.xlu1 %1190 }
 0x39e   : > { %v1192_v53 = vsub.f32 %v1186_v36, %v1191_v51 }
 0x3a0   : > { %v1193_v59 = vmul.f32 1.442695, %v1192_v53 }
 0x3a2   : > { %2797 = vpow2.f32 %v1193_v59 }
 0x3a8   : > { %v2798_v1 = vpop.eup %2797 }
 0x3a9   : > { %v1195_v9 = vsel %vm893_vm4, %v2798_v1, 0.0 }
 0x3df   : > { %v928_v44 = vpop.f32.mrf.mxu3 }
 0x3e0   : > { %931 = vst.msk [vmem:[#allocation3] sm:$0xff] %vm867_vm3, %v928_v44 }
 0x3e7   : > { %v961_v61 = vpop.f32.mrf.mxu3 }
 0x3e8   : > { %v1261_v47 = vpop.f32.mrf.mxu0  ;;  %v964_v62 = vsel %vm893_vm4, %v961_v61, -inf }
 0x3e9   : > { %v1264_v48 = vsel %vm893_vm4, %v1261_v47, -inf }
 0x3ea   : > { %1265 = vmax.xlane.f32.xlu0 %v1264_v48 }
 0x3f0   : > { %v3737_v54 = vpop.f32.mrf.mxu1  ;;  %v1411_v55 = vpop.f32.mrf.mxu0 }
 0x3f1   : > { %v1414_v56 = vsel %vm893_vm4, %v1411_v55, -inf  ;;  %v1339_v57 = vsel %vm893_vm4, %v3737_v54, -inf }
 0x3f2   : > { %1415 = vmax.xlane.f32.xlu1 %v1414_v56  ;;  %1340 = vmax.xlane.f32.xlu2 %v1339_v57  ;;  %v3792_v57 = vld [vmem:[%s4124_s25 + $0x8] sm:$0xff] }
 0x3fa   : > { %965 = vmax.xlane.f32.xlu1 %v964_v62  ;;  %1046 = vadd.xlane.f32.xlu2 %v1045_v63 }
 0x402   : > { %1121 = vadd.xlane.f32.xlu1 %v1120_v8  ;;  %1196 = vadd.xlane.f32.xlu2 %v1195_v9 }
 0x41b   : > { %1050 = vrot.lane.b32.xlu1 %v3675_v10, %s4082_s9  ;;  %s4085_s9 = smov 44  }
 0x423   : > { %1200 = vrot.lane.b32.xlu1 %v3675_v10, %s4081_s28  ;;  %s4084_s28 = smov 52  }
 0x45d   : > { %v1266_v11 = vpop.xlane.xlu0 %1265 }
 0x45e   : > { %v1267_v12 = vsub.f32 %v1261_v47, %v1266_v11 }
 0x460   : > { %v1268_v13 = vmul.f32 1.442695, %v1267_v12  ;;  %v3816_v12 = vld [vmem:[%s3595_s7 + $0x18] sm:$0xff] }
 0x461   : > { %1476 = vmatpush.msra.mxu1 %v3816_v12 }
 0x462   : > { %2799 = vpow2.f32 %v1268_v13  ;;  %v3819_v13 = vld [vmem:[%s3595_s7 + $0x10] sm:$0xff] }
 0x463   : > { %1477 = vmatpush.msra.mxu1 %v3819_v13 }
 0x465   : > { %v1416_v14 = vpop.xlane.xlu1 %1415  ;;  %v1341_v24 = vpop.xlane.xlu2 %1340 }
 0x466   : > { %v1417_v15 = vsub.f32 %v1411_v55, %v1416_v14  ;;  %v1342_v36 = vsub.f32 %v3737_v54, %v1341_v24  ;;  %v3823_v14 = vld [vmem:[%s3595_s7 + $0x8] sm:$0xff] }
 0x467   : > { %1478 = vmatpush.msra.mxu1 %v3823_v14 }
 0x468   : > { %v3753_v16 = vpop.eup %2799  ;;  %v1418_v17 = vmul.f32 1.442695, %v1417_v15  ;;  %v1343_v37 = vmul.f32 1.442695, %v1342_v36  ;;  %v3827_v15 = vld [vmem:[%s3595_s7] sm:$0xff]  ;;  %s4125_s7 = smov 120  }
 0x469   : > { %v1270_v18 = vsel %vm893_vm4, %v3753_v16, 0.0  ;;  %1479 = vmatpush.msra.mxu1 %v3827_v15 }
 0x46a   : > { %2801 = vpow2.f32 %v1418_v17  ;;  %1271 = vadd.xlane.f32.xlu2 %v1270_v18  ;;  %v3835_v17 = vld [vmem:[%s3608_s8 + $0x10] sm:$0xff]  ;;  %v3839_v18 = vld [vmem:[%s3608_s8 + $0x8] sm:$0xff] }
 0x46d   : > { %v966_v19 = vpop.xlane.xlu1 %965  ;;  %v1047_v27 = vpop.xlane.xlu2 %1046 }
 0x46e   : > { %v967_v20 = vsub.f32 %v961_v61, %v966_v19  ;;  %v3843_v19 = vld [vmem:[%s3608_s8] sm:$0xff] }
 0x470   : > { %v3757_v21 = vpop.eup %2801  ;;  %v968_v22 = vmul.f32 1.442695, %v967_v20 }
 0x471   : > { %v1420_v23 = vsel %vm893_vm4, %v3757_v21, 0.0 }
 0x472   : > { %2803 = vpow2.f32 %v968_v22  ;;  %1421 = vadd.xlane.f32.xlu1 %v1420_v23 }
 0x473   : > { %2805 = vrcp.f32 %v1047_v27 }
 0x475   : > { %v1122_v28 = vpop.xlane.xlu1 %1121  ;;  %v1197_v29 = vpop.xlane.xlu2 %1196 }
 0x476   : > { %2807 = vrcp.f32 %v1197_v29 }
 0x477   : > { %2809 = vpow2.f32 %v1343_v37 }
 0x478   : > { %v2804_v25 = vpop.eup %2803 }
 0x479   : > { %v970_v26 = vsel %vm893_vm4, %v2804_v25, 0.0  ;;  %v2806_v30 = vpop.eup %2805 }
 0x47a   : > { %971 = vadd.xlane.f32.xlu0 %v970_v26  ;;  %v1049_v31 = vmul.f32 %v2806_v30, %v2794_v60  ;;  %v3855_v26 = vld [vmem:[%s645_s13] ss:$0 sm:$0xff]  ;;  %s4126_s13 = smov 76  }
 0x47c   : > { %v2808_v33 = vpop.eup %2807 }
 0x47d   : > { %v1199_v34 = vmul.f32 %v2808_v33, %v2798_v1  ;;  %v2810_v38 = vpop.eup %2809 }
 0x47e   : > { %v1345_v39 = vsel %vm893_vm4, %v2810_v38, 0.0 }
 0x482   : > { %1125 = vrot.lane.b32.xlu2 %v3675_v10, %s4084_s28  ;;  %s4087_s28 = smov 40  }
 0x48a   : > { %1275 = vrot.lane.b32.xlu2 %v3675_v10, %s4085_s9  ;;  %s4086_s9 = smov 36  }
 0x48d   : > { %v1051_v32 = vpop.permute.xlu1 %1050 }
 0x48e   : > { %975 = vrot.lane.b32.xlu0 %v3675_v10, %s4088_s21  ;;  %1071 = vmatpush.msra.mxu3 %v1051_v32  ;;  %s3249_s21 = smov 20  }
 0x48f   : > { %2603 = vmatmul.msk.f32.vlgmr.msra.gmra.mxu3 %vm893_vm4, %v1049_v31 }
 0x492   : > { %1350 = vrot.lane.b32.xlu2 %v3675_v10, %s4087_s28  ;;  %s4091_s28 = smov 16  }
 0x495   : > { %v1201_v35 = vpop.permute.xlu1 %1200 }
 0x496   : > { %1221 = vmatpush.msrb.mxu3 %v1201_v35 }
 0x497   : > { %2609 = vmatmul.msk.f32.vlgmr.msrb.gmra.mxu3 %vm893_vm4, %v1199_v34 }
 0x49a   : > { %1425 = vrot.lane.b32.xlu2 %v3675_v10, %s4086_s9  ;;  %s4090_s9 = smov 8  }
 0x4b8   : > { %1346 = vadd.xlane.f32.xlu0 %v1345_v39 }
 0x4dd   : > { %v1272_v40 = vpop.xlane.xlu2 %1271 }
 0x4e5   : > { %v1126_v41 = vpop.permute.xlu2 %1125  ;;  %v1422_v50 = vpop.xlane.xlu1 %1421 }
 0x4ed   : > { %v1276_v42 = vpop.permute.xlu2 %1275  ;;  %v972_v43 = vpop.xlane.xlu0 %971 }
 0x4ee   : > { %2811 = vrcp.f32 %v972_v43 }
 0x4ef   : > { %2813 = vrcp.f32 %v1122_v28 }
 0x4f0   : > { %2815 = vrcp.f32 %v1272_v40 }
 0x4f1   : > { %2817 = vrcp.f32 %v1422_v50 }
 0x4f4   : > { %v2812_v45 = vpop.eup %2811 }
 0x4f5   : > { %v1351_v44 = vpop.permute.xlu2 %1350  ;;  %v974_v47 = vmul.f32 %v2812_v45, %v2804_v25  ;;  %v2814_v10 = vpop.eup %2813 }
 0x4f6   : > { %1371 = vmatpush.msra.mxu3 %v1351_v44  ;;  %v1124_v48 = vmul.f32 %v2814_v10, %v3744_v0  ;;  %v2816_v51 = vpop.eup %2815 }
 0x4f7   : > { %v1274_v52 = vmul.f32 %v2816_v51, %v3753_v16  ;;  %v2818_v54 = vpop.eup %2817  ;;  %v3832_v16 = vld [vmem:[%s3608_s8 + $0x18] sm:$0xff]  ;;  %s4127_s8 = smov 68  }
 0x4f8   : > { %v1424_v55 = vmul.f32 %v2818_v54, %v3757_v21  ;;  %1540 = vmatpush.msrb.mxu3 %v3832_v16 }
 0x4fa   : > { %1541 = vmatpush.msrb.mxu3 %v3835_v17 }
 0x4fc   : > { %1542 = vmatpush.msrb.mxu3 %v3839_v18 }
 0x4fd   : > { %v1426_v49 = vpop.permute.xlu2 %1425 }
 0x4fe   : > { %1543 = vmatpush.msrb.mxu3 %v3843_v19 }
 0x500   : > { %v976_v46 = vpop.permute.xlu0 %975 }
 0x501   : > { %996 = vmatpush.msra.mxu2 %v976_v46 }
 0x502   : > { %2600 = vmatmul.msk.f32.vlgmr.msra.gmra.mxu2 %vm893_vm4, %v974_v47 }
 0x503   : > { %1146 = vmatpush.msrb.mxu2 %v1126_v41 }
 0x505   : > { %1296 = vmatpush.msra.mxu2 %v1276_v42 }
 0x50a   : > { %2606 = vmatmul.msk.f32.vlgmr.msrb.gmra.mxu2 %vm893_vm4, %v1124_v48 }
 0x50b   : > { %1446 = vmatpush.msrb.mxu2 %v1426_v49 }
 0x512   : > { %v1073_v53 = vpop.f32.mrf.mxu3  ;;  %2612 = vmatmul.msk.f32.vlgmr.msra.gmra.mxu2 %vm893_vm4, %v1274_v52 }
 0x513   : > { %1077 = vrot.lane.b32.xlu2 %v1073_v53, %s4090_s9  ;;  %1625 = vmatpush.msra.mxu2 %v3649_v2  ;;  %s3247_s9 = smov 4  }
 0x515   : > { %1626 = vmatpush.msra.mxu2 %v3652_v3 }
 0x517   : > { %1627 = vmatpush.msra.mxu2 %v3656_v4 }
 0x519   : > { %1628 = vmatpush.msra.mxu2 %v3660_v5 }
 0x51a   : > { %v1223_v56 = vpop.f32.mrf.mxu3  ;;  %2618 = vmatmul.msk.f32.vlgmr.msrb.gmra.mxu2 %vm893_vm4, %v1424_v55 }
 0x51b   : > { %1227 = vrot.lane.b32.xlu1 %v1223_v56, %s4091_s28  ;;  %s4092_s28 = smov 12  }
 0x522   : > { %2623 = vmatmul.msk.f32.vlgmr.msra.gmra.mxu2 %vm836_vm1, %v3792_v57 }
 0x52b   : > { %v1347_v2 = vpop.xlane.xlu0 %1346 }
 0x52c   : > { %2819 = vrcp.f32 %v1347_v2 }
 0x532   : > { %v2820_v3 = vpop.eup %2819 }
 0x533   : > { %v1349_v4 = vmul.f32 %v2820_v3, %v2810_v38 }
 0x535   : > { %2615 = vmatmul.msk.f32.vlgmr.msra.gmra.mxu3 %vm893_vm4, %v1349_v4 }
 0x56d   : > { %v1078_v1 = vpop.permute.xlu2 %1077 }
 0x585   : > { %v998_v5 = vpop.f32.mrf.mxu2 }
 0x586   : > { %1002 = vrot.lane.b32.xlu0 %v998_v5, %s3247_s9 }
 0x58d   : > { %v1148_v58 = vpop.f32.mrf.mxu2  ;;  %v1228_v9 = vpop.permute.xlu1 %1227 }
 0x58e   : > { %1152 = vrot.lane.b32.xlu2 %v1148_v58, %s4092_s28  ;;  %s3251_s28 = smov 24  }
 0x595   : > { %v1298_v59 = vpop.f32.mrf.mxu2 }
 0x596   : > { %1302 = vrot.lane.b32.xlu2 %v1298_v59, %s3249_s21 }
 0x59d   : > { %v1448_v60 = vpop.f32.mrf.mxu2 }
 0x59e   : > { %1452 = vrot.lane.b32.xlu2 %v1448_v60, %s3250_s16 }
 0x5a5   : > { %v1630_v61 = vpop.f32.mrf.mxu2 }
 0x5a6   : > { %v1631_v62 = vadd.f32 %v3671_v7, %v1630_v61 }
 0x5a8   : > { %1634 = vst.msk [vmem:[#allocation2 + $0x8] sm:$0xff] %vm860_vm2, %v1631_v62 }
 0x5af   : > { %v3803_v63 = vld [vmem:[#allocation2 + $0x8] sm:$0xff] }
 0x5b0   : > { %1676 = vrot.lane.b32.xlu1 %v3803_v63, %s3223_s2  ;;  %v1636_v25 = vmul.f32 0.5, %v3803_v63  ;;  %s4130_s2 = scalar_lea.vmem [#allocation11], %s3586_s17 }
 0x5b1   : > { %v3894_v60 = vld [vmem:[%s4130_s2] ss:$0 sm:$0xff] }
 0x5b8   : > { %v1373_v0 = vpop.f32.mrf.mxu3 }
 0x5b9   : > { %1377 = vrot.lane.b32.xlu0 %v1373_v0, %s3251_s28 }
 0x5c1   : > { %1638 = vrot.lane.b32.xlu0 %v3803_v63, %s3224_s20  ;;  %s4131_s20 = scalar_lea.vmem [#allocation12], %s3586_s17 }
 0x5e8   : > { %v1153_v8 = vpop.permute.xlu2 %1152 }
 0x5f0   : > { %v1303_v11 = vpop.permute.xlu2 %1302 }
 0x5f8   : > { %v1003_v7 = vpop.permute.xlu0 %1002  ;;  %v1453_v22 = vpop.permute.xlu2 %1452 }
 0x5f9   : > { %1006 = vst.msk [vmem:[#allocation3] sm:$0xff] %vm1005_vm5, %v1003_v7 }
 0x5fa   : > { %1081 = vst.msk [vmem:[#allocation3] sm:$0xff] %vm1080_vm6, %v1078_v1  ;;  %v3898_v1 = vld [vmem:[%s4131_s20] ss:$0 sm:$0xff] }
 0x5fb   : > { %1156 = vst.msk [vmem:[#allocation3] sm:$0xff] %vm1155_vm7, %v1153_v8 }
 0x5fc   : > { %1231 = vst.msk [vmem:[#allocation3] sm:$0xff] %vm1230_vm8, %v1228_v9 }
 0x5fd   : > { %1306 = vst.msk [vmem:[#allocation3] sm:$0xff] %vm1305_vm9, %v1303_v11 }
 0x622   : > { %v1677_v20 = vpop.permute.xlu1 %1676 }
 0x623   : > { %1697 = vmatpush.msra.mxu3 %v1677_v20  ;;  %v828_v20 = vld [vmem:[%s3638_s12 + $0x38] sm:$0xff] }
 0x624   : > { %1564 = vmatpush.msra.mxu0 %v828_v20 }
 0x62b   : > { %v1378_v21 = vpop.permute.xlu0 %1377 }
 0x62c   : > { %1381 = vst.msk [vmem:[#allocation3] sm:$0xff] %vm1380_vm10, %v1378_v21  ;;  %v827_v21 = vld [vmem:[%s3638_s12 + $0x30] sm:$0xff] }
 0x62d   : > { %1456 = vst.msk [vmem:[#allocation3] sm:$0xff] %vm1455_vm11, %v1453_v22  ;;  %1565 = vmatpush.msra.mxu0 %v827_v21 }
 0x633   : > { %v1639_v23 = vpop.permute.xlu0 %1638 }
 0x634   : > { %v1457_v24 = vld [vmem:[#allocation3] sm:$0xff]  ;;  %2624 = vmatpush.xpose.msk.msrb.mxu1 %vm867_vm3, %v1639_v23 }
 0x635   : > { %2619 = vmatmul.msk.f32.vlgmr.msra.gmra.mxu1 %vm836_vm1, %v1457_v24 }
 0x63d   : > { %2625 = vmatmul.msk.f32.vlgmr.msrb.gmra.mxu1 %vm867_vm3, %v1636_v25 }
 0x6b2   : > { %v1481_v27 = vpop.f32.mrf.mxu1 }
 0x6b3   : > { %v1482_v28 = vadd.f32 %v3855_v26, %v1481_v27 }
 0x6b5   : > { %v1484_v29 = vadd.f32 %v1482_v28, %v3666_v6  ;;  %v3252_v6 = vmov 32.0  }
 0x6b6   : > { %2821 = vrcp.f32 %v3252_v6 }
 0x6b7   : > { %v1485_v30 = vsel %vm836_vm1, %v1484_v29, 0.0 }
 0x6b8   : > { %1486 = vadd.xlane.f32.xlu2 %v1485_v30 }
 0x6ba   : > { %v1662_v31 = vpop.f32.mrf.mxu1 }
 0x6bb   : > { %v1665_v32 = vsel %vm893_vm4, %v1662_v31, -inf }
 0x6bc   : > { %1666 = vmax.xlane.f32.xlu0 %v1665_v32  ;;  %v2822_v33 = vpop.eup %2821 }
 0x6bd   : > { %v1489_v34 = vmul.f32 32.0, %v2822_v33  ;;  %vm1493_vm12 = vweird.f32 %v2822_v33 }
 0x6bf   : > { %v1490_v35 = vsub.f32 1.0, %v1489_v34  ;;  %v826_v34 = vld [vmem:[%s3638_s12 + $0x28] sm:$0xff] }
 0x6c0   : > { %1566 = vmatpush.msra.mxu0 %v826_v34 }
 0x6c1   : > { %v1491_v36 = vmul.f32 %v2822_v33, %v1490_v35  ;;  %v825_v35 = vld [vmem:[%s3638_s12 + $0x20] sm:$0xff] }
 0x6c2   : > { %1567 = vmatpush.msra.mxu0 %v825_v35 }
 0x6c3   : > { %v1492_v37 = vadd.f32 %v2822_v33, %v1491_v36  ;;  %v824_v36 = vld [vmem:[%s3638_s12 + $0x18] sm:$0xff] }
 0x6c4   : > { %1568 = vmatpush.msra.mxu0 %v824_v36 }
 0x6c5   : > { %v3874_v38 = vsel %vm1493_vm12, %v2822_v33, %v1492_v37 }
 0x6d0   : > { %1707 = vrot.lane.b32.xlu2 %v1636_v25, %s3225_s24  ;;  %1710 = vrot.lane.b32.xlu0 %v3803_v63, %s3222_s14  ;;  %s4129_s14 = smov 100  }
 0x6d8   : > { %1855 = vrot.lane.b32.xlu2 %v1636_v25, %s3226_s18  ;;  %1784 = vrot.lane.b32.xlu0 %v3803_v63, %s3227_s19  ;;  %s4132_s19 = sld [smem:[#allocation33_spill]] }
 0x6e0   : > { %1929 = vrot.lane.b32.xlu2 %v1636_v25, %s3232_s11  ;;  %1858 = vrot.lane.b32.xlu0 %v3803_v63, %s3229_s30  ;;  %s4133_s30 = scalar_lea.vmem %s4132_s19, %s3624_s23  ;;  %s4135_s23 = smov 56  }
 0x6e1   : > { %s4137_s11 = smov 52  }
 0x6e8   : > { %1932 = vrot.lane.b32.xlu0 %v3803_v63, %s3231_s27  ;;  %s4136_s27 = smov 48  }
 0x6f0   : > { %2003 = vrot.lane.b32.xlu0 %v1636_v25, %s3236_s29  ;;  %s4128_s29 = smov 72  }
 0x6f8   : > { %2077 = vrot.lane.b32.xlu0 %v1636_v25, %s3237_s22  ;;  %s4138_s22 = smov 44  }
 0x72b   : > { %v1487_v39 = vpop.xlane.xlu2 %1486 }
 0x72c   : > { %v1495_v40 = vmul.f32 %v3874_v38, %v1487_v39 }
 0x72e   : > { %v1496_v41 = vsub.f32 %v1484_v29, %v1495_v40 }
 0x72f   : > { %v1667_v42 = vpop.xlane.xlu0 %1666 }
 0x730   : > { %v1668_v43 = vsub.f32 %v1662_v31, %v1667_v42  ;;  %v1497_v44 = vmul.f32 %v1496_v41, %v1496_v41 }
 0x732   : > { %v1669_v45 = vmul.f32 1.442695, %v1668_v43  ;;  %v1498_v46 = vsel %vm836_vm1, %v1497_v44, 0.0 }
 0x733   : > { %1499 = vadd.xlane.f32.xlu1 %v1498_v46  ;;  %v1708_v49 = vpop.permute.xlu2 %1707 }
 0x734   : > { %2823 = vpow2.f32 %v1669_v45 }
 0x73a   : > { %v2824_v47 = vpop.eup %2823 }
 0x73b   : > { %v1671_v10 = vsel %vm893_vm4, %v2824_v47, 0.0  ;;  %v1856_v52 = vpop.permute.xlu2 %1855 }
 0x73c   : > { %1672 = vadd.xlane.f32.xlu2 %v1671_v10 }
 0x742   : > { %v1711_v48 = vpop.permute.xlu0 %1710 }
 0x743   : > { %2627 = vmatpush.xpose.msk.msrb.mxu2 %vm867_vm3, %v1711_v48  ;;  %v1930_v4 = vpop.permute.xlu2 %1929 }
 0x746   : > { %2628 = vmatmul.msk.f32.vlgmr.msrb.gmra.mxu2 %vm867_vm3, %v1708_v49 }
 0x74a   : > { %v1785_v50 = vpop.permute.xlu0 %1784 }
 0x74c   : > { %1781 = vrot.lane.b32.xlu1 %v1636_v25, %s4125_s7  ;;  %s4139_s7 = smov 40  }
 0x752   : > { %v1859_v51 = vpop.permute.xlu0 %1858 }
 0x753   : > { %2633 = vmatpush.xpose.msk.msra.mxu2 %vm867_vm3, %v1859_v51 }
 0x754   : > { %2006 = vrot.lane.b32.xlu1 %v3803_v63, %s4126_s13  ;;  %2154 = vrot.lane.b32.xlu2 %v3803_v63, %s4127_s8  ;;  %s4140_s13 = smov 36   ;;  %s4141_s8 = smov 12  }
 0x756   : > { %2634 = vmatmul.msk.f32.vlgmr.msra.gmra.mxu2 %vm867_vm3, %v1856_v52 }
 0x75a   : > { %v1933_v7 = vpop.permute.xlu0 %1932 }
 0x75c   : > { %2080 = vrot.lane.b32.xlu1 %v3803_v63, %s4128_s29  ;;  %s4143_s29 = smov 16  }
 0x764   : > { %2151 = vrot.lane.b32.xlu1 %v1636_v25, %s4129_s14  ;;  %v2004_v25 = vpop.permute.xlu0 %2003  ;;  %s4144_s14 = scalar_lea.vmem [#allocation15], %s3586_s17 }
 0x76c   : > { %v2078_v33 = vpop.permute.xlu0 %2077 }
 0x7a6   : > { %v1500_v53 = vpop.xlane.xlu1 %1499 }
 0x7a7   : > { %v1501_v54 = vmul.f32 %v1500_v53, %v3874_v38 }
 0x7a9   : > { %v1502_v55 = vadd.f32 1e-05, %v1501_v54 }
 0x7ab   : > { %2825 = vrsqrt.f32 %v1502_v55  ;;  %vm1509_vm14 = vweird.f32 %v1502_v55 }
 0x7af   : > { %v1673_v0 = vpop.xlane.xlu2 %1672 }
 0x7b0   : > { %2827 = vrcp.f32 %v1673_v0 }
 0x7b1   : > { %v2826_v56 = vpop.eup %2825 }
 0x7b2   : > { %v1504_v2 = vmul.f32 %v2826_v56, %v1502_v55  ;;  %vm1510_vm13 = vweird.f32 %v2826_v56 }
 0x7b3   : > { %vm1511_vm15 = vmor %vm1509_vm14, %vm1510_vm13 }
 0x7b4   : > { %v1505_v3 = vmul.f32 %v2826_v56, %v1504_v2 }
 0x7b6   : > { %v1506_v5 = vmul.f32 0.5, %v1505_v3  ;;  %v2828_v22 = vpop.eup %2827 }
 0x7b7   : > { %v2155_v24 = vpop.permute.xlu2 %2154  ;;  %v1675_v27 = vmul.f32 %v2828_v22, %v2824_v47 }
 0x7b8   : > { %v1507_v58 = vsub.f32 1.5, %v1506_v5 }
 0x7ba   : > { %v1508_v59 = vmul.f32 %v2826_v56, %v1507_v58 }
 0x7bc   : > { %v1512_v61 = vsel %vm1511_vm15, %v2826_v56, %v1508_v59 }
 0x7bd   : > { %v1513_v62 = vmul.f32 %v1512_v61, %v1496_v41 }
 0x7be   : > { %v1782_v8 = vpop.permute.xlu1 %1781 }
 0x7bf   : > { %v1517_v9 = vmul.f32 %v3894_v60, %v1513_v62 }
 0x7c1   : > { %v3902_v11 = vadd.f32 %v3898_v1, %v1517_v9 }
 0x7c3   : > { %2620 = vmatmul.msk.f32.vlgmr.msrb.gmra.mxu3 %vm836_vm1, %v3902_v11 }
 0x7c4   : > { %2630 = vmatpush.xpose.msk.msrb.mxu3 %vm867_vm3, %v1785_v50 }
 0x7c6   : > { %v2007_v23 = vpop.permute.xlu1 %2006 }
 0x7c7   : > { %2639 = vmatpush.xpose.msk.msrb.mxu2 %vm867_vm3, %v2007_v23 }
 0x7c9   : > { %v1733_v28 = vpop.f32.mrf.mxu2 }
 0x7ca   : > { %2640 = vmatmul.msk.f32.vlgmr.msrb.gmra.mxu2 %vm867_vm3, %v2004_v25  ;;  %v1736_v29 = vsel %vm893_vm4, %v1733_v28, -inf }
 0x7cb   : > { %2645 = vmatpush.xpose.msk.msra.mxu2 %vm867_vm3, %v2155_v24  ;;  %2626 = vmatmul.msk.f32.vlgmr.msra.gmra.mxu3 %vm893_vm4, %v1675_v27 }
 0x7cc   : > { %1737 = vmax.xlane.f32.xlu2 %v1736_v29  ;;  %2636 = vmatpush.xpose.msk.msra.mxu3 %vm867_vm3, %v1933_v7 }
 0x7ce   : > { %v2081_v30 = vpop.permute.xlu1 %2080 }
 0x7cf   : > { %2306 = vmatpush.msrb.mxu2 %v828_v20 }
 0x7d1   : > { %2307 = vmatpush.msrb.mxu2 %v827_v21 }
 0x7d3   : > { %2631 = vmatmul.msk.f32.vlgmr.msrb.gmra.mxu3 %vm867_vm3, %v1782_v8  ;;  %2308 = vmatpush.msrb.mxu2 %v826_v34 }
 0x7d4   : > { %2642 = vmatpush.xpose.msk.msrb.mxu3 %vm867_vm3, %v2081_v30 }
 0x7d5   : > { %2309 = vmatpush.msrb.mxu2 %v825_v35 }
 0x7d6   : > { %v2152_v31 = vpop.permute.xlu1 %2151 }
 0x7d7   : > { %2646 = vmatmul.msk.f32.vlgmr.msra.gmra.mxu2 %vm867_vm3, %v2152_v31 }
 0x7d8   : > { %2310 = vmatpush.msrb.mxu2 %v824_v36 }
 0x7d9   : > { %v1881_v32 = vpop.f32.mrf.mxu2 }
 0x7da   : > { %v1884_v6 = vsel %vm893_vm4, %v1881_v32, -inf }
 0x7db   : > { %1885 = vmax.xlane.f32.xlu1 %v1884_v6  ;;  %2637 = vmatmul.msk.f32.vlgmr.msra.gmra.mxu3 %vm867_vm3, %v1930_v4 }
 0x7dc   : > { %2238 = vmatpush.msra.mxu3 %v3816_v12  ;;  %v823_v12 = vld [vmem:[%s3638_s12 + $0x10] sm:$0xff] }
 0x7dd   : > { %1569 = vmatpush.msra.mxu0 %v823_v12  ;;  %2311 = vmatpush.msrb.mxu2 %v823_v12 }
 0x7de   : > { %2239 = vmatpush.msra.mxu3 %v3819_v13  ;;  %v822_v13 = vld [vmem:[%s3638_s12 + $0x8] sm:$0xff] }
 0x7df   : > { %1570 = vmatpush.msra.mxu0 %v822_v13  ;;  %2312 = vmatpush.msrb.mxu2 %v822_v13 }
 0x7e0   : > { %2240 = vmatpush.msra.mxu3 %v3823_v14  ;;  %v821_v14 = vld [vmem:[%s3638_s12] sm:$0xff]  ;;  %s4134_s12 = smov 60  }
 0x7e1   : > { %1571 = vmatpush.msra.mxu0 %v821_v14  ;;  %2313 = vmatpush.msrb.mxu2 %v821_v14 }
 0x7e2   : > { %2241 = vmatpush.msra.mxu3 %v3827_v15  ;;  %v3936_v15 = vld [vmem:[%s4133_s30] ss:$0 sm:$0xff] }
 0x7e3   : > { %2643 = vmatmul.msk.f32.vlgmr.msrb.gmra.mxu3 %vm867_vm3, %v2078_v33 }
 0x83f   : > { %v1738_v41 = vpop.xlane.xlu2 %1737 }
 0x840   : > { %v1739_v43 = vsub.f32 %v1733_v28, %v1738_v41 }
 0x842   : > { %v1740_v47 = vmul.f32 1.442695, %v1739_v43 }
 0x844   : > { %2829 = vpow2.f32 %v1740_v47 }
 0x846   : > { %v1545_v37 = vpop.f32.mrf.mxu3 }
 0x847   : > { %v1546_v39 = vadd.f32 %v3936_v15, %v1545_v37 }
 0x849   : > { %v1548_v40 = vmax.f32 %v1546_v39, 0.0 }
 0x84a   : > { %v2830_v53 = vpop.eup %2829 }
 0x84b   : > { %2621 = vmatmul.msk.f32.vlgmr.msra.gmra.mxu0 %vm1552_vm0, %v1548_v40  ;;  %v1742_v54 = vsel %vm893_vm4, %v2830_v53, 0.0 }
 0x84d   : > { %v2029_v42 = vpop.f32.mrf.mxu2 }
 0x84e   : > { %v1699_v44 = vpop.f32.mrf.mxu3  ;;  %v2032_v45 = vsel %vm893_vm4, %v2029_v42, -inf  ;;  %v1886_v46 = vpop.xlane.xlu1 %1885 }
 0x84f   : > { %1703 = vst.msk [vmem:[#allocation3 + $0x8] sm:$0xff] %vm867_vm3, %v1699_v44  ;;  %2033 = vmax.xlane.f32.xlu0 %v2032_v45  ;;  %v1887_v10 = vsub.f32 %v1881_v32, %v1886_v46 }
 0x851   : > { %v1888_v48 = vmul.f32 1.442695, %v1887_v10 }
 0x853   : > { %2831 = vpow2.f32 %v1888_v48 }
 0x856   : > { %v1807_v49 = vpop.f32.mrf.mxu3 }
 0x857   : > { %v1810_v50 = vsel %vm893_vm4, %v1807_v49, -inf }
 0x858   : > { %1811 = vmax.xlane.f32.xlu0 %v1810_v50 }
 0x859   : > { %v2832_v55 = vpop.eup %2831 }
 0x85a   : > { %v2177_v51 = vpop.f32.mrf.mxu2  ;;  %v1890_v56 = vsel %vm893_vm4, %v2832_v55, 0.0 }
 0x85b   : > { %v2180_v52 = vsel %vm893_vm4, %v2177_v51, -inf }
 0x85c   : > { %2181 = vmax.xlane.f32.xlu1 %v2180_v52 }
 0x85e   : > { %v1955_v27 = vpop.f32.mrf.mxu3 }
 0x85f   : > { %v1958_v29 = vsel %vm893_vm4, %v1955_v27, -inf }
 0x860   : > { %1743 = vadd.xlane.f32.xlu0 %v1742_v54 }
 0x864   : > { %1891 = vadd.xlane.f32.xlu1 %v1890_v56 }
 0x866   : > { %v2103_v31 = vpop.f32.mrf.mxu3 }
 0x867   : > { %v2106_v32 = vsel %vm893_vm4, %v2103_v31, -inf }
 0x874   : > { %1747 = vrot.lane.b32.xlu0 %v3803_v63, %s4134_s12 }
 0x87d   : > { %1821 = vrot.lane.b32.xlu1 %v3803_v63, %s4135_s23 }
 0x885   : > { %1969 = vrot.lane.b32.xlu1 %v3803_v63, %s4136_s27 }
 0x8c2   : > { %v2034_v2 = vpop.xlane.xlu0 %2033 }
 0x8c3   : > { %v2035_v3 = vsub.f32 %v2029_v42, %v2034_v2 }
 0x8c5   : > { %v2036_v4 = vmul.f32 1.442695, %v2035_v3 }
 0x8c7   : > { %2833 = vpow2.f32 %v2036_v4 }
 0x8c8   : > { %v1573_v3 = vpop.f32.mrf.mxu0 }
 0x8cb   : > { %v1812_v61 = vpop.xlane.xlu0 %1811 }
 0x8cc   : > { %v1813_v28 = vsub.f32 %v1807_v49, %v1812_v61 }
 0x8cd   : > { %v3952_v5 = vpop.eup %2833 }
 0x8ce   : > { %v2038_v58 = vsel %vm893_vm4, %v3952_v5, 0.0  ;;  %v1814_v30 = vmul.f32 1.442695, %v1813_v28 }
 0x8cf   : > { %v2182_v59 = vpop.xlane.xlu1 %2181  ;;  %2039 = vadd.xlane.f32.xlu2 %v2038_v58 }
 0x8d0   : > { %v2183_v62 = vsub.f32 %v2177_v51, %v2182_v59 }
 0x8d2   : > { %v2184_v0 = vmul.f32 1.442695, %v2183_v62 }
 0x8d3   : > { %v1744_v7 = vpop.xlane.xlu0 %1743 }
 0x8d4   : > { %2835 = vpow2.f32 %v2184_v0 }
 0x8d5   : > { %2837 = vrcp.f32 %v1744_v7 }
 0x8d6   : > { %2839 = vpow2.f32 %v1814_v30 }
 0x8d7   : > { %v1892_v23 = vpop.xlane.xlu1 %1891 }
 0x8d8   : > { %2841 = vrcp.f32 %v1892_v23 }
 0x8da   : > { %v3956_v8 = vpop.eup %2835 }
 0x8db   : > { %v2186_v9 = vsel %vm893_vm4, %v3956_v8, 0.0  ;;  %v2838_v20 = vpop.eup %2837 }
 0x8dc   : > { %2187 = vadd.xlane.f32.xlu1 %v2186_v9  ;;  %v1746_v21 = vmul.f32 %v2838_v20, %v2830_v53  ;;  %v2840_v6 = vpop.eup %2839  ;;  %v3998_v9 = vld [vmem:[%s4144_s14] ss:$0 sm:$0xff] }
 0x8dd   : > { %v1816_v33 = vsel %vm893_vm4, %v2840_v6, 0.0  ;;  %v1574_v20 = vadd.f32 %v3998_v9, %v1573_v3 }
 0x8de   : > { %v2842_v35 = vpop.eup %2841 }
 0x8df   : > { %v1894_v36 = vmul.f32 %v2842_v35, %v2832_v55 }
 0x8e6   : > { %v1748_v22 = vpop.permute.xlu0 %1747 }
 0x8e7   : > { %1895 = vrot.lane.b32.xlu2 %v3803_v63, %s4137_s11  ;;  %1768 = vmatpush.msra.mxu1 %v1748_v22 }
 0x8e8   : > { %2629 = vmatmul.msk.f32.vlgmr.msra.gmra.mxu1 %vm893_vm4, %v1746_v21  ;;  %v1576_v21 = vadd.f32 %v1574_v20, %v3902_v11 }
 0x8ea   : > { %v1577_v22 = vsel %vm836_vm1, %v1576_v21, 0.0 }
 0x8ef   : > { %v1822_v24 = vpop.permute.xlu1 %1821 }
 0x8f0   : > { %1842 = vmatpush.msrb.mxu0 %v1822_v24 }
 0x8f7   : > { %v1970_v25 = vpop.permute.xlu1 %1969 }
 0x8f8   : > { %1990 = vmatpush.msra.mxu0 %v1970_v25 }
 0x910   : > { %1959 = vmax.xlane.f32.xlu2 %v1958_v29 }
 0x918   : > { %2107 = vmax.xlane.f32.xlu2 %v2106_v32 }
 0x920   : > { %1817 = vadd.xlane.f32.xlu2 %v1816_v33 }
 0x942   : > { %v2040_v34 = vpop.xlane.xlu2 %2039 }
 0x94a   : > { %v1896_v12 = vpop.permute.xlu2 %1895 }
 0x94b   : > { %1916 = vmatpush.msrb.mxu1 %v1896_v12 }
 0x94c   : > { %2635 = vmatmul.msk.f32.vlgmr.msrb.gmra.mxu1 %vm893_vm4, %v1894_v36 }
 0x965   : > { %v1770_v48 = vpop.f32.mrf.mxu1 }
 0x983   : > { %v1960_v13 = vpop.xlane.xlu2 %1959 }
 0x984   : > { %v1961_v14 = vsub.f32 %v1955_v27, %v1960_v13 }
 0x986   : > { %v1962_v37 = vmul.f32 1.442695, %v1961_v14 }
 0x988   : > { %2843 = vpow2.f32 %v1962_v37 }
 0x98b   : > { %v2108_v39 = vpop.xlane.xlu2 %2107 }
 0x98c   : > { %v2109_v40 = vsub.f32 %v2103_v31, %v2108_v39 }
 0x98e   : > { %v2844_v41 = vpop.eup %2843  ;;  %v2110_v42 = vmul.f32 1.442695, %v2109_v40 }
 0x98f   : > { %v1964_v43 = vsel %vm893_vm4, %v2844_v41, 0.0 }
 0x990   : > { %2845 = vpow2.f32 %v2110_v42  ;;  %1965 = vadd.xlane.f32.xlu2 %v1964_v43 }
 0x993   : > { %v1818_v44 = vpop.xlane.xlu2 %1817 }
 0x994   : > { %2847 = vrcp.f32 %v1818_v44 }
 0x995   : > { %2849 = vrcp.f32 %v2040_v34 }
 0x996   : > { %v2846_v45 = vpop.eup %2845 }
 0x997   : > { %v2112_v46 = vsel %vm893_vm4, %v2846_v45, 0.0 }
 0x998   : > { %2113 = vadd.xlane.f32.xlu0 %v2112_v46 }
 0x99a   : > { %v2848_v47 = vpop.eup %2847 }
 0x99b   : > { %v1820_v10 = vmul.f32 %v2848_v47, %v2840_v6  ;;  %v2850_v51 = vpop.eup %2849 }
 0x99c   : > { %v2042_v53 = vmul.f32 %v2850_v51, %v3952_v5 }
 0x99d   : > { %2632 = vmatmul.msk.f32.vlgmr.msrb.gmra.mxu0 %vm893_vm4, %v1820_v10 }
 0x9a8   : > { %2043 = vrot.lane.b32.xlu2 %v3803_v63, %s4138_s22 }
 0x9ac   : > { %1774 = vrot.lane.b32.xlu0 %v1770_v48, %s3247_s9  ;;  %s4142_s9 = smov 8  }
 0x9b0   : > { %2117 = vrot.lane.b32.xlu2 %v3803_v63, %s4139_s7 }
 0x9b8   : > { %2191 = vrot.lane.b32.xlu2 %v3803_v63, %s4140_s13  ;;  %v2188_v63 = vpop.xlane.xlu1 %2187 }
 0x9c9   : > { %v1918_v49 = vpop.f32.mrf.mxu1 }
 0x9ca   : > { %1922 = vrot.lane.b32.xlu2 %v1918_v49, %s4141_s8 }
 0xa03   : > { %v1966_v50 = vpop.xlane.xlu2 %1965 }
 0xa04   : > { %2851 = vrcp.f32 %v1966_v50 }
 0xa0a   : > { %v2852_v52 = vpop.eup %2851 }
 0xa0b   : > { %v1968_v54 = vmul.f32 %v2852_v52, %v2844_v41  ;;  %v2044_v55 = vpop.permute.xlu2 %2043  ;;  %v2114_v56 = vpop.xlane.xlu0 %2113 }
 0xa0c   : > { %2853 = vrcp.f32 %v2114_v56  ;;  %2064 = vmatpush.msra.mxu1 %v2044_v55 }
 0xa0d   : > { %2638 = vmatmul.msk.f32.vlgmr.msra.gmra.mxu0 %vm893_vm4, %v1968_v54  ;;  %2641 = vmatmul.msk.f32.vlgmr.msra.gmra.mxu1 %vm893_vm4, %v2042_v53  ;;  %2855 = vrcp.f32 %v2188_v63 }
 0xa12   : > { %v2854_v2 = vpop.eup %2853 }
 0xa13   : > { %v2116_v4 = vmul.f32 %v2854_v2, %v2846_v45  ;;  %v2118_v58 = vpop.permute.xlu2 %2117  ;;  %v2856_v5 = vpop.eup %2855 }
 0xa14   : > { %2138 = vmatpush.msrb.mxu0 %v2118_v58  ;;  %v2190_v61 = vmul.f32 %v2856_v5, %v3956_v8 }
 0xa15   : > { %2644 = vmatmul.msk.f32.vlgmr.msrb.gmra.mxu0 %vm893_vm4, %v2116_v4 }
 0xa16   : > { %2286 = vmatpush.msra.mxu0 %v3832_v16 }
 0xa18   : > { %2287 = vmatpush.msra.mxu0 %v3835_v17 }
 0xa1a   : > { %v1844_v59 = vpop.f32.mrf.mxu0  ;;  %2288 = vmatpush.msra.mxu0 %v3839_v18 }
 0xa1b   : > { %v2192_v62 = vpop.permute.xlu2 %2191  ;;  %1848 = vrot.lane.b32.xlu2 %v1844_v59, %s4142_s9 }
 0xa1c   : > { %2212 = vmatpush.msrb.mxu1 %v2192_v62  ;;  %2289 = vmatpush.msra.mxu0 %v3843_v19 }
 0xa1d   : > { %2647 = vmatmul.msk.f32.vlgmr.msrb.gmra.mxu1 %vm893_vm4, %v2190_v61 }
 0xa1e   : > { %v1775_v0 = vpop.permute.xlu0 %1774 }
 0xa1f   : > { %1777 = vst.msk [vmem:[#allocation3 + $0x8] sm:$0xff] %vm1005_vm5, %v1775_v0 }
 0xa24   : > { %v1923_v16 = vpop.permute.xlu2 %1922 }
 0xa75   : > { %v1849_v7 = vpop.permute.xlu2 %1848 }
 0xa76   : > { %1851 = vst.msk [vmem:[#allocation3 + $0x8] sm:$0xff] %vm1080_vm6, %v1849_v7 }
 0xa77   : > { %1925 = vst.msk [vmem:[#allocation3 + $0x8] sm:$0xff] %vm1155_vm7, %v1923_v16 }
 0xa8a   : > { %v1992_v17 = vpop.f32.mrf.mxu0  ;;  %v2066_v18 = vpop.f32.mrf.mxu1 }
 0xa8b   : > { %1996 = vrot.lane.b32.xlu1 %v1992_v17, %s4143_s29  ;;  %2070 = vrot.lane.b32.xlu2 %v2066_v18, %s3249_s21  ;;  %s4146_s21 = scalar_lea.vmem [#allocation18], %s3586_s17 }
 0xa8c   : > { %v2788_v4 = vld [vmem:[%s4146_s21] ss:$0 sm:$0xff] }
 0xa92   : > { %v2140_v8 = vpop.f32.mrf.mxu0 }
 0xa93   : > { %2144 = vrot.lane.b32.xlu0 %v2140_v8, %s3251_s28  ;;  %s4145_s28 = scalar_lea.vmem [#allocation17], %s3586_s17 }
 0xa94   : > { %v2787_v2 = vld [vmem:[%s4145_s28] ss:$0 sm:$0xff] }
 0xa9a   : > { %v2214_v19 = vpop.f32.mrf.mxu1 }
 0xa9b   : > { %2218 = vrot.lane.b32.xlu2 %v2214_v19, %s3250_s16 }
 0xab5   : > { %1578 = vadd.xlane.f32.xlu1 %v1577_v22 }
 0xae5   : > { %v2071_v24 = vpop.permute.xlu2 %2070 }
 0xaf5   : > { %v2219_v27 = vpop.permute.xlu2 %2218 }
 0xafd   : > { %v1997_v23 = vpop.permute.xlu1 %1996 }
 0xafe   : > { %1999 = vst.msk [vmem:[#allocation3 + $0x8] sm:$0xff] %vm1230_vm8, %v1997_v23 }
 0xaff   : > { %2073 = vst.msk [vmem:[#allocation3 + $0x8] sm:$0xff] %vm1305_vm9, %v2071_v24 }
 0xb05   : > { %v2145_v25 = vpop.permute.xlu0 %2144 }
 0xb06   : > { %2147 = vst.msk [vmem:[#allocation3 + $0x8] sm:$0xff] %vm1380_vm10, %v2145_v25 }
 0xb07   : > { %2221 = vst.msk [vmem:[#allocation3 + $0x8] sm:$0xff] %vm1455_vm11, %v2219_v27 }
 0xb0e   : > { %v2222_v28 = vld [vmem:[#allocation3 + $0x8] sm:$0xff] }
 0xb0f   : > { %2648 = vmatmul.msk.f32.vlgmr.msra.gmra.mxu3 %vm836_vm1, %v2222_v28 }
 0xb28   : > { %v1579_v32 = vpop.xlane.xlu1 %1578 }
 0xb29   : > { %v1580_v34 = vmul.f32 %v1579_v32, %v3874_v38 }
 0xb2b   : > { %v1581_v12 = vsub.f32 %v1576_v21, %v1580_v34 }
 0xb2d   : > { %v1582_v14 = vmul.f32 %v1581_v12, %v1581_v12 }
 0xb92   : > { %v2243_v29 = vpop.f32.mrf.mxu3 }
 0xb93   : > { %v2244_v11 = vadd.f32 %v3855_v26, %v2243_v29  ;;  %v1583_v26 = vsel %vm836_vm1, %v1582_v14, 0.0 }
 0xb95   : > { %v2246_v30 = vadd.f32 %v3792_v57, %v2244_v11 }
 0xb97   : > { %v2247_v31 = vsel %vm836_vm1, %v2246_v30, 0.0 }
 0xb98   : > { %2248 = vadd.xlane.f32.xlu0 %v2247_v31 }
 0xc0b   : > { %v2249_v6 = vpop.xlane.xlu0 %2248 }
 0xc0c   : > { %v2250_v33 = vmul.f32 %v2249_v6, %v3874_v38 }
 0xc0e   : > { %v2251_v35 = vsub.f32 %v2246_v30, %v2250_v33 }
 0xc10   : > { %v2252_v36 = vmul.f32 %v2251_v35, %v2251_v35 }
 0xc12   : > { %v2253_v13 = vsel %vm836_vm1, %v2252_v36, 0.0 }
 0xc13   : > { %2254 = vadd.xlane.f32.xlu2 %v2253_v13 }
 0xc1b   : > { %1584 = vadd.xlane.f32.xlu2 %v1583_v26 }
 0xc86   : > { %v2255_v57 = vpop.xlane.xlu2 %2254 }
 0xc87   : > { %v2256_v37 = vmul.f32 %v2255_v57, %v3874_v38 }
 0xc89   : > { %v2257_v39 = vadd.f32 1e-05, %v2256_v37 }
 0xc8b   : > { %2857 = vrsqrt.f32 %v2257_v39  ;;  %vm2264_vm3 = vweird.f32 %v2257_v39 }
 0xc8e   : > { %v1585_v40 = vpop.xlane.xlu2 %1584 }
 0xc8f   : > { %v1586_v41 = vmul.f32 %v1585_v40, %v3874_v38 }
 0xc91   : > { %v2858_v42 = vpop.eup %2857  ;;  %v1587_v43 = vadd.f32 1e-05, %v1586_v41 }
 0xc92   : > { %v2259_v44 = vmul.f32 %v2858_v42, %v2257_v39  ;;  %vm2265_vm2 = vweird.f32 %v2858_v42 }
 0xc93   : > { %2859 = vrsqrt.f32 %v1587_v43  ;;  %vm2266_vm4 = vmor %vm2264_vm3, %vm2265_vm2  ;;  %vm1594_vm6 = vweird.f32 %v1587_v43 }
 0xc94   : > { %v2260_v45 = vmul.f32 %v2858_v42, %v2259_v44 }
 0xc96   : > { %v2261_v46 = vmul.f32 0.5, %v2260_v45 }
 0xc98   : > { %v2262_v47 = vsub.f32 1.5, %v2261_v46 }
 0xc99   : > { %v2860_v10 = vpop.eup %2859 }
 0xc9a   : > { %v2263_v48 = vmul.f32 %v2858_v42, %v2262_v47  ;;  %v1589_v49 = vmul.f32 %v2860_v10, %v1587_v43  ;;  %vm1595_vm5 = vweird.f32 %v2860_v10 }
 0xc9b   : > { %vm1596_vm7 = vmor %vm1594_vm6, %vm1595_vm5 }
 0xc9c   : > { %v2267_v50 = vsel %vm2266_vm4, %v2858_v42, %v2263_v48  ;;  %v1590_v51 = vmul.f32 %v2860_v10, %v1589_v49 }
 0xc9d   : > { %v2268_v52 = vmul.f32 %v2267_v50, %v2251_v35 }
 0xc9e   : > { %v1591_v53 = vmul.f32 0.5, %v1590_v51 }
 0xc9f   : > { %v2269_v54 = vmul.f32 %v3894_v60, %v2268_v52 }
 0xca0   : > { %v1592_v55 = vsub.f32 1.5, %v1591_v53 }
 0xca1   : > { %v2270_v56 = vadd.f32 %v3898_v1, %v2269_v54 }
 0xca2   : > { %v1593_v63 = vmul.f32 %v2860_v10, %v1592_v55 }
 0xca3   : > { %2649 = vmatmul.msk.f32.vlgmr.msra.gmra.mxu0 %vm836_vm1, %v2270_v56 }
 0xca4   : > { %v1597_v3 = vsel %vm1596_vm7, %v2860_v10, %v1593_v63 }
 0xca5   : > { %v1598_v58 = vmul.f32 %v1597_v3, %v1581_v12 }
 0xca7   : > { %v1602_v5 = vmul.f32 %v2787_v2, %v1598_v58 }
 0xca9   : > { %v1606_v59 = vadd.f32 %v2788_v4, %v1602_v5 }
 0xcab   : > { %1607 = vst.msk [vmem:[%s4124_s25] sm:$0xff] %vm836_vm1, %v1606_v59 }
 0xd20   : > { %v2291_v60 = vpop.f32.mrf.mxu0 }
 0xd21   : > { %v2292_v1 = vadd.f32 %v3936_v15, %v2291_v60 }
 0xd23   : > { %v2294_v61 = vmax.f32 %v2292_v1, 0.0 }
 0xd25   : > { %2650 = vmatmul.msk.f32.vlgmr.msrb.gmra.mxu2 %vm1552_vm0, %v2294_v61 }
 0xda8   : > { %v2315_v62 = vpop.f32.mrf.mxu2 }
 0xda9   : > { %v2316_v0 = vadd.f32 %v3998_v9, %v2315_v62 }
 0xdab   : > { %v2318_v16 = vadd.f32 %v2316_v0, %v2270_v56 }
 0xdad   : > { %v2319_v7 = vsel %vm836_vm1, %v2318_v16, 0.0 }
 0xdae   : > { %2320 = vadd.xlane.f32.xlu0 %v2319_v7 }
 0xe21   : > { %v2321_v17 = vpop.xlane.xlu0 %2320 }
 0xe22   : > { %v2322_v18 = vmul.f32 %v2321_v17, %v3874_v38 }
 0xe24   : > { %v2323_v8 = vsub.f32 %v2318_v16, %v2322_v18 }
 0xe26   : > { %v2324_v19 = vmul.f32 %v2323_v8, %v2323_v8 }
 0xe28   : > { %v2325_v20 = vsel %vm836_vm1, %v2324_v19, 0.0 }
 0xe29   : > { %2326 = vadd.xlane.f32.xlu0 %v2325_v20 }
 0xe9c   : > { %v2327_v21 = vpop.xlane.xlu0 %2326 }
 0xe9d   : > { %v2328_v15 = vmul.f32 %v2327_v21, %v3874_v38 }
 0xe9f   : > { %v2329_v22 = vadd.f32 1e-05, %v2328_v15 }
 0xea1   : > { %2861 = vrsqrt.f32 %v2329_v22  ;;  %vm2336_vm9 = vweird.f32 %v2329_v22 }
 0xea7   : > { %v2862_v23 = vpop.eup %2861 }
 0xea8   : > { %v2331_v24 = vmul.f32 %v2862_v23, %v2329_v22  ;;  %vm2337_vm8 = vweird.f32 %v2862_v23 }
 0xea9   : > { %vm2338_vm10 = vmor %vm2336_vm9, %vm2337_vm8 }
 0xeaa   : > { %v2332_v9 = vmul.f32 %v2862_v23, %v2331_v24 }
 0xeac   : > { %v2333_v25 = vmul.f32 0.5, %v2332_v9 }
 0xeae   : > { %v2334_v27 = vsub.f32 1.5, %v2333_v25 }
 0xeb0   : > { %v2335_v28 = vmul.f32 %v2862_v23, %v2334_v27 }
 0xeb2   : > { %v2339_v29 = vsel %vm2338_vm10, %v2862_v23, %v2335_v28 }
 0xeb3   : > { %v2340_v11 = vmul.f32 %v2339_v29, %v2323_v8 }
 0xeb5   : > { %v2341_v30 = vmul.f32 %v2787_v2, %v2340_v11 }
 0xeb7   : > { %v2342_v31 = vadd.f32 %v2788_v4, %v2341_v30 }
 0xeb9   : > { %2651 = vst.msk [vmem:[%s4124_s25 + $0x8] sm:$0xff] %vm836_vm1, %v2342_v31 }
 0xeba PF: > { %s4147_s28 = sld [smem:[#allocation27_spill]]  ;;  %s4150_s25 = smov %s3209_s26 }
 0xebb   : > { %s4148_s24 = sld [smem:[#allocation26_spill]] }
 0xebc   : > { %s4149_s27 = sld [smem:[#allocation28_spill]] }
 0xec0   : > { %p36_p7 = scmp.ge.s32.totalorder %s4147_s28, 10  }
 0xec1   : > { %s4151_s26 = smov %s4148_s24 }
 0xec2   :  { %38 = sbr.rel (!%p36_p7) target bundleno = 22 (0x16), region = 225 }
 0xec7   :  { %2355 = vsyncpa [#allocation5], 1 }
 0xec8   :  { %2357 = vsyncpa [#allocation5 + $0x1], 1 }
 0xec9   :  { %2358 = vsyncpa [#allocation7], 1 }
 0xeca   :  { %2360 = vsyncpa [#allocation7 + $0x1], 1 }
 0xecb   :  { %2361 = vsyncpa [#allocation10], 1 }
 0xecc   :  { %2363 = vsyncpa [#allocation10 + $0x1], 1 }
 0xecd   :  { %2364 = vsyncpa [#allocation13], 1 }
 0xece   :  { %2366 = vsyncpa [#allocation13 + $0x1], 1 }
 0xecf   :  { %2367 = vsyncpa [#allocation16], 1 }
 0xed0   :  { %2369 = vsyncpa [#allocation16 + $0x1], 1 }
 0xed1   :  { %2370 = vsyncpa [#allocation19], 1 }
 0xed2   :  { %2372 = vsyncpa [#allocation19 + $0x1], 1 }

// kernel: closed_call.27
= control target key start
LH: loop header
LB: loop body
LE: loop exit
PB: predicated region body
PF: predicated region fallthrough
CT: control target
= control target key end

     0   :  { %s6368_s0 = inlined_call_operand.vmem [shape: f32[2,6,32], index: 0, kind: input, shape index: {}]   ;;  %s6369_s1 = inlined_call_operand.vmem [shape: f32[6,32], index: 1, kind: input, shape index: {}]   ;;  %s6370_s2 = inlined_call_operand.<no memory space> [shape: s32[1,1], index: 2, kind: input, shape index: {}]   ;;  %s6371_s3 = inlined_call_operand.<no memory space> [shape: f32[1,1], index: 3, kind: input, shape index: {}]   ;;  %s6372_s4 = inlined_call_operand.vmem [shape: f32[8,2,8,64], index: 4, kind: input, shape index: {}]   ;;  %s6373_s5 = inlined_call_operand.vmem [shape: f32[8,32,96], index: 5, kind: input, shape index: {}]   ;;  %s6374_s6 = inlined_call_operand.vmem [shape: f32[8,1,96], index: 6, kind: input, shape index: {}]   ;;  %s6375_s7 = inlined_call_operand.vmem [shape: f32[8,32,32], index: 7, kind: input, shape index: {}]   ;;  %s6376_s8 = inlined_call_operand.vmem [shape: f32[8,1,32], index: 8, kind: input, shape index: {}]   ;;  %s6377_s9 = inlined_call_operand.vmem [shape: f32[8,1,32], index: 9, kind: input, shape index: {}]   ;;  %s6378_s10 = inlined_call_operand.vmem [shape: f32[8,1,32], index: 10, kind: input, shape index: {}]   ;;  %s6379_s11 = inlined_call_operand.vmem [shape: f32[8,32,32], index: 11, kind: input, shape index: {}]   ;;  %s6380_s12 = inlined_call_operand.vmem [shape: f32[8,1,32], index: 12, kind: input, shape index: {}]   ;;  %s6381_s13 = inlined_call_operand.vmem [shape: f32[8,32,32], index: 13, kind: input, shape index: {}]   ;;  %s6382_s14 = inlined_call_operand.vmem [shape: f32[8,1,32], index: 14, kind: input, shape index: {}]   ;;  %s6383_s15 = inlined_call_operand.vmem [shape: f32[8,1,32], index: 15, kind: input, shape index: {}]   ;;  %s6384_s16 = inlined_call_operand.vmem [shape: f32[8,1,32], index: 16, kind: input, shape index: {}]   ;;  %s6385_s17 = inlined_call_operand.vmem [shape: f32[8,32,64], index: 17, kind: input, shape index: {}]   ;;  %s6386_s18 = inlined_call_operand.vmem [shape: f32[8,1,64], index: 18, kind: input, shape index: {}]   ;;  %s6387_s19 = inlined_call_operand.vmem [shape: f32[8,64,32], index: 19, kind: input, shape index: {}]   ;;  %s6388_s20 = inlined_call_operand.hbm [shape: f32[8,1,32], index: 20, kind: input, shape index: {}]   ;;  %s6389_s21 = inlined_call_operand.hbm [shape: f32[8,1,32], index: 21, kind: input, shape index: {}]   ;;  %s6390_s22 = inlined_call_operand.hbm [shape: f32[8,1,32], index: 22, kind: input, shape index: {}]   ;;  %s6391_s23 = inlined_call_operand.vmem [shape: f32[32,32], index: 23, kind: input, shape index: {}]   ;;  %s6392_s24 = inlined_call_operand.vmem [shape: f32[1,32], index: 24, kind: input, shape index: {}]   ;;  %s6393_s25 = inlined_call_operand.vmem [shape: f32[32,32], index: 25, kind: input, shape index: {}]   ;;  %s6394_s26 = inlined_call_operand.vmem [shape: f32[1,32], index: 26, kind: input, shape index: {}]   ;;  %s6395_s27 = inlined_call_operand.hbm [shape: f32[2,6,32], index: 27, kind: output, shape index: {0}]   ;;  %s6396_s28 = inlined_call_operand.vmem [shape: f32[2,1,32], index: 28, kind: output, shape index: {1}]  }
   0x1   :  { %6479 = sst [smem:[#allocation31_spill]] %s6368_s0 }
   0x2   :  { %6480 = sst [smem:[#allocation32_spill]] %s6369_s1 }
   0x3   :  { %6481 = sst [smem:[#allocation33_spill]] %s6370_s2 }
   0x4   :  { %6482 = sst [smem:[#allocation34_spill]] %s6371_s3 }
   0x5   :  { %6483 = sst [smem:[#allocation35_spill]] %s6372_s4 }
   0x6   :  { %6484 = sst [smem:[#allocation36_spill]] %s6373_s5 }
   0x7   :  { %6485 = sst [smem:[#allocation37_spill]] %s6374_s6 }
   0x8   :  { %6486 = sst [smem:[#allocation38_spill]] %s6375_s7 }
   0x9   :  { %6487 = sst [smem:[#allocation39_spill]] %s6376_s8 }
   0xa   :  { %6488 = sst [smem:[#allocation40_spill]] %s6377_s9 }
   0xb   :  { %6489 = sst [smem:[#allocation41_spill]] %s6378_s10 }
   0xc   :  { %6490 = sst [smem:[#allocation42_spill]] %s6379_s11 }
   0xd   :  { %6491 = sst [smem:[#allocation43_spill]] %s6380_s12 }
   0xe   :  { %6492 = sst [smem:[#allocation44_spill]] %s6381_s13 }
   0xf   :  { %6493 = sst [smem:[#allocation45_spill]] %s6382_s14 }
  0x10   :  { %6494 = sst [smem:[#allocation46_spill]] %s6383_s15 }
  0x11   :  { %6495 = sst [smem:[#allocation47_spill]] %s6384_s16 }
  0x12   :  { %6496 = sst [smem:[#allocation48_spill]] %s6385_s17 }
  0x13   :  { %6497 = sst [smem:[#allocation49_spill]] %s6386_s18 }
  0x14   :  { %6498 = sst [smem:[#allocation50_spill]] %s6387_s19 }
  0x15   :  { %6499 = sst [smem:[#allocation51_spill]] %s6388_s20 }
  0x16   :  { %6500 = sst [smem:[#allocation52_spill]] %s6389_s21 }
  0x17   :  { %6501 = sst [smem:[#allocation53_spill]] %s6390_s22 }
  0x18   :  { %6502 = sst [smem:[#allocation54_spill]] %s6391_s23 }
  0x19   :  { %6503 = sst [smem:[#allocation55_spill]] %s6392_s24 }
  0x1a   :  { %6504 = sst [smem:[#allocation56_spill]] %s6393_s25 }
  0x1b   :  { %6505 = sst [smem:[#allocation57_spill]] %s6394_s26 }
  0x1c   :  { %6506 = sst [smem:[#allocation58_spill]] %s6395_s27 }
  0x1d   :  { %6507 = sst [smem:[#allocation59_spill]] %s6396_s28 }
  0x1e   :  { %s6508_s9 = sld [smem:[#allocation33_spill]] }
  0x1f   :  { %s6509_s23 = sld [smem:[#allocation34_spill]] }
  0x24   :  { %34 = sst [smem:[#allocation5]] %s6508_s9 }
  0x25   :  { %35 = sst [smem:[#allocation6]] %s6509_s23 }
  0x26   :  { %36 = vsyncpa [#allocation8], 0 }
  0x27   :  { %38 = vsyncpa [#allocation8 + $0x1], 0 }
  0x28   :  { %39 = vsyncpa [#allocation11], 0 }
  0x29   :  { %41 = vsyncpa [#allocation11 + $0x1], 0 }
  0x2a   :  { %42 = vsyncpa [#allocation9], 0  ;;  %s5361_s6 = smov 0   ;;  %s5363_s10 = smov 0  }
  0x2b   :  { %s5365_s0 = smov 0   ;;  %s5367_s11 = smov 0  }
  0x2c LB: > { %6510 = sst [smem:[#allocation17_spill]] %s5166_s10  ;;  %s5380_s23 = sadd.s32 4294967295, %s5174_s11   ;;  %s5174_s11 = sphi %s5367_s11, %s6641_s11   ;;  %s5170_s0 = sphi %s5365_s0, %s6644_s0   ;;  %s5166_s10 = sphi %s5363_s10, %s6643_s10   ;;  %s5162_s6 = sphi %s5361_s6, %s6642_s6  }
  0x2d   : > { %6511 = sst [smem:[#allocation18_spill]] %s5170_s0  ;;  %s5383_s29 = sadd.s32 1, %s5174_s11  }
  0x2e   : > { %6512 = sst [smem:[#allocation19_spill]] %s5380_s23  ;;  %s552_s2 = ssub.s32 %s5174_s11, %s5383_s29 }
  0x2f   : > { %6513 = sst [smem:[#allocation20_spill]] %s5383_s29  ;;  %s555_s7 = sadd.s32 1, %s5170_s0 }
  0x30   : > { %p553_p0 = scmp.eq.s32.totalorder %s552_s2, 0  ;;  %p562_p1 = scmp.ne.s32.totalorder %s5170_s0, %s5166_s10 }
  0x31   : > { %p563_p2 = scmp.eq.s32.totalorder %s5174_s11, 0  ;;  %p568_p3 = scmp.ne.s32.totalorder %s5166_s10, %s5162_s6 }
  0x32   : > { %s5393_s12 = scalar_select %p553_p0, %s5170_s0, %s555_s7  }
  0x33   : > { %p564_p4 = por %p563_p2, %p562_p1  ;;  %p569_p5 = scmp.eq.s32.totalorder %s5380_s23, 0 }
  0x34   : > { %6514 = sst [smem:[#allocation21_spill]] %s5393_s12  ;;  %p4770_p6 = scmp.lt.s32.totalorder %s5174_s11, 8 }
  0x35   : > { %p5397_p7 = por %p569_p5, %p568_p3  ;;  %s5402_s4 = sand.u32 1, %s5170_s0  }
  0x36   : > { %p5404_p8 = pnand %p4770_p6, %p564_p4  ;;  %s921_s5 = sand.u32 1, %s5174_s11  }
  0x37   : > { %s6517_s21 = sld [smem:[#allocation52_spill]]  ;;  %s924_s2 = scalar_lea.vmem [#allocation10], %s5402_s4 }
  0x38   : > { %s931_s7 = sshll.u32 %s924_s2, 4  ;;  %s5414_s12 = scalar_lea.sflag [#allocation11], %s921_s5  ;;  %s932_s7 = int_to_ptr.vmem [resolvable:$true] %s931_s7 }
  0x39   : > { %p5018_p10 = pneg %p5404_p8 }
  0x3d   : > { %s927_s3 = scalar_lea.hbm %s6517_s21, %s5174_s11  ;;  %s5021_s30 = scalar_lea.hbm %s6517_s21, 8 }
  0x3e   : > { %s929_s6 = sshll.u32 %s927_s3, 4  ;;  %s930_s6 = int_to_ptr.hbm [resolvable:$true] %s929_s6 }
  0x3f   : > { %s5014_s0 = sshra.s32 %s930_s6, 4  ;;  %s5015_s0 = int_to_ptr.hbm [resolvable:$true] %s5014_s0 }
  0x40   : > { %s5016_s29 = scalar_lea.hbm %s5015_s0, 1  ;;  %p5022_p13 = scmp.lt.s32.totalorder %s5015_s0, %s6517_s21 }
  0x41   : > { %p5017_p9 = scmp.ne.s32.totalorder %s5015_s0, %s5016_s29  ;;  %p5023_p0 = scmp.lt.s32.totalorder %s5021_s30, %s5016_s29 }
  0x43   : > { %p5019_p11 = pnand %p5018_p10, %p5017_p9  ;;  %p5024_p1 = por %p5023_p0, %p5022_p13 }
  0x45   : > { %p5020_p12 = pneg %p5019_p11 }
  0x47   : > { %p5025_p2 = pnand %p5024_p1, %p5020_p12 }
  0x49   : > { %5028 = shalt.err (!%p5025_p2)
}
  0x4a   : > { %4766 = dma.hbm_to_vmem [thread:$0]  (!%p5404_p8), %s930_s6, 16, %s932_s7, %s5414_s12  }
  0x4b   : > { %p4578_p3 = scmp.ge.s32.totalorder %s5174_s11, 1  ;;  %p953_p4 = scmp.lt.s32.totalorder %s5174_s11, 9 }
  0x4c   : > { %s6519_s20 = sld [smem:[#allocation51_spill]]  ;;  %s907_s30 = scalar_lea.vmem [#allocation7], %s5402_s4 }
  0x4d   : > { %p5432_p5 = pnand %p4578_p3, %p953_p4  ;;  %s914_s3 = sshll.u32 %s907_s30, 4  ;;  %s915_s3 = int_to_ptr.vmem [resolvable:$true] %s914_s3 }
  0x4e   : > { %s905_s2 = scalar_lea.sflag [#allocation8], %s5402_s4 }
  0x52   : > { %s910_s5 = scalar_lea.hbm %s6519_s20, %s5174_s11  ;;  %s5051_s24 = scalar_lea.hbm %s6519_s20, 8 }
  0x53   : > { %s912_s9 = sshll.u32 %s910_s5, 4  ;;  %s913_s9 = int_to_ptr.hbm [resolvable:$true] %s912_s9 }
  0x54   : > { %s5044_s21 = sshra.s32 %s913_s9, 4  ;;  %s5045_s21 = int_to_ptr.hbm [resolvable:$true] %s5044_s21 }
  0x55   : > { %s5046_s28 = scalar_lea.hbm %s5045_s21, 1  ;;  %p5052_p12 = scmp.lt.s32.totalorder %s5045_s21, %s6519_s20 }
  0x56   : > { %p5047_p6 = scmp.ne.s32.totalorder %s5045_s21, %s5046_s28  ;;  %p5053_p13 = scmp.lt.s32.totalorder %s5051_s24, %s5046_s28 }
  0x58   : > { %p5049_p9 = pnand %p5047_p6, %p5018_p10  ;;  %p5054_p0 = por %p5053_p13, %p5052_p12 }
  0x5a   : > { %p5050_p11 = pneg %p5049_p9 }
  0x5c   : > { %p5055_p1 = pnand %p5054_p0, %p5050_p11 }
  0x5e   : > { %5058 = shalt.err (!%p5055_p1)
}
  0x5f   : > { %4763 = dma.hbm_to_vmem [thread:$0]  (!%p5404_p8), %s913_s9, 16, %s915_s3, %s905_s2  }
  0x60   : > { %s6520_s22 = sld [smem:[#allocation53_spill]]  ;;  %s941_s7 = scalar_lea.vmem [#allocation12], %s5402_s4 }
  0x61   : > { %s948_s25 = sshll.u32 %s941_s7, 4  ;;  %s949_s25 = int_to_ptr.vmem [resolvable:$true] %s948_s25 }
  0x66   : > { %s944_s26 = scalar_lea.hbm %s6520_s22, %s5174_s11  ;;  %s5081_s9 = scalar_lea.hbm %s6520_s22, 8 }
  0x67   : > { %s946_s6 = sshll.u32 %s944_s26, 4  ;;  %s947_s6 = int_to_ptr.hbm [resolvable:$true] %s946_s6 }
  0x68   : > { %s5074_s21 = sshra.s32 %s947_s6, 4  ;;  %s5075_s21 = int_to_ptr.hbm [resolvable:$true] %s5074_s21 }
  0x69   : > { %s5076_s24 = scalar_lea.hbm %s5075_s21, 1  ;;  %p5082_p6 = scmp.lt.s32.totalorder %s5075_s21, %s6520_s22 }
  0x6a   : > { %p5077_p2 = scmp.ne.s32.totalorder %s5075_s21, %s5076_s24  ;;  %p5083_p9 = scmp.lt.s32.totalorder %s5081_s9, %s5076_s24 }
  0x6c   : > { %p5079_p3 = pnand %p5077_p2, %p5018_p10  ;;  %p5084_p11 = por %p5083_p9, %p5082_p6 }
  0x6e   : > { %p5080_p4 = pneg %p5079_p3 }
  0x70   : > { %p5085_p12 = pnand %p5084_p11, %p5080_p4 }
  0x72   : > { %5088 = shalt.err (!%p5085_p12)
}
  0x73   : > { %4769 = dma.hbm_to_vmem [thread:$0]  (!%p5404_p8), %s947_s6, 16, %s949_s25, %s5414_s12  }
  0x74   : > { %957 = sbr.rel (%p5432_p5) target bundleno = 6785 (0x1a81), region = 128 }
  0x79   : > { %s5473_s26 = sand.u32 1, %s5166_s10  }
  0x7a   : > { %6521 = sst [smem:[#allocation22_spill]] %s5473_s26  ;;  %s960_s11 = scalar_lea.sflag [#allocation8], %s5473_s26 }
  0x7b   : > { %5149 = dma.done.wait (%p5397_p7), %s960_s11, 16  }
  0x7c   : > { %5151 = vsyncadd (%p5397_p7), %s960_s11, 4294967280  ;;  %s968_s25 = sand.u32 1, %s5380_s23  }
  0x7d   : > { %s969_s12 = scalar_lea.sflag [#allocation11], %s968_s25 }
  0x7e   : > { %5153 = dma.done.wait (%p5397_p7), %s969_s12, 32  }
  0x7f   : > { %5155 = vsyncadd (%p5397_p7), %s969_s12, 4294967264  ;;  %p1118_p8 = scmp.lt.s32.totalorder %s5380_s23, 7  ;;  %s5488_s27 = sld [smem:[#allocation5]] }
  0x80   : > { %s6523_s21 = sld [smem:[#allocation35_spill]]  ;;  %p4593_p7 = scmp.ne.s32.totalorder %s5380_s23, 0 }
  0x81   : > { %s1119_s29 = scalar_select %p1118_p8, %s5380_s23, 7 }
  0x82   : > { %s6525_s9 = sld [smem:[#allocation36_spill]] }
  0x83   : > { %s4743_s5 = sshll.u32 %s1119_s29, 4  ;;  %s4744_s30 = sshll.u32 %s1119_s29, 5 }
  0x84   : > { %s6526_s11 = sld [smem:[#allocation37_spill]] }
  0x85   : > { %6522 = sst [smem:[#allocation23_spill]] %s5488_s27 }
  0x86   : > { %s5494_s24 = scalar_lea.vmem %s6523_s21, %s4743_s5  ;;  %s6527_s4 = sld [smem:[#allocation38_spill]] }
  0x87   : > { %6524 = sst [smem:[#allocation24_spill]] %s5494_s24 }
  0x88   : > { %s5499_s3 = scalar_lea.vmem %s6525_s9, %s4744_s30  ;;  %s6529_s5 = sld [smem:[#allocation39_spill]] }
  0x89   : > { %s6531_s0 = sld [smem:[#allocation40_spill]] }
  0x8a   : > { %s5504_s25 = scalar_lea.vmem %s6526_s11, %s1119_s29  ;;  %s6532_s2 = sld [smem:[#allocation41_spill]] }
  0x8b   : > { %s6533_s8 = sld [smem:[#allocation42_spill]] }
  0x8c   : > { %s5509_s20 = scalar_lea.vmem %s6527_s4, %s4744_s30  ;;  %s6534_s22 = sld [smem:[#allocation43_spill]] }
  0x8d   : > { %6528 = sst [smem:[#allocation25_spill]] %s5509_s20 }
  0x8e   : > { %s5514_s7 = scalar_lea.vmem %s6529_s5, %s1119_s29  ;;  %s6535_s13 = sld [smem:[#allocation44_spill]] }
  0x8f   : > { %6530 = sst [smem:[#allocation26_spill]] %s5514_s7  ;;  %s5519_s9 = scalar_lea.vmem %s6531_s0, %s1119_s29 }
  0x90   : > { %s5524_s11 = scalar_lea.vmem %s6532_s2, %s1119_s29  ;;  %s6536_s14 = sld [smem:[#allocation45_spill]] }
  0x91   : > { %s5529_s4 = scalar_lea.vmem %s6533_s8, %s4744_s30  ;;  %s6538_s15 = sld [smem:[#allocation46_spill]] }
  0x92   : > { %s5534_s6 = scalar_lea.vmem %s6534_s22, %s1119_s29  ;;  %s6539_s16 = sld [smem:[#allocation47_spill]] }
  0x93   : > { %s6541_s17 = sld [smem:[#allocation48_spill]]  ;;  %s4749_s0 = sshll.u32 %s1119_s29, 6 }
  0x94   : > { %s5539_s21 = scalar_lea.vmem %s6535_s13, %s4744_s30  ;;  %s6543_s18 = sld [smem:[#allocation49_spill]] }
  0x95   : > { %s6545_s19 = sld [smem:[#allocation50_spill]] }
  0x96   : > { %s5544_s10 = scalar_lea.vmem %s6536_s14, %s1119_s29  ;;  %s6546_s12 = sld [smem:[#allocation31_spill]] (!%p4593_p7) }
  0x97   : > { %6537 = sst [smem:[#allocation27_spill]] %s5544_s10  ;;  %s5549_s27 = scalar_lea.vmem %s6538_s15, %s1119_s29 }
  0x98   : > { %s5554_s20 = scalar_lea.vmem %s6539_s16, %s1119_s29  ;;  %1184 = sbr.rel (%p4593_p7) target bundleno = 167 (0xa7), region = 144 }
  0x99   : > { %6540 = sst [smem:[#allocation28_spill]] %s5554_s20  ;;  %s5559_s7 = scalar_lea.vmem %s6541_s17, %s4744_s30 }
  0x9a   : > { %6542 = sst [smem:[#allocation29_spill]] %s5559_s7  ;;  %s5564_s28 = scalar_lea.vmem %s6543_s18, %s1119_s29 }
  0x9b   : > { %6544 = sst [smem:[#allocation30_spill]] %s5564_s28  ;;  %s5569_s2 = scalar_lea.vmem %s6545_s19, %s4749_s0 }
  0x9c   : > { %s6547_s16 = sld [smem:[#allocation32_spill]] (!%p4593_p7) }
  0x9d   : > { %v1185_v0 = vld [vmem:[%s6546_s12] sm:$0x3f]  ;;  %vm1188_vm0 = vcmask 259072   ;;  %v4594_v3 = vld [vmem:[%s6546_s12 + $0x8] sm:$0x3f] }
  0xa2   : > { %v1186_v1 = vld [vmem:[%s6547_s16] sm:$0x3f] }
  0xa3   : > { %v1187_v2 = vadd.f32 %v1186_v1, %v1185_v0  ;;  %v1192_v4 = vld [vmem:[%s6547_s16] sm:$0x3f] }
  0xa4   : > { %v1193_v5 = vadd.f32 %v4594_v3, %v1192_v4 }
  0xa5   : > { %1189 = vst.msk [vmem:[#allocation13] sm:$0x3f] %vm1188_vm0, %v1187_v2 }
  0xa6   : > { %1195 = vst.msk [vmem:[#allocation13 + $0x8] sm:$0x3f] %vm1188_vm0, %v1193_v5 }
  0xa7 PF: > { %v1199_v6 = vld [vmem:[%s5499_s3 + $0x18] sm:$0xff]  ;;  %v1198_v7 = vld [vmem:[%s5499_s3 + $0x10] sm:$0xff]  ;;  %v1197_v8 = vld [vmem:[%s5499_s3 + $0x8] sm:$0xff]  ;;  %vm1244_vm1 = vcmask 261120   ;;  %vm1268_vm2 = vcmask 783360   ;;  %s6426_s0 = smov 92   ;;  %v1236_v39 = vlaneseq }
  0xa8   : > { %1260 = vmatpush.msra.mxu0 %v1199_v6  ;;  %v1196_v9 = vld [vmem:[%s5499_s3] sm:$0xff]  ;;  %s6411_s1 = smov 64   ;;  %s6422_s24 = smov 96   ;;  %vm1275_vm3 = vcmask 31744   ;;  %vm6446_vm4 = vcmask 1045504   ;;  %vm6447_vm6 = vcmask 46080  }
  0xa9   : > { %v4839_v11 = vld [vmem:[%s5504_s25] ss:$0 sm:$0xff]  ;;  %s6458_s8 = smov 124   ;;  %s6456_s30 = smov 116   ;;  %v5645_v40 = vand.u32 127, %v1236_v39  ;;  %vm6445_vm7 = vcmask 48128  }
  0xaa   : > { %1261 = vmatpush.msra.mxu0 %v1198_v7  ;;  %s6435_s22 = smov 88   ;;  %s6412_s13 = smov 76   ;;  %vm1345_vm8 = vcmask 29696   ;;  %vm1422_vm9 = vcmask 62496   ;;  %vm1499_vm10 = vcmask 95296   ;;  %vm1576_vm11 = vcmask 128096  }
  0xab   : > { %s6418_s29 = smov 84   ;;  %s6450_s14 = smov 120   ;;  %vm1653_vm12 = vcmask 160896   ;;  %vm1730_vm13 = vcmask 193696   ;;  %vm1807_vm14 = vcmask 226496   ;;  %vm1884_vm15 = vcmask 259296  }
  0xac   : > { %v5589_v10 = vld [vmem:[#allocation13] sm:$0x3f]  ;;  %1262 = vmatpush.msra.mxu0 %v1197_v8  ;;  %s6420_s5 = smov 80   ;;  %s6454_s15 = smov 112   ;;  %vm1914_vm0 = vcmask 259072  }
  0xad   : > { %s6563_s12 = smov 68   ;;  %s6564_s16 = smov 4  }
  0xae   : > { %1263 = vmatpush.msra.mxu0 %v1196_v9  ;;  %s6565_s17 = smov 12   ;;  %s6566_s18 = smov 8  }
  0xaf   : > { %4595 = vmatmul.msk.f32.vlgmr.msra.gmra.mxu0 %vm1244_vm1, %v5589_v10  ;;  %s6567_s19 = smov 16   ;;  %s6568_s23 = smov 20  }
  0xb0   : > { %s6570_s26 = smov 28  }
 0x12c   : > { %v1265_v12 = vpop.f32.mrf.mxu0 }
 0x12d   : > { %v1266_v13 = vadd.f32 %v4839_v11, %v1265_v12 }
 0x12f   : > { %1269 = vst.msk [vmem:[#allocation2] sm:$0x3f] %vm1268_vm2, %v1266_v13 }
 0x136   : > { %v5595_v14 = vld [vmem:[#allocation2] sm:$0x3f] }
 0x137   : > { %v1270_v15 = vld [vmem:[#allocation2] sm:$0x3f]  ;;  %1353 = vrot.lane.b32.xlu2 %v5595_v14, %s6426_s0  ;;  %v1348_v17 = vmul.f32 0.5, %v5595_v14  ;;  %s6432_s0 = smov 60  }
 0x138   : > { %1316 = vrot.lane.b32.xlu1 %v1270_v15, %s6411_s1  ;;  %1273 = vrot.lane.b32.xlu0 %v1270_v15, %s6422_s24  ;;  %v5601_v16 = vld [vmem:[#allocation2] sm:$0x3f]  ;;  %s6414_s1 = smov 68   ;;  %v1271_v32 = vmul.f32 0.5, %v1270_v15  ;;  %s6424_s24 = smov 48  }
 0x139   : > { %v1502_v18 = vmul.f32 0.5, %v5601_v16  ;;  %v5607_v19 = vld [vmem:[#allocation2] sm:$0x3f] }
 0x13a   : > { %v5609_v20 = vld [vmem:[#allocation2] sm:$0x3f]  ;;  %v1425_v21 = vmul.f32 0.5, %v5607_v19 }
 0x13b   : > { %v5619_v22 = vld [vmem:[#allocation2] sm:$0x3f]  ;;  %v1656_v59 = vmul.f32 0.5, %v5609_v20 }
 0x13c   : > { %v1579_v23 = vmul.f32 0.5, %v5619_v22  ;;  %v5625_v24 = vld [vmem:[#allocation2] sm:$0x3f] }
 0x13d   : > { %v1810_v25 = vmul.f32 0.5, %v5625_v24  ;;  %v5662_v49 = vld [vmem:[#allocation2] sm:$0x3f] }
 0x13e   : > { %v1733_v60 = vmul.f32 0.5, %v5662_v49 }
 0x13f   : > { %1350 = vrot.lane.b32.xlu2 %v1348_v17, %s6458_s8 }
 0x140   : > { %1504 = vrot.lane.b32.xlu1 %v1502_v18, %s6456_s30 }
 0x147   : > { %1430 = vrot.lane.b32.xlu2 %v5607_v19, %s6435_s22  ;;  %s6460_s22 = smov 20  }
 0x148   : > { %1661 = vrot.lane.b32.xlu1 %v5609_v20, %s6412_s13  ;;  %s6439_s13 = smov 100  }
 0x14f   : > { %1507 = vrot.lane.b32.xlu2 %v5601_v16, %s6418_s29  ;;  %s6441_s29 = smov 104  }
 0x157   : > { %1427 = vrot.lane.b32.xlu2 %v1425_v21, %s6450_s14 }
 0x15f   : > { %1584 = vrot.lane.b32.xlu2 %v5619_v22, %s6420_s5  ;;  %s6425_s5 = smov 56  }
 0x167   : > { %1581 = vrot.lane.b32.xlu2 %v1579_v23, %s6454_s15 }
 0x16f   : > { %1815 = vrot.lane.b32.xlu2 %v5625_v24, %s6414_s1  ;;  %s6548_s1 = sld [smem:[#allocation23_spill]] }
 0x175   : > { %v1238_v41 = vstv %s6548_s1  ;;  %s6416_s1 = smov 72  }
 0x176   : > { %vm5649_vm5 = vcmp.lt.s32.totalorder %v5645_v40, %v1238_v41 }
 0x177   : > { %1812 = vrot.lane.b32.xlu2 %v1810_v25, %s6439_s13  ;;  %s6448_s13 = smov 24  }
 0x191   : > { %v1354_v26 = vpop.permute.xlu2 %1353 }
 0x199   : > { %v5631_v27 = vpop.permute.xlu2 %1350 }
 0x1a1   : > { %v1431_v28 = vpop.permute.xlu2 %1430 }
 0x1a9   : > { %v1508_v29 = vpop.permute.xlu2 %1507 }
 0x1aa   : > { %v1317_v30 = vpop.permute.xlu1 %1316  ;;  %v1274_v31 = vpop.permute.xlu0 %1273  ;;  %4608 = vmatpush.xpose.msk.msrb.mxu0 %vm1275_vm3, %v1508_v29 }
 0x1ab   : > { %4598 = vmatpush.msk.msra.mxu3 %vm6446_vm4, %v1317_v30  ;;  %4596 = vmatpush.xpose.msk.msra.mxu1 %vm1275_vm3, %v1274_v31 }
 0x1ad   : > { %4600 = vmatpush.xpose.msk.msrb.mxu3 %vm1275_vm3, %v1354_v26 }
 0x1ae   : > { %4597 = vmatmul.msk.f32.vlgmr.msra.gmra.mxu1 %vm1275_vm3, %v1271_v32 }
 0x1af   : > { %4604 = vmatpush.xpose.msk.msrb.mxu1 %vm1275_vm3, %v1431_v28 }
 0x1b1   : > { %v1428_v33 = vpop.permute.xlu2 %1427 }
 0x1b2   : > { %v1505_v34 = vpop.permute.xlu1 %1504 }
 0x1b3   : > { %4609 = vmatmul.msk.f32.vlgmr.msrb.gmra.mxu0 %vm1275_vm3, %v1505_v34 }
 0x1b6   : > { %4605 = vmatmul.msk.f32.vlgmr.msrb.gmra.mxu1 %vm1275_vm3, %v1428_v33 }
 0x1b9   : > { %v1585_v35 = vpop.permute.xlu2 %1584 }
 0x1ba   : > { %v1662_v36 = vpop.permute.xlu1 %1661  ;;  %4612 = vmatpush.xpose.msk.msra.mxu1 %vm1275_vm3, %v1585_v35 }
 0x1bb   : > { %4616 = vmatpush.xpose.msk.msra.mxu0 %vm1275_vm3, %v1662_v36 }
 0x1c1   : > { %v1582_v37 = vpop.permute.xlu2 %1581 }
 0x1c2   : > { %4613 = vmatmul.msk.f32.vlgmr.msra.gmra.mxu1 %vm1275_vm3, %v1582_v37 }
 0x1c9   : > { %v1816_v38 = vpop.permute.xlu2 %1815 }
 0x1ca   : > { %4624 = vmatpush.xpose.msk.msrb.mxu0 %vm1275_vm3, %v1816_v38 }
 0x1d1   : > { %v1813_v4 = vpop.permute.xlu2 %1812 }
 0x22b   : > { %v1298_v43 = vpop.f32.mrf.mxu1 }
 0x22c   : > { %v1303_v44 = vsel %vm5649_vm5, %v1298_v43, -1e+30 }
 0x22d   : > { %v1305_v45 = vsel %vm6447_vm6, %v1303_v44, -inf }
 0x22e   : > { %1306 = vmax.xlane.f32.xlu0 %v1305_v45 }
 0x230   : > { %v1530_v46 = vpop.f32.mrf.mxu0 }
 0x231   : > { %v5658_v47 = vsel %vm5649_vm5, %v1530_v46, -1e+30 }
 0x232   : > { %v1534_v48 = vsel %vm6447_vm6, %v5658_v47, -inf }
 0x233   : > { %1535 = vmax.xlane.f32.xlu2 %v1534_v48  ;;  %v1453_v50 = vpop.f32.mrf.mxu1 }
 0x234   : > { %v1456_v51 = vsel %vm5649_vm5, %v1453_v50, -1e+30 }
 0x235   : > { %v1457_v52 = vsel %vm6447_vm6, %v1456_v51, -inf }
 0x23f   : > { %v1607_v61 = vpop.f32.mrf.mxu1 }
 0x240   : > { %v1610_v62 = vsel %vm5649_vm5, %v1607_v61, -1e+30 }
 0x241   : > { %v1611_v63 = vsel %vm6447_vm6, %v1610_v62, -inf }
 0x242   : > { %1738 = vrot.lane.b32.xlu0 %v5662_v49, %s6416_s1  ;;  %s6452_s1 = smov 108  }
 0x26c   : > { %1458 = vmax.xlane.f32.xlu0 %v1457_v52 }
 0x2a1   : > { %v1307_v53 = vpop.xlane.xlu0 %1306 }
 0x2a2   : > { %v1308_v54 = vsub.f32 %v1303_v44, %v1307_v53 }
 0x2a4   : > { %v1309_v55 = vmul.f32 1.442695, %v1308_v54 }
 0x2a6   : > { %4851 = vpow2.f32 %v1309_v55  ;;  %v1536_v13 = vpop.xlane.xlu2 %1535 }
 0x2a7   : > { %v1537_v18 = vsub.f32 %v5658_v47, %v1536_v13 }
 0x2a9   : > { %v1538_v30 = vmul.f32 1.442695, %v1537_v18 }
 0x2ac   : > { %v4852_v56 = vpop.eup %4851 }
 0x2ad   : > { %v1311_v57 = vsel %vm6447_vm6, %v4852_v56, 0.0 }
 0x2ae   : > { %1312 = vadd.xlane.f32.xlu1 %v1311_v57 }
 0x2b4   : > { %v1739_v58 = vpop.permute.xlu0 %1738 }
 0x2b5   : > { %4620 = vmatpush.xpose.msk.msrb.mxu1 %vm1275_vm3, %v1739_v58 }
 0x2c7   : > { %1658 = vrot.lane.b32.xlu1 %v1656_v59, %s6452_s1 }
 0x2cf   : > { %1735 = vrot.lane.b32.xlu1 %v1733_v60, %s6441_s29  ;;  %s6551_s29 = sld [smem:[#allocation25_spill]] }
 0x2df   : > { %v1459_v7 = vpop.xlane.xlu0 %1458 }
 0x2e0   : > { %v1460_v9 = vsub.f32 %v1456_v51, %v1459_v7 }
 0x2e2   : > { %v1461_v15 = vmul.f32 1.442695, %v1460_v9 }
 0x2f9   : > { %1612 = vmax.xlane.f32.xlu1 %v1611_v63 }
 0x321   : > { %v1313_v0 = vpop.xlane.xlu1 %1312 }
 0x322   : > { %4853 = vrcp.f32 %v1313_v0 }
 0x323   : > { %4855 = vpow2.f32 %v1461_v15 }
 0x324   : > { %4857 = vpow2.f32 %v1538_v30 }
 0x328   : > { %v4854_v1 = vpop.eup %4853 }
 0x329   : > { %v1315_v2 = vmul.f32 %v4854_v1, %v4852_v56  ;;  %v4856_v33 = vpop.eup %4855 }
 0x32a   : > { %v1463_v36 = vsel %vm6447_vm6, %v4856_v33, 0.0  ;;  %v5702_v37 = vpop.eup %4857 }
 0x32b   : > { %4599 = vmatmul.msk.f32.vlgmr.msra.gmra.mxu3 %vm6445_vm7, %v1315_v2  ;;  %v1540_v39 = vsel %vm6447_vm6, %v5702_v37, 0.0 }
 0x333   : > { %4601 = vmatmul.msk.f32.vlgmr.msrb.gmra.mxu3 %vm1275_vm3, %v5631_v27 }
 0x339   : > { %v1659_v3 = vpop.permute.xlu1 %1658 }
 0x33a   : > { %4617 = vmatmul.msk.f32.vlgmr.msra.gmra.mxu0 %vm1275_vm3, %v1659_v3 }
 0x341   : > { %v1736_v5 = vpop.permute.xlu1 %1735 }
 0x342   : > { %4621 = vmatmul.msk.f32.vlgmr.msrb.gmra.mxu1 %vm1275_vm3, %v1736_v5  ;;  %4625 = vmatmul.msk.f32.vlgmr.msrb.gmra.mxu0 %vm1275_vm3, %v1813_v4 }
 0x36c   : > { %v1613_v17 = vpop.xlane.xlu1 %1612 }
 0x36d   : > { %v1614_v25 = vsub.f32 %v1610_v62, %v1613_v17 }
 0x36f   : > { %v1615_v32 = vmul.f32 1.442695, %v1614_v25 }
 0x371   : > { %4859 = vpow2.f32 %v1615_v32 }
 0x377   : > { %v4860_v38 = vpop.eup %4859 }
 0x378   : > { %v1617_v41 = vsel %vm6447_vm6, %v4860_v38, 0.0 }
 0x3ae   : > { %v1342_v6 = vpop.f32.mrf.mxu3 }
 0x3af   : > { %1346 = vst.msk [vmem:[#allocation4] sm:$0x3f] %vm1345_vm8, %v1342_v6 }
 0x3b6   : > { %v1376_v31 = vpop.f32.mrf.mxu3 }
 0x3b7   : > { %v1684_v8 = vpop.f32.mrf.mxu0  ;;  %v1379_v34 = vsel %vm5649_vm5, %v1376_v31, -1e+30 }
 0x3b8   : > { %v1687_v11 = vsel %vm5649_vm5, %v1684_v8, -1e+30  ;;  %v1380_v35 = vsel %vm6447_vm6, %v1379_v34, -inf }
 0x3b9   : > { %v1688_v12 = vsel %vm6447_vm6, %v1687_v11, -inf }
 0x3ba   : > { %1689 = vmax.xlane.f32.xlu0 %v1688_v12 }
 0x3bf   : > { %v1761_v21 = vpop.f32.mrf.mxu1  ;;  %v1838_v23 = vpop.f32.mrf.mxu0 }
 0x3c0   : > { %v5691_v26 = vsel %vm5649_vm5, %v1761_v21, -1e+30  ;;  %v1841_v27 = vsel %vm5649_vm5, %v1838_v23, -1e+30 }
 0x3c1   : > { %v1842_v28 = vsel %vm6447_vm6, %v1841_v27, -inf  ;;  %v1765_v29 = vsel %vm6447_vm6, %v5691_v26, -inf }
 0x3c2   : > { %1843 = vmax.xlane.f32.xlu1 %v1842_v28  ;;  %1766 = vmax.xlane.f32.xlu2 %v1765_v29 }
 0x3ca   : > { %1381 = vmax.xlane.f32.xlu1 %v1380_v35  ;;  %1464 = vadd.xlane.f32.xlu2 %v1463_v36 }
 0x3d2   : > { %1541 = vadd.xlane.f32.xlu1 %v1540_v39  ;;  %1618 = vadd.xlane.f32.xlu2 %v1617_v41  ;;  %v5762_v41 = vld [vmem:[%s6551_s29 + $0x18] sm:$0xff] }
 0x3d3   : > { %1905 = vmatpush.msra.mxu1 %v5762_v41 }
 0x3eb   : > { %1468 = vrot.lane.b32.xlu1 %v5607_v19, %s6425_s5  ;;  %s6429_s5 = smov 44  }
 0x3f3   : > { %1622 = vrot.lane.b32.xlu1 %v5619_v22, %s6424_s24  ;;  %s6428_s24 = smov 52  }
 0x42d   : > { %v1690_v43 = vpop.xlane.xlu0 %1689 }
 0x42e   : > { %v1691_v44 = vsub.f32 %v1687_v11, %v1690_v43  ;;  %v5765_v43 = vld [vmem:[%s6551_s29 + $0x10] sm:$0xff] }
 0x42f   : > { %1906 = vmatpush.msra.mxu1 %v5765_v43 }
 0x430   : > { %v1692_v45 = vmul.f32 1.442695, %v1691_v44  ;;  %v5769_v44 = vld [vmem:[%s6551_s29 + $0x8] sm:$0xff] }
 0x431   : > { %1907 = vmatpush.msra.mxu1 %v5769_v44 }
 0x432   : > { %4861 = vpow2.f32 %v1692_v45  ;;  %v5773_v45 = vld [vmem:[%s6551_s29] sm:$0xff]  ;;  %s6553_s29 = sld [smem:[#allocation24_spill]] }
 0x433   : > { %1908 = vmatpush.msra.mxu1 %v5773_v45 }
 0x435   : > { %v1844_v46 = vpop.xlane.xlu1 %1843  ;;  %v1767_v55 = vpop.xlane.xlu2 %1766 }
 0x436   : > { %v1845_v47 = vsub.f32 %v1841_v27, %v1844_v46 }
 0x438   : > { %v5711_v48 = vpop.eup %4861  ;;  %v1846_v50 = vmul.f32 1.442695, %v1845_v47 }
 0x439   : > { %v1694_v51 = vsel %vm6447_vm6, %v5711_v48, 0.0 }
 0x43a   : > { %4863 = vpow2.f32 %v1846_v50  ;;  %1695 = vadd.xlane.f32.xlu2 %v1694_v51 }
 0x43d   : > { %v1382_v52 = vpop.xlane.xlu1 %1381  ;;  %v1465_v58 = vpop.xlane.xlu2 %1464 }
 0x43e   : > { %v1383_v19 = vsub.f32 %v1379_v34, %v1382_v52 }
 0x440   : > { %v5715_v53 = vpop.eup %4863  ;;  %v1384_v54 = vmul.f32 1.442695, %v1383_v19 }
 0x441   : > { %v1848_v22 = vsel %vm6447_vm6, %v5715_v53, 0.0 }
 0x442   : > { %4865 = vpow2.f32 %v1384_v54  ;;  %1849 = vadd.xlane.f32.xlu1 %v1848_v22  ;;  %v5206_v54 = vmov 32.0  }
 0x443   : > { %4867 = vrcp.f32 %v1465_v58 }
 0x445   : > { %v1542_v59 = vpop.xlane.xlu1 %1541  ;;  %v1619_v60 = vpop.xlane.xlu2 %1618 }
 0x446   : > { %4869 = vrcp.f32 %v1619_v60 }
 0x448   : > { %v4866_v56 = vpop.eup %4865 }
 0x449   : > { %v1386_v57 = vsel %vm6447_vm6, %v4866_v56, 0.0  ;;  %v4868_v61 = vpop.eup %4867 }
 0x44a   : > { %1387 = vadd.xlane.f32.xlu0 %v1386_v57  ;;  %v1467_v62 = vmul.f32 %v4868_v61, %v4856_v33 }
 0x452   : > { %1545 = vrot.lane.b32.xlu2 %v5601_v16, %s6428_s24  ;;  %v4870_v16 = vpop.eup %4869  ;;  %s6431_s24 = smov 40  }
 0x453   : > { %v1621_v0 = vmul.f32 %v4870_v16, %v4860_v38  ;;  %v1211_v16 = vld [vmem:[%s5529_s4 + $0x18] sm:$0xff] }
 0x45a   : > { %1699 = vrot.lane.b32.xlu2 %v5609_v20, %s6429_s5  ;;  %s6430_s5 = smov 36  }
 0x45d   : > { %v1469_v63 = vpop.permute.xlu1 %1468 }
 0x45e   : > { %1391 = vrot.lane.b32.xlu0 %v5595_v14, %s6432_s0  ;;  %4606 = vmatpush.msk.msra.mxu3 %vm6446_vm4, %v1469_v63  ;;  %v1768_v14 = vsub.f32 %v5691_v26, %v1767_v55  ;;  %s6464_s0 = smov 4  }
 0x45f   : > { %4607 = vmatmul.msk.f32.vlgmr.msra.gmra.mxu3 %vm6445_vm7, %v1467_v62 }
 0x460   : > { %v1769_v20 = vmul.f32 1.442695, %v1768_v14  ;;  %v1208_v14 = vld [vmem:[%s5529_s4] sm:$0xff] }
 0x462   : > { %1776 = vrot.lane.b32.xlu2 %v5662_v49, %s6431_s24  ;;  %4871 = vpow2.f32 %v1769_v20  ;;  %s6437_s24 = smov 16   ;;  %v5792_v20 = vld [vmem:[%s6553_s29] sm:$0xff] }
 0x463   : > { %4630 = vmatpush.xpose.msk.msra.mxu0 %vm1275_vm3, %v5792_v20 }
 0x465   : > { %v1623_v1 = vpop.permute.xlu1 %1622 }
 0x466   : > { %4614 = vmatpush.msk.msrb.mxu3 %vm6446_vm4, %v1623_v1  ;;  %v1209_v1 = vld [vmem:[%s5529_s4 + $0x8] sm:$0xff] }
 0x467   : > { %4615 = vmatmul.msk.f32.vlgmr.msrb.gmra.mxu3 %vm6445_vm7, %v1621_v0  ;;  %v1210_v0 = vld [vmem:[%s5529_s4 + $0x10] sm:$0xff] }
 0x468   : > { %v4872_v2 = vpop.eup %4871 }
 0x469   : > { %v1771_v3 = vsel %vm6447_vm6, %v4872_v2, 0.0 }
 0x46a   : > { %1853 = vrot.lane.b32.xlu2 %v5625_v24, %s6430_s5  ;;  %s6433_s5 = smov 8  }
 0x488   : > { %1772 = vadd.xlane.f32.xlu0 %v1771_v3 }
 0x4ad   : > { %v1696_v4 = vpop.xlane.xlu2 %1695 }
 0x4b5   : > { %v1546_v49 = vpop.permute.xlu2 %1545  ;;  %v1850_v15 = vpop.xlane.xlu1 %1849 }
 0x4bd   : > { %v1700_v5 = vpop.permute.xlu2 %1699  ;;  %v1388_v6 = vpop.xlane.xlu0 %1387 }
 0x4be   : > { %4873 = vrcp.f32 %v1388_v6 }
 0x4bf   : > { %4875 = vrcp.f32 %v1542_v59 }
 0x4c0   : > { %4877 = vrcp.f32 %v1696_v4 }
 0x4c1   : > { %4879 = vrcp.f32 %v1850_v15 }
 0x4c4   : > { %v4874_v8 = vpop.eup %4873 }
 0x4c5   : > { %v1777_v7 = vpop.permute.xlu2 %1776  ;;  %v1390_v24 = vmul.f32 %v4874_v8, %v4866_v56  ;;  %v4876_v11 = vpop.eup %4875 }
 0x4c6   : > { %4622 = vmatpush.msk.msra.mxu3 %vm6446_vm4, %v1777_v7  ;;  %v1544_v12 = vmul.f32 %v4876_v11, %v5702_v37  ;;  %v4878_v17 = vpop.eup %4877 }
 0x4c7   : > { %v1698_v18 = vmul.f32 %v4878_v17, %v5711_v48  ;;  %v4880_v23 = vpop.eup %4879 }
 0x4c8   : > { %v1852_v25 = vmul.f32 %v4880_v23, %v5715_v53  ;;  %1970 = vmatpush.msrb.mxu3 %v1211_v16 }
 0x4ca   : > { %1971 = vmatpush.msrb.mxu3 %v1210_v0 }
 0x4cc   : > { %1972 = vmatpush.msrb.mxu3 %v1209_v1 }
 0x4cd   : > { %v1854_v13 = vpop.permute.xlu2 %1853 }
 0x4ce   : > { %1973 = vmatpush.msrb.mxu3 %v1208_v14 }
 0x4d0   : > { %v1392_v9 = vpop.permute.xlu0 %1391 }
 0x4d1   : > { %4602 = vmatpush.msk.msra.mxu2 %vm6446_vm4, %v1392_v9 }
 0x4d2   : > { %4603 = vmatmul.msk.f32.vlgmr.msra.gmra.mxu2 %vm6445_vm7, %v1390_v24  ;;  %v4841_v24 = vld [vmem:[%s5519_s9] ss:$0 sm:$0xff] }
 0x4d3   : > { %4610 = vmatpush.msk.msrb.mxu2 %vm6446_vm4, %v1546_v49 }
 0x4d5   : > { %4618 = vmatpush.msk.msra.mxu2 %vm6446_vm4, %v1700_v5 }
 0x4da   : > { %4611 = vmatmul.msk.f32.vlgmr.msrb.gmra.mxu2 %vm6445_vm7, %v1544_v12 }
 0x4db   : > { %4626 = vmatpush.msk.msrb.mxu2 %vm6446_vm4, %v1854_v13  ;;  %v4842_v13 = vld [vmem:[%s5524_s11] ss:$0 sm:$0xff] }
 0x4e2   : > { %v1492_v21 = vpop.f32.mrf.mxu3  ;;  %4619 = vmatmul.msk.f32.vlgmr.msra.gmra.mxu2 %vm6445_vm7, %v1698_v18  ;;  %v4843_v18 = vld [vmem:[%s5534_s6] ss:$0 sm:$0xff] }
 0x4e3   : > { %1496 = vrot.lane.b32.xlu2 %v1492_v21, %s6433_s5  ;;  %s6462_s5 = smov 12  }
 0x4ea   : > { %v1646_v26 = vpop.f32.mrf.mxu3  ;;  %4627 = vmatmul.msk.f32.vlgmr.msrb.gmra.mxu2 %vm6445_vm7, %v1852_v25 }
 0x4eb   : > { %1650 = vrot.lane.b32.xlu1 %v1646_v26, %s6437_s24  ;;  %s6443_s24 = smov 28  }
 0x4f3   : > { %2055 = vrot.lane.b32.xlu1 %v5792_v20, %s6458_s8 }
 0x4fb   : > { %v1773_v27 = vpop.xlane.xlu0 %1772  ;;  %2130 = vrot.lane.b32.xlu1 %v5792_v20, %s6450_s14 }
 0x4fc   : > { %4881 = vrcp.f32 %v1773_v27 }
 0x4fd   : > { %4883 = vrcp.f32 %v5206_v54 }
 0x502   : > { %v4882_v28 = vpop.eup %4881 }
 0x503   : > { %v1775_v29 = vmul.f32 %v4882_v28, %v4872_v2  ;;  %v4884_v22 = vpop.eup %4883  ;;  %2205 = vrot.lane.b32.xlu1 %v5792_v20, %s6456_s30 }
 0x504   : > { %v1919_v55 = vmul.f32 32.0, %v4884_v22 }
 0x505   : > { %4623 = vmatmul.msk.f32.vlgmr.msra.gmra.mxu3 %vm6445_vm7, %v1775_v29  ;;  %vm1923_vm7 = vweird.f32 %v4884_v22 }
 0x506   : > { %v1920_v56 = vsub.f32 1.0, %v1919_v55 }
 0x508   : > { %v1921_v57 = vmul.f32 %v4884_v22, %v1920_v56 }
 0x50a   : > { %v1922_v58 = vadd.f32 %v4884_v22, %v1921_v57 }
 0x50b   : > { %2355 = vrot.lane.b32.xlu1 %v5792_v20, %s6452_s1 }
 0x50c   : > { %v5783_v59 = vsel %vm1923_vm7, %v4884_v22, %v1922_v58 }
 0x53d   : > { %v1497_v35 = vpop.permute.xlu2 %1496 }
 0x555   : > { %v1415_v30 = vpop.f32.mrf.mxu2 }
 0x556   : > { %1419 = vrot.lane.b32.xlu0 %v1415_v30, %s6464_s0  ;;  %s6562_s0 = smov 72  }
 0x55d   : > { %v1569_v31 = vpop.f32.mrf.mxu2  ;;  %v1651_v38 = vpop.permute.xlu1 %1650 }
 0x55e   : > { %1573 = vrot.lane.b32.xlu2 %v1569_v31, %s6462_s5  ;;  %s6561_s5 = smov 76  }
 0x565   : > { %v1723_v32 = vpop.f32.mrf.mxu2 }
 0x566   : > { %1727 = vrot.lane.b32.xlu2 %v1723_v32, %s6460_s22  ;;  %s6560_s22 = smov 84  }
 0x56d   : > { %v1877_v33 = vpop.f32.mrf.mxu2 }
 0x56e   : > { %1881 = vrot.lane.b32.xlu2 %v1877_v33, %s6443_s24  ;;  %s6552_s24 = sld [smem:[#allocation26_spill]]  ;;  %v2056_v33 = vpop.permute.xlu1 %2055 }
 0x56f   : > { %4633 = vmatpush.xpose.msk.msrb.mxu1 %vm1275_vm3, %v2056_v33 }
 0x574   : > { %v4840_v50 = vld [vmem:[%s6552_s24] ss:$0 sm:$0xff] }
 0x588   : > { %v1800_v34 = vpop.f32.mrf.mxu3 }
 0x589   : > { %1804 = vrot.lane.b32.xlu0 %v1800_v34, %s6448_s13  ;;  %s6554_s13 = smov 104  }
 0x5b8   : > { %v1574_v36 = vpop.permute.xlu2 %1573 }
 0x5c0   : > { %v1728_v39 = vpop.permute.xlu2 %1727 }
 0x5c8   : > { %v1420_v37 = vpop.permute.xlu0 %1419  ;;  %v1882_v47 = vpop.permute.xlu2 %1881 }
 0x5c9   : > { %1423 = vst.msk [vmem:[#allocation4] sm:$0x3f] %vm1422_vm9, %v1420_v37 }
 0x5ca   : > { %1500 = vst.msk [vmem:[#allocation4] sm:$0x3f] %vm1499_vm10, %v1497_v35 }
 0x5cb   : > { %1577 = vst.msk [vmem:[#allocation4] sm:$0x3f] %vm1576_vm11, %v1574_v36 }
 0x5cc   : > { %1654 = vst.msk [vmem:[#allocation4] sm:$0x3f] %vm1653_vm12, %v1651_v38  ;;  %v2131_v38 = vpop.permute.xlu1 %2130 }
 0x5cd   : > { %1731 = vst.msk [vmem:[#allocation4] sm:$0x3f] %vm1730_vm13, %v1728_v39  ;;  %4636 = vmatpush.xpose.msk.msrb.mxu0 %vm1275_vm3, %v2131_v38 }
 0x5fb   : > { %v1805_v46 = vpop.permute.xlu0 %1804 }
 0x5fc   : > { %1808 = vst.msk [vmem:[#allocation4] sm:$0x3f] %vm1807_vm14, %v1805_v46 }
 0x5fd   : > { %1885 = vst.msk [vmem:[#allocation4] sm:$0x3f] %vm1884_vm15, %v1882_v47 }
 0x604   : > { %v1886_v48 = vld [vmem:[#allocation4] sm:$0x3f] }
 0x605   : > { %4628 = vmatmul.msk.f32.vlgmr.msra.gmra.mxu1 %vm1244_vm1, %v1886_v48 }
 0x682   : > { %v1910_v51 = vpop.f32.mrf.mxu1 }
 0x683   : > { %v1911_v52 = vadd.f32 %v4840_v50, %v1910_v51  ;;  %v2206_v51 = vpop.permute.xlu1 %2205 }
 0x684   : > { %4639 = vmatpush.xpose.msk.msra.mxu1 %vm1275_vm3, %v2206_v51 }
 0x685   : > { %v1913_v19 = vadd.f32 %v1911_v52, %v5589_v10 }
 0x687   : > { %v1915_v53 = vsel %vm1914_vm0, %v1913_v19, 0.0 }
 0x688   : > { %1916 = vadd.xlane.f32.xlu0 %v1915_v53 }
 0x68b   : > { %v2356_v52 = vpop.permute.xlu1 %2355 }
 0x6fb   : > { %v1917_v60 = vpop.xlane.xlu0 %1916 }
 0x6fc   : > { %v1925_v10 = vmul.f32 %v5783_v59, %v1917_v60 }
 0x6fe   : > { %v1926_v61 = vsub.f32 %v1913_v19, %v1925_v10 }
 0x700   : > { %v1927_v62 = vmul.f32 %v1926_v61, %v1926_v61 }
 0x702   : > { %v1928_v63 = vsel %vm1914_vm0, %v1927_v62, 0.0 }
 0x703   : > { %1929 = vadd.xlane.f32.xlu2 %v1928_v63 }
 0x71b   : > { %2280 = vrot.lane.b32.xlu2 %v5792_v20, %s6454_s15 }
 0x776   : > { %v1930_v2 = vpop.xlane.xlu2 %1929 }
 0x777   : > { %v1931_v3 = vmul.f32 %v1930_v2, %v5783_v59 }
 0x779   : > { %v1932_v4 = vadd.f32 1e-05, %v1931_v3 }
 0x77b   : > { %4885 = vrsqrt.f32 %v1932_v4  ;;  %vm1939_vm4 = vweird.f32 %v1932_v4 }
 0x77e   : > { %v2281_v39 = vpop.permute.xlu2 %2280 }
 0x781   : > { %v4886_v49 = vpop.eup %4885 }
 0x782   : > { %v1934_v5 = vmul.f32 %v4886_v49, %v1932_v4  ;;  %vm1940_vm7 = vweird.f32 %v4886_v49 }
 0x783   : > { %vm1941_vm6 = vmor %vm1939_vm4, %vm1940_vm7  ;;  %vm2008_vm4 = vcmask 62464  }
 0x784   : > { %v1935_v6 = vmul.f32 %v4886_v49, %v1934_v5 }
 0x786   : > { %v1936_v7 = vmul.f32 0.5, %v1935_v6 }
 0x788   : > { %v1937_v8 = vsub.f32 1.5, %v1936_v7 }
 0x78a   : > { %v1938_v9 = vmul.f32 %v4886_v49, %v1937_v8 }
 0x78c   : > { %v1942_v11 = vsel %vm1941_vm6, %v4886_v49, %v1938_v9  ;;  %vm6475_vm6 = vcmask 64512  }
 0x78d   : > { %v1943_v12 = vmul.f32 %v1942_v11, %v1926_v61 }
 0x78f   : > { %v1947_v15 = vmul.f32 %v4841_v24, %v1943_v12 }
 0x791   : > { %v5809_v17 = vadd.f32 %v4842_v13, %v1947_v15 }
 0x793   : > { %4629 = vmatmul.msk.f32.vlgmr.msrb.gmra.mxu3 %vm1244_vm1, %v5809_v17 }
 0x816   : > { %v1975_v21 = vpop.f32.mrf.mxu3 }
 0x817   : > { %v1976_v23 = vadd.f32 %v4843_v18, %v1975_v21 }
 0x819   : > { %1978 = vst.msk [vmem:[#allocation3] sm:$0x3f] %vm1914_vm0, %v1976_v23 }
 0x820   : > { %v2423_v25 = vld [vmem:[#allocation3] sm:$0x3f] }
 0x821   : > { %v2123_v26 = vld [vmem:[#allocation3] sm:$0x3f]  ;;  %v2424_v28 = vmul.f32 0.5, %v2423_v25 }
 0x822   : > { %v2048_v27 = vld [vmem:[#allocation3] sm:$0x3f]  ;;  %v2124_v29 = vmul.f32 0.5, %v2123_v26 }
 0x823   : > { %v2049_v30 = vmul.f32 0.5, %v2048_v27  ;;  %v1979_v31 = vld [vmem:[#allocation3] sm:$0x3f]  ;;  %2427 = vrot.lane.b32.xlu2 %v2424_v28, %s6554_s13 }
 0x824   : > { %v1980_v32 = vmul.f32 0.5, %v1979_v31  ;;  %2127 = vrot.lane.b32.xlu0 %v2124_v29, %s6450_s14  ;;  %v2348_v34 = vld [vmem:[#allocation3] sm:$0x3f]  ;;  %s6555_s14 = smov 100  }
 0x825   : > { %2052 = vrot.lane.b32.xlu1 %v2049_v30, %s6458_s8  ;;  %v2198_v35 = vld [vmem:[#allocation3] sm:$0x3f]  ;;  %v2349_v36 = vmul.f32 0.5, %v2348_v34  ;;  %s6559_s8 = smov 80  }
 0x826   : > { %4631 = vmatmul.msk.f32.vlgmr.msra.gmra.mxu0 %vm1275_vm3, %v1980_v32  ;;  %v2199_v37 = vmul.f32 0.5, %v2198_v35  ;;  %v2273_v46 = vld [vmem:[#allocation3] sm:$0x3f] }
 0x827   : > { %4642 = vmatpush.xpose.msk.msra.mxu0 %vm1275_vm3, %v2281_v39  ;;  %v2274_v47 = vmul.f32 0.5, %v2273_v46  ;;  %v2498_v48 = vld [vmem:[#allocation3] sm:$0x3f] }
 0x828   : > { %v2499_v50 = vmul.f32 0.5, %v2498_v48 }
 0x82c   : > { %2352 = vrot.lane.b32.xlu0 %v2349_v36, %s6452_s1  ;;  %s6556_s1 = smov 88  }
 0x82d   : > { %2202 = vrot.lane.b32.xlu1 %v2199_v37, %s6456_s30  ;;  %s6558_s30 = smov 96  }
 0x834   : > { %2505 = vrot.lane.b32.xlu0 %v5792_v20, %s6555_s14 }
 0x835   : > { %2277 = vrot.lane.b32.xlu1 %v2274_v47, %s6454_s15  ;;  %s6557_s15 = smov 92  }
 0x83d   : > { %2430 = vrot.lane.b32.xlu1 %v5792_v20, %s6554_s13 }
 0x845   : > { %2502 = vrot.lane.b32.xlu1 %v2499_v50, %s6555_s14 }
 0x87d   : > { %v2428_v10 = vpop.permute.xlu2 %2427 }
 0x896   : > { %v2128_v19 = vpop.permute.xlu0 %2127 }
 0x897   : > { %v2053_v53 = vpop.permute.xlu1 %2052  ;;  %4637 = vmatmul.msk.f32.vlgmr.msrb.gmra.mxu0 %vm1275_vm3, %v2128_v19 }
 0x898   : > { %4634 = vmatmul.msk.f32.vlgmr.msrb.gmra.mxu1 %vm1275_vm3, %v2053_v53 }
 0x899   : > { %4645 = vmatpush.xpose.msk.msrb.mxu1 %vm1275_vm3, %v2356_v52 }
 0x89e   : > { %v2353_v54 = vpop.permute.xlu0 %2352 }
 0x89f   : > { %v2203_v22 = vpop.permute.xlu1 %2202 }
 0x8a0   : > { %4640 = vmatmul.msk.f32.vlgmr.msra.gmra.mxu1 %vm1275_vm3, %v2203_v22 }
 0x8a3   : > { %v2005_v55 = vpop.f32.mrf.mxu0 }
 0x8a4   : > { %v2009_v56 = vsel %vm2008_vm4, %v2005_v55, -inf }
 0x8a5   : > { %2010 = vmax.xlane.f32.xlu0 %v2009_v56 }
 0x8a6   : > { %v2506_v57 = vpop.permute.xlu0 %2505 }
 0x8a7   : > { %v2278_v58 = vpop.permute.xlu1 %2277  ;;  %4651 = vmatpush.xpose.msk.msra.mxu1 %vm1275_vm3, %v2506_v57 }
 0x8a8   : > { %4643 = vmatmul.msk.f32.vlgmr.msra.gmra.mxu0 %vm1275_vm3, %v2278_v58  ;;  %4646 = vmatmul.msk.f32.vlgmr.msrb.gmra.mxu1 %vm1275_vm3, %v2353_v54 }
 0x8af   : > { %v2431_v60 = vpop.permute.xlu1 %2430 }
 0x8b0   : > { %4648 = vmatpush.xpose.msk.msrb.mxu0 %vm1275_vm3, %v2431_v60 }
 0x8b3   : > { %4649 = vmatmul.msk.f32.vlgmr.msrb.gmra.mxu0 %vm1275_vm3, %v2428_v10 }
 0x8b7   : > { %v2503_v61 = vpop.permute.xlu1 %2502 }
 0x8b8   : > { %4652 = vmatmul.msk.f32.vlgmr.msra.gmra.mxu1 %vm1275_vm3, %v2503_v61 }
 0x914   : > { %v2153_v62 = vpop.f32.mrf.mxu0 }
 0x915   : > { %v2078_v63 = vpop.f32.mrf.mxu1  ;;  %v2156_v16 = vsel %vm2008_vm4, %v2153_v62, -inf }
 0x916   : > { %v2081_v0 = vsel %vm2008_vm4, %v2078_v63, -inf  ;;  %2157 = vmax.xlane.f32.xlu1 %v2156_v16 }
 0x917   : > { %2082 = vmax.xlane.f32.xlu2 %v2081_v0 }
 0x918   : > { %v2011_v1 = vpop.xlane.xlu0 %2010 }
 0x919   : > { %v2012_v14 = vsub.f32 %v2005_v55, %v2011_v1 }
 0x91b   : > { %v2013_v2 = vmul.f32 1.442695, %v2012_v14 }
 0x91d   : > { %4887 = vpow2.f32 %v2013_v2  ;;  %v2228_v3 = vpop.f32.mrf.mxu1 }
 0x91e   : > { %v2231_v4 = vsel %vm2008_vm4, %v2228_v3, -inf }
 0x91f   : > { %2232 = vmax.xlane.f32.xlu0 %v2231_v4 }
 0x923   : > { %v4888_v49 = vpop.eup %4887 }
 0x924   : > { %v2015_v5 = vsel %vm2008_vm4, %v4888_v49, 0.0 }
 0x925   : > { %2016 = vadd.xlane.f32.xlu1 %v2015_v5  ;;  %v2303_v6 = vpop.f32.mrf.mxu0  ;;  %v2378_v8 = vpop.f32.mrf.mxu1 }
 0x926   : > { %v2306_v7 = vsel %vm2008_vm4, %v2303_v6, -inf  ;;  %v2381_v9 = vsel %vm2008_vm4, %v2378_v8, -inf }
 0x927   : > { %2307 = vmax.xlane.f32.xlu2 %v2306_v7 }
 0x92d   : > { %2382 = vmax.xlane.f32.xlu1 %v2381_v9 }
 0x930   : > { %v2453_v24 = vpop.f32.mrf.mxu0 }
 0x931   : > { %v2456_v11 = vsel %vm2008_vm4, %v2453_v24, -inf }
 0x933   : > { %2167 = vrot.lane.b32.xlu0 %v5792_v20, %s6556_s1 }
 0x935   : > { %v2528_v12 = vpop.f32.mrf.mxu1 }
 0x936   : > { %v2531_v13 = vsel %vm2008_vm4, %v2528_v12, -inf }
 0x93f   : > { %2092 = vrot.lane.b32.xlu2 %v5792_v20, %s6557_s15 }
 0x946   : > { %2020 = vrot.lane.b32.xlu1 %v5792_v20, %s6558_s30 }
 0x95d   : > { %2457 = vmax.xlane.f32.xlu0 %v2456_v11 }
 0x968   : > { %2532 = vmax.xlane.f32.xlu2 %v2531_v13 }
 0x971   : > { %2317 = vrot.lane.b32.xlu0 %v5792_v20, %s6559_s8 }
 0x980   : > { %2242 = vrot.lane.b32.xlu2 %v5792_v20, %s6560_s22 }
 0x989   : > { %v2158_v23 = vpop.xlane.xlu1 %2157 }
 0x98a   : > { %v2083_v15 = vpop.xlane.xlu2 %2082  ;;  %v2159_v29 = vsub.f32 %v2153_v62, %v2158_v23 }
 0x98b   : > { %v2084_v18 = vsub.f32 %v2078_v63, %v2083_v15 }
 0x98c   : > { %v2160_v33 = vmul.f32 1.442695, %v2159_v29 }
 0x98d   : > { %v2085_v21 = vmul.f32 1.442695, %v2084_v18 }
 0x98f   : > { %4889 = vpow2.f32 %v2085_v21 }
 0x992   : > { %v2233_v25 = vpop.xlane.xlu0 %2232 }
 0x993   : > { %v2234_v26 = vsub.f32 %v2228_v3, %v2233_v25 }
 0x995   : > { %v2235_v27 = vmul.f32 1.442695, %v2234_v26  ;;  %v5860_v28 = vpop.eup %4889 }
 0x996   : > { %v2087_v32 = vsel %vm2008_vm4, %v5860_v28, 0.0 }
 0x997   : > { %4891 = vpow2.f32 %v2235_v27 }
 0x998   : > { %v2017_v30 = vpop.xlane.xlu1 %2016  ;;  %4893 = vpow2.f32 %v2160_v33  ;;  %v4993_v33 = vld [vmem:[%s5499_s3 + $0x18] sm:$0xff] }
 0x99a   : > { %v2308_v31 = vpop.xlane.xlu2 %2307 }
 0x99b   : > { %v2309_v34 = vsub.f32 %v2303_v6, %v2308_v31  ;;  %2088 = vadd.xlane.f32.xlu0 %v2087_v32 }
 0x99d   : > { %v2310_v35 = vmul.f32 1.442695, %v2309_v34  ;;  %v4892_v36 = vpop.eup %4891  ;;  %v4994_v34 = vld [vmem:[%s5499_s3 + $0x10] sm:$0xff] }
 0x99e   : > { %v2237_v47 = vsel %vm2008_vm4, %v4892_v36, 0.0  ;;  %v4894_v48 = vpop.eup %4893 }
 0x99f   : > { %4895 = vpow2.f32 %v2310_v35  ;;  %v2162_v51 = vsel %vm2008_vm4, %v4894_v48, 0.0  ;;  %v4995_v35 = vld [vmem:[%s5499_s3 + $0x8] sm:$0xff] }
 0x9a0   : > { %v2383_v37 = vpop.xlane.xlu1 %2382 }
 0x9a1   : > { %v2384_v38 = vsub.f32 %v2378_v8, %v2383_v37  ;;  %v4996_v37 = vld [vmem:[%s5499_s3] sm:$0xff]  ;;  %s6569_s3 = smov 24  }
 0x9a2   : > { %v2093_v46 = vpop.permute.xlu2 %2092 }
 0x9a3   : > { %v2385_v39 = vmul.f32 1.442695, %v2384_v38  ;;  %2238 = vadd.xlane.f32.xlu0 %v2237_v47  ;;  %2113 = vmatpush.msra.mxu3 %v2093_v46 }
 0x9a5   : > { %4897 = vpow2.f32 %v2385_v39  ;;  %v4896_v50 = vpop.eup %4895  ;;  %v2168_v56 = vpop.permute.xlu0 %2167 }
 0x9a6   : > { %v2312_v19 = vsel %vm2008_vm4, %v4896_v50, 0.0  ;;  %4899 = vrcp.f32 %v2017_v30 }
 0x9a9   : > { %2163 = vadd.xlane.f32.xlu2 %v2162_v51 }
 0x9ab   : > { %v4898_v52 = vpop.eup %4897  ;;  %2313 = vadd.xlane.f32.xlu0 %v2312_v19  ;;  %v4997_v19 = vld [vmem:[%s5504_s25] ss:$0 sm:$0xff]  ;;  %s6572_s25 = smov 124  }
 0x9ac   : > { %v2387_v53 = vsel %vm2008_vm4, %v4898_v52, 0.0  ;;  %v4900_v54 = vpop.eup %4899 }
 0x9ad   : > { %2388 = vadd.xlane.f32.xlu1 %v2387_v53  ;;  %v2019_v22 = vmul.f32 %v4900_v54, %v4888_v49 }
 0x9b8   : > { %v2021_v55 = vpop.permute.xlu1 %2020 }
 0x9b9   : > { %2042 = vmatpush.msra.mxu2 %v2021_v55 }
 0x9ba   : > { %4632 = vmatmul.msk.f32.vlgmr.msra.gmra.mxu2 %vm6475_vm6, %v2019_v22 }
 0x9bb   : > { %2188 = vmatpush.msrb.mxu2 %v2168_v56 }
 0x9c6   : > { %2392 = vrot.lane.b32.xlu1 %v5792_v20, %s6561_s5 }
 0x9d0   : > { %v2458_v57 = vpop.xlane.xlu0 %2457 }
 0x9d1   : > { %v2459_v58 = vsub.f32 %v2453_v24, %v2458_v57 }
 0x9d3   : > { %v2460_v60 = vmul.f32 1.442695, %v2459_v58 }
 0x9d5   : > { %4901 = vpow2.f32 %v2460_v60  ;;  %v5910_v60 = vld [vmem:[%s5539_s21 + $0x18] sm:$0xff] }
 0x9d6   : > { %2592 = vmatpush.msra.mxu0 %v5910_v60 }
 0x9db   : > { %v4902_v10 = vpop.eup %4901  ;;  %v2533_v61 = vpop.xlane.xlu2 %2532 }
 0x9dc   : > { %v2534_v62 = vsub.f32 %v2528_v12, %v2533_v61  ;;  %v2462_v63 = vsel %vm2008_vm4, %v4902_v10, 0.0  ;;  %v5917_v61 = vld [vmem:[%s5539_s21 + $0x8] sm:$0xff] }
 0x9dd   : > { %2463 = vadd.xlane.f32.xlu2 %v2462_v63 }
 0x9de   : > { %v2535_v16 = vmul.f32 1.442695, %v2534_v62  ;;  %v5921_v62 = vld [vmem:[%s5539_s21] sm:$0xff] }
 0x9e0   : > { %4903 = vpow2.f32 %v2535_v16 }
 0x9e3   : > { %v2318_v0 = vpop.permute.xlu0 %2317  ;;  %v2243_v2 = vpop.permute.xlu2 %2242 }
 0x9e4   : > { %2338 = vmatpush.msra.mxu2 %v2318_v0  ;;  %2263 = vmatpush.msrb.mxu3 %v2243_v2 }
 0x9e6   : > { %v4904_v1 = vpop.eup %4903 }
 0x9e7   : > { %v2537_v14 = vsel %vm2008_vm4, %v4904_v1, 0.0 }
 0x9e8   : > { %2538 = vadd.xlane.f32.xlu0 %v2537_v14 }
 0x9f5   : > { %2467 = vrot.lane.b32.xlu2 %v5792_v20, %s6562_s0 }
 0x9fc   : > { %2542 = vrot.lane.b32.xlu0 %v5792_v20, %s6563_s12 }
 0xa0e   : > { %v2089_v3 = vpop.xlane.xlu0 %2088 }
 0xa0f   : > { %4905 = vrcp.f32 %v2089_v3 }
 0xa15   : > { %v4906_v4 = vpop.eup %4905 }
 0xa16   : > { %v2091_v49 = vmul.f32 %v4906_v4, %v5860_v28  ;;  %v2239_v5 = vpop.xlane.xlu0 %2238  ;;  %v4844_v4 = vld [vmem:[%s5544_s10] ss:$0 sm:$0xff]  ;;  %s6574_s10 = smov 120  }
 0xa17   : > { %4907 = vrcp.f32 %v2239_v5 }
 0xa18   : > { %4635 = vmatmul.msk.f32.vlgmr.msra.gmra.mxu3 %vm6475_vm6, %v2091_v49 }
 0xa1c   : > { %v2164_v6 = vpop.xlane.xlu2 %2163 }
 0xa1d   : > { %v4908_v7 = vpop.eup %4907  ;;  %4909 = vrcp.f32 %v2164_v6 }
 0xa1e   : > { %v2241_v8 = vmul.f32 %v4908_v7, %v4892_v36  ;;  %v2314_v9 = vpop.xlane.xlu0 %2313  ;;  %v5889_v36 = vld [vmem:[#allocation13 + $0x8] sm:$0x3f] }
 0xa1f   : > { %4911 = vrcp.f32 %v2314_v9 }
 0xa20   : > { %4641 = vmatmul.msk.f32.vlgmr.msrb.gmra.mxu3 %vm6475_vm6, %v2241_v8  ;;  %v2389_v12 = vpop.xlane.xlu1 %2388 }
 0xa21   : > { %4913 = vrcp.f32 %v2389_v12 }
 0xa23   : > { %v4910_v24 = vpop.eup %4909 }
 0xa24   : > { %v2166_v11 = vmul.f32 %v4910_v24, %v4894_v48 }
 0xa25   : > { %v4912_v20 = vpop.eup %4911 }
 0xa26   : > { %4638 = vmatmul.msk.f32.vlgmr.msrb.gmra.mxu2 %vm6475_vm6, %v2166_v11  ;;  %v2316_v13 = vmul.f32 %v4912_v20, %v4896_v50 }
 0xa27   : > { %v4914_v15 = vpop.eup %4913 }
 0xa28   : > { %v2391_v18 = vmul.f32 %v4914_v15, %v4898_v52 }
 0xa2e   : > { %4644 = vmatmul.msk.f32.vlgmr.msra.gmra.mxu2 %vm6475_vm6, %v2316_v13 }
 0xa38   : > { %v2393_v21 = vpop.permute.xlu1 %2392 }
 0xa39   : > { %2413 = vmatpush.msra.mxu3 %v2393_v21 }
 0xa3a   : > { %4647 = vmatmul.msk.f32.vlgmr.msra.gmra.mxu3 %vm6475_vm6, %v2391_v18 }
 0xa3d   : > { %v2044_v23 = vpop.f32.mrf.mxu2 }
 0xa3e   : > { %2047 = vst.msk [vmem:[#allocation4] sm:$0x3f] %vm1345_vm8, %v2044_v23 }
 0xa50   : > { %v2464_v25 = vpop.xlane.xlu2 %2463 }
 0xa51   : > { %4915 = vrcp.f32 %v2464_v25 }
 0xa57   : > { %v4916_v26 = vpop.eup %4915 }
 0xa58   : > { %v2466_v27 = vmul.f32 %v4916_v26, %v4902_v10  ;;  %v2468_v28 = vpop.permute.xlu2 %2467  ;;  %v5913_v10 = vld [vmem:[%s5539_s21 + $0x10] sm:$0xff]  ;;  %s6573_s21 = smov 64   ;;  %v1223_v26 = vld [vmem:[%s5559_s7 + $0x18] sm:$0xff] }
 0xa59   : > { %2488 = vmatpush.msrb.mxu2 %v2468_v28  ;;  %2593 = vmatpush.msra.mxu0 %v5913_v10  ;;  %v1221_v28 = vld [vmem:[%s5559_s7 + $0x8] sm:$0xff] }
 0xa5a   : > { %4650 = vmatmul.msk.f32.vlgmr.msrb.gmra.mxu2 %vm6475_vm6, %v2466_v27  ;;  %v1222_v27 = vld [vmem:[%s5559_s7 + $0x10] sm:$0xff] }
 0xa5b   : > { %v2539_v29 = vpop.xlane.xlu0 %2538  ;;  %2594 = vmatpush.msra.mxu0 %v5917_v61  ;;  %2649 = vmatpush.msra.mxu2 %v1223_v26 }
 0xa5c   : > { %4917 = vrcp.f32 %v2539_v29  ;;  %v1220_v29 = vld [vmem:[%s5559_s7] sm:$0xff]  ;;  %s6579_s7 = smov 108  }
 0xa5d   : > { %2595 = vmatpush.msra.mxu0 %v5921_v62  ;;  %2650 = vmatpush.msra.mxu2 %v1222_v27 }
 0xa5f   : > { %2651 = vmatpush.msra.mxu2 %v1221_v28 }
 0xa61   : > { %2652 = vmatpush.msra.mxu2 %v1220_v29 }
 0xa62   : > { %v4918_v30 = vpop.eup %4917 }
 0xa63   : > { %v2541_v31 = vmul.f32 %v4918_v30, %v4904_v1 }
 0xa6e   : > { %v2543_v32 = vpop.permute.xlu0 %2542 }
 0xa6f   : > { %2563 = vmatpush.msrb.mxu3 %v2543_v32 }
 0xa70   : > { %4653 = vmatmul.msk.f32.vlgmr.msrb.gmra.mxu3 %vm6475_vm6, %v2541_v31 }
 0xa71   : > { %2734 = vmatpush.msra.mxu3 %v4993_v33 }
 0xa73   : > { %2735 = vmatpush.msra.mxu3 %v4994_v34 }
 0xa75   : > { %2736 = vmatpush.msra.mxu3 %v4995_v35 }
 0xa77   : > { %2737 = vmatpush.msra.mxu3 %v4996_v37 }
 0xa78   : > { %4657 = vmatmul.msk.f32.vlgmr.msra.gmra.mxu3 %vm1244_vm1, %v5889_v36 }
 0xa9b   : > { %v2115_v38 = vpop.f32.mrf.mxu3 }
 0xa9c   : > { %2119 = vrot.lane.b32.xlu1 %v2115_v38, %s6564_s16 }
 0xaa3   : > { %v2265_v39 = vpop.f32.mrf.mxu3 }
 0xaa4   : > { %2269 = vrot.lane.b32.xlu1 %v2265_v39, %s6565_s17 }
 0xaa9   : > { %v2190_v46 = vpop.f32.mrf.mxu2 }
 0xaaa   : > { %2194 = vrot.lane.b32.xlu2 %v2190_v46, %s6566_s18 }
 0xab1   : > { %v2340_v47 = vpop.f32.mrf.mxu2 }
 0xab2   : > { %2344 = vrot.lane.b32.xlu0 %v2340_v47, %s6567_s19 }
 0xabd   : > { %v2415_v48 = vpop.f32.mrf.mxu3 }
 0xabe   : > { %2419 = vrot.lane.b32.xlu2 %v2415_v48, %s6568_s23 }
 0xadd   : > { %v2490_v50 = vpop.f32.mrf.mxu2 }
 0xade   : > { %2494 = vrot.lane.b32.xlu1 %v2490_v50, %s6569_s3 }
 0xaf3   : > { %v2565_v51 = vpop.f32.mrf.mxu3 }
 0xaf4   : > { %2569 = vrot.lane.b32.xlu0 %v2565_v51, %s6570_s26 }
 0xafb   : > { %v2739_v52 = vpop.f32.mrf.mxu3 }
 0xafc   : > { %v2740_v53 = vadd.f32 %v4997_v19, %v2739_v52 }
 0xafe   : > { %2743 = vst.msk [vmem:[#allocation2 + $0x8] sm:$0x3f] %vm1268_vm2, %v2740_v53  ;;  %vm6571_vm2 = vcmask 46080  }
 0xaff   : > { %vm6577_vm7 = vmmov %vm6571_vm2 }
 0xb04   : > { %v2195_v55 = vpop.permute.xlu2 %2194 }
 0xb05   : > { %v2744_v54 = vld [vmem:[#allocation2 + $0x8] sm:$0x3f] }
 0xb06   : > { %2747 = vrot.lane.b32.xlu2 %v2744_v54, %s6558_s30  ;;  %v5925_v63 = vld [vmem:[#allocation2 + $0x8] sm:$0x3f]  ;;  %v2745_v2 = vmul.f32 0.5, %v2744_v54  ;;  %s6576_s30 = smov 112  }
 0xb07   : > { %v2816_v11 = vmul.f32 0.5, %v5925_v63  ;;  %v5944_v20 = vld [vmem:[#allocation2 + $0x8] sm:$0x3f] }
 0xb08   : > { %v5950_v12 = vld [vmem:[#allocation2 + $0x8] sm:$0x3f] }
 0xb09   : > { %v2968_v13 = vmul.f32 0.5, %v5950_v12  ;;  %v5953_v15 = vld [vmem:[#allocation2 + $0x8] sm:$0x3f] }
 0xb0a   : > { %v5958_v18 = vld [vmem:[#allocation2 + $0x8] sm:$0x3f]  ;;  %v3120_v51 = vmul.f32 0.5, %v5953_v15 }
 0xb0b   : > { %v3044_v21 = vmul.f32 0.5, %v5958_v18  ;;  %v5961_v23 = vld [vmem:[#allocation2 + $0x8] sm:$0x3f] }
 0xb0c   : > { %v5966_v25 = vld [vmem:[#allocation2 + $0x8] sm:$0x3f]  ;;  %v3196_v52 = vmul.f32 0.5, %v5961_v23 }
 0xb0d   : > { %v3272_v50 = vmul.f32 0.5, %v5966_v25 }
 0xb0e   : > { %v2120_v22 = vpop.permute.xlu1 %2119  ;;  %2821 = vrot.lane.b32.xlu2 %v5925_v63, %s6557_s15 }
 0xb0f   : > { %2122 = vst.msk [vmem:[#allocation4] sm:$0x3f] %vm1422_vm9, %v2120_v22 }
 0xb10   : > { %2197 = vst.msk [vmem:[#allocation4] sm:$0x3f] %vm1499_vm10, %v2195_v55 }
 0xb16   : > { %v2270_v56 = vpop.permute.xlu1 %2269 }
 0xb17   : > { %2272 = vst.msk [vmem:[#allocation4] sm:$0x3f] %vm1576_vm11, %v2270_v56 }
 0xb18   : > { %v2420_v58 = vpop.permute.xlu2 %2419 }
 0xb24   : > { %v2345_v57 = vpop.permute.xlu0 %2344 }
 0xb25   : > { %2347 = vst.msk [vmem:[#allocation4] sm:$0x3f] %vm1653_vm12, %v2345_v57 }
 0xb26   : > { %2422 = vst.msk [vmem:[#allocation4] sm:$0x3f] %vm1730_vm13, %v2420_v58 }
 0xb50   : > { %v2495_v16 = vpop.permute.xlu1 %2494 }
 0xb51   : > { %2497 = vst.msk [vmem:[#allocation4] sm:$0x3f] %vm1807_vm14, %v2495_v16 }
 0xb60   : > { %v2748_v0 = vpop.permute.xlu2 %2747 }
 0xb61   : > { %4658 = vmatpush.xpose.msk.msrb.mxu0 %vm1275_vm3, %v2748_v0 }
 0xb66   : > { %v2570_v1 = vpop.permute.xlu0 %2569 }
 0xb67   : > { %2572 = vst.msk [vmem:[#allocation4] sm:$0x3f] %vm1884_vm15, %v2570_v1 }
 0xb68   : > { %v2822_v3 = vpop.permute.xlu2 %2821 }
 0xb69   : > { %4662 = vmatpush.xpose.msk.msrb.mxu3 %vm1275_vm3, %v2822_v3 }
 0xb6e   : > { %v2573_v14 = vld [vmem:[#allocation4] sm:$0x3f] }
 0xb6f   : > { %4654 = vmatmul.msk.f32.vlgmr.msra.gmra.mxu0 %vm1244_vm1, %v2573_v14 }
 0xb77   : > { %4659 = vmatmul.msk.f32.vlgmr.msrb.gmra.mxu0 %vm1275_vm3, %v2745_v2 }
 0xbec   : > { %v2597_v49 = vpop.f32.mrf.mxu0 }
 0xbed   : > { %v2598_v5 = vadd.f32 %v4844_v4, %v2597_v49 }
 0xbef   : > { %v2600_v6 = vadd.f32 %v2598_v5, %v5809_v17  ;;  %v2892_v17 = vmul.f32 0.5, %v5944_v20 }
 0xbf1   : > { %v2601_v7 = vsel %vm1914_vm0, %v2600_v6, 0.0 }
 0xbf2   : > { %2602 = vadd.xlane.f32.xlu1 %v2601_v7  ;;  %v4845_v7 = vld [vmem:[%s5549_s27] ss:$0 sm:$0xff] }
 0xbf4   : > { %v2771_v8 = vpop.f32.mrf.mxu0 }
 0xbf5   : > { %v2774_v9 = vsel %vm5649_vm5, %v2771_v8, -1e+30 }
 0xbf6   : > { %v2775_v24 = vsel %vm6571_vm2, %v2774_v9, -inf  ;;  %vm6578_vm2 = vcmask 1045504  }
 0xbf7   : > { %2776 = vmax.xlane.f32.xlu0 %v2775_v24 }
 0xc0b   : > { %2818 = vrot.lane.b32.xlu1 %v2816_v11, %s6572_s25  ;;  %2786 = vrot.lane.b32.xlu0 %v2744_v54, %s6573_s21  ;;  %s6575_s21 = smov 116   ;;  %v4846_v11 = vld [vmem:[%s5554_s20] ss:$0 sm:$0xff]  ;;  %s6602_s20 = smov 36  }
 0xc13   : > { %2894 = vrot.lane.b32.xlu1 %v2892_v17, %s6574_s10  ;;  %2897 = vrot.lane.b32.xlu0 %v5944_v20, %s6556_s1 }
 0xc1b   : > { %3125 = vrot.lane.b32.xlu1 %v5953_v15, %s6561_s5  ;;  %2970 = vrot.lane.b32.xlu0 %v2968_v13, %s6575_s21 }
 0xc23   : > { %3201 = vrot.lane.b32.xlu1 %v5961_v23, %s6562_s0  ;;  %3046 = vrot.lane.b32.xlu0 %v3044_v21, %s6576_s30 }
 0xc2b   : > { %3277 = vrot.lane.b32.xlu0 %v5966_v25, %s6563_s12 }
 0xc65   : > { %v2603_v30 = vpop.xlane.xlu1 %2602 }
 0xc66   : > { %v2604_v31 = vmul.f32 %v2603_v30, %v5783_v59 }
 0xc68   : > { %v2605_v32 = vsub.f32 %v2600_v6, %v2604_v31 }
 0xc6a   : > { %v2777_v33 = vpop.xlane.xlu0 %2776  ;;  %v2606_v34 = vmul.f32 %v2605_v32, %v2605_v32 }
 0xc6b   : > { %v2778_v35 = vsub.f32 %v2774_v9, %v2777_v33  ;;  %v6017_v33 = vld [vmem:[%s5569_s2 + $0x38] sm:$0xff] }
 0xc6c   : > { %v2607_v37 = vsel %vm1914_vm0, %v2606_v34, 0.0  ;;  %2673 = vmatpush.msrb.mxu1 %v6017_v33  ;;  %v6021_v34 = vld [vmem:[%s5569_s2 + $0x30] sm:$0xff] }
 0xc6d   : > { %v2779_v38 = vmul.f32 1.442695, %v2778_v35  ;;  %2608 = vadd.xlane.f32.xlu2 %v2607_v37  ;;  %v6041_v35 = vld [vmem:[%s5569_s2 + $0x8] sm:$0xff]  ;;  %v6044_v37 = vld [vmem:[%s5569_s2] sm:$0xff] }
 0xc6e   : > { %2674 = vmatpush.msrb.mxu1 %v6021_v34 }
 0xc6f   : > { %4919 = vpow2.f32 %v2779_v38 }
 0xc75   : > { %v4920_v39 = vpop.eup %4919 }
 0xc76   : > { %v2781_v46 = vsel %vm6577_vm7, %v4920_v39, 0.0 }
 0xc77   : > { %2782 = vadd.xlane.f32.xlu1 %v2781_v46 }
 0xc7d   : > { %v2819_v47 = vpop.permute.xlu1 %2818  ;;  %v2787_v48 = vpop.permute.xlu0 %2786 }
 0xc7e   : > { %4660 = vmatpush.msk.msrb.mxu2 %vm6578_vm2, %v2787_v48  ;;  %4663 = vmatmul.msk.f32.vlgmr.msrb.gmra.mxu3 %vm1275_vm3, %v2819_v47 }
 0xc85   : > { %2973 = vrot.lane.b32.xlu2 %v5950_v12, %s6560_s22  ;;  %v2898_v19 = vpop.permute.xlu0 %2897  ;;  %v2895_v54 = vpop.permute.xlu1 %2894 }
 0xc8d   : > { %3049 = vrot.lane.b32.xlu2 %v5958_v18, %s6559_s8  ;;  %v2971_v53 = vpop.permute.xlu0 %2970  ;;  %v3126_v58 = vpop.permute.xlu1 %3125 }
 0xc90   : > { %3274 = vrot.lane.b32.xlu1 %v3272_v50, %s6555_s14  ;;  %v4847_v50 = vld [vmem:[%s5564_s28] ss:$0 sm:$0xff]  ;;  %s6588_s28 = smov 56  }
 0xc95   : > { %3122 = vrot.lane.b32.xlu2 %v3120_v51, %s6579_s7  ;;  %v3047_v56 = vpop.permute.xlu0 %3046  ;;  %v3202_v3 = vpop.permute.xlu1 %3201 }
 0xc9d   : > { %3198 = vrot.lane.b32.xlu2 %v3196_v52, %s6554_s13  ;;  %v3278_v1 = vpop.permute.xlu0 %3277 }
 0xce0   : > { %v2609_v22 = vpop.xlane.xlu2 %2608 }
 0xce1   : > { %v2610_v55 = vmul.f32 %v2609_v22, %v5783_v59 }
 0xce3   : > { %v2611_v57 = vadd.f32 1e-05, %v2610_v55 }
 0xce5   : > { %4921 = vrsqrt.f32 %v2611_v57  ;;  %vm2618_vm2 = vweird.f32 %v2611_v57 }
 0xce8   : > { %v2974_v16 = vpop.permute.xlu2 %2973 }
 0xce9   : > { %4670 = vmatpush.xpose.msk.msra.mxu3 %vm1275_vm3, %v2974_v16 }
 0xcea   : > { %v2783_v24 = vpop.xlane.xlu1 %2782 }
 0xceb   : > { %v4922_v0 = vpop.eup %4921  ;;  %4923 = vrcp.f32 %v2783_v24 }
 0xcec   : > { %v2613_v14 = vmul.f32 %v4922_v0, %v2611_v57  ;;  %4671 = vmatmul.msk.f32.vlgmr.msra.gmra.mxu3 %vm1275_vm3, %v2971_v53  ;;  %vm2619_vm7 = vweird.f32 %v4922_v0 }
 0xced   : > { %4678 = vmatpush.xpose.msk.msrb.mxu3 %vm1275_vm3, %v3126_v58  ;;  %vm2620_vm6 = vmor %vm2618_vm2, %vm2619_vm7  ;;  %vm6581_vm7 = vcmask 48128  }
 0xcee   : > { %v2614_v2 = vmul.f32 %v4922_v0, %v2613_v14 }
 0xcf0   : > { %v2615_v4 = vmul.f32 0.5, %v2614_v2  ;;  %v3050_v49 = vpop.permute.xlu2 %3049 }
 0xcf1   : > { %4686 = vmatpush.xpose.msk.msra.mxu3 %vm1275_vm3, %v3278_v1  ;;  %v4924_v26 = vpop.eup %4923 }
 0xcf2   : > { %v2616_v5 = vsub.f32 1.5, %v2615_v4  ;;  %v2785_v30 = vmul.f32 %v4924_v26, %v4920_v39 }
 0xcf4   : > { %v2617_v6 = vmul.f32 %v4922_v0, %v2616_v5 }
 0xcf6   : > { %v2621_v8 = vsel %vm2620_vm6, %v4922_v0, %v2617_v6  ;;  %vm6580_vm6 = vcmask 46080  }
 0xcf7   : > { %v2622_v9 = vmul.f32 %v2621_v8, %v2605_v32  ;;  %vm6582_vm2 = vmmov %vm6580_vm6 }
 0xcf8   : > { %v3123_v17 = vpop.permute.xlu2 %3122 }
 0xcf9   : > { %v2626_v13 = vmul.f32 %v4845_v7, %v2622_v9  ;;  %4679 = vmatmul.msk.f32.vlgmr.msrb.gmra.mxu3 %vm1275_vm3, %v3123_v17 }
 0xcfb   : > { %v5997_v21 = vadd.f32 %v4846_v11, %v2626_v13 }
 0xcfd   : > { %4655 = vmatmul.msk.f32.vlgmr.msra.gmra.mxu2 %vm1244_vm1, %v5997_v21 }
 0xcfe   : > { %4666 = vmatpush.xpose.msk.msra.mxu2 %vm1275_vm3, %v2898_v19 }
 0xd00   : > { %v3199_v32 = vpop.permute.xlu2 %3198 }
 0xd01   : > { %v2844_v27 = vpop.f32.mrf.mxu3 }
 0xd02   : > { %v2847_v28 = vsel %vm5649_vm5, %v2844_v27, -1e+30  ;;  %v3275_v29 = vpop.permute.xlu1 %3274 }
 0xd03   : > { %4687 = vmatmul.msk.f32.vlgmr.msra.gmra.mxu3 %vm1275_vm3, %v3275_v29  ;;  %v2848_v31 = vsel %vm6580_vm6, %v2847_v28, -inf  ;;  %vm6583_vm6 = vmmov %vm6582_vm2 }
 0xd04   : > { %2849 = vmax.xlane.f32.xlu0 %v2848_v31 }
 0xd05   : > { %4661 = vmatmul.msk.f32.vlgmr.msrb.gmra.mxu2 %vm6581_vm7, %v2785_v30  ;;  %vm6476_vm7 = vcmask 523264  }
 0xd06   : > { %4674 = vmatpush.xpose.msk.msrb.mxu2 %vm1275_vm3, %v3050_v49 }
 0xd0d   : > { %4667 = vmatmul.msk.f32.vlgmr.msra.gmra.mxu2 %vm1275_vm3, %v2895_v54 }
 0xd0e   : > { %4682 = vmatpush.xpose.msk.msra.mxu2 %vm1275_vm3, %v3202_v3 }
 0xd15   : > { %4675 = vmatmul.msk.f32.vlgmr.msrb.gmra.mxu2 %vm1275_vm3, %v3047_v56 }
 0xd16   : > { %3363 = vmatpush.msrb.mxu2 %v5762_v41  ;;  %v6025_v41 = vld [vmem:[%s5569_s2 + $0x28] sm:$0xff] }
 0xd17   : > { %2675 = vmatpush.msrb.mxu1 %v6025_v41 }
 0xd18   : > { %3364 = vmatpush.msrb.mxu2 %v5765_v43  ;;  %v6029_v43 = vld [vmem:[%s5569_s2 + $0x20] sm:$0xff] }
 0xd19   : > { %2676 = vmatpush.msrb.mxu1 %v6029_v43 }
 0xd1a   : > { %3365 = vmatpush.msrb.mxu2 %v5769_v44  ;;  %v6032_v44 = vld [vmem:[%s5569_s2 + $0x18] sm:$0xff] }
 0xd1b   : > { %2677 = vmatpush.msrb.mxu1 %v6032_v44 }
 0xd1c   : > { %3366 = vmatpush.msrb.mxu2 %v5773_v45  ;;  %v6037_v45 = vld [vmem:[%s5569_s2 + $0x10] sm:$0xff]  ;;  %s6586_s2 = smov 60  }
 0xd1d   : > { %4683 = vmatmul.msk.f32.vlgmr.msra.gmra.mxu2 %vm1275_vm3, %v3199_v32  ;;  %2678 = vmatpush.msrb.mxu1 %v6037_v45 }
 0xd1f   : > { %2679 = vmatpush.msrb.mxu1 %v6041_v35 }
 0xd21   : > { %2680 = vmatpush.msrb.mxu1 %v6044_v37 }
 0xd6f   : > { %v2996_v38 = vpop.f32.mrf.mxu3 }
 0xd70   : > { %v2999_v39 = vsel %vm5649_vm5, %v2996_v38, -1e+30 }
 0xd71   : > { %v3000_v46 = vsel %vm6582_vm2, %v2999_v39, -inf }
 0xd72   : > { %3001 = vmax.xlane.f32.xlu1 %v3000_v46 }
 0xd77   : > { %v2850_v54 = vpop.xlane.xlu0 %2849 }
 0xd78   : > { %v2851_v58 = vsub.f32 %v2847_v28, %v2850_v54 }
 0xd7a   : > { %v2852_v16 = vmul.f32 1.442695, %v2851_v58 }
 0xd7c   : > { %v3148_v47 = vpop.f32.mrf.mxu3  ;;  %4925 = vpow2.f32 %v2852_v16 }
 0xd7d   : > { %v3151_v48 = vsel %vm5649_vm5, %v3148_v47, -1e+30 }
 0xd7e   : > { %v3152_v51 = vsel %vm6583_vm6, %v3151_v48, -inf  ;;  %vm6584_vm6 = vmmov %vm6582_vm2 }
 0xd7f   : > { %3153 = vmax.xlane.f32.xlu2 %v3152_v51 }
 0xd80   : > { %v2654_v52 = vpop.f32.mrf.mxu2 }
 0xd81   : > { %v2655_v19 = vadd.f32 %v4847_v50, %v2654_v52 }
 0xd82   : > { %v4926_v2 = vpop.eup %4925 }
 0xd83   : > { %v2657_v53 = vmax.f32 %v2655_v19, 0.0 }
 0xd85   : > { %4656 = vmatmul.msk.f32.vlgmr.msrb.gmra.mxu1 %vm6476_vm7, %v2657_v53  ;;  %vm6585_vm7 = vmmov %vm6582_vm2 }
 0xd86   : > { %v3300_v22 = vpop.f32.mrf.mxu3  ;;  %v2854_v3 = vsel %vm6585_vm7, %v4926_v2, 0.0  ;;  %vm6587_vm7 = vmmov %vm6582_vm2 }
 0xd87   : > { %v3303_v55 = vsel %vm5649_vm5, %v3300_v22, -1e+30 }
 0xd88   : > { %v2810_v56 = vpop.f32.mrf.mxu2  ;;  %v3304_v57 = vsel %vm6582_vm2, %v3303_v55, -inf }
 0xd89   : > { %2814 = vst.msk [vmem:[#allocation4 + $0x8] sm:$0x3f] %vm1345_vm8, %v2810_v56  ;;  %3305 = vmax.xlane.f32.xlu0 %v3304_v57 }
 0xd90   : > { %v2920_v0 = vpop.f32.mrf.mxu2 }
 0xd91   : > { %v2923_v1 = vsel %vm5649_vm5, %v2920_v0, -1e+30 }
 0xd92   : > { %v2924_v14 = vsel %vm6584_vm6, %v2923_v1, -inf  ;;  %vm6589_vm6 = vcmask 1045504  }
 0xd93   : > { %2925 = vmax.xlane.f32.xlu2 %v2924_v14 }
 0xd98   : > { %v3072_v29 = vpop.f32.mrf.mxu2 }
 0xd99   : > { %v3075_v30 = vsel %vm5649_vm5, %v3072_v29, -1e+30 }
 0xd9a   : > { %v3076_v31 = vsel %vm6587_vm7, %v3075_v30, -inf }
 0xd9b   : > { %2855 = vadd.xlane.f32.xlu2 %v2854_v3 }
 0xda0   : > { %v3224_v32 = vpop.f32.mrf.mxu2 }
 0xdb3   : > { %2859 = vrot.lane.b32.xlu2 %v5925_v63, %s6586_s2  ;;  %s6590_s2 = smov 52  }
 0xde5   : > { %v3002_v4 = vpop.xlane.xlu1 %3001 }
 0xde6   : > { %v3003_v49 = vsub.f32 %v2999_v39, %v3002_v4  ;;  %v3227_v39 = vsel %vm5649_vm5, %v3224_v32, -1e+30  ;;  %vm6596_vm5 = vcmask 1045504   ;;  %v5000_v32 = vld [vmem:[%s5529_s4 + $0x8] sm:$0xff] }
 0xde8   : > { %v3004_v5 = vmul.f32 1.442695, %v3003_v49 }
 0xdea   : > { %4927 = vpow2.f32 %v3004_v5 }
 0xdf0   : > { %v4928_v6 = vpop.eup %4927 }
 0xdf1   : > { %v3006_v7 = vsel %vm6582_vm2, %v4928_v6, 0.0  ;;  %vm6591_vm2 = vcmask 48128  }
 0xdf2   : > { %3007 = vadd.xlane.f32.xlu0 %v3006_v7  ;;  %v3154_v8 = vpop.xlane.xlu2 %3153 }
 0xdf3   : > { %v3155_v9 = vsub.f32 %v3151_v48, %v3154_v8 }
 0xdf5   : > { %v3156_v24 = vmul.f32 1.442695, %v3155_v9 }
 0xdf7   : > { %4929 = vpow2.f32 %v3156_v24 }
 0xdfc   : > { %v3306_v48 = vpop.xlane.xlu0 %3305 }
 0xdfd   : > { %v6067_v11 = vpop.eup %4929  ;;  %v3307_v50 = vsub.f32 %v3303_v55, %v3306_v48 }
 0xdfe   : > { %v3158_v17 = vsel %vm6587_vm7, %v6067_v11, 0.0 }
 0xdff   : > { %3159 = vadd.xlane.f32.xlu1 %v3158_v17  ;;  %v3308_v51 = vmul.f32 1.442695, %v3307_v50 }
 0xe06   : > { %2935 = vrot.lane.b32.xlu0 %v5944_v20, %s6588_s28  ;;  %v2926_v63 = vpop.xlane.xlu2 %2925  ;;  %s6593_s28 = smov 48  }
 0xe07   : > { %v2927_v20 = vsub.f32 %v2923_v1, %v2926_v63 }
 0xe09   : > { %v2928_v38 = vmul.f32 1.442695, %v2927_v20  ;;  %v4999_v20 = vld [vmem:[%s5529_s4 + $0x10] sm:$0xff] }
 0xe0e   : > { %v2856_v13 = vpop.xlane.xlu2 %2855 }
 0xe0f   : > { %4931 = vrcp.f32 %v2856_v13 }
 0xe10   : > { %4933 = vpow2.f32 %v2928_v38 }
 0xe11   : > { %4935 = vpow2.f32 %v3308_v51 }
 0xe15   : > { %v4932_v26 = vpop.eup %4931 }
 0xe16   : > { %v2858_v27 = vmul.f32 %v4932_v26, %v4926_v2  ;;  %v2860_v28 = vpop.permute.xlu2 %2859 }
 0xe17   : > { %4664 = vmatpush.msk.msra.mxu0 %vm6589_vm6, %v2860_v28  ;;  %vm6592_vm6 = vmmov %vm6587_vm7 }
 0xe18   : > { %3011 = vrot.lane.b32.xlu1 %v5950_v12, %s6590_s2  ;;  %4665 = vmatmul.msk.f32.vlgmr.msra.gmra.mxu0 %vm6591_vm2, %v2858_v27  ;;  %v3228_v46 = vsel %vm6592_vm6, %v3227_v39, -inf  ;;  %v4934_v12 = vpop.eup %4933  ;;  %vm6594_vm2 = vmmov %vm6592_vm6  ;;  %s6600_s2 = smov 44  }
 0xe19   : > { %v2930_v47 = vsel %vm6594_vm2, %v4934_v12, 0.0  ;;  %v6086_v52 = vpop.eup %4935  ;;  %vm6595_vm7 = vmmov %vm6594_vm2  ;;  %vm6598_vm2 = vcmask 48128  }
 0xe1a   : > { %v3310_v42 = vsel %vm6595_vm7, %v6086_v52, 0.0  ;;  %vm6597_vm6 = vmmov %vm6596_vm5 }
 0xe30   : > { %3077 = vmax.xlane.f32.xlu0 %v3076_v31 }
 0xe42   : > { %3229 = vmax.xlane.f32.xlu1 %v3228_v46  ;;  %v5001_v46 = vld [vmem:[%s5529_s4] sm:$0xff] }
 0xe44   : > { %3087 = vrot.lane.b32.xlu0 %v5958_v18, %s6593_s28  ;;  %s6601_s28 = smov 40  }
 0xe4a   : > { %2931 = vadd.xlane.f32.xlu1 %v2930_v47 }
 0xe65   : > { %v3008_v19 = vpop.xlane.xlu0 %3007 }
 0xe66   : > { %4937 = vrcp.f32 %v3008_v19 }
 0xe6c   : > { %v4938_v54 = vpop.eup %4937 }
 0xe6d   : > { %v3010_v22 = vmul.f32 %v4938_v54, %v4928_v6 }
 0xe6e   : > { %3311 = vadd.xlane.f32.xlu0 %v3310_v42 }
 0xe72   : > { %v3160_v18 = vpop.xlane.xlu1 %3159 }
 0xe78   : > { %v2936_v53 = vpop.permute.xlu0 %2935 }
 0xe79   : > { %4668 = vmatpush.msk.msra.mxu1 %vm6596_vm5, %v2936_v53 }
 0xe8a   : > { %v3012_v56 = vpop.permute.xlu1 %3011 }
 0xe8b   : > { %4672 = vmatpush.msk.msrb.mxu0 %vm6597_vm6, %v3012_v56  ;;  %vm6599_vm6 = vmmov %vm6595_vm7 }
 0xe8c   : > { %4673 = vmatmul.msk.f32.vlgmr.msrb.gmra.mxu0 %vm6598_vm2, %v3010_v22 }
 0xe95   : > { %v2883_v8 = vpop.f32.mrf.mxu0 }
 0xea3   : > { %v3078_v55 = vpop.xlane.xlu0 %3077 }
 0xea4   : > { %v3079_v57 = vsub.f32 %v3075_v30, %v3078_v55 }
 0xea6   : > { %v3080_v58 = vmul.f32 1.442695, %v3079_v57  ;;  %v5002_v57 = vld [vmem:[%s6552_s24] ss:$0 sm:$0xff] }
 0xea8   : > { %4939 = vpow2.f32 %v3080_v58 }
 0xeae   : > { %v4940_v16 = vpop.eup %4939 }
 0xeaf   : > { %v3082_v0 = vsel %vm6595_vm7, %v4940_v16, 0.0  ;;  %vm6603_vm7 = vmmov %vm6598_vm2 }
 0xeb0   : > { %3083 = vadd.xlane.f32.xlu1 %v3082_v0 }
 0xeb5   : > { %v3230_v1 = vpop.xlane.xlu1 %3229 }
 0xeb6   : > { %v3231_v14 = vsub.f32 %v3227_v39, %v3230_v1  ;;  %v3088_v2 = vpop.permute.xlu0 %3087 }
 0xeb7   : > { %4676 = vmatpush.msk.msrb.mxu1 %vm6596_vm5, %v3088_v2 }
 0xeb8   : > { %v3232_v3 = vmul.f32 1.442695, %v3231_v14 }
 0xeba   : > { %4941 = vpow2.f32 %v3232_v3 }
 0xebd   : > { %v2932_v4 = vpop.xlane.xlu1 %2931 }
 0xebe   : > { %4943 = vrcp.f32 %v2932_v4 }
 0xec0   : > { %v4942_v49 = vpop.eup %4941 }
 0xec1   : > { %v3234_v5 = vsel %vm6599_vm6, %v4942_v49, 0.0  ;;  %vm6604_vm6 = vmmov %vm6598_vm2 }
 0xec2   : > { %3235 = vadd.xlane.f32.xlu2 %v3234_v5 }
 0xec4   : > { %v4944_v6 = vpop.eup %4943 }
 0xec5   : > { %v2934_v7 = vmul.f32 %v4944_v6, %v4934_v12  ;;  %v6119_v12 = vpop.f32.mrf.mxu1 }
 0xec7   : > { %4669 = vmatmul.msk.f32.vlgmr.msra.gmra.mxu1 %vm6598_vm2, %v2934_v7  ;;  %vm6605_vm2 = vmmov %vm6596_vm5 }
 0xec9   : > { %3163 = vrot.lane.b32.xlu1 %v5953_v15, %s6600_s2 }
 0xed1   : > { %3239 = vrot.lane.b32.xlu1 %v5961_v23, %s6601_s28 }
 0xed9   : > { %3315 = vrot.lane.b32.xlu1 %v5966_v25, %s6602_s20 }
 0xeda   : > { %2887 = vrot.lane.b32.xlu2 %v2883_v8, %s6564_s16 }
 0xee1   : > { %v3312_v27 = vpop.xlane.xlu0 %3311 }
 0xf09   : > { %v3035_v9 = vpop.f32.mrf.mxu0 }
 0xf0a   : > { %3039 = vrot.lane.b32.xlu0 %v3035_v9, %s6565_s17 }
 0xf23   : > { %v3084_v24 = vpop.xlane.xlu1 %3083 }
 0xf24   : > { %4945 = vrcp.f32 %v3084_v24 }
 0xf25   : > { %4947 = vrcp.f32 %v3160_v18 }
 0xf2a   : > { %v4946_v17 = vpop.eup %4945 }
 0xf2b   : > { %v3086_v63 = vmul.f32 %v4946_v17, %v4940_v16  ;;  %v4948_v13 = vpop.eup %4947 }
 0xf2c   : > { %v3162_v23 = vmul.f32 %v4948_v13, %v6067_v11  ;;  %v4998_v11 = vld [vmem:[%s5529_s4 + $0x18] sm:$0xff]  ;;  %s6626_s4 = sld [smem:[#allocation19_spill]] }
 0xf2d   : > { %4677 = vmatmul.msk.f32.vlgmr.msrb.gmra.mxu1 %vm6603_vm7, %v3086_v63  ;;  %vm6606_vm7 = vmmov %vm6604_vm6 }
 0xf32   : > { %p4727_p10 = scmp.ne.s32.totalorder %s6626_s4, 7 }
 0xf33   : > { %s4140_s28 = sld [smem:[#allocation6]] (!%p4727_p10) }
 0xf34   : > { %s6637_s20 = sld [smem:[#allocation59_spill]] (!%p4727_p10) }
 0xf35   : > { %v3236_v15 = vpop.xlane.xlu2 %3235 }
 0xf36   : > { %4949 = vrcp.f32 %v3236_v15 }
 0xf37   : > { %4951 = vrcp.f32 %v3312_v27 }
 0xf3b   : > { %v3164_v25 = vpop.permute.xlu1 %3163 }
 0xf3c   : > { %4680 = vmatpush.msk.msra.mxu0 %vm6596_vm5, %v3164_v25  ;;  %v4950_v28 = vpop.eup %4949  ;;  %vm6607_vm5 = vmmov %vm6605_vm2 }
 0xf3d   : > { %4681 = vmatmul.msk.f32.vlgmr.msra.gmra.mxu0 %vm6604_vm6, %v3162_v23  ;;  %v2888_v26 = vpop.permute.xlu2 %2887  ;;  %v3238_v29 = vmul.f32 %v4950_v28, %v4942_v49  ;;  %v4952_v31 = vpop.eup %4951  ;;  %v6139_v49 = vld [vmem:[%s6553_s29 + $0x8] sm:$0xff]  ;;  %v5003_v23 = vld [vmem:[%s5519_s9] ss:$0 sm:$0xff]  ;;  %s6608_s9 = smov 96  }
 0xf3e   : > { %2890 = vst.msk [vmem:[#allocation4 + $0x8] sm:$0x3f] %vm1422_vm9, %v2888_v26  ;;  %v3314_v38 = vmul.f32 %v4952_v31, %v6086_v52  ;;  %4693 = vmatpush.xpose.msk.msrb.mxu3 %vm1275_vm3, %v6139_v49  ;;  %v5004_v26 = vld [vmem:[%s5524_s11] ss:$0 sm:$0xff]  ;;  %s6618_s11 = sld [smem:[#allocation22_spill]] }
 0xf43   : > { %v3240_v30 = vpop.permute.xlu1 %3239 }
 0xf44   : > { %4684 = vmatpush.msk.msra.mxu1 %vm6605_vm2, %v3240_v30  ;;  %v2959_v47 = vpop.f32.mrf.mxu1 }
 0xf45   : > { %4685 = vmatmul.msk.f32.vlgmr.msra.gmra.mxu1 %vm6606_vm7, %v3238_v29  ;;  %v5005_v29 = vld [vmem:[%s5534_s6] ss:$0 sm:$0xff]  ;;  %s6627_s6 = sld [smem:[#allocation23_spill]] (!%p4727_p10) }
 0xf46   : > { %3411 = vmatpush.msrb.mxu1 %v4998_v11 }
 0xf48   : > { %3412 = vmatpush.msrb.mxu1 %v4999_v20 }
 0xf4a   : > { %3413 = vmatpush.msrb.mxu1 %v5000_v32 }
 0xf4b   : > { %v3316_v39 = vpop.permute.xlu1 %3315 }
 0xf4c   : > { %4688 = vmatpush.msk.msrb.mxu0 %vm6607_vm5, %v3316_v39  ;;  %3414 = vmatpush.msrb.mxu1 %v5001_v46 }
 0xf4d   : > { %4689 = vmatmul.msk.f32.vlgmr.msrb.gmra.mxu0 %vm6604_vm6, %v3314_v38 }
 0xf7c   : > { %v3040_v53 = vpop.permute.xlu0 %3039 }
 0xfaa   : > { %v3111_v48 = vpop.f32.mrf.mxu1 }
 0xfba   : > { %v3187_v50 = vpop.f32.mrf.mxu0 }
 0xfbb   : > { %3191 = vrot.lane.b32.xlu1 %v3187_v50, %s6568_s23 }
 0xfc2   : > { %v3263_v51 = vpop.f32.mrf.mxu1 }
 0xfc3   : > { %2963 = vrot.lane.b32.xlu1 %v2959_v47, %s6566_s18  ;;  %3267 = vrot.lane.b32.xlu2 %v3263_v51, %s6569_s3 }
 0xfca   : > { %v3339_v52 = vpop.f32.mrf.mxu0 }
 0xfcb   : > { %3115 = vrot.lane.b32.xlu1 %v3111_v48, %s6567_s19 }
 0xfd3   : > { %3343 = vrot.lane.b32.xlu1 %v3339_v52, %s6570_s26 }
 0xfdb   : > { %3496 = vrot.lane.b32.xlu1 %v6139_v49, %s6572_s25 }
 0xfe3   : > { %3571 = vrot.lane.b32.xlu1 %v6139_v49, %s6574_s10 }
 0xfeb   : > { %3646 = vrot.lane.b32.xlu1 %v6139_v49, %s6575_s21 }
 0xff3   : > { %3796 = vrot.lane.b32.xlu1 %v6139_v49, %s6579_s7 }
0x101d   : > { %v3268_v54 = vpop.permute.xlu2 %3267 }
0x102d   : > { %v3192_v42 = vpop.permute.xlu1 %3191 }
0x1035   : > { %v2964_v19 = vpop.permute.xlu1 %2963 }
0x1036   : > { %2966 = vst.msk [vmem:[#allocation4 + $0x8] sm:$0x3f] %vm1499_vm10, %v2964_v19 }
0x1037   : > { %3042 = vst.msk [vmem:[#allocation4 + $0x8] sm:$0x3f] %vm1576_vm11, %v3040_v53 }
0x103d   : > { %v3116_v18 = vpop.permute.xlu1 %3115 }
0x103e   : > { %3118 = vst.msk [vmem:[#allocation4 + $0x8] sm:$0x3f] %vm1653_vm12, %v3116_v18 }
0x103f   : > { %3194 = vst.msk [vmem:[#allocation4 + $0x8] sm:$0x3f] %vm1730_vm13, %v3192_v42 }
0x1040   : > { %3270 = vst.msk [vmem:[#allocation4 + $0x8] sm:$0x3f] %vm1807_vm14, %v3268_v54 }
0x1045   : > { %v3344_v22 = vpop.permute.xlu1 %3343 }
0x1046   : > { %3346 = vst.msk [vmem:[#allocation4 + $0x8] sm:$0x3f] %vm1884_vm15, %v3344_v22 }
0x104d   : > { %v3347_v56 = vld [vmem:[#allocation4 + $0x8] sm:$0x3f]  ;;  %v3497_v46 = vpop.permute.xlu1 %3496 }
0x104e   : > { %4690 = vmatmul.msk.f32.vlgmr.msrb.gmra.mxu2 %vm1244_vm1, %v3347_v56 }
0x104f   : > { %4697 = vmatpush.xpose.msk.msra.mxu2 %vm1275_vm3, %v3497_v46 }
0x1055   : > { %v3572_v50 = vpop.permute.xlu1 %3571 }
0x1056   : > { %4701 = vmatpush.xpose.msk.msra.mxu3 %vm1275_vm3, %v3572_v50 }
0x105d   : > { %v3647_v53 = vpop.permute.xlu1 %3646 }
0x105e   : > { %4705 = vmatpush.xpose.msk.msrb.mxu2 %vm1275_vm3, %v3647_v53 }
0x10d1   : > { %v3368_v55 = vpop.f32.mrf.mxu2 }
0x10d2   : > { %v3369_v58 = vadd.f32 %v5002_v57, %v3368_v55  ;;  %v3797_v57 = vpop.permute.xlu1 %3796 }
0x10d4   : > { %v3371_v16 = vadd.f32 %v3369_v58, %v5889_v36 }
0x10d6   : > { %v3372_v0 = vsel %vm1914_vm0, %v3371_v16, 0.0 }
0x10d7   : > { %3373 = vadd.xlane.f32.xlu0 %v3372_v0 }
0x114a   : > { %v3374_v1 = vpop.xlane.xlu0 %3373 }
0x114b   : > { %v3375_v14 = vmul.f32 %v3374_v1, %v5783_v59 }
0x114d   : > { %v3376_v2 = vsub.f32 %v3371_v16, %v3375_v14 }
0x114f   : > { %v3377_v3 = vmul.f32 %v3376_v2, %v3376_v2 }
0x1151   : > { %v3378_v4 = vsel %vm1914_vm0, %v3377_v3, 0.0 }
0x1152   : > { %3379 = vadd.xlane.f32.xlu2 %v3378_v4 }
0x116a   : > { %3721 = vrot.lane.b32.xlu2 %v6139_v49, %s6576_s30 }
0x1172   : > { %3946 = vrot.lane.b32.xlu2 %v6139_v49, %s6555_s14 }
0x11c5   : > { %v3380_v36 = vpop.xlane.xlu2 %3379 }
0x11c6   : > { %v3381_v5 = vmul.f32 %v3380_v36, %v5783_v59 }
0x11c8   : > { %v3382_v6 = vadd.f32 1e-05, %v3381_v5 }
0x11ca   : > { %4953 = vrsqrt.f32 %v3382_v6  ;;  %vm3389_vm7 = vweird.f32 %v3382_v6 }
0x11cd   : > { %v3722_v55 = vpop.permute.xlu2 %3721 }
0x11d0   : > { %v4954_v7 = vpop.eup %4953 }
0x11d1   : > { %v3384_v8 = vmul.f32 %v4954_v7, %v3382_v6  ;;  %vm3390_vm2 = vweird.f32 %v4954_v7 }
0x11d2   : > { %vm3391_vm5 = vmor %vm3389_vm7, %vm3390_vm2 }
0x11d3   : > { %v3385_v9 = vmul.f32 %v4954_v7, %v3384_v8 }
0x11d5   : > { %v3386_v24 = vmul.f32 0.5, %v3385_v9  ;;  %v3947_v0 = vpop.permute.xlu2 %3946 }
0x11d7   : > { %v3387_v17 = vsub.f32 1.5, %v3386_v24 }
0x11d9   : > { %v3388_v63 = vmul.f32 %v4954_v7, %v3387_v17 }
0x11db   : > { %v3392_v15 = vsel %vm3391_vm5, %v4954_v7, %v3388_v63 }
0x11dc   : > { %v3393_v13 = vmul.f32 %v3392_v15, %v3376_v2 }
0x11de   : > { %v3394_v25 = vmul.f32 %v5003_v23, %v3393_v13 }
0x11e0   : > { %v6158_v27 = vadd.f32 %v5004_v26, %v3394_v25 }
0x11e2   : > { %4691 = vmatmul.msk.f32.vlgmr.msrb.gmra.mxu1 %vm1244_vm1, %v6158_v27 }
0x125f   : > { %v3416_v28 = vpop.f32.mrf.mxu1 }
0x1260   : > { %v3417_v30 = vadd.f32 %v5005_v29, %v3416_v28 }
0x1262   : > { %3420 = vst.msk [vmem:[#allocation3 + $0x8] sm:$0x3f] %vm1914_vm0, %v3417_v30 }
0x1269   : > { %v3639_v11 = vld [vmem:[#allocation3 + $0x8] sm:$0x3f] }
0x126a   : > { %v3489_v31 = vld [vmem:[#allocation3 + $0x8] sm:$0x3f]  ;;  %v3640_v32 = vmul.f32 0.5, %v3639_v11 }
0x126b   : > { %v3421_v20 = vld [vmem:[#allocation3 + $0x8] sm:$0x3f]  ;;  %v3490_v38 = vmul.f32 0.5, %v3489_v31 }
0x126c   : > { %v3422_v39 = vmul.f32 0.5, %v3421_v20  ;;  %3643 = vrot.lane.b32.xlu0 %v3640_v32, %s6575_s21  ;;  %v3564_v47 = vld [vmem:[#allocation3 + $0x8] sm:$0x3f] }
0x126d   : > { %3493 = vrot.lane.b32.xlu1 %v3490_v38, %s6572_s25  ;;  %v3565_v48 = vmul.f32 0.5, %v3564_v47  ;;  %v3939_v51 = vld [vmem:[#allocation3 + $0x8] sm:$0x3f] }
0x126e   : > { %4694 = vmatmul.msk.f32.vlgmr.msrb.gmra.mxu3 %vm1275_vm3, %v3422_v39  ;;  %v3714_v52 = vld [vmem:[#allocation3 + $0x8] sm:$0x3f]  ;;  %v3940_v42 = vmul.f32 0.5, %v3939_v51 }
0x126f   : > { %v3715_v19 = vmul.f32 0.5, %v3714_v52  ;;  %v3789_v18 = vld [vmem:[#allocation3 + $0x8] sm:$0x3f]  ;;  %4709 = vmatpush.xpose.msk.msrb.mxu3 %vm1275_vm3, %v3722_v55 }
0x1270   : > { %v3790_v54 = vmul.f32 0.5, %v3789_v18  ;;  %v3864_v22 = vld [vmem:[#allocation3 + $0x8] sm:$0x3f] }
0x1271   : > { %v3865_v56 = vmul.f32 0.5, %v3864_v22 }
0x1274   : > { %3871 = vrot.lane.b32.xlu0 %v6139_v49, %s6554_s13 }
0x1275   : > { %3568 = vrot.lane.b32.xlu1 %v3565_v48, %s6574_s10  ;;  %s4728_s10 = sadd.s32 (!%p4727_p10), 4294967295, %s6627_s6 }
0x127c   : > { %3943 = vrot.lane.b32.xlu0 %v3940_v42, %s6555_s14 }
0x127d   : > { %3718 = vrot.lane.b32.xlu1 %v3715_v19, %s6576_s30 }
0x1285   : > { %3793 = vrot.lane.b32.xlu1 %v3790_v54, %s6579_s7  ;;  %s6630_s7 = sld [smem:[#allocation56_spill]] (!%p4727_p10) }
0x128d   : > { %3868 = vrot.lane.b32.xlu1 %v3865_v56, %s6554_s13  ;;  %s6633_s13 = sld [smem:[#allocation54_spill]] (!%p4727_p10) }
0x12de   : > { %v3644_v58 = vpop.permute.xlu0 %3643 }
0x12df   : > { %v3494_v16 = vpop.permute.xlu1 %3493 }
0x12e0   : > { %4698 = vmatmul.msk.f32.vlgmr.msra.gmra.mxu2 %vm1275_vm3, %v3494_v16 }
0x12e1   : > { %4713 = vmatpush.xpose.msk.msra.mxu2 %vm1275_vm3, %v3797_v57 }
0x12e6   : > { %v3872_v14 = vpop.permute.xlu0 %3871 }
0x12e7   : > { %v3569_v1 = vpop.permute.xlu1 %3568 }
0x12e8   : > { %4702 = vmatmul.msk.f32.vlgmr.msra.gmra.mxu3 %vm1275_vm3, %v3569_v1  ;;  %4706 = vmatmul.msk.f32.vlgmr.msrb.gmra.mxu2 %vm1275_vm3, %v3644_v58 }
0x12e9   : > { %4717 = vmatpush.xpose.msk.msra.mxu3 %vm1275_vm3, %v3872_v14  ;;  %4721 = vmatpush.xpose.msk.msrb.mxu2 %vm1275_vm3, %v3947_v0 }
0x12ee   : > { %v3944_v5 = vpop.permute.xlu0 %3943 }
0x12ef   : > { %v3719_v2 = vpop.permute.xlu1 %3718 }
0x12f0   : > { %4710 = vmatmul.msk.f32.vlgmr.msrb.gmra.mxu3 %vm1275_vm3, %v3719_v2 }
0x12f1   : > { %v3448_v3 = vpop.f32.mrf.mxu3  ;;  %4030 = vmatpush.msrb.mxu3 %v5910_v60 }
0x12f2   : > { %v3451_v4 = vsel %vm2008_vm4, %v3448_v3, -inf }
0x12f3   : > { %3452 = vmax.xlane.f32.xlu2 %v3451_v4  ;;  %4031 = vmatpush.msrb.mxu3 %v5913_v10 }
0x12f5   : > { %4032 = vmatpush.msrb.mxu3 %v5917_v61 }
0x12f7   : > { %v3794_v36 = vpop.permute.xlu1 %3793  ;;  %4033 = vmatpush.msrb.mxu3 %v5921_v62 }
0x12f8   : > { %4714 = vmatmul.msk.f32.vlgmr.msra.gmra.mxu2 %vm1275_vm3, %v3794_v36 }
0x12f9   : > { %4098 = vmatpush.msra.mxu2 %v6017_v33 }
0x12fb   : > { %4099 = vmatpush.msra.mxu2 %v6021_v34 }
0x12fd   : > { %4100 = vmatpush.msra.mxu2 %v6025_v41 }
0x12ff   : > { %v3869_v60 = vpop.permute.xlu1 %3868  ;;  %4101 = vmatpush.msra.mxu2 %v6029_v43 }
0x1300   : > { %4718 = vmatmul.msk.f32.vlgmr.msra.gmra.mxu3 %vm1275_vm3, %v3869_v60  ;;  %4722 = vmatmul.msk.f32.vlgmr.msrb.gmra.mxu2 %vm1275_vm3, %v3944_v5  ;;  %vm6609_vm3 = vcmask 64512  }
0x1301   : > { %4102 = vmatpush.msra.mxu2 %v6032_v44  ;;  %vm6610_vm6 = vmmov %vm6609_vm3 }
0x1302   : > { %vm6611_vm2 = vmmov %vm6609_vm3 }
0x1303   : > { %4103 = vmatpush.msra.mxu2 %v6037_v45  ;;  %vm6614_vm7 = vmmov %vm6611_vm2 }
0x1304   : > { %vm6615_vm5 = vmmov %vm6611_vm2 }
0x1305   : > { %4104 = vmatpush.msra.mxu2 %v6041_v35 }
0x1307   : > { %4105 = vmatpush.msra.mxu2 %v6044_v37 }
0x1363   : > { %v3519_v10 = vpop.f32.mrf.mxu2 }
0x1364   : > { %v3522_v61 = vsel %vm2008_vm4, %v3519_v10, -inf }
0x1365   : > { %3523 = vmax.xlane.f32.xlu1 %v3522_v61 }
0x1366   : > { %v3453_v62 = vpop.xlane.xlu2 %3452 }
0x1367   : > { %v3454_v33 = vsub.f32 %v3448_v3, %v3453_v62 }
0x1369   : > { %v3455_v34 = vmul.f32 1.442695, %v3454_v33 }
0x136b   : > { %4955 = vpow2.f32 %v3455_v34  ;;  %v3594_v41 = vpop.f32.mrf.mxu3  ;;  %v3669_v43 = vpop.f32.mrf.mxu2 }
0x136c   : > { %v3597_v6 = vsel %vm2008_vm4, %v3594_v41, -inf  ;;  %v3672_v44 = vsel %vm2008_vm4, %v3669_v43, -inf }
0x136d   : > { %3598 = vmax.xlane.f32.xlu0 %v3597_v6  ;;  %3673 = vmax.xlane.f32.xlu2 %v3672_v44 }
0x1371   : > { %v4956_v45 = vpop.eup %4955 }
0x1372   : > { %v3457_v7 = vsel %vm2008_vm4, %v4956_v45, 0.0 }
0x1373   : > { %v3744_v35 = vpop.f32.mrf.mxu3 }
0x1374   : > { %v3747_v37 = vsel %vm2008_vm4, %v3744_v35, -inf }
0x1375   : > { %3748 = vmax.xlane.f32.xlu1 %v3747_v37  ;;  %3458 = vadd.xlane.f32.xlu0 %v3457_v7 }
0x137b   : > { %v3819_v8 = vpop.f32.mrf.mxu2 }
0x137c   : > { %v3822_v9 = vsel %vm2008_vm4, %v3819_v8, -inf }
0x137d   : > { %3823 = vmax.xlane.f32.xlu0 %v3822_v9 }
0x1383   : > { %v3894_v24 = vpop.f32.mrf.mxu3  ;;  %v3969_v63 = vpop.f32.mrf.mxu2 }
0x1384   : > { %v3897_v17 = vsel %vm2008_vm4, %v3894_v24, -inf  ;;  %v3972_v15 = vsel %vm2008_vm4, %v3969_v63, -inf }
0x1385   : > { %3608 = vrot.lane.b32.xlu2 %v6139_v49, %s6556_s1 }
0x138e   : > { %3533 = vrot.lane.b32.xlu1 %v6139_v49, %s6557_s15  ;;  %s6612_s15 = sld [smem:[#allocation29_spill]] }
0x1391   : > { %3462 = vrot.lane.b32.xlu0 %v6139_v49, %s6608_s9 }
0x13ae   : > { %3898 = vmax.xlane.f32.xlu2 %v3897_v17 }
0x13b8   : > { %3973 = vmax.xlane.f32.xlu1 %v3972_v15 }
0x13d1   : > { %3683 = vrot.lane.b32.xlu1 %v6139_v49, %s6560_s22 }
0x13d8   : > { %v3524_v13 = vpop.xlane.xlu1 %3523 }
0x13d9   : > { %v3525_v23 = vsub.f32 %v3519_v10, %v3524_v13 }
0x13db   : > { %v3526_v25 = vmul.f32 1.442695, %v3525_v23 }
0x13dd   : > { %4957 = vpow2.f32 %v3526_v25  ;;  %v5006_v25 = vld [vmem:[%s6612_s15 + $0x18] sm:$0xff] }
0x13e0   : > { %v3599_v26 = vpop.xlane.xlu0 %3598  ;;  %v3674_v28 = vpop.xlane.xlu2 %3673 }
0x13e1   : > { %v3675_v29 = vsub.f32 %v3669_v43, %v3674_v28  ;;  %v3600_v38 = vsub.f32 %v3594_v41, %v3599_v26  ;;  %v5007_v26 = vld [vmem:[%s6612_s15 + $0x10] sm:$0xff]  ;;  %v5008_v28 = vld [vmem:[%s6612_s15 + $0x8] sm:$0xff] }
0x13e3   : > { %v4958_v30 = vpop.eup %4957  ;;  %v3676_v11 = vmul.f32 1.442695, %v3675_v29  ;;  %v3601_v48 = vmul.f32 1.442695, %v3600_v38  ;;  %v5009_v29 = vld [vmem:[%s6612_s15] sm:$0xff] }
0x13e4   : > { %v3528_v31 = vsel %vm2008_vm4, %v4958_v30, 0.0 }
0x13e5   : > { %3529 = vadd.xlane.f32.xlu2 %v3528_v31  ;;  %4959 = vpow2.f32 %v3676_v11 }
0x13e8   : > { %v3749_v20 = vpop.xlane.xlu1 %3748  ;;  %v3459_v32 = vpop.xlane.xlu0 %3458 }
0x13e9   : > { %v3750_v39 = vsub.f32 %v3744_v35, %v3749_v20  ;;  %v3609_v0 = vpop.permute.xlu2 %3608 }
0x13eb   : > { %v3751_v46 = vmul.f32 1.442695, %v3750_v39  ;;  %v4960_v47 = vpop.eup %4959 }
0x13ec   : > { %v3678_v50 = vsel %vm2008_vm4, %v4960_v47, 0.0 }
0x13ed   : > { %4961 = vpow2.f32 %v3751_v46  ;;  %3679 = vadd.xlane.f32.xlu2 %v3678_v50 }
0x13ee   : > { %4963 = vpow2.f32 %v3601_v48 }
0x13f0   : > { %v3824_v51 = vpop.xlane.xlu0 %3823 }
0x13f1   : > { %v3825_v52 = vsub.f32 %v3819_v8, %v3824_v51 }
0x13f3   : > { %v6219_v42 = vpop.eup %4961  ;;  %v3826_v19 = vmul.f32 1.442695, %v3825_v52 }
0x13f4   : > { %v3753_v53 = vsel %vm2008_vm4, %v6219_v42, 0.0  ;;  %v4964_v18 = vpop.eup %4963 }
0x13f5   : > { %4965 = vpow2.f32 %v3826_v19  ;;  %3754 = vadd.xlane.f32.xlu2 %v3753_v53  ;;  %v3603_v54 = vsel %vm2008_vm4, %v4964_v18, 0.0 }
0x13f6   : > { %4967 = vrcp.f32 %v3459_v32 }
0x13fb   : > { %v4966_v22 = vpop.eup %4965  ;;  %3604 = vadd.xlane.f32.xlu1 %v3603_v54 }
0x13fc   : > { %v3828_v56 = vsel %vm2008_vm4, %v4966_v22, 0.0  ;;  %v4968_v55 = vpop.eup %4967 }
0x13fd   : > { %3829 = vadd.xlane.f32.xlu0 %v3828_v56  ;;  %v3461_v58 = vmul.f32 %v4968_v55, %v4956_v45 }
0x1400   : > { %v3534_v57 = vpop.permute.xlu1 %3533 }
0x1401   : > { %3554 = vmatpush.msra.mxu1 %v3534_v57 }
0x1403   : > { %v3463_v16 = vpop.permute.xlu0 %3462 }
0x1404   : > { %3483 = vmatpush.msra.mxu0 %v3463_v16 }
0x1405   : > { %4695 = vmatmul.msk.f32.vlgmr.msra.gmra.mxu0 %vm6609_vm3, %v3461_v58  ;;  %vm6616_vm3 = vmmov %vm6611_vm2 }
0x1406   : > { %3629 = vmatpush.msrb.mxu0 %v3609_v0 }
0x140d   : > { %3758 = vrot.lane.b32.xlu2 %v6139_v49, %s6559_s8 }
0x1411   : > { %3833 = vrot.lane.b32.xlu0 %v6139_v49, %s6561_s5 }
0x1419   : > { %3908 = vrot.lane.b32.xlu0 %v6139_v49, %s6562_s0 }
0x1421   : > { %v3899_v1 = vpop.xlane.xlu2 %3898 }
0x1422   : > { %v3900_v14 = vsub.f32 %v3894_v24, %v3899_v1 }
0x1424   : > { %v3901_v2 = vmul.f32 1.442695, %v3900_v14 }
0x1426   : > { %4969 = vpow2.f32 %v3901_v2 }
0x142b   : > { %v3974_v3 = vpop.xlane.xlu1 %3973 }
0x142c   : > { %v4970_v4 = vpop.eup %4969  ;;  %v3975_v36 = vsub.f32 %v3969_v63, %v3974_v3 }
0x142d   : > { %v3903_v5 = vsel %vm2008_vm4, %v4970_v4, 0.0 }
0x142e   : > { %v3976_v60 = vmul.f32 1.442695, %v3975_v36  ;;  %3904 = vadd.xlane.f32.xlu1 %v3903_v5 }
0x1430   : > { %4971 = vpow2.f32 %v3976_v60 }
0x1436   : > { %v4972_v10 = vpop.eup %4971 }
0x1437   : > { %v3978_v61 = vsel %vm2008_vm4, %v4972_v10, 0.0  ;;  %vm6613_vm4 = vmmov %vm6611_vm2 }
0x1438   : > { %3979 = vadd.xlane.f32.xlu2 %v3978_v61 }
0x1443   : > { %v3684_v62 = vpop.permute.xlu1 %3683 }
0x1444   : > { %3704 = vmatpush.msrb.mxu1 %v3684_v62 }
0x1447   : > { %3983 = vrot.lane.b32.xlu1 %v6139_v49, %s6563_s12 }
0x1458   : > { %v3530_v33 = vpop.xlane.xlu2 %3529 }
0x1459   : > { %4973 = vrcp.f32 %v3530_v33 }
0x145f   : > { %v4974_v34 = vpop.eup %4973 }
0x1460   : > { %v3532_v41 = vmul.f32 %v4974_v34, %v4958_v30  ;;  %v3680_v43 = vpop.xlane.xlu2 %3679 }
0x1461   : > { %4975 = vrcp.f32 %v3680_v43 }
0x1462   : > { %4699 = vmatmul.msk.f32.vlgmr.msra.gmra.mxu1 %vm6610_vm6, %v3532_v41 }
0x1467   : > { %v4976_v6 = vpop.eup %4975 }
0x1468   : > { %v3682_v44 = vmul.f32 %v4976_v6, %v4960_v47  ;;  %v3755_v45 = vpop.xlane.xlu2 %3754 }
0x146a   : > { %4707 = vmatmul.msk.f32.vlgmr.msrb.gmra.mxu1 %vm6611_vm2, %v3682_v44 }
0x146e   : > { %v3605_v35 = vpop.xlane.xlu1 %3604 }
0x146f   : > { %4977 = vrcp.f32 %v3605_v35 }
0x1470   : > { %v3759_v37 = vpop.permute.xlu2 %3758  ;;  %4979 = vrcp.f32 %v3755_v45  ;;  %v3830_v8 = vpop.xlane.xlu0 %3829 }
0x1471   : > { %3779 = vmatpush.msra.mxu0 %v3759_v37  ;;  %4981 = vrcp.f32 %v3830_v8 }
0x1475   : > { %v4978_v49 = vpop.eup %4977 }
0x1476   : > { %v3607_v7 = vmul.f32 %v4978_v49, %v4964_v18  ;;  %v4980_v9 = vpop.eup %4979 }
0x1477   : > { %v3757_v24 = vmul.f32 %v4980_v9, %v6219_v42  ;;  %v4982_v17 = vpop.eup %4981 }
0x1478   : > { %4703 = vmatmul.msk.f32.vlgmr.msrb.gmra.mxu0 %vm6613_vm4, %v3607_v7  ;;  %v3832_v15 = vmul.f32 %v4982_v17, %v4966_v22 }
0x1480   : > { %4711 = vmatmul.msk.f32.vlgmr.msra.gmra.mxu0 %vm6614_vm7, %v3757_v24 }
0x1482   : > { %v3485_v63 = vpop.f32.mrf.mxu0 }
0x1483   : > { %3488 = vst.msk [vmem:[#allocation4 + $0x8] sm:$0x3f] %vm1345_vm8, %v3485_v63  ;;  %v3834_v13 = vpop.permute.xlu0 %3833  ;;  %vm6617_vm8 = vmmov %vm6611_vm2 }
0x1484   : > { %3854 = vmatpush.msra.mxu1 %v3834_v13 }
0x1485   : > { %4715 = vmatmul.msk.f32.vlgmr.msra.gmra.mxu1 %vm6615_vm5, %v3832_v15 }
0x148b   : > { %v3909_v23 = vpop.permute.xlu0 %3908 }
0x148c   : > { %3929 = vmatpush.msrb.mxu0 %v3909_v23 }
0x148e   : > { %4078 = vmatpush.msra.mxu0 %v5006_v25 }
0x1490   : > { %4079 = vmatpush.msra.mxu0 %v5007_v26  ;;  %v5011_v26 = vld [vmem:[%s5549_s27] ss:$0 sm:$0xff] }
0x1492   : > { %4080 = vmatpush.msra.mxu0 %v5008_v28 }
0x1494   : > { %4081 = vmatpush.msra.mxu0 %v5009_v29 }
0x14a1   : > { %v3905_v30 = vpop.xlane.xlu1 %3904 }
0x14a2   : > { %4983 = vrcp.f32 %v3905_v30 }
0x14a8   : > { %v4984_v11 = vpop.eup %4983 }
0x14a9   : > { %v3907_v31 = vmul.f32 %v4984_v11, %v4970_v4 }
0x14ab   : > { %4719 = vmatmul.msk.f32.vlgmr.msrb.gmra.mxu0 %vm6616_vm3, %v3907_v31  ;;  %v3980_v20 = vpop.xlane.xlu2 %3979 }
0x14ac   : > { %4985 = vrcp.f32 %v3980_v20 }
0x14b2   : > { %v4986_v32 = vpop.eup %4985 }
0x14b3   : > { %v3982_v38 = vmul.f32 %v4986_v32, %v4972_v10 }
0x14b9   : > { %v3984_v39 = vpop.permute.xlu1 %3983 }
0x14ba   : > { %4004 = vmatpush.msrb.mxu1 %v3984_v39 }
0x14bb   : > { %4723 = vmatmul.msk.f32.vlgmr.msrb.gmra.mxu1 %vm6617_vm8, %v3982_v38 }
0x14df   : > { %v3556_v46 = vpop.f32.mrf.mxu1 }
0x14e0   : > { %3560 = vrot.lane.b32.xlu0 %v3556_v46, %s6564_s16  ;;  %s6619_s16 = scalar_lea.vmem [#allocation7], %s6618_s11 }
0x14e1   : > { %v6260_v18 = vld [vmem:[%s6619_s16] ss:$0 sm:$0xff] }
0x14e2   : > { %v2683_v54 = vadd.f32 %v6260_v18, %v6119_v12 }
0x14e4   : > { %v2685_v56 = vadd.f32 %v2683_v54, %v5997_v21 }
0x14e6   : > { %v2686_v55 = vsel %vm1914_vm0, %v2685_v56, 0.0 }
0x14e7   : > { %v3706_v47 = vpop.f32.mrf.mxu1 }
0x14e8   : > { %3710 = vrot.lane.b32.xlu0 %v3706_v47, %s6565_s17  ;;  %s6620_s17 = sld [smem:[#allocation27_spill]] }
0x14ee   : > { %v5010_v21 = vld [vmem:[%s6620_s17] ss:$0 sm:$0xff] }
0x14f5   : > { %v3631_v48 = vpop.f32.mrf.mxu0 }
0x14f6   : > { %3635 = vrot.lane.b32.xlu2 %v3631_v48, %s6566_s18  ;;  %s6621_s18 = sld [smem:[#allocation28_spill]] }
0x14fc   : > { %v5012_v30 = vld [vmem:[%s6621_s18] ss:$0 sm:$0xff] }
0x14fd   : > { %v3781_v50 = vpop.f32.mrf.mxu0 }
0x14fe   : > { %3785 = vrot.lane.b32.xlu0 %v3781_v50, %s6567_s19  ;;  %s6622_s19 = sld [smem:[#allocation30_spill]] }
0x1502   : > { %v3856_v51 = vpop.f32.mrf.mxu1 }
0x1503   : > { %3860 = vrot.lane.b32.xlu1 %v3856_v51, %s6568_s23  ;;  %s6623_s23 = scalar_lea.vmem [#allocation10], %s6618_s11 }
0x1504   : > { %v4849_v20 = vld [vmem:[%s6623_s23] ss:$0 sm:$0xff] }
0x1505   : > { %v5013_v50 = vld [vmem:[%s6622_s19] ss:$0 sm:$0xff]  ;;  %s6636_s19 = sld [smem:[#allocation55_spill]] (!%p4727_p10) }
0x1528   : > { %v3931_v52 = vpop.f32.mrf.mxu0 }
0x1529   : > { %3935 = vrot.lane.b32.xlu0 %v3931_v52, %s6569_s3 }
0x1538   : > { %v4006_v42 = vpop.f32.mrf.mxu1 }
0x1539   : > { %4010 = vrot.lane.b32.xlu1 %v4006_v42, %s6570_s26  ;;  %s6624_s26 = scalar_lea.vmem [#allocation12], %s6618_s11  ;;  %s6634_s11 = sld [smem:[#allocation57_spill]] (!%p4727_p10) }
0x153a   : > { %v4850_v38 = vld [vmem:[%s6624_s26] ss:$0 sm:$0xff] }
0x153f   : > { %s6635_s16 = smov (!%p4727_p10), %s6634_s11 }
0x1550   : > { %v3636_v53 = vpop.permute.xlu2 %3635 }
0x1552   : > { %v3561_v19 = vpop.permute.xlu0 %3560 }
0x1553   : > { %3563 = vst.msk [vmem:[#allocation4 + $0x8] sm:$0x3f] %vm1422_vm9, %v3561_v19 }
0x1554   : > { %3638 = vst.msk [vmem:[#allocation4 + $0x8] sm:$0x3f] %vm1499_vm10, %v3636_v53 }
0x155a   : > { %v3711_v22 = vpop.permute.xlu0 %3710 }
0x155b   : > { %3713 = vst.msk [vmem:[#allocation4 + $0x8] sm:$0x3f] %vm1576_vm11, %v3711_v22 }
0x1563   : > { %2687 = vadd.xlane.f32.xlu1 %v2686_v55 }
0x1570   : > { %v3786_v57 = vpop.permute.xlu0 %3785 }
0x1571   : > { %3788 = vst.msk [vmem:[#allocation4 + $0x8] sm:$0x3f] %vm1653_vm12, %v3786_v57 }
0x1575   : > { %v3861_v58 = vpop.permute.xlu1 %3860 }
0x1576   : > { %3863 = vst.msk [vmem:[#allocation4 + $0x8] sm:$0x3f] %vm1730_vm13, %v3861_v58 }
0x159b   : > { %v3936_v16 = vpop.permute.xlu0 %3935 }
0x159c   : > { %3938 = vst.msk [vmem:[#allocation4 + $0x8] sm:$0x3f] %vm1807_vm14, %v3936_v16 }
0x15ab   : > { %v4011_v0 = vpop.permute.xlu1 %4010 }
0x15ac   : > { %4013 = vst.msk [vmem:[#allocation4 + $0x8] sm:$0x3f] %vm1884_vm15, %v4011_v0  ;;  %vm6625_vm15 = vcmask 523264  }
0x15b3   : > { %v4014_v12 = vld [vmem:[#allocation4 + $0x8] sm:$0x3f] }
0x15b4   : > { %4724 = vmatmul.msk.f32.vlgmr.msrb.gmra.mxu3 %vm1244_vm1, %v4014_v12 }
0x15d6   : > { %v2688_v4 = vpop.xlane.xlu1 %2687 }
0x15d7   : > { %v2689_v60 = vmul.f32 %v2688_v4, %v5783_v59 }
0x15d9   : > { %v2690_v62 = vsub.f32 %v2685_v56, %v2689_v60 }
0x15db   : > { %v2691_v34 = vmul.f32 %v2690_v62, %v2690_v62 }
0x15dd   : > { %v2692_v41 = vsel %vm1914_vm0, %v2691_v34, 0.0 }
0x1637   : > { %v4035_v1 = vpop.f32.mrf.mxu3 }
0x1638   : > { %v4036_v14 = vadd.f32 %v5010_v21, %v4035_v1 }
0x163a   : > { %v4038_v2 = vadd.f32 %v4036_v14, %v6158_v27 }
0x163c   : > { %v4039_v3 = vsel %vm1914_vm0, %v4038_v2, 0.0 }
0x163d   : > { %4040 = vadd.xlane.f32.xlu2 %v4039_v3 }
0x16b0   : > { %v4041_v36 = vpop.xlane.xlu2 %4040 }
0x16b1   : > { %v4042_v5 = vmul.f32 %v4041_v36, %v5783_v59 }
0x16b3   : > { %v4043_v10 = vsub.f32 %v4038_v2, %v4042_v5 }
0x16b5   : > { %v4044_v61 = vmul.f32 %v4043_v10, %v4043_v10 }
0x16b7   : > { %v4045_v33 = vsel %vm1914_vm0, %v4044_v61, 0.0 }
0x16b8   : > { %4046 = vadd.xlane.f32.xlu0 %v4045_v33 }
0x16c0   : > { %2693 = vadd.xlane.f32.xlu0 %v2692_v41 }
0x172b   : > { %v4047_v27 = vpop.xlane.xlu0 %4046 }
0x172c   : > { %v4048_v43 = vmul.f32 %v4047_v27, %v5783_v59 }
0x172e   : > { %v4049_v6 = vadd.f32 1e-05, %v4048_v43 }
0x1730   : > { %4987 = vrsqrt.f32 %v4049_v6  ;;  %vm4056_vm10 = vweird.f32 %v4049_v6 }
0x1733   : > { %v2694_v44 = vpop.xlane.xlu0 %2693 }
0x1734   : > { %v2695_v45 = vmul.f32 %v2694_v44, %v5783_v59 }
0x1736   : > { %v4988_v35 = vpop.eup %4987  ;;  %v2696_v37 = vadd.f32 1e-05, %v2695_v45 }
0x1737   : > { %v4051_v49 = vmul.f32 %v4988_v35, %v4049_v6  ;;  %vm4057_vm9 = vweird.f32 %v4988_v35 }
0x1738   : > { %4989 = vrsqrt.f32 %v2696_v37  ;;  %vm4058_vm11 = vmor %vm4056_vm10, %vm4057_vm9  ;;  %vm2703_vm13 = vweird.f32 %v2696_v37 }
0x1739   : > { %v4052_v7 = vmul.f32 %v4988_v35, %v4051_v49 }
0x173b   : > { %v4053_v8 = vmul.f32 0.5, %v4052_v7 }
0x173d   : > { %v4054_v9 = vsub.f32 1.5, %v4053_v8 }
0x173e   : > { %v4990_v24 = vpop.eup %4989 }
0x173f   : > { %v4055_v17 = vmul.f32 %v4988_v35, %v4054_v9  ;;  %v2698_v63 = vmul.f32 %v4990_v24, %v2696_v37  ;;  %vm2704_vm12 = vweird.f32 %v4990_v24 }
0x1740   : > { %vm2705_vm14 = vmor %vm2703_vm13, %vm2704_vm12 }
0x1741   : > { %v4059_v15 = vsel %vm4058_vm11, %v4988_v35, %v4055_v17  ;;  %v2699_v13 = vmul.f32 %v4990_v24, %v2698_v63 }
0x1742   : > { %v4060_v23 = vmul.f32 %v4059_v15, %v4043_v10 }
0x1743   : > { %v2700_v25 = vmul.f32 0.5, %v2699_v13 }
0x1744   : > { %v4061_v28 = vmul.f32 %v5011_v26, %v4060_v23 }
0x1745   : > { %v2701_v29 = vsub.f32 1.5, %v2700_v25 }
0x1746   : > { %v4062_v11 = vadd.f32 %v5012_v30, %v4061_v28 }
0x1747   : > { %v2702_v31 = vmul.f32 %v4990_v24, %v2701_v29 }
0x1748   : > { %4725 = vmatmul.msk.f32.vlgmr.msra.gmra.mxu0 %vm1244_vm1, %v4062_v11 }
0x1749   : > { %v2706_v32 = vsel %vm2705_vm14, %v4990_v24, %v2702_v31 }
0x174a   : > { %v2707_v39 = vmul.f32 %v2706_v32, %v2690_v62 }
0x174c   : > { %v2711_v46 = vmul.f32 %v4849_v20, %v2707_v39 }
0x174e   : > { %v2715_v47 = vadd.f32 %v4850_v38, %v2711_v46 }
0x1750   : > { %2716 = vst.msk [vmem:[#allocation13] sm:$0x3f] %vm1914_vm0, %v2715_v47 }
0x17c5   : > { %v4083_v48 = vpop.f32.mrf.mxu0 }
0x17c6   : > { %v4084_v51 = vadd.f32 %v5013_v50, %v4083_v48 }
0x17c8   : > { %v4086_v52 = vmax.f32 %v4084_v51, 0.0 }
0x17ca   : > { %4726 = vmatmul.msk.f32.vlgmr.msra.gmra.mxu2 %vm6625_vm15, %v4086_v52 }
0x184d   : > { %v4107_v42 = vpop.f32.mrf.mxu2 }
0x184e   : > { %v4108_v19 = vadd.f32 %v6260_v18, %v4107_v42 }
0x1850   : > { %v4110_v53 = vadd.f32 %v4108_v19, %v4062_v11 }
0x1852   : > { %v4111_v54 = vsel %vm1914_vm0, %v4110_v53, 0.0 }
0x1853   : > { %4112 = vadd.xlane.f32.xlu2 %v4111_v54 }
0x18c6   : > { %v4113_v22 = vpop.xlane.xlu2 %4112 }
0x18c7   : > { %v4114_v56 = vmul.f32 %v4113_v22, %v5783_v59 }
0x18c9   : > { %v4115_v55 = vsub.f32 %v4110_v53, %v4114_v56 }
0x18cb   : > { %v4116_v57 = vmul.f32 %v4115_v55, %v4115_v55 }
0x18cd   : > { %v4117_v58 = vsel %vm1914_vm0, %v4116_v57, 0.0 }
0x18ce   : > { %4118 = vadd.xlane.f32.xlu1 %v4117_v58 }
0x1941   : > { %v4119_v16 = vpop.xlane.xlu1 %4118 }
0x1942   : > { %v4120_v0 = vmul.f32 %v4119_v16, %v5783_v59 }
0x1944   : > { %v4121_v12 = vadd.f32 1e-05, %v4120_v0 }
0x1946   : > { %4991 = vrsqrt.f32 %v4121_v12  ;;  %vm4128_vm2 = vweird.f32 %v4121_v12 }
0x194c   : > { %v4992_v1 = vpop.eup %4991 }
0x194d   : > { %v4123_v21 = vmul.f32 %v4992_v1, %v4121_v12  ;;  %vm4129_vm6 = vweird.f32 %v4992_v1 }
0x194e   : > { %vm4130_vm4 = vmor %vm4128_vm2, %vm4129_vm6 }
0x194f   : > { %v4124_v18 = vmul.f32 %v4992_v1, %v4123_v21 }
0x1951   : > { %v4125_v14 = vmul.f32 0.5, %v4124_v18 }
0x1953   : > { %v4126_v2 = vsub.f32 1.5, %v4125_v14 }
0x1955   : > { %v4127_v3 = vmul.f32 %v4992_v1, %v4126_v2 }
0x1957   : > { %v4131_v4 = vsel %vm4130_vm4, %v4992_v1, %v4127_v3 }
0x1958   : > { %v4132_v36 = vmul.f32 %v4131_v4, %v4115_v55 }
0x195a   : > { %v4133_v5 = vmul.f32 %v4849_v20, %v4132_v36  ;;  %4139 = sbr.rel (%p4727_p10) target bundleno = 6774 (0x1a76), region = 148 }
0x195c   : > { %v4134_v60 = vadd.f32 %v4850_v38, %v4133_v5 }
0x195e   : > { %4135 = vst.msk [vmem:[#allocation13 + $0x8] sm:$0x3f] %vm1914_vm0, %v4134_v60 }
0x195f   : > { %v4146_v59 = vld [vmem:[#allocation13] sm:$0x3f]  ;;  %vm6628_vm7 = vcmask 1045504   ;;  %v4142_v61 = vstv %s4728_s10  ;;  %v5207_v34 = vmov 0.0   ;;  %vm6631_vm0 = vcmask 48128   ;;  %v4202_v27 = vld [vmem:[%s6630_s7 + $0x8] sm:$0xff] }
0x1960   : > { %4730 = vmatpush.msk.msra.mxu0 %vm6628_vm7, %v4146_v59  ;;  %vm6629_vm5 = vmmov %vm6628_vm7  ;;  %v4204_v62 = vld [vmem:[%s6630_s7 + $0x18] sm:$0xff]  ;;  %vm4143_vm3 = vcmp.eq.s32.totalorder %v5645_v40, %v4142_v61  ;;  %v4203_v33 = vld [vmem:[%s6630_s7 + $0x10] sm:$0xff]  ;;  %v4226_v24 = vstv %s4140_s28  ;;  %vm4229_vm9 = vcmask 253952  }
0x1961   : > { %4218 = vmatpush.msra.mxu2 %v4204_v62  ;;  %v4729_v41 = vsel %vm4143_vm3, 1.0, %v5207_v34  ;;  %vm6632_vm8 = vmmov %vm6631_vm0  ;;  %v4176_v40 = vld [vmem:[%s6633_s13 + $0x18] sm:$0xff]  ;;  %v4201_v43 = vld [vmem:[%s6630_s7] sm:$0xff] }
0x1962   : > { %4731 = vmatmul.msk.f32.vlgmr.msra.gmra.mxu0 %vm6631_vm0, %v4729_v41  ;;  %4193 = vmatpush.msra.mxu1 %v4176_v40  ;;  %v4175_v6 = vld [vmem:[%s6633_s13 + $0x10] sm:$0xff]  ;;  %v4174_v44 = vld [vmem:[%s6633_s13 + $0x8] sm:$0xff]  ;;  %v4173_v45 = vld [vmem:[%s6633_s13] sm:$0xff] }
0x1963   : > { %4219 = vmatpush.msra.mxu2 %v4203_v33  ;;  %4275 = vmatpush.msrb.mxu0 %v4176_v40  ;;  %v4205_v49 = vld [vmem:[%s6634_s11] sm:$0x1] }
0x1964   : > { %4194 = vmatpush.msra.mxu1 %v4175_v6  ;;  %v4177_v7 = vld [vmem:[%s6636_s19] sm:$0x1] }
0x1965   : > { %v4231_v10 = vld [vmem:[#allocation13 + $0x8] sm:$0x3f]  ;;  %4220 = vmatpush.msra.mxu2 %v4202_v27  ;;  %4276 = vmatpush.msrb.mxu0 %v4175_v6 }
0x1966   : > { %4734 = vmatpush.msk.msra.mxu3 %vm6629_vm5, %v4231_v10  ;;  %4195 = vmatpush.msra.mxu1 %v4174_v44  ;;  %v4287_v13 = vld [vmem:[%s6635_s16] sm:$0x1] }
0x1967   : > { %4735 = vmatmul.msk.f32.vlgmr.msra.gmra.mxu3 %vm6632_vm8, %v4729_v41  ;;  %4221 = vmatpush.msra.mxu2 %v4201_v43  ;;  %v4259_v25 = vld [vmem:[%s6636_s19] sm:$0x1] }
0x1968   : > { %4300 = vmatpush.msrb.mxu3 %v4204_v62  ;;  %4277 = vmatpush.msrb.mxu0 %v4174_v44 }
0x1969   : > { %4196 = vmatpush.msra.mxu1 %v4173_v45 }
0x196a   : > { %4301 = vmatpush.msrb.mxu3 %v4203_v33  ;;  %4278 = vmatpush.msrb.mxu0 %v4173_v45 }
0x196c   : > { %4302 = vmatpush.msrb.mxu3 %v4202_v27 }
0x196e   : > { %4303 = vmatpush.msrb.mxu3 %v4201_v43 }
0x19df   : > { %v4170_v35 = vpop.f32.mrf.mxu0 }
0x19e0   : > { %4733 = vmatmul.msk.f32.vlgmr.msra.gmra.mxu2 %vm1244_vm1, %v4170_v35  ;;  %4732 = vmatmul.msk.f32.vlgmr.msra.gmra.mxu1 %vm1244_vm1, %v4170_v35 }
0x19ea   : > { %v4252_v37 = vpop.f32.mrf.mxu3 }
0x19eb   : > { %4736 = vmatmul.msk.f32.vlgmr.msrb.gmra.mxu0 %vm1244_vm1, %v4252_v37  ;;  %4737 = vmatmul.msk.f32.vlgmr.msrb.gmra.mxu3 %vm1244_vm1, %v4252_v37 }
0x1a5d   : > { %v4198_v8 = vpop.f32.mrf.mxu1 }
0x1a5e   : > { %v4199_v63 = vadd.f32 %v4198_v8, %v4177_v7 }
0x1a63   : > { %v4223_v9 = vpop.f32.mrf.mxu2 }
0x1a64   : > { %v4224_v17 = vadd.f32 %v4223_v9, %v4205_v49 }
0x1a66   : > { %v4227_v15 = vmul.f32 %v4226_v24, %v4224_v17 }
0x1a68   : > { %v4228_v23 = vadd.f32 %v4227_v15, %v4199_v63  ;;  %v4280_v26 = vpop.f32.mrf.mxu0 }
0x1a69   : > { %v4281_v30 = vadd.f32 %v4280_v26, %v4259_v25 }
0x1a6a   : > { %4230 = vst.msk [vmem:[%s6637_s20] sm:$0x1] %vm4229_vm9, %v4228_v23 }
0x1a6e   : > { %v4305_v28 = vpop.f32.mrf.mxu3 }
0x1a6f   : > { %v4306_v29 = vadd.f32 %v4305_v28, %v4287_v13 }
0x1a71   : > { %v4308_v11 = vmul.f32 %v4306_v29, %v4226_v24 }
0x1a73   : > { %v4309_v31 = vadd.f32 %v4308_v11, %v4281_v30 }
0x1a75   : > { %4738 = vst.msk [vmem:[%s6637_s20 + $0x1] sm:$0x1] %vm4229_vm9, %v4309_v31 }
0x1a76 PF: > { %s6638_s24 = sld [smem:[#allocation19_spill]]  ;;  %s5208_s8 = smov [#allocation13]  }
0x1a77   : > { %s4317_s30 = sshll.u32 %s5208_s8, 4  ;;  %s6639_s5 = sld [smem:[#allocation58_spill]]  ;;  %s4318_s30 = int_to_ptr.vmem [resolvable:$true] %s4317_s30 }
0x1a78   : > { %s5209_s29 = smov 128   ;;  %s6640_s3 = smov 8  }
0x1a7c   : > { %p4771_p5 = scmp.eq.s32.totalorder %s6638_s24, 7 }
0x1a7d   : > { %s4319_s1 = sshll.u32 %s6639_s5, 4  ;;  %s4320_s1 = int_to_ptr.hbm [resolvable:$true] %s4319_s1 }
0x1a7e   : > { %4757 = dma.vmem_to_hbm [thread:$0]  (%p4771_p5), %s4318_s30, 256, %s4320_s1, [#allocation9], %s5209_s29, %s5209_s29, %s6640_s3  }
0x1a7f   : > { %5157 = dma.done.wait (%p4771_p5), [#allocation9], 256  }
0x1a80   : > { %5159 = vsyncadd (%p4771_p5), [#allocation9], 4294967040 }
0x1a81 PF: > { %s6641_s11 = sld [smem:[#allocation20_spill]] }
0x1a82   : > { %s6642_s6 = sld [smem:[#allocation17_spill]] }
0x1a83   : > { %s6643_s10 = sld [smem:[#allocation18_spill]] }
0x1a84   : > { %s6644_s0 = sld [smem:[#allocation21_spill]] }
0x1a87   : > { %p45_p13 = scmp.ge.s32.totalorder %s6641_s11, 10  }
0x1a89   :  { %47 = sbr.rel (!%p45_p13) target bundleno = 44 (0x2c), region = 261 }
0x1a8e   :  { %4342 = vsyncpa [#allocation8], 1 }
0x1a8f   :  { %4344 = vsyncpa [#allocation8 + $0x1], 1 }
0x1a90   :  { %4345 = vsyncpa [#allocation11], 1 }
0x1a91   :  { %4347 = vsyncpa [#allocation11 + $0x1], 1 }
0x1a92   :  { %4348 = vsyncpa [#allocation9], 1 }
0x1a93   :  { %4350 = vsyncpa [#allocation9 + $0x1], 1 }

</bundles_post_ra>
